<compile_context>
chip_gen: v7x
topology: tpu7x:2x2x1
jax: 0.10.0
libtpu: 0.0.40
codegen_flags: <defaults>
</compile_context>

<pallas_src>
import math

import numpy as np
import jax
import jax.numpy as jnp
from jax import lax
from jax.experimental import pallas as pl
from jax.experimental.pallas import tpu as pltpu

# ---------------------------------------------------------------------------
# Static network configuration (kept out of jit-traced params)
# ---------------------------------------------------------------------------
# (Cin, Cout, stride, padding, dilation) for the 6 conv blocks
CONV_CFG = [
    (1, 16, 1, 1, 1),
    (16, 32, 1, 1, 1),
    (32, 64, 2, 1, 1),
    (64, 64, 1, 2, 2),
    (64, 128, 2, 1, 1),
    (128, 128, 1, 2, 2),
]
IN_SPATIAL = 16          # H == W of the input images
NUM_CLASSES = 1
C_PAD = 128              # every channel dim is zero-padded to 128 lanes
BN_EPS = 1e-5
N_LAYERS = len(CONV_CFG)
CHUNK = 96               # M-chunk for the tap accumulation (keeps acc in vregs)


def _round16(v):
    return ((v + 15) // 16) * 16


# Per-layer geometry, derived once in Python (all static).
_GEOM = []
_h = IN_SPATIAL
for (_cin, _cout, _s, _p, _d) in CONV_CFG:
    # slack-row sizing below relies on padding == dilation for every layer
    assert _p == _d, "frame slack sizing assumes padding == dilation"
    _hp = _h + 2 * _p
    _ho = (_h + 2 * _p - 2 * _d - 1) // _s + 1
    _GEOM.append(dict(hin=_h, hp=_hp, wp=_hp, ho=_ho, s=_s, p=_p, d=_d))
    _h = _ho

# Rows of the stride-1 "virtual output" slab each conv computes.
# Layer 0 is im2col'ed in the wrapper -> exactly ho*ho rows.
ACC_LEN = [_GEOM[0]["ho"] * _GEOM[0]["ho"]] + [g["hin"] * g["wp"] for g in _GEOM[1:]]
# Flattened padded frame sizes (inputs of layers 1..5): pad ring + tap slack,
# rounded to 16 rows for bf16 sublane packing.
BUF_ROWS = [_round16(g["hp"] * g["wp"] + 2 * g["d"]) for g in _GEOM[1:]]
Y_ROWS = _round16(max(ACC_LEN))

# The fused head uses a power-of-two trick for the valid-column mask.
assert _GEOM[-1]["wp"] & (_GEOM[-1]["wp"] - 1) == 0


def _build_scatter(l):
    """Constant 0/1 matrix routing layer-l outputs into layer-(l+1)'s padded frame."""
    g, g2 = _GEOM[l], _GEOM[l + 1]
    ho, s, wp = g["ho"], g["s"], g["wp"]
    wp2, p2 = g2["wp"], g2["p"]
    S = np.zeros((BUF_ROWS[l], ACC_LEN[l]), np.float32)
    for ou in range(ho):
        for ov in range(ho):
            sr = ou * ho + ov if l == 0 else (s * ou) * wp + (s * ov)
            fr = (ou + p2) * wp2 + (ov + p2)
            S[fr, sr] = 1.0
    return S


_SCATTERS_NP = [_build_scatter(l) for l in range(N_LAYERS - 1)]


# ---------------------------------------------------------------------------
# The single fused Pallas kernel (one grid step == one image)
# ---------------------------------------------------------------------------
def fused_wdm_kernel(x_ref, w_ref, sb_ref, s0_ref, s1_ref, s2_ref, s3_ref, s4_ref,
                     fcw_ref, fcb_ref, out_ref, b1, b2, b3, b4, b5, y_s):
    bufs = (b1, b2, b3, b4, b5)
    s_refs = (s0_ref, s1_ref, s2_ref, s3_ref, s4_ref)

    def scale_bias(l):
        lsb = sb_ref[l]                         # (2,128): folded BN scale / bias
        return lsb[0:1, :], lsb[1:2, :]

    # ---- layer 0: Cin=1, pre-im2col'ed input -> a single MXU matmul --------
    scale, bias = scale_bias(0)
    acc0 = jnp.dot(x_ref[...], w_ref[0], preferred_element_type=jnp.float32)
    y0 = jnp.maximum(acc0 * scale + bias, 0.0).astype(jnp.bfloat16)
    # One scatter matmul writes layer-1's entire padded frame (pads/slack = 0).
    b1[...] = jnp.dot(s0_ref[...], y0,
                      preferred_element_type=jnp.float32).astype(b1.dtype)

    # ---- layers 1..4: 9 shifted-slice taps, chunked f32 accumulation -------
    for l in range(1, N_LAYERS - 1):
        g = _GEOM[l]
        wp, d, acc_len = g["wp"], g["d"], ACC_LEN[l]
        src = bufs[l - 1]
        scale, bias = scale_bias(l)
        ch = CHUNK if acc_len % CHUNK == 0 else acc_len
        n_chunks = acc_len // ch
        y_val = None
        for c in range(n_chunks):
            m0 = c * ch
            acc = None
            for kh in range(3):
                for kw in range(3):
                    off = (kh * wp + kw) * d + m0
                    a = src[pl.ds(off, ch), :]
                    t = jnp.dot(a, w_ref[1 + (l - 1) * 9 + kh * 3 + kw],
                                preferred_element_type=jnp.float32)
                    acc = t if acc is None else acc + t
            yc = jnp.maximum(acc * scale + bias, 0.0).astype(jnp.bfloat16)
            if n_chunks > 1:
                y_s[pl.ds(m0, ch), :] = yc
            else:
                y_val = yc
        if n_chunks > 1:
            y_val = y_s[pl.ds(0, acc_len), :]
        # Scatter matmul: stride handling, padding layout and zeroing in one go.
        bufs[l][...] = jnp.dot(s_refs[l][...], y_val,
                               preferred_element_type=jnp.float32).astype(bufs[l].dtype)

    # ---- layer 5 fused with the classifier head -----------------------------
    l = N_LAYERS - 1
    g = _GEOM[l]
    wp, d, acc_len, ho = g["wp"], g["d"], ACC_LEN[l], g["ho"]
    src = bufs[l - 1]
    scale, bias = scale_bias(l)
    acc = None
    for kh in range(3):
        for kw in range(3):
            off = (kh * wp + kw) * d
            a = src[pl.ds(off, acc_len), :]
            t = jnp.dot(a, w_ref[1 + (l - 1) * 9 + kh * 3 + kw],
                        preferred_element_type=jnp.float32)
            acc = t if acc is None else acc + t
    y = jnp.maximum(acc * scale + bias, 0.0)                    # (acc_len,128) f32
    # AdaptiveAvgPool2d((1,1)) over the ho x ho valid positions (wp is 2**k).
    ridx = lax.broadcasted_iota(jnp.int32, y.shape, 0)
    col = jnp.bitwise_and(ridx, wp - 1)
    y = jnp.where(col < ho, y, 0.0)
    pooled = jnp.sum(y, axis=0, keepdims=True) / float(ho * ho)  # (1,128)

    logits = jnp.dot(pooled, fcw_ref[...],
                     preferred_element_type=jnp.float32) + fcb_ref[...]
    # TODO(synk): nn.Dropout(0.3) is eval-mode identity, nothing to emit here.
    out_ref[...] = jnp.broadcast_to(logits, out_ref.shape).astype(out_ref.dtype)


# ---------------------------------------------------------------------------
# Wrapper
# ---------------------------------------------------------------------------
def _prepare_input(x_nchw):
    """NCHW (Cin=1) -> im2col patches (N*256, 128) bf16: lane k = tap kh*3+kw."""
    n, c, h, w = x_nchw.shape
    assert (c, h, w) == (CONV_CFG[0][0], IN_SPATIAL, IN_SPATIAL), \
        "kernel geometry is compiled for (1, 16, 16) inputs"
    p0 = CONV_CFG[0][3]
    xp = jnp.pad(x_nchw[:, 0], ((0, 0), (p0, p0), (p0, p0)))      # (N,18,18)
    taps = [xp[:, kh:kh + h, kw:kw + w] for kh in range(3) for kw in range(3)]
    patches = jnp.stack(taps, axis=-1).reshape(n, h * w, 9)        # (N,256,9)
    patches = jnp.pad(patches, ((0, 0), (0, 0), (0, C_PAD - 9)))
    return patches.astype(jnp.bfloat16).reshape(n * h * w, C_PAD)


@jax.jit
def forward_pallas(params, x_nchw):
    n = x_nchw.shape[0]
    xf = _prepare_input(x_nchw)
    scatters = [jnp.asarray(s, jnp.bfloat16) for s in _SCATTERS_NP]

    def full(shape):
        return pl.BlockSpec(shape, lambda i: (0,) * len(shape))

    out = pl.pallas_call(
        fused_wdm_kernel,
        out_shape=jax.ShapeDtypeStruct((8 * n, C_PAD), jnp.float32),
        grid=(n,),
        in_specs=[
            pl.BlockSpec((IN_SPATIAL * IN_SPATIAL, C_PAD), lambda i: (i, 0)),
            full((1 + 9 * (N_LAYERS - 1), C_PAD, C_PAD)),           # conv weights
            full((N_LAYERS, 2, C_PAD)),                             # folded BN scale/bias
        ] + [full(s.shape) for s in scatters] + [
            full((C_PAD, C_PAD)),                                   # fc weight
            full((1, C_PAD)),                                       # fc bias
        ],
        out_specs=pl.BlockSpec((8, C_PAD), lambda i: (i, 0)),
        scratch_shapes=[pltpu.VMEM((rows, C_PAD), jnp.bfloat16) for rows in BUF_ROWS]
                      + [pltpu.VMEM((Y_ROWS, C_PAD), jnp.bfloat16)],
        compiler_params=pltpu.CompilerParams(
            dimension_semantics=("parallel",)),
    )(xf, params["w"], params["sb"], *scatters, params["fc_w"], params["fc_b"])
    return out.reshape(n, 8, C_PAD)[:, 0, :NUM_CLASSES]


# ---------------------------------------------------------------------------
# Parameter construction (deterministic, synthetic; eval-mode BN folded)
# ---------------------------------------------------------------------------
def init_params(key, num_classes=NUM_CLASSES):
    w_packed = []
    sb = jnp.zeros((N_LAYERS, 2, C_PAD), jnp.float32)
    ref_layers = []
    for l, (cin, cout, s, p, d) in enumerate(CONV_CFG):
        key, kw_, kb_, kg_, kbt_, km_, kv_ = jax.random.split(key, 7)
        fan_in = cin * 9
        bound = 1.0 / math.sqrt(fan_in)
        w = jax.random.uniform(kw_, (3, 3, cin, cout), jnp.float32, -bound, bound)
        cb = jax.random.uniform(kb_, (cout,), jnp.float32, -bound, bound)
        gamma = jax.random.uniform(kg_, (cout,), jnp.float32, 0.5, 1.5)
        beta = jax.random.uniform(kbt_, (cout,), jnp.float32, -0.1, 0.1)
        rmean = 0.1 * jax.random.normal(km_, (cout,), jnp.float32)
        rvar = jax.random.uniform(kv_, (cout,), jnp.float32, 0.5, 1.5)
        # Fold eval-mode BN (+ conv bias) into per-channel scale & bias.
        scale = gamma / jnp.sqrt(rvar + BN_EPS)
        bias = beta + (cb - rmean) * scale
        w_bf = w.astype(jnp.bfloat16)
        if l == 0:
            # Layer 0 (Cin=1): weights laid out as (tap kh*3+kw, cout) -> one matmul.
            w0 = jnp.zeros((1, C_PAD, C_PAD), jnp.bfloat16)
            w0 = w0.at[0, :9, :cout].set(w_bf[:, :, 0, :].reshape(9, cout))
            w_packed.append(w0)
        else:
            wpd = jnp.zeros((3, 3, C_PAD, C_PAD), jnp.bfloat16)
            wpd = wpd.at[:, :, :cin, :cout].set(w_bf)
            w_packed.append(wpd.reshape(9, C_PAD, C_PAD))
        sb = sb.at[l, 0, :cout].set(scale).at[l, 1, :cout].set(bias)
        ref_layers.append(dict(w=w_bf.astype(jnp.float32), scale=scale, bias=bias))

    key, kfw, kfb = jax.random.split(key, 3)
    bound = 1.0 / math.sqrt(128)
    fc_w = jax.random.uniform(kfw, (128, num_classes), jnp.float32, -bound, bound)
    fc_b = jax.random.uniform(kfb, (num_classes,), jnp.float32, -bound, bound)
    fc_w_pad = jnp.zeros((C_PAD, C_PAD), jnp.float32).at[:, :num_classes].set(fc_w)
    fc_b_pad = jnp.zeros((1, C_PAD), jnp.float32).at[0, :num_classes].set(fc_b)

    pallas_params = dict(w=jnp.concatenate(w_packed, axis=0), sb=sb,
                         fc_w=fc_w_pad, fc_b=fc_b_pad)
    ref_params = dict(convs=ref_layers, fc_w=fc_w, fc_b=fc_b)
    return pallas_params, ref_params


# ---------------------------------------------------------------------------
# Pure-JAX reference (lax.conv) for a numerical sanity check
# ---------------------------------------------------------------------------
@jax.jit
def forward_reference(ref_params, x_nchw):
    x = jnp.transpose(x_nchw, (0, 2, 3, 1))
    x = x.astype(jnp.bfloat16).astype(jnp.float32)   # kernel feeds bf16 matmuls
    for idx, ((cin, cout, s, p, d), layer) in enumerate(
            zip(CONV_CFG, ref_params["convs"])):
        y = lax.conv_general_dilated(
            x, layer["w"], window_strides=(s, s), padding=((p, p), (p, p)),
            rhs_dilation=(d, d), dimension_numbers=("NHWC", "HWIO", "NHWC"))
        x = jnp.maximum(y * layer["scale"] + layer["bias"], 0.0)
        if idx + 1 < N_LAYERS:                       # match kernel's bf16 frames
            x = x.astype(jnp.bfloat16).astype(jnp.float32)
    pooled = jnp.mean(x, axis=(1, 2))                # (N, 128)
    return pooled @ ref_params["fc_w"] + ref_params["fc_b"]


# ---------------------------------------------------------------------------
if __name__ == "__main__":
    key = jax.random.PRNGKey(0)
    key, kx = jax.random.split(key)
    x = jax.random.normal(kx, (2, 1, 16, 16), jnp.float32)   # NCHW, like PyTorch
    pallas_params, ref_params = init_params(key, num_classes=NUM_CLASSES)

    out = jax.block_until_ready(forward_pallas(pallas_params, x))
    assert out.shape == (2, NUM_CLASSES), out.shape

    ref = jax.block_until_ready(forward_reference(ref_params, x))
    err = float(jnp.max(jnp.abs(out - ref)))
    tol = 1e-2 * (1.0 + float(jnp.max(jnp.abs(ref))))
    assert err < tol, f"mismatch vs reference: max abs err {err} (tol {tol})"

    print("KERNEL_OK")
</pallas_src>

<mosaic_0001>
module attributes {stable_mosaic.version = 11 : i64} {
  func.func @fused_wdm_kernel(%arg0: i32, %arg1: memref<256x128xbf16, #tpu.memory_space<vmem>>, %arg2: memref<46x128x128xbf16, #tpu.memory_space<vmem>>, %arg3: memref<6x2x128xf32, #tpu.memory_space<vmem>>, %arg4: memref<336x256xbf16, #tpu.memory_space<vmem>>, %arg5: memref<336x288xbf16, #tpu.memory_space<vmem>>, %arg6: memref<160x288xbf16, #tpu.memory_space<vmem>>, %arg7: memref<112x96xbf16, #tpu.memory_space<vmem>>, %arg8: memref<80x80xbf16, #tpu.memory_space<vmem>>, %arg9: memref<128x128xf32, #tpu.memory_space<vmem>>, %arg10: memref<1x128xf32, #tpu.memory_space<vmem>>, %arg11: memref<8x128xf32, #tpu.memory_space<vmem>>, %arg12: memref<336x128xbf16, #tpu.memory_space<vmem>>, %arg13: memref<336x128xbf16, #tpu.memory_space<vmem>>, %arg14: memref<160x128xbf16, #tpu.memory_space<vmem>>, %arg15: memref<112x128xbf16, #tpu.memory_space<vmem>>, %arg16: memref<80x128xbf16, #tpu.memory_space<vmem>>, %arg17: memref<288x128xbf16, #tpu.memory_space<vmem>>) attributes {dimension_semantics = [#tpu.dimension_semantics<parallel>], iteration_bounds = array<i64: 2>, scalar_prefetch = 0 : i64, scratch_operands = 6 : i64, tpu.core_type = #tpu.core_type<tc>, window_params = [{transform_indices = @transform_0, window_bounds = array<i64: 256, 128>}, {pipeline_mode = #tpu.pipeline_mode<synchronous>, transform_indices = @transform_1, window_bounds = array<i64: 46, 128, 128>}, {pipeline_mode = #tpu.pipeline_mode<synchronous>, transform_indices = @transform_2, window_bounds = array<i64: 6, 2, 128>}, {pipeline_mode = #tpu.pipeline_mode<synchronous>, transform_indices = @transform_3, window_bounds = array<i64: 336, 256>}, {pipeline_mode = #tpu.pipeline_mode<synchronous>, transform_indices = @transform_4, window_bounds = array<i64: 336, 288>}, {pipeline_mode = #tpu.pipeline_mode<synchronous>, transform_indices = @transform_5, window_bounds = array<i64: 160, 288>}, {pipeline_mode = #tpu.pipeline_mode<synchronous>, transform_indices = @transform_6, window_bounds = array<i64: 112, 96>}, {pipeline_mode = #tpu.pipeline_mode<synchronous>, transform_indices = @transform_7, window_bounds = array<i64: 80, 80>}, {pipeline_mode = #tpu.pipeline_mode<synchronous>, transform_indices = @transform_8, window_bounds = array<i64: 128, 128>}, {pipeline_mode = #tpu.pipeline_mode<synchronous>, transform_indices = @transform_9, window_bounds = array<i64: 1, 128>}, {transform_indices = @transform_10, window_bounds = array<i64: 8, 128>}]} {
    %c0 = arith.constant 0 : index
    %c0_0 = arith.constant 0 : index
    %c0_1 = arith.constant 0 : index
    %0 = vector.load %arg3[%c0, %c0_0, %c0_1] : memref<6x2x128xf32, #tpu.memory_space<vmem>>, vector<1x2x128xf32>
    %1 = vector.shape_cast %0 : vector<1x2x128xf32> to vector<2x128xf32>
    %2 = vector.extract_strided_slice %1 {offsets = [0, 0], sizes = [1, 128], strides = [1, 1]} : vector<2x128xf32> to vector<1x128xf32>
    %3 = vector.extract_strided_slice %1 {offsets = [1, 0], sizes = [1, 128], strides = [1, 1]} : vector<2x128xf32> to vector<1x128xf32>
    %c0_2 = arith.constant 0 : index
    %c0_3 = arith.constant 0 : index
    %4 = vector.load %arg1[%c0_2, %c0_3] : memref<256x128xbf16, #tpu.memory_space<vmem>>, vector<256x128xbf16>
    %c0_4 = arith.constant 0 : index
    %c0_5 = arith.constant 0 : index
    %c0_6 = arith.constant 0 : index
    %5 = vector.load %arg2[%c0_4, %c0_5, %c0_6] : memref<46x128x128xbf16, #tpu.memory_space<vmem>>, vector<1x128x128xbf16>
    %6 = vector.shape_cast %5 : vector<1x128x128xbf16> to vector<128x128xbf16>
    %cst = arith.constant dense<0.000000e+00> : vector<256x128xf32>
    %7 = tpu.matmul %4, %6, %cst {dimension_numbers = #tpu.dot_dimension_numbers<[1], [0], [0], [1], [0, 0, 1, 1], [], []>} : vector<256x128xbf16>, vector<128x128xbf16>, vector<256x128xf32> -> vector<256x128xf32>
    %8 = vector.broadcast %2 : vector<1x128xf32> to vector<256x128xf32>
    %9 = arith.mulf %7, %8 : vector<256x128xf32>
    %10 = vector.broadcast %3 : vector<1x128xf32> to vector<256x128xf32>
    %11 = arith.addf %9, %10 : vector<256x128xf32>
    %cst_7 = arith.constant 0.000000e+00 : f32
    %12 = vector.broadcast %cst_7 : f32 to vector<256x128xf32>
    %13 = arith.maximumf %11, %12 : vector<256x128xf32>
    %14 = arith.truncf %13 : vector<256x128xf32> to vector<256x128xbf16>
    %c0_8 = arith.constant 0 : index
    %c0_9 = arith.constant 0 : index
    %15 = vector.load %arg4[%c0_8, %c0_9] : memref<336x256xbf16, #tpu.memory_space<vmem>>, vector<336x256xbf16>
    %cst_10 = arith.constant dense<0.000000e+00> : vector<336x128xf32>
    %16 = tpu.matmul %15, %14, %cst_10 {dimension_numbers = #tpu.dot_dimension_numbers<[1], [0], [0], [1], [0, 0, 1, 1], [], []>} : vector<336x256xbf16>, vector<256x128xbf16>, vector<336x128xf32> -> vector<336x128xf32>
    %17 = arith.truncf %16 : vector<336x128xf32> to vector<336x128xbf16>
    %c0_11 = arith.constant 0 : index
    %c0_12 = arith.constant 0 : index
    %18 = vector.load %arg12[%c0_11, %c0_12] : memref<336x128xbf16, #tpu.memory_space<vmem>>, vector<336x128xbf16>
    tpu.vector_store %arg12[%c0_11, %c0_12], %17 {strides = array<i32>} : memref<336x128xbf16, #tpu.memory_space<vmem>>, vector<336x128xbf16>,
    %c1 = arith.constant 1 : index
    %c0_13 = arith.constant 0 : index
    %c0_14 = arith.constant 0 : index
    %19 = vector.load %arg3[%c1, %c0_13, %c0_14] : memref<6x2x128xf32, #tpu.memory_space<vmem>>, vector<1x2x128xf32>
    %20 = vector.shape_cast %19 : vector<1x2x128xf32> to vector<2x128xf32>
    %21 = vector.extract_strided_slice %20 {offsets = [0, 0], sizes = [1, 128], strides = [1, 1]} : vector<2x128xf32> to vector<1x128xf32>
    %22 = vector.extract_strided_slice %20 {offsets = [1, 0], sizes = [1, 128], strides = [1, 1]} : vector<2x128xf32> to vector<1x128xf32>
    %c0_15 = arith.constant 0 : index
    %c0_16 = arith.constant 0 : index
    %23 = vector.load %arg12[%c0_15, %c0_16] : memref<336x128xbf16, #tpu.memory_space<vmem>>, vector<96x128xbf16>
    %c1_17 = arith.constant 1 : index
    %c0_18 = arith.constant 0 : index
    %c0_19 = arith.constant 0 : index
    %24 = vector.load %arg2[%c1_17, %c0_18, %c0_19] : memref<46x128x128xbf16, #tpu.memory_space<vmem>>, vector<1x128x128xbf16>
    %25 = vector.shape_cast %24 : vector<1x128x128xbf16> to vector<128x128xbf16>
    %cst_20 = arith.constant dense<0.000000e+00> : vector<96x128xf32>
    %26 = tpu.matmul %23, %25, %cst_20 {dimension_numbers = #tpu.dot_dimension_numbers<[1], [0], [0], [1], [0, 0, 1, 1], [], []>} : vector<96x128xbf16>, vector<128x128xbf16>, vector<96x128xf32> -> vector<96x128xf32>
    %c1_21 = arith.constant 1 : index
    %c0_22 = arith.constant 0 : index
    %27 = vector.load %arg12[%c1_21, %c0_22] : memref<336x128xbf16, #tpu.memory_space<vmem>>, vector<96x128xbf16>
    %c2 = arith.constant 2 : index
    %c0_23 = arith.constant 0 : index
    %c0_24 = arith.constant 0 : index
    %28 = vector.load %arg2[%c2, %c0_23, %c0_24] : memref<46x128x128xbf16, #tpu.memory_space<vmem>>, vector<1x128x128xbf16>
    %29 = vector.shape_cast %28 : vector<1x128x128xbf16> to vector<128x128xbf16>
    %cst_25 = arith.constant dense<0.000000e+00> : vector<96x128xf32>
    %30 = tpu.matmul %27, %29, %cst_25 {dimension_numbers = #tpu.dot_dimension_numbers<[1], [0], [0], [1], [0, 0, 1, 1], [], []>} : vector<96x128xbf16>, vector<128x128xbf16>, vector<96x128xf32> -> vector<96x128xf32>
    %31 = arith.addf %26, %30 : vector<96x128xf32>
    %c2_26 = arith.constant 2 : index
    %c0_27 = arith.constant 0 : index
    %32 = vector.load %arg12[%c2_26, %c0_27] : memref<336x128xbf16, #tpu.memory_space<vmem>>, vector<96x128xbf16>
    %c3 = arith.constant 3 : index
    %c0_28 = arith.constant 0 : index
    %c0_29 = arith.constant 0 : index
    %33 = vector.load %arg2[%c3, %c0_28, %c0_29] : memref<46x128x128xbf16, #tpu.memory_space<vmem>>, vector<1x128x128xbf16>
    %34 = vector.shape_cast %33 : vector<1x128x128xbf16> to vector<128x128xbf16>
    %cst_30 = arith.constant dense<0.000000e+00> : vector<96x128xf32>
    %35 = tpu.matmul %32, %34, %cst_30 {dimension_numbers = #tpu.dot_dimension_numbers<[1], [0], [0], [1], [0, 0, 1, 1], [], []>} : vector<96x128xbf16>, vector<128x128xbf16>, vector<96x128xf32> -> vector<96x128xf32>
    %36 = arith.addf %31, %35 : vector<96x128xf32>
    %c18 = arith.constant 18 : index
    %c0_31 = arith.constant 0 : index
    %37 = vector.load %arg12[%c18, %c0_31] : memref<336x128xbf16, #tpu.memory_space<vmem>>, vector<96x128xbf16>
    %c4 = arith.constant 4 : index
    %c0_32 = arith.constant 0 : index
    %c0_33 = arith.constant 0 : index
    %38 = vector.load %arg2[%c4, %c0_32, %c0_33] : memref<46x128x128xbf16, #tpu.memory_space<vmem>>, vector<1x128x128xbf16>
    %39 = vector.shape_cast %38 : vector<1x128x128xbf16> to vector<128x128xbf16>
    %cst_34 = arith.constant dense<0.000000e+00> : vector<96x128xf32>
    %40 = tpu.matmul %37, %39, %cst_34 {dimension_numbers = #tpu.dot_dimension_numbers<[1], [0], [0], [1], [0, 0, 1, 1], [], []>} : vector<96x128xbf16>, vector<128x128xbf16>, vector<96x128xf32> -> vector<96x128xf32>
    %41 = arith.addf %36, %40 : vector<96x128xf32>
    %c19 = arith.constant 19 : index
    %c0_35 = arith.constant 0 : index
    %42 = vector.load %arg12[%c19, %c0_35] : memref<336x128xbf16, #tpu.memory_space<vmem>>, vector<96x128xbf16>
    %c5 = arith.constant 5 : index
    %c0_36 = arith.constant 0 : index
    %c0_37 = arith.constant 0 : index
    %43 = vector.load %arg2[%c5, %c0_36, %c0_37] : memref<46x128x128xbf16, #tpu.memory_space<vmem>>, vector<1x128x128xbf16>
    %44 = vector.shape_cast %43 : vector<1x128x128xbf16> to vector<128x128xbf16>
    %cst_38 = arith.constant dense<0.000000e+00> : vector<96x128xf32>
    %45 = tpu.matmul %42, %44, %cst_38 {dimension_numbers = #tpu.dot_dimension_numbers<[1], [0], [0], [1], [0, 0, 1, 1], [], []>} : vector<96x128xbf16>, vector<128x128xbf16>, vector<96x128xf32> -> vector<96x128xf32>
    %46 = arith.addf %41, %45 : vector<96x128xf32>
    %c20 = arith.constant 20 : index
    %c0_39 = arith.constant 0 : index
    %47 = vector.load %arg12[%c20, %c0_39] : memref<336x128xbf16, #tpu.memory_space<vmem>>, vector<96x128xbf16>
    %c6 = arith.constant 6 : index
    %c0_40 = arith.constant 0 : index
    %c0_41 = arith.constant 0 : index
    %48 = vector.load %arg2[%c6, %c0_40, %c0_41] : memref<46x128x128xbf16, #tpu.memory_space<vmem>>, vector<1x128x128xbf16>
    %49 = vector.shape_cast %48 : vector<1x128x128xbf16> to vector<128x128xbf16>
    %cst_42 = arith.constant dense<0.000000e+00> : vector<96x128xf32>
    %50 = tpu.matmul %47, %49, %cst_42 {dimension_numbers = #tpu.dot_dimension_numbers<[1], [0], [0], [1], [0, 0, 1, 1], [], []>} : vector<96x128xbf16>, vector<128x128xbf16>, vector<96x128xf32> -> vector<96x128xf32>
    %51 = arith.addf %46, %50 : vector<96x128xf32>
    %c36 = arith.constant 36 : index
    %c0_43 = arith.constant 0 : index
    %52 = vector.load %arg12[%c36, %c0_43] : memref<336x128xbf16, #tpu.memory_space<vmem>>, vector<96x128xbf16>
    %c7 = arith.constant 7 : index
    %c0_44 = arith.constant 0 : index
    %c0_45 = arith.constant 0 : index
    %53 = vector.load %arg2[%c7, %c0_44, %c0_45] : memref<46x128x128xbf16, #tpu.memory_space<vmem>>, vector<1x128x128xbf16>
    %54 = vector.shape_cast %53 : vector<1x128x128xbf16> to vector<128x128xbf16>
    %cst_46 = arith.constant dense<0.000000e+00> : vector<96x128xf32>
    %55 = tpu.matmul %52, %54, %cst_46 {dimension_numbers = #tpu.dot_dimension_numbers<[1], [0], [0], [1], [0, 0, 1, 1], [], []>} : vector<96x128xbf16>, vector<128x128xbf16>, vector<96x128xf32> -> vector<96x128xf32>
    %56 = arith.addf %51, %55 : vector<96x128xf32>
    %c37 = arith.constant 37 : index
    %c0_47 = arith.constant 0 : index
    %57 = vector.load %arg12[%c37, %c0_47] : memref<336x128xbf16, #tpu.memory_space<vmem>>, vector<96x128xbf16>
    %c8 = arith.constant 8 : index
    %c0_48 = arith.constant 0 : index
    %c0_49 = arith.constant 0 : index
    %58 = vector.load %arg2[%c8, %c0_48, %c0_49] : memref<46x128x128xbf16, #tpu.memory_space<vmem>>, vector<1x128x128xbf16>
    %59 = vector.shape_cast %58 : vector<1x128x128xbf16> to vector<128x128xbf16>
    %cst_50 = arith.constant dense<0.000000e+00> : vector<96x128xf32>
    %60 = tpu.matmul %57, %59, %cst_50 {dimension_numbers = #tpu.dot_dimension_numbers<[1], [0], [0], [1], [0, 0, 1, 1], [], []>} : vector<96x128xbf16>, vector<128x128xbf16>, vector<96x128xf32> -> vector<96x128xf32>
    %61 = arith.addf %56, %60 : vector<96x128xf32>
    %c38 = arith.constant 38 : index
    %c0_51 = arith.constant 0 : index
    %62 = vector.load %arg12[%c38, %c0_51] : memref<336x128xbf16, #tpu.memory_space<vmem>>, vector<96x128xbf16>
    %c9 = arith.constant 9 : index
    %c0_52 = arith.constant 0 : index
    %c0_53 = arith.constant 0 : index
    %63 = vector.load %arg2[%c9, %c0_52, %c0_53] : memref<46x128x128xbf16, #tpu.memory_space<vmem>>, vector<1x128x128xbf16>
    %64 = vector.shape_cast %63 : vector<1x128x128xbf16> to vector<128x128xbf16>
    %cst_54 = arith.constant dense<0.000000e+00> : vector<96x128xf32>
    %65 = tpu.matmul %62, %64, %cst_54 {dimension_numbers = #tpu.dot_dimension_numbers<[1], [0], [0], [1], [0, 0, 1, 1], [], []>} : vector<96x128xbf16>, vector<128x128xbf16>, vector<96x128xf32> -> vector<96x128xf32>
    %66 = arith.addf %61, %65 : vector<96x128xf32>
    %67 = vector.broadcast %21 : vector<1x128xf32> to vector<96x128xf32>
    %68 = arith.mulf %66, %67 : vector<96x128xf32>
    %69 = vector.broadcast %22 : vector<1x128xf32> to vector<96x128xf32>
    %70 = arith.addf %68, %69 : vector<96x128xf32>
    %cst_55 = arith.constant 0.000000e+00 : f32
    %71 = vector.broadcast %cst_55 : f32 to vector<96x128xf32>
    %72 = arith.maximumf %70, %71 : vector<96x128xf32>
    %73 = arith.truncf %72 : vector<96x128xf32> to vector<96x128xbf16>
    %c0_56 = arith.constant 0 : index
    %c0_57 = arith.constant 0 : index
    %74 = vector.load %arg17[%c0_56, %c0_57] : memref<288x128xbf16, #tpu.memory_space<vmem>>, vector<96x128xbf16>
    tpu.vector_store %arg17[%c0_56, %c0_57], %73 {strides = array<i32>} : memref<288x128xbf16, #tpu.memory_space<vmem>>, vector<96x128xbf16>,
    %c96 = arith.constant 96 : index
    %c0_58 = arith.constant 0 : index
    %75 = vector.load %arg12[%c96, %c0_58] : memref<336x128xbf16, #tpu.memory_space<vmem>>, vector<96x128xbf16>
    %c1_59 = arith.constant 1 : index
    %c0_60 = arith.constant 0 : index
    %c0_61 = arith.constant 0 : index
    %76 = vector.load %arg2[%c1_59, %c0_60, %c0_61] : memref<46x128x128xbf16, #tpu.memory_space<vmem>>, vector<1x128x128xbf16>
    %77 = vector.shape_cast %76 : vector<1x128x128xbf16> to vector<128x128xbf16>
    %cst_62 = arith.constant dense<0.000000e+00> : vector<96x128xf32>
    %78 = tpu.matmul %75, %77, %cst_62 {dimension_numbers = #tpu.dot_dimension_numbers<[1], [0], [0], [1], [0, 0, 1, 1], [], []>} : vector<96x128xbf16>, vector<128x128xbf16>, vector<96x128xf32> -> vector<96x128xf32>
    %c97 = arith.constant 97 : index
    %c0_63 = arith.constant 0 : index
    %79 = vector.load %arg12[%c97, %c0_63] : memref<336x128xbf16, #tpu.memory_space<vmem>>, vector<96x128xbf16>
    %c2_64 = arith.constant 2 : index
    %c0_65 = arith.constant 0 : index
    %c0_66 = arith.constant 0 : index
    %80 = vector.load %arg2[%c2_64, %c0_65, %c0_66] : memref<46x128x128xbf16, #tpu.memory_space<vmem>>, vector<1x128x128xbf16>
    %81 = vector.shape_cast %80 : vector<1x128x128xbf16> to vector<128x128xbf16>
    %cst_67 = arith.constant dense<0.000000e+00> : vector<96x128xf32>
    %82 = tpu.matmul %79, %81, %cst_67 {dimension_numbers = #tpu.dot_dimension_numbers<[1], [0], [0], [1], [0, 0, 1, 1], [], []>} : vector<96x128xbf16>, vector<128x128xbf16>, vector<96x128xf32> -> vector<96x128xf32>
    %83 = arith.addf %78, %82 : vector<96x128xf32>
    %c98 = arith.constant 98 : index
    %c0_68 = arith.constant 0 : index
    %84 = vector.load %arg12[%c98, %c0_68] : memref<336x128xbf16, #tpu.memory_space<vmem>>, vector<96x128xbf16>
    %c3_69 = arith.constant 3 : index
    %c0_70 = arith.constant 0 : index
    %c0_71 = arith.constant 0 : index
    %85 = vector.load %arg2[%c3_69, %c0_70, %c0_71] : memref<46x128x128xbf16, #tpu.memory_space<vmem>>, vector<1x128x128xbf16>
    %86 = vector.shape_cast %85 : vector<1x128x128xbf16> to vector<128x128xbf16>
    %cst_72 = arith.constant dense<0.000000e+00> : vector<96x128xf32>
    %87 = tpu.matmul %84, %86, %cst_72 {dimension_numbers = #tpu.dot_dimension_numbers<[1], [0], [0], [1], [0, 0, 1, 1], [], []>} : vector<96x128xbf16>, vector<128x128xbf16>, vector<96x128xf32> -> vector<96x128xf32>
    %88 = arith.addf %83, %87 : vector<96x128xf32>
    %c114 = arith.constant 114 : index
    %c0_73 = arith.constant 0 : index
    %89 = vector.load %arg12[%c114, %c0_73] : memref<336x128xbf16, #tpu.memory_space<vmem>>, vector<96x128xbf16>
    %c4_74 = arith.constant 4 : index
    %c0_75 = arith.constant 0 : index
    %c0_76 = arith.constant 0 : index
    %90 = vector.load %arg2[%c4_74, %c0_75, %c0_76] : memref<46x128x128xbf16, #tpu.memory_space<vmem>>, vector<1x128x128xbf16>
    %91 = vector.shape_cast %90 : vector<1x128x128xbf16> to vector<128x128xbf16>
    %cst_77 = arith.constant dense<0.000000e+00> : vector<96x128xf32>
    %92 = tpu.matmul %89, %91, %cst_77 {dimension_numbers = #tpu.dot_dimension_numbers<[1], [0], [0], [1], [0, 0, 1, 1], [], []>} : vector<96x128xbf16>, vector<128x128xbf16>, vector<96x128xf32> -> vector<96x128xf32>
    %93 = arith.addf %88, %92 : vector<96x128xf32>
    %c115 = arith.constant 115 : index
    %c0_78 = arith.constant 0 : index
    %94 = vector.load %arg12[%c115, %c0_78] : memref<336x128xbf16, #tpu.memory_space<vmem>>, vector<96x128xbf16>
    %c5_79 = arith.constant 5 : index
    %c0_80 = arith.constant 0 : index
    %c0_81 = arith.constant 0 : index
    %95 = vector.load %arg2[%c5_79, %c0_80, %c0_81] : memref<46x128x128xbf16, #tpu.memory_space<vmem>>, vector<1x128x128xbf16>
    %96 = vector.shape_cast %95 : vector<1x128x128xbf16> to vector<128x128xbf16>
    %cst_82 = arith.constant dense<0.000000e+00> : vector<96x128xf32>
    %97 = tpu.matmul %94, %96, %cst_82 {dimension_numbers = #tpu.dot_dimension_numbers<[1], [0], [0], [1], [0, 0, 1, 1], [], []>} : vector<96x128xbf16>, vector<128x128xbf16>, vector<96x128xf32> -> vector<96x128xf32>
    %98 = arith.addf %93, %97 : vector<96x128xf32>
    %c116 = arith.constant 116 : index
    %c0_83 = arith.constant 0 : index
    %99 = vector.load %arg12[%c116, %c0_83] : memref<336x128xbf16, #tpu.memory_space<vmem>>, vector<96x128xbf16>
    %c6_84 = arith.constant 6 : index
    %c0_85 = arith.constant 0 : index
    %c0_86 = arith.constant 0 : index
    %100 = vector.load %arg2[%c6_84, %c0_85, %c0_86] : memref<46x128x128xbf16, #tpu.memory_space<vmem>>, vector<1x128x128xbf16>
    %101 = vector.shape_cast %100 : vector<1x128x128xbf16> to vector<128x128xbf16>
    %cst_87 = arith.constant dense<0.000000e+00> : vector<96x128xf32>
    %102 = tpu.matmul %99, %101, %cst_87 {dimension_numbers = #tpu.dot_dimension_numbers<[1], [0], [0], [1], [0, 0, 1, 1], [], []>} : vector<96x128xbf16>, vector<128x128xbf16>, vector<96x128xf32> -> vector<96x128xf32>
    %103 = arith.addf %98, %102 : vector<96x128xf32>
    %c132 = arith.constant 132 : index
    %c0_88 = arith.constant 0 : index
    %104 = vector.load %arg12[%c132, %c0_88] : memref<336x128xbf16, #tpu.memory_space<vmem>>, vector<96x128xbf16>
    %c7_89 = arith.constant 7 : index
    %c0_90 = arith.constant 0 : index
    %c0_91 = arith.constant 0 : index
    %105 = vector.load %arg2[%c7_89, %c0_90, %c0_91] : memref<46x128x128xbf16, #tpu.memory_space<vmem>>, vector<1x128x128xbf16>
    %106 = vector.shape_cast %105 : vector<1x128x128xbf16> to vector<128x128xbf16>
    %cst_92 = arith.constant dense<0.000000e+00> : vector<96x128xf32>
    %107 = tpu.matmul %104, %106, %cst_92 {dimension_numbers = #tpu.dot_dimension_numbers<[1], [0], [0], [1], [0, 0, 1, 1], [], []>} : vector<96x128xbf16>, vector<128x128xbf16>, vector<96x128xf32> -> vector<96x128xf32>
    %108 = arith.addf %103, %107 : vector<96x128xf32>
    %c133 = arith.constant 133 : index
    %c0_93 = arith.constant 0 : index
    %109 = vector.load %arg12[%c133, %c0_93] : memref<336x128xbf16, #tpu.memory_space<vmem>>, vector<96x128xbf16>
    %c8_94 = arith.constant 8 : index
    %c0_95 = arith.constant 0 : index
    %c0_96 = arith.constant 0 : index
    %110 = vector.load %arg2[%c8_94, %c0_95, %c0_96] : memref<46x128x128xbf16, #tpu.memory_space<vmem>>, vector<1x128x128xbf16>
    %111 = vector.shape_cast %110 : vector<1x128x128xbf16> to vector<128x128xbf16>
    %cst_97 = arith.constant dense<0.000000e+00> : vector<96x128xf32>
    %112 = tpu.matmul %109, %111, %cst_97 {dimension_numbers = #tpu.dot_dimension_numbers<[1], [0], [0], [1], [0, 0, 1, 1], [], []>} : vector<96x128xbf16>, vector<128x128xbf16>, vector<96x128xf32> -> vector<96x128xf32>
    %113 = arith.addf %108, %112 : vector<96x128xf32>
    %c134 = arith.constant 134 : index
    %c0_98 = arith.constant 0 : index
    %114 = vector.load %arg12[%c134, %c0_98] : memref<336x128xbf16, #tpu.memory_space<vmem>>, vector<96x128xbf16>
    %c9_99 = arith.constant 9 : index
    %c0_100 = arith.constant 0 : index
    %c0_101 = arith.constant 0 : index
    %115 = vector.load %arg2[%c9_99, %c0_100, %c0_101] : memref<46x128x128xbf16, #tpu.memory_space<vmem>>, vector<1x128x128xbf16>
    %116 = vector.shape_cast %115 : vector<1x128x128xbf16> to vector<128x128xbf16>
    %cst_102 = arith.constant dense<0.000000e+00> : vector<96x128xf32>
    %117 = tpu.matmul %114, %116, %cst_102 {dimension_numbers = #tpu.dot_dimension_numbers<[1], [0], [0], [1], [0, 0, 1, 1], [], []>} : vector<96x128xbf16>, vector<128x128xbf16>, vector<96x128xf32> -> vector<96x128xf32>
    %118 = arith.addf %113, %117 : vector<96x128xf32>
    %119 = vector.broadcast %21 : vector<1x128xf32> to vector<96x128xf32>
    %120 = arith.mulf %118, %119 : vector<96x128xf32>
    %121 = vector.broadcast %22 : vector<1x128xf32> to vector<96x128xf32>
    %122 = arith.addf %120, %121 : vector<96x128xf32>
    %cst_103 = arith.constant 0.000000e+00 : f32
    %123 = vector.broadcast %cst_103 : f32 to vector<96x128xf32>
    %124 = arith.maximumf %122, %123 : vector<96x128xf32>
    %125 = arith.truncf %124 : vector<96x128xf32> to vector<96x128xbf16>
    %c96_104 = arith.constant 96 : index
    %c0_105 = arith.constant 0 : index
    %126 = vector.load %arg17[%c96_104, %c0_105] : memref<288x128xbf16, #tpu.memory_space<vmem>>, vector<96x128xbf16>
    tpu.vector_store %arg17[%c96_104, %c0_105], %125 {strides = array<i32>} : memref<288x128xbf16, #tpu.memory_space<vmem>>, vector<96x128xbf16>,
    %c192 = arith.constant 192 : index
    %c0_106 = arith.constant 0 : index
    %127 = vector.load %arg12[%c192, %c0_106] : memref<336x128xbf16, #tpu.memory_space<vmem>>, vector<96x128xbf16>
    %c1_107 = arith.constant 1 : index
    %c0_108 = arith.constant 0 : index
    %c0_109 = arith.constant 0 : index
    %128 = vector.load %arg2[%c1_107, %c0_108, %c0_109] : memref<46x128x128xbf16, #tpu.memory_space<vmem>>, vector<1x128x128xbf16>
    %129 = vector.shape_cast %128 : vector<1x128x128xbf16> to vector<128x128xbf16>
    %cst_110 = arith.constant dense<0.000000e+00> : vector<96x128xf32>
    %130 = tpu.matmul %127, %129, %cst_110 {dimension_numbers = #tpu.dot_dimension_numbers<[1], [0], [0], [1], [0, 0, 1, 1], [], []>} : vector<96x128xbf16>, vector<128x128xbf16>, vector<96x128xf32> -> vector<96x128xf32>
    %c193 = arith.constant 193 : index
    %c0_111 = arith.constant 0 : index
    %131 = vector.load %arg12[%c193, %c0_111] : memref<336x128xbf16, #tpu.memory_space<vmem>>, vector<96x128xbf16>
    %c2_112 = arith.constant 2 : index
    %c0_113 = arith.constant 0 : index
    %c0_114 = arith.constant 0 : index
    %132 = vector.load %arg2[%c2_112, %c0_113, %c0_114] : memref<46x128x128xbf16, #tpu.memory_space<vmem>>, vector<1x128x128xbf16>
    %133 = vector.shape_cast %132 : vector<1x128x128xbf16> to vector<128x128xbf16>
    %cst_115 = arith.constant dense<0.000000e+00> : vector<96x128xf32>
    %134 = tpu.matmul %131, %133, %cst_115 {dimension_numbers = #tpu.dot_dimension_numbers<[1], [0], [0], [1], [0, 0, 1, 1], [], []>} : vector<96x128xbf16>, vector<128x128xbf16>, vector<96x128xf32> -> vector<96x128xf32>
    %135 = arith.addf %130, %134 : vector<96x128xf32>
    %c194 = arith.constant 194 : index
    %c0_116 = arith.constant 0 : index
    %136 = vector.load %arg12[%c194, %c0_116] : memref<336x128xbf16, #tpu.memory_space<vmem>>, vector<96x128xbf16>
    %c3_117 = arith.constant 3 : index
    %c0_118 = arith.constant 0 : index
    %c0_119 = arith.constant 0 : index
    %137 = vector.load %arg2[%c3_117, %c0_118, %c0_119] : memref<46x128x128xbf16, #tpu.memory_space<vmem>>, vector<1x128x128xbf16>
    %138 = vector.shape_cast %137 : vector<1x128x128xbf16> to vector<128x128xbf16>
    %cst_120 = arith.constant dense<0.000000e+00> : vector<96x128xf32>
    %139 = tpu.matmul %136, %138, %cst_120 {dimension_numbers = #tpu.dot_dimension_numbers<[1], [0], [0], [1], [0, 0, 1, 1], [], []>} : vector<96x128xbf16>, vector<128x128xbf16>, vector<96x128xf32> -> vector<96x128xf32>
    %140 = arith.addf %135, %139 : vector<96x128xf32>
    %c210 = arith.constant 210 : index
    %c0_121 = arith.constant 0 : index
    %141 = vector.load %arg12[%c210, %c0_121] : memref<336x128xbf16, #tpu.memory_space<vmem>>, vector<96x128xbf16>
    %c4_122 = arith.constant 4 : index
    %c0_123 = arith.constant 0 : index
    %c0_124 = arith.constant 0 : index
    %142 = vector.load %arg2[%c4_122, %c0_123, %c0_124] : memref<46x128x128xbf16, #tpu.memory_space<vmem>>, vector<1x128x128xbf16>
    %143 = vector.shape_cast %142 : vector<1x128x128xbf16> to vector<128x128xbf16>
    %cst_125 = arith.constant dense<0.000000e+00> : vector<96x128xf32>
    %144 = tpu.matmul %141, %143, %cst_125 {dimension_numbers = #tpu.dot_dimension_numbers<[1], [0], [0], [1], [0, 0, 1, 1], [], []>} : vector<96x128xbf16>, vector<128x128xbf16>, vector<96x128xf32> -> vector<96x128xf32>
    %145 = arith.addf %140, %144 : vector<96x128xf32>
    %c211 = arith.constant 211 : index
    %c0_126 = arith.constant 0 : index
    %146 = vector.load %arg12[%c211, %c0_126] : memref<336x128xbf16, #tpu.memory_space<vmem>>, vector<96x128xbf16>
    %c5_127 = arith.constant 5 : index
    %c0_128 = arith.constant 0 : index
    %c0_129 = arith.constant 0 : index
    %147 = vector.load %arg2[%c5_127, %c0_128, %c0_129] : memref<46x128x128xbf16, #tpu.memory_space<vmem>>, vector<1x128x128xbf16>
    %148 = vector.shape_cast %147 : vector<1x128x128xbf16> to vector<128x128xbf16>
    %cst_130 = arith.constant dense<0.000000e+00> : vector<96x128xf32>
    %149 = tpu.matmul %146, %148, %cst_130 {dimension_numbers = #tpu.dot_dimension_numbers<[1], [0], [0], [1], [0, 0, 1, 1], [], []>} : vector<96x128xbf16>, vector<128x128xbf16>, vector<96x128xf32> -> vector<96x128xf32>
    %150 = arith.addf %145, %149 : vector<96x128xf32>
    %c212 = arith.constant 212 : index
    %c0_131 = arith.constant 0 : index
    %151 = vector.load %arg12[%c212, %c0_131] : memref<336x128xbf16, #tpu.memory_space<vmem>>, vector<96x128xbf16>
    %c6_132 = arith.constant 6 : index
    %c0_133 = arith.constant 0 : index
    %c0_134 = arith.constant 0 : index
    %152 = vector.load %arg2[%c6_132, %c0_133, %c0_134] : memref<46x128x128xbf16, #tpu.memory_space<vmem>>, vector<1x128x128xbf16>
    %153 = vector.shape_cast %152 : vector<1x128x128xbf16> to vector<128x128xbf16>
    %cst_135 = arith.constant dense<0.000000e+00> : vector<96x128xf32>
    %154 = tpu.matmul %151, %153, %cst_135 {dimension_numbers = #tpu.dot_dimension_numbers<[1], [0], [0], [1], [0, 0, 1, 1], [], []>} : vector<96x128xbf16>, vector<128x128xbf16>, vector<96x128xf32> -> vector<96x128xf32>
    %155 = arith.addf %150, %154 : vector<96x128xf32>
    %c228 = arith.constant 228 : index
    %c0_136 = arith.constant 0 : index
    %156 = vector.load %arg12[%c228, %c0_136] : memref<336x128xbf16, #tpu.memory_space<vmem>>, vector<96x128xbf16>
    %c7_137 = arith.constant 7 : index
    %c0_138 = arith.constant 0 : index
    %c0_139 = arith.constant 0 : index
    %157 = vector.load %arg2[%c7_137, %c0_138, %c0_139] : memref<46x128x128xbf16, #tpu.memory_space<vmem>>, vector<1x128x128xbf16>
    %158 = vector.shape_cast %157 : vector<1x128x128xbf16> to vector<128x128xbf16>
    %cst_140 = arith.constant dense<0.000000e+00> : vector<96x128xf32>
    %159 = tpu.matmul %156, %158, %cst_140 {dimension_numbers = #tpu.dot_dimension_numbers<[1], [0], [0], [1], [0, 0, 1, 1], [], []>} : vector<96x128xbf16>, vector<128x128xbf16>, vector<96x128xf32> -> vector<96x128xf32>
    %160 = arith.addf %155, %159 : vector<96x128xf32>
    %c229 = arith.constant 229 : index
    %c0_141 = arith.constant 0 : index
    %161 = vector.load %arg12[%c229, %c0_141] : memref<336x128xbf16, #tpu.memory_space<vmem>>, vector<96x128xbf16>
    %c8_142 = arith.constant 8 : index
    %c0_143 = arith.constant 0 : index
    %c0_144 = arith.constant 0 : index
    %162 = vector.load %arg2[%c8_142, %c0_143, %c0_144] : memref<46x128x128xbf16, #tpu.memory_space<vmem>>, vector<1x128x128xbf16>
    %163 = vector.shape_cast %162 : vector<1x128x128xbf16> to vector<128x128xbf16>
    %cst_145 = arith.constant dense<0.000000e+00> : vector<96x128xf32>
    %164 = tpu.matmul %161, %163, %cst_145 {dimension_numbers = #tpu.dot_dimension_numbers<[1], [0], [0], [1], [0, 0, 1, 1], [], []>} : vector<96x128xbf16>, vector<128x128xbf16>, vector<96x128xf32> -> vector<96x128xf32>
    %165 = arith.addf %160, %164 : vector<96x128xf32>
    %c230 = arith.constant 230 : index
    %c0_146 = arith.constant 0 : index
    %166 = vector.load %arg12[%c230, %c0_146] : memref<336x128xbf16, #tpu.memory_space<vmem>>, vector<96x128xbf16>
    %c9_147 = arith.constant 9 : index
    %c0_148 = arith.constant 0 : index
    %c0_149 = arith.constant 0 : index
    %167 = vector.load %arg2[%c9_147, %c0_148, %c0_149] : memref<46x128x128xbf16, #tpu.memory_space<vmem>>, vector<1x128x128xbf16>
    %168 = vector.shape_cast %167 : vector<1x128x128xbf16> to vector<128x128xbf16>
    %cst_150 = arith.constant dense<0.000000e+00> : vector<96x128xf32>
    %169 = tpu.matmul %166, %168, %cst_150 {dimension_numbers = #tpu.dot_dimension_numbers<[1], [0], [0], [1], [0, 0, 1, 1], [], []>} : vector<96x128xbf16>, vector<128x128xbf16>, vector<96x128xf32> -> vector<96x128xf32>
    %170 = arith.addf %165, %169 : vector<96x128xf32>
    %171 = vector.broadcast %21 : vector<1x128xf32> to vector<96x128xf32>
    %172 = arith.mulf %170, %171 : vector<96x128xf32>
    %173 = vector.broadcast %22 : vector<1x128xf32> to vector<96x128xf32>
    %174 = arith.addf %172, %173 : vector<96x128xf32>
    %cst_151 = arith.constant 0.000000e+00 : f32
    %175 = vector.broadcast %cst_151 : f32 to vector<96x128xf32>
    %176 = arith.maximumf %174, %175 : vector<96x128xf32>
    %177 = arith.truncf %176 : vector<96x128xf32> to vector<96x128xbf16>
    %c192_152 = arith.constant 192 : index
    %c0_153 = arith.constant 0 : index
    %178 = vector.load %arg17[%c192_152, %c0_153] : memref<288x128xbf16, #tpu.memory_space<vmem>>, vector<96x128xbf16>
    tpu.vector_store %arg17[%c192_152, %c0_153], %177 {strides = array<i32>} : memref<288x128xbf16, #tpu.memory_space<vmem>>, vector<96x128xbf16>,
    %c0_154 = arith.constant 0 : index
    %c0_155 = arith.constant 0 : index
    %179 = vector.load %arg17[%c0_154, %c0_155] : memref<288x128xbf16, #tpu.memory_space<vmem>>, vector<288x128xbf16>
    %c0_156 = arith.constant 0 : index
    %c0_157 = arith.constant 0 : index
    %180 = vector.load %arg5[%c0_156, %c0_157] : memref<336x288xbf16, #tpu.memory_space<vmem>>, vector<336x288xbf16>
    %cst_158 = arith.constant dense<0.000000e+00> : vector<336x128xf32>
    %181 = tpu.matmul %180, %179, %cst_158 {dimension_numbers = #tpu.dot_dimension_numbers<[1], [0], [0], [1], [0, 0, 1, 1], [], []>} : vector<336x288xbf16>, vector<288x128xbf16>, vector<336x128xf32> -> vector<336x128xf32>
    %182 = arith.truncf %181 : vector<336x128xf32> to vector<336x128xbf16>
    %c0_159 = arith.constant 0 : index
    %c0_160 = arith.constant 0 : index
    %183 = vector.load %arg13[%c0_159, %c0_160] : memref<336x128xbf16, #tpu.memory_space<vmem>>, vector<336x128xbf16>
    tpu.vector_store %arg13[%c0_159, %c0_160], %182 {strides = array<i32>} : memref<336x128xbf16, #tpu.memory_space<vmem>>, vector<336x128xbf16>,
    %c2_161 = arith.constant 2 : index
    %c0_162 = arith.constant 0 : index
    %c0_163 = arith.constant 0 : index
    %184 = vector.load %arg3[%c2_161, %c0_162, %c0_163] : memref<6x2x128xf32, #tpu.memory_space<vmem>>, vector<1x2x128xf32>
    %185 = vector.shape_cast %184 : vector<1x2x128xf32> to vector<2x128xf32>
    %186 = vector.extract_strided_slice %185 {offsets = [0, 0], sizes = [1, 128], strides = [1, 1]} : vector<2x128xf32> to vector<1x128xf32>
    %187 = vector.extract_strided_slice %185 {offsets = [1, 0], sizes = [1, 128], strides = [1, 1]} : vector<2x128xf32> to vector<1x128xf32>
    %c0_164 = arith.constant 0 : index
    %c0_165 = arith.constant 0 : index
    %188 = vector.load %arg13[%c0_164, %c0_165] : memref<336x128xbf16, #tpu.memory_space<vmem>>, vector<96x128xbf16>
    %c10 = arith.constant 10 : index
    %c0_166 = arith.constant 0 : index
    %c0_167 = arith.constant 0 : index
    %189 = vector.load %arg2[%c10, %c0_166, %c0_167] : memref<46x128x128xbf16, #tpu.memory_space<vmem>>, vector<1x128x128xbf16>
    %190 = vector.shape_cast %189 : vector<1x128x128xbf16> to vector<128x128xbf16>
    %cst_168 = arith.constant dense<0.000000e+00> : vector<96x128xf32>
    %191 = tpu.matmul %188, %190, %cst_168 {dimension_numbers = #tpu.dot_dimension_numbers<[1], [0], [0], [1], [0, 0, 1, 1], [], []>} : vector<96x128xbf16>, vector<128x128xbf16>, vector<96x128xf32> -> vector<96x128xf32>
    %c1_169 = arith.constant 1 : index
    %c0_170 = arith.constant 0 : index
    %192 = vector.load %arg13[%c1_169, %c0_170] : memref<336x128xbf16, #tpu.memory_space<vmem>>, vector<96x128xbf16>
    %c11 = arith.constant 11 : index
    %c0_171 = arith.constant 0 : index
    %c0_172 = arith.constant 0 : index
    %193 = vector.load %arg2[%c11, %c0_171, %c0_172] : memref<46x128x128xbf16, #tpu.memory_space<vmem>>, vector<1x128x128xbf16>
    %194 = vector.shape_cast %193 : vector<1x128x128xbf16> to vector<128x128xbf16>
    %cst_173 = arith.constant dense<0.000000e+00> : vector<96x128xf32>
    %195 = tpu.matmul %192, %194, %cst_173 {dimension_numbers = #tpu.dot_dimension_numbers<[1], [0], [0], [1], [0, 0, 1, 1], [], []>} : vector<96x128xbf16>, vector<128x128xbf16>, vector<96x128xf32> -> vector<96x128xf32>
    %196 = arith.addf %191, %195 : vector<96x128xf32>
    %c2_174 = arith.constant 2 : index
    %c0_175 = arith.constant 0 : index
    %197 = vector.load %arg13[%c2_174, %c0_175] : memref<336x128xbf16, #tpu.memory_space<vmem>>, vector<96x128xbf16>
    %c12 = arith.constant 12 : index
    %c0_176 = arith.constant 0 : index
    %c0_177 = arith.constant 0 : index
    %198 = vector.load %arg2[%c12, %c0_176, %c0_177] : memref<46x128x128xbf16, #tpu.memory_space<vmem>>, vector<1x128x128xbf16>
    %199 = vector.shape_cast %198 : vector<1x128x128xbf16> to vector<128x128xbf16>
    %cst_178 = arith.constant dense<0.000000e+00> : vector<96x128xf32>
    %200 = tpu.matmul %197, %199, %cst_178 {dimension_numbers = #tpu.dot_dimension_numbers<[1], [0], [0], [1], [0, 0, 1, 1], [], []>} : vector<96x128xbf16>, vector<128x128xbf16>, vector<96x128xf32> -> vector<96x128xf32>
    %201 = arith.addf %196, %200 : vector<96x128xf32>
    %c18_179 = arith.constant 18 : index
    %c0_180 = arith.constant 0 : index
    %202 = vector.load %arg13[%c18_179, %c0_180] : memref<336x128xbf16, #tpu.memory_space<vmem>>, vector<96x128xbf16>
    %c13 = arith.constant 13 : index
    %c0_181 = arith.constant 0 : index
    %c0_182 = arith.constant 0 : index
    %203 = vector.load %arg2[%c13, %c0_181, %c0_182] : memref<46x128x128xbf16, #tpu.memory_space<vmem>>, vector<1x128x128xbf16>
    %204 = vector.shape_cast %203 : vector<1x128x128xbf16> to vector<128x128xbf16>
    %cst_183 = arith.constant dense<0.000000e+00> : vector<96x128xf32>
    %205 = tpu.matmul %202, %204, %cst_183 {dimension_numbers = #tpu.dot_dimension_numbers<[1], [0], [0], [1], [0, 0, 1, 1], [], []>} : vector<96x128xbf16>, vector<128x128xbf16>, vector<96x128xf32> -> vector<96x128xf32>
    %206 = arith.addf %201, %205 : vector<96x128xf32>
    %c19_184 = arith.constant 19 : index
    %c0_185 = arith.constant 0 : index
    %207 = vector.load %arg13[%c19_184, %c0_185] : memref<336x128xbf16, #tpu.memory_space<vmem>>, vector<96x128xbf16>
    %c14 = arith.constant 14 : index
    %c0_186 = arith.constant 0 : index
    %c0_187 = arith.constant 0 : index
    %208 = vector.load %arg2[%c14, %c0_186, %c0_187] : memref<46x128x128xbf16, #tpu.memory_space<vmem>>, vector<1x128x128xbf16>
    %209 = vector.shape_cast %208 : vector<1x128x128xbf16> to vector<128x128xbf16>
    %cst_188 = arith.constant dense<0.000000e+00> : vector<96x128xf32>
    %210 = tpu.matmul %207, %209, %cst_188 {dimension_numbers = #tpu.dot_dimension_numbers<[1], [0], [0], [1], [0, 0, 1, 1], [], []>} : vector<96x128xbf16>, vector<128x128xbf16>, vector<96x128xf32> -> vector<96x128xf32>
    %211 = arith.addf %206, %210 : vector<96x128xf32>
    %c20_189 = arith.constant 20 : index
    %c0_190 = arith.constant 0 : index
    %212 = vector.load %arg13[%c20_189, %c0_190] : memref<336x128xbf16, #tpu.memory_space<vmem>>, vector<96x128xbf16>
    %c15 = arith.constant 15 : index
    %c0_191 = arith.constant 0 : index
    %c0_192 = arith.constant 0 : index
    %213 = vector.load %arg2[%c15, %c0_191, %c0_192] : memref<46x128x128xbf16, #tpu.memory_space<vmem>>, vector<1x128x128xbf16>
    %214 = vector.shape_cast %213 : vector<1x128x128xbf16> to vector<128x128xbf16>
    %cst_193 = arith.constant dense<0.000000e+00> : vector<96x128xf32>
    %215 = tpu.matmul %212, %214, %cst_193 {dimension_numbers = #tpu.dot_dimension_numbers<[1], [0], [0], [1], [0, 0, 1, 1], [], []>} : vector<96x128xbf16>, vector<128x128xbf16>, vector<96x128xf32> -> vector<96x128xf32>
    %216 = arith.addf %211, %215 : vector<96x128xf32>
    %c36_194 = arith.constant 36 : index
    %c0_195 = arith.constant 0 : index
    %217 = vector.load %arg13[%c36_194, %c0_195] : memref<336x128xbf16, #tpu.memory_space<vmem>>, vector<96x128xbf16>
    %c16 = arith.constant 16 : index
    %c0_196 = arith.constant 0 : index
    %c0_197 = arith.constant 0 : index
    %218 = vector.load %arg2[%c16, %c0_196, %c0_197] : memref<46x128x128xbf16, #tpu.memory_space<vmem>>, vector<1x128x128xbf16>
    %219 = vector.shape_cast %218 : vector<1x128x128xbf16> to vector<128x128xbf16>
    %cst_198 = arith.constant dense<0.000000e+00> : vector<96x128xf32>
    %220 = tpu.matmul %217, %219, %cst_198 {dimension_numbers = #tpu.dot_dimension_numbers<[1], [0], [0], [1], [0, 0, 1, 1], [], []>} : vector<96x128xbf16>, vector<128x128xbf16>, vector<96x128xf32> -> vector<96x128xf32>
    %221 = arith.addf %216, %220 : vector<96x128xf32>
    %c37_199 = arith.constant 37 : index
    %c0_200 = arith.constant 0 : index
    %222 = vector.load %arg13[%c37_199, %c0_200] : memref<336x128xbf16, #tpu.memory_space<vmem>>, vector<96x128xbf16>
    %c17 = arith.constant 17 : index
    %c0_201 = arith.constant 0 : index
    %c0_202 = arith.constant 0 : index
    %223 = vector.load %arg2[%c17, %c0_201, %c0_202] : memref<46x128x128xbf16, #tpu.memory_space<vmem>>, vector<1x128x128xbf16>
    %224 = vector.shape_cast %223 : vector<1x128x128xbf16> to vector<128x128xbf16>
    %cst_203 = arith.constant dense<0.000000e+00> : vector<96x128xf32>
    %225 = tpu.matmul %222, %224, %cst_203 {dimension_numbers = #tpu.dot_dimension_numbers<[1], [0], [0], [1], [0, 0, 1, 1], [], []>} : vector<96x128xbf16>, vector<128x128xbf16>, vector<96x128xf32> -> vector<96x128xf32>
    %226 = arith.addf %221, %225 : vector<96x128xf32>
    %c38_204 = arith.constant 38 : index
    %c0_205 = arith.constant 0 : index
    %227 = vector.load %arg13[%c38_204, %c0_205] : memref<336x128xbf16, #tpu.memory_space<vmem>>, vector<96x128xbf16>
    %c18_206 = arith.constant 18 : index
    %c0_207 = arith.constant 0 : index
    %c0_208 = arith.constant 0 : index
    %228 = vector.load %arg2[%c18_206, %c0_207, %c0_208] : memref<46x128x128xbf16, #tpu.memory_space<vmem>>, vector<1x128x128xbf16>
    %229 = vector.shape_cast %228 : vector<1x128x128xbf16> to vector<128x128xbf16>
    %cst_209 = arith.constant dense<0.000000e+00> : vector<96x128xf32>
    %230 = tpu.matmul %227, %229, %cst_209 {dimension_numbers = #tpu.dot_dimension_numbers<[1], [0], [0], [1], [0, 0, 1, 1], [], []>} : vector<96x128xbf16>, vector<128x128xbf16>, vector<96x128xf32> -> vector<96x128xf32>
    %231 = arith.addf %226, %230 : vector<96x128xf32>
    %232 = vector.broadcast %186 : vector<1x128xf32> to vector<96x128xf32>
    %233 = arith.mulf %231, %232 : vector<96x128xf32>
    %234 = vector.broadcast %187 : vector<1x128xf32> to vector<96x128xf32>
    %235 = arith.addf %233, %234 : vector<96x128xf32>
    %cst_210 = arith.constant 0.000000e+00 : f32
    %236 = vector.broadcast %cst_210 : f32 to vector<96x128xf32>
    %237 = arith.maximumf %235, %236 : vector<96x128xf32>
    %238 = arith.truncf %237 : vector<96x128xf32> to vector<96x128xbf16>
    %c0_211 = arith.constant 0 : index
    %c0_212 = arith.constant 0 : index
    %239 = vector.load %arg17[%c0_211, %c0_212] : memref<288x128xbf16, #tpu.memory_space<vmem>>, vector<96x128xbf16>
    tpu.vector_store %arg17[%c0_211, %c0_212], %238 {strides = array<i32>} : memref<288x128xbf16, #tpu.memory_space<vmem>>, vector<96x128xbf16>,
    %c96_213 = arith.constant 96 : index
    %c0_214 = arith.constant 0 : index
    %240 = vector.load %arg13[%c96_213, %c0_214] : memref<336x128xbf16, #tpu.memory_space<vmem>>, vector<96x128xbf16>
    %c10_215 = arith.constant 10 : index
    %c0_216 = arith.constant 0 : index
    %c0_217 = arith.constant 0 : index
    %241 = vector.load %arg2[%c10_215, %c0_216, %c0_217] : memref<46x128x128xbf16, #tpu.memory_space<vmem>>, vector<1x128x128xbf16>
    %242 = vector.shape_cast %241 : vector<1x128x128xbf16> to vector<128x128xbf16>
    %cst_218 = arith.constant dense<0.000000e+00> : vector<96x128xf32>
    %243 = tpu.matmul %240, %242, %cst_218 {dimension_numbers = #tpu.dot_dimension_numbers<[1], [0], [0], [1], [0, 0, 1, 1], [], []>} : vector<96x128xbf16>, vector<128x128xbf16>, vector<96x128xf32> -> vector<96x128xf32>
    %c97_219 = arith.constant 97 : index
    %c0_220 = arith.constant 0 : index
    %244 = vector.load %arg13[%c97_219, %c0_220] : memref<336x128xbf16, #tpu.memory_space<vmem>>, vector<96x128xbf16>
    %c11_221 = arith.constant 11 : index
    %c0_222 = arith.constant 0 : index
    %c0_223 = arith.constant 0 : index
    %245 = vector.load %arg2[%c11_221, %c0_222, %c0_223] : memref<46x128x128xbf16, #tpu.memory_space<vmem>>, vector<1x128x128xbf16>
    %246 = vector.shape_cast %245 : vector<1x128x128xbf16> to vector<128x128xbf16>
    %cst_224 = arith.constant dense<0.000000e+00> : vector<96x128xf32>
    %247 = tpu.matmul %244, %246, %cst_224 {dimension_numbers = #tpu.dot_dimension_numbers<[1], [0], [0], [1], [0, 0, 1, 1], [], []>} : vector<96x128xbf16>, vector<128x128xbf16>, vector<96x128xf32> -> vector<96x128xf32>
    %248 = arith.addf %243, %247 : vector<96x128xf32>
    %c98_225 = arith.constant 98 : index
    %c0_226 = arith.constant 0 : index
    %249 = vector.load %arg13[%c98_225, %c0_226] : memref<336x128xbf16, #tpu.memory_space<vmem>>, vector<96x128xbf16>
    %c12_227 = arith.constant 12 : index
    %c0_228 = arith.constant 0 : index
    %c0_229 = arith.constant 0 : index
    %250 = vector.load %arg2[%c12_227, %c0_228, %c0_229] : memref<46x128x128xbf16, #tpu.memory_space<vmem>>, vector<1x128x128xbf16>
    %251 = vector.shape_cast %250 : vector<1x128x128xbf16> to vector<128x128xbf16>
    %cst_230 = arith.constant dense<0.000000e+00> : vector<96x128xf32>
    %252 = tpu.matmul %249, %251, %cst_230 {dimension_numbers = #tpu.dot_dimension_numbers<[1], [0], [0], [1], [0, 0, 1, 1], [], []>} : vector<96x128xbf16>, vector<128x128xbf16>, vector<96x128xf32> -> vector<96x128xf32>
    %253 = arith.addf %248, %252 : vector<96x128xf32>
    %c114_231 = arith.constant 114 : index
    %c0_232 = arith.constant 0 : index
    %254 = vector.load %arg13[%c114_231, %c0_232] : memref<336x128xbf16, #tpu.memory_space<vmem>>, vector<96x128xbf16>
    %c13_233 = arith.constant 13 : index
    %c0_234 = arith.constant 0 : index
    %c0_235 = arith.constant 0 : index
    %255 = vector.load %arg2[%c13_233, %c0_234, %c0_235] : memref<46x128x128xbf16, #tpu.memory_space<vmem>>, vector<1x128x128xbf16>
    %256 = vector.shape_cast %255 : vector<1x128x128xbf16> to vector<128x128xbf16>
    %cst_236 = arith.constant dense<0.000000e+00> : vector<96x128xf32>
    %257 = tpu.matmul %254, %256, %cst_236 {dimension_numbers = #tpu.dot_dimension_numbers<[1], [0], [0], [1], [0, 0, 1, 1], [], []>} : vector<96x128xbf16>, vector<128x128xbf16>, vector<96x128xf32> -> vector<96x128xf32>
    %258 = arith.addf %253, %257 : vector<96x128xf32>
    %c115_237 = arith.constant 115 : index
    %c0_238 = arith.constant 0 : index
    %259 = vector.load %arg13[%c115_237, %c0_238] : memref<336x128xbf16, #tpu.memory_space<vmem>>, vector<96x128xbf16>
    %c14_239 = arith.constant 14 : index
    %c0_240 = arith.constant 0 : index
    %c0_241 = arith.constant 0 : index
    %260 = vector.load %arg2[%c14_239, %c0_240, %c0_241] : memref<46x128x128xbf16, #tpu.memory_space<vmem>>, vector<1x128x128xbf16>
    %261 = vector.shape_cast %260 : vector<1x128x128xbf16> to vector<128x128xbf16>
    %cst_242 = arith.constant dense<0.000000e+00> : vector<96x128xf32>
    %262 = tpu.matmul %259, %261, %cst_242 {dimension_numbers = #tpu.dot_dimension_numbers<[1], [0], [0], [1], [0, 0, 1, 1], [], []>} : vector<96x128xbf16>, vector<128x128xbf16>, vector<96x128xf32> -> vector<96x128xf32>
    %263 = arith.addf %258, %262 : vector<96x128xf32>
    %c116_243 = arith.constant 116 : index
    %c0_244 = arith.constant 0 : index
    %264 = vector.load %arg13[%c116_243, %c0_244] : memref<336x128xbf16, #tpu.memory_space<vmem>>, vector<96x128xbf16>
    %c15_245 = arith.constant 15 : index
    %c0_246 = arith.constant 0 : index
    %c0_247 = arith.constant 0 : index
    %265 = vector.load %arg2[%c15_245, %c0_246, %c0_247] : memref<46x128x128xbf16, #tpu.memory_space<vmem>>, vector<1x128x128xbf16>
    %266 = vector.shape_cast %265 : vector<1x128x128xbf16> to vector<128x128xbf16>
    %cst_248 = arith.constant dense<0.000000e+00> : vector<96x128xf32>
    %267 = tpu.matmul %264, %266, %cst_248 {dimension_numbers = #tpu.dot_dimension_numbers<[1], [0], [0], [1], [0, 0, 1, 1], [], []>} : vector<96x128xbf16>, vector<128x128xbf16>, vector<96x128xf32> -> vector<96x128xf32>
    %268 = arith.addf %263, %267 : vector<96x128xf32>
    %c132_249 = arith.constant 132 : index
    %c0_250 = arith.constant 0 : index
    %269 = vector.load %arg13[%c132_249, %c0_250] : memref<336x128xbf16, #tpu.memory_space<vmem>>, vector<96x128xbf16>
    %c16_251 = arith.constant 16 : index
    %c0_252 = arith.constant 0 : index
    %c0_253 = arith.constant 0 : index
    %270 = vector.load %arg2[%c16_251, %c0_252, %c0_253] : memref<46x128x128xbf16, #tpu.memory_space<vmem>>, vector<1x128x128xbf16>
    %271 = vector.shape_cast %270 : vector<1x128x128xbf16> to vector<128x128xbf16>
    %cst_254 = arith.constant dense<0.000000e+00> : vector<96x128xf32>
    %272 = tpu.matmul %269, %271, %cst_254 {dimension_numbers = #tpu.dot_dimension_numbers<[1], [0], [0], [1], [0, 0, 1, 1], [], []>} : vector<96x128xbf16>, vector<128x128xbf16>, vector<96x128xf32> -> vector<96x128xf32>
    %273 = arith.addf %268, %272 : vector<96x128xf32>
    %c133_255 = arith.constant 133 : index
    %c0_256 = arith.constant 0 : index
    %274 = vector.load %arg13[%c133_255, %c0_256] : memref<336x128xbf16, #tpu.memory_space<vmem>>, vector<96x128xbf16>
    %c17_257 = arith.constant 17 : index
    %c0_258 = arith.constant 0 : index
    %c0_259 = arith.constant 0 : index
    %275 = vector.load %arg2[%c17_257, %c0_258, %c0_259] : memref<46x128x128xbf16, #tpu.memory_space<vmem>>, vector<1x128x128xbf16>
    %276 = vector.shape_cast %275 : vector<1x128x128xbf16> to vector<128x128xbf16>
    %cst_260 = arith.constant dense<0.000000e+00> : vector<96x128xf32>
    %277 = tpu.matmul %274, %276, %cst_260 {dimension_numbers = #tpu.dot_dimension_numbers<[1], [0], [0], [1], [0, 0, 1, 1], [], []>} : vector<96x128xbf16>, vector<128x128xbf16>, vector<96x128xf32> -> vector<96x128xf32>
    %278 = arith.addf %273, %277 : vector<96x128xf32>
    %c134_261 = arith.constant 134 : index
    %c0_262 = arith.constant 0 : index
    %279 = vector.load %arg13[%c134_261, %c0_262] : memref<336x128xbf16, #tpu.memory_space<vmem>>, vector<96x128xbf16>
    %c18_263 = arith.constant 18 : index
    %c0_264 = arith.constant 0 : index
    %c0_265 = arith.constant 0 : index
    %280 = vector.load %arg2[%c18_263, %c0_264, %c0_265] : memref<46x128x128xbf16, #tpu.memory_space<vmem>>, vector<1x128x128xbf16>
    %281 = vector.shape_cast %280 : vector<1x128x128xbf16> to vector<128x128xbf16>
    %cst_266 = arith.constant dense<0.000000e+00> : vector<96x128xf32>
    %282 = tpu.matmul %279, %281, %cst_266 {dimension_numbers = #tpu.dot_dimension_numbers<[1], [0], [0], [1], [0, 0, 1, 1], [], []>} : vector<96x128xbf16>, vector<128x128xbf16>, vector<96x128xf32> -> vector<96x128xf32>
    %283 = arith.addf %278, %282 : vector<96x128xf32>
    %284 = vector.broadcast %186 : vector<1x128xf32> to vector<96x128xf32>
    %285 = arith.mulf %283, %284 : vector<96x128xf32>
    %286 = vector.broadcast %187 : vector<1x128xf32> to vector<96x128xf32>
    %287 = arith.addf %285, %286 : vector<96x128xf32>
    %cst_267 = arith.constant 0.000000e+00 : f32
    %288 = vector.broadcast %cst_267 : f32 to vector<96x128xf32>
    %289 = arith.maximumf %287, %288 : vector<96x128xf32>
    %290 = arith.truncf %289 : vector<96x128xf32> to vector<96x128xbf16>
    %c96_268 = arith.constant 96 : index
    %c0_269 = arith.constant 0 : index
    %291 = vector.load %arg17[%c96_268, %c0_269] : memref<288x128xbf16, #tpu.memory_space<vmem>>, vector<96x128xbf16>
    tpu.vector_store %arg17[%c96_268, %c0_269], %290 {strides = array<i32>} : memref<288x128xbf16, #tpu.memory_space<vmem>>, vector<96x128xbf16>,
    %c192_270 = arith.constant 192 : index
    %c0_271 = arith.constant 0 : index
    %292 = vector.load %arg13[%c192_270, %c0_271] : memref<336x128xbf16, #tpu.memory_space<vmem>>, vector<96x128xbf16>
    %c10_272 = arith.constant 10 : index
    %c0_273 = arith.constant 0 : index
    %c0_274 = arith.constant 0 : index
    %293 = vector.load %arg2[%c10_272, %c0_273, %c0_274] : memref<46x128x128xbf16, #tpu.memory_space<vmem>>, vector<1x128x128xbf16>
    %294 = vector.shape_cast %293 : vector<1x128x128xbf16> to vector<128x128xbf16>
    %cst_275 = arith.constant dense<0.000000e+00> : vector<96x128xf32>
    %295 = tpu.matmul %292, %294, %cst_275 {dimension_numbers = #tpu.dot_dimension_numbers<[1], [0], [0], [1], [0, 0, 1, 1], [], []>} : vector<96x128xbf16>, vector<128x128xbf16>, vector<96x128xf32> -> vector<96x128xf32>
    %c193_276 = arith.constant 193 : index
    %c0_277 = arith.constant 0 : index
    %296 = vector.load %arg13[%c193_276, %c0_277] : memref<336x128xbf16, #tpu.memory_space<vmem>>, vector<96x128xbf16>
    %c11_278 = arith.constant 11 : index
    %c0_279 = arith.constant 0 : index
    %c0_280 = arith.constant 0 : index
    %297 = vector.load %arg2[%c11_278, %c0_279, %c0_280] : memref<46x128x128xbf16, #tpu.memory_space<vmem>>, vector<1x128x128xbf16>
    %298 = vector.shape_cast %297 : vector<1x128x128xbf16> to vector<128x128xbf16>
    %cst_281 = arith.constant dense<0.000000e+00> : vector<96x128xf32>
    %299 = tpu.matmul %296, %298, %cst_281 {dimension_numbers = #tpu.dot_dimension_numbers<[1], [0], [0], [1], [0, 0, 1, 1], [], []>} : vector<96x128xbf16>, vector<128x128xbf16>, vector<96x128xf32> -> vector<96x128xf32>
    %300 = arith.addf %295, %299 : vector<96x128xf32>
    %c194_282 = arith.constant 194 : index
    %c0_283 = arith.constant 0 : index
    %301 = vector.load %arg13[%c194_282, %c0_283] : memref<336x128xbf16, #tpu.memory_space<vmem>>, vector<96x128xbf16>
    %c12_284 = arith.constant 12 : index
    %c0_285 = arith.constant 0 : index
    %c0_286 = arith.constant 0 : index
    %302 = vector.load %arg2[%c12_284, %c0_285, %c0_286] : memref<46x128x128xbf16, #tpu.memory_space<vmem>>, vector<1x128x128xbf16>
    %303 = vector.shape_cast %302 : vector<1x128x128xbf16> to vector<128x128xbf16>
    %cst_287 = arith.constant dense<0.000000e+00> : vector<96x128xf32>
    %304 = tpu.matmul %301, %303, %cst_287 {dimension_numbers = #tpu.dot_dimension_numbers<[1], [0], [0], [1], [0, 0, 1, 1], [], []>} : vector<96x128xbf16>, vector<128x128xbf16>, vector<96x128xf32> -> vector<96x128xf32>
    %305 = arith.addf %300, %304 : vector<96x128xf32>
    %c210_288 = arith.constant 210 : index
    %c0_289 = arith.constant 0 : index
    %306 = vector.load %arg13[%c210_288, %c0_289] : memref<336x128xbf16, #tpu.memory_space<vmem>>, vector<96x128xbf16>
    %c13_290 = arith.constant 13 : index
    %c0_291 = arith.constant 0 : index
    %c0_292 = arith.constant 0 : index
    %307 = vector.load %arg2[%c13_290, %c0_291, %c0_292] : memref<46x128x128xbf16, #tpu.memory_space<vmem>>, vector<1x128x128xbf16>
    %308 = vector.shape_cast %307 : vector<1x128x128xbf16> to vector<128x128xbf16>
    %cst_293 = arith.constant dense<0.000000e+00> : vector<96x128xf32>
    %309 = tpu.matmul %306, %308, %cst_293 {dimension_numbers = #tpu.dot_dimension_numbers<[1], [0], [0], [1], [0, 0, 1, 1], [], []>} : vector<96x128xbf16>, vector<128x128xbf16>, vector<96x128xf32> -> vector<96x128xf32>
    %310 = arith.addf %305, %309 : vector<96x128xf32>
    %c211_294 = arith.constant 211 : index
    %c0_295 = arith.constant 0 : index
    %311 = vector.load %arg13[%c211_294, %c0_295] : memref<336x128xbf16, #tpu.memory_space<vmem>>, vector<96x128xbf16>
    %c14_296 = arith.constant 14 : index
    %c0_297 = arith.constant 0 : index
    %c0_298 = arith.constant 0 : index
    %312 = vector.load %arg2[%c14_296, %c0_297, %c0_298] : memref<46x128x128xbf16, #tpu.memory_space<vmem>>, vector<1x128x128xbf16>
    %313 = vector.shape_cast %312 : vector<1x128x128xbf16> to vector<128x128xbf16>
    %cst_299 = arith.constant dense<0.000000e+00> : vector<96x128xf32>
    %314 = tpu.matmul %311, %313, %cst_299 {dimension_numbers = #tpu.dot_dimension_numbers<[1], [0], [0], [1], [0, 0, 1, 1], [], []>} : vector<96x128xbf16>, vector<128x128xbf16>, vector<96x128xf32> -> vector<96x128xf32>
    %315 = arith.addf %310, %314 : vector<96x128xf32>
    %c212_300 = arith.constant 212 : index
    %c0_301 = arith.constant 0 : index
    %316 = vector.load %arg13[%c212_300, %c0_301] : memref<336x128xbf16, #tpu.memory_space<vmem>>, vector<96x128xbf16>
    %c15_302 = arith.constant 15 : index
    %c0_303 = arith.constant 0 : index
    %c0_304 = arith.constant 0 : index
    %317 = vector.load %arg2[%c15_302, %c0_303, %c0_304] : memref<46x128x128xbf16, #tpu.memory_space<vmem>>, vector<1x128x128xbf16>
    %318 = vector.shape_cast %317 : vector<1x128x128xbf16> to vector<128x128xbf16>
    %cst_305 = arith.constant dense<0.000000e+00> : vector<96x128xf32>
    %319 = tpu.matmul %316, %318, %cst_305 {dimension_numbers = #tpu.dot_dimension_numbers<[1], [0], [0], [1], [0, 0, 1, 1], [], []>} : vector<96x128xbf16>, vector<128x128xbf16>, vector<96x128xf32> -> vector<96x128xf32>
    %320 = arith.addf %315, %319 : vector<96x128xf32>
    %c228_306 = arith.constant 228 : index
    %c0_307 = arith.constant 0 : index
    %321 = vector.load %arg13[%c228_306, %c0_307] : memref<336x128xbf16, #tpu.memory_space<vmem>>, vector<96x128xbf16>
    %c16_308 = arith.constant 16 : index
    %c0_309 = arith.constant 0 : index
    %c0_310 = arith.constant 0 : index
    %322 = vector.load %arg2[%c16_308, %c0_309, %c0_310] : memref<46x128x128xbf16, #tpu.memory_space<vmem>>, vector<1x128x128xbf16>
    %323 = vector.shape_cast %322 : vector<1x128x128xbf16> to vector<128x128xbf16>
    %cst_311 = arith.constant dense<0.000000e+00> : vector<96x128xf32>
    %324 = tpu.matmul %321, %323, %cst_311 {dimension_numbers = #tpu.dot_dimension_numbers<[1], [0], [0], [1], [0, 0, 1, 1], [], []>} : vector<96x128xbf16>, vector<128x128xbf16>, vector<96x128xf32> -> vector<96x128xf32>
    %325 = arith.addf %320, %324 : vector<96x128xf32>
    %c229_312 = arith.constant 229 : index
    %c0_313 = arith.constant 0 : index
    %326 = vector.load %arg13[%c229_312, %c0_313] : memref<336x128xbf16, #tpu.memory_space<vmem>>, vector<96x128xbf16>
    %c17_314 = arith.constant 17 : index
    %c0_315 = arith.constant 0 : index
    %c0_316 = arith.constant 0 : index
    %327 = vector.load %arg2[%c17_314, %c0_315, %c0_316] : memref<46x128x128xbf16, #tpu.memory_space<vmem>>, vector<1x128x128xbf16>
    %328 = vector.shape_cast %327 : vector<1x128x128xbf16> to vector<128x128xbf16>
    %cst_317 = arith.constant dense<0.000000e+00> : vector<96x128xf32>
    %329 = tpu.matmul %326, %328, %cst_317 {dimension_numbers = #tpu.dot_dimension_numbers<[1], [0], [0], [1], [0, 0, 1, 1], [], []>} : vector<96x128xbf16>, vector<128x128xbf16>, vector<96x128xf32> -> vector<96x128xf32>
    %330 = arith.addf %325, %329 : vector<96x128xf32>
    %c230_318 = arith.constant 230 : index
    %c0_319 = arith.constant 0 : index
    %331 = vector.load %arg13[%c230_318, %c0_319] : memref<336x128xbf16, #tpu.memory_space<vmem>>, vector<96x128xbf16>
    %c18_320 = arith.constant 18 : index
    %c0_321 = arith.constant 0 : index
    %c0_322 = arith.constant 0 : index
    %332 = vector.load %arg2[%c18_320, %c0_321, %c0_322] : memref<46x128x128xbf16, #tpu.memory_space<vmem>>, vector<1x128x128xbf16>
    %333 = vector.shape_cast %332 : vector<1x128x128xbf16> to vector<128x128xbf16>
    %cst_323 = arith.constant dense<0.000000e+00> : vector<96x128xf32>
    %334 = tpu.matmul %331, %333, %cst_323 {dimension_numbers = #tpu.dot_dimension_numbers<[1], [0], [0], [1], [0, 0, 1, 1], [], []>} : vector<96x128xbf16>, vector<128x128xbf16>, vector<96x128xf32> -> vector<96x128xf32>
    %335 = arith.addf %330, %334 : vector<96x128xf32>
    %336 = vector.broadcast %186 : vector<1x128xf32> to vector<96x128xf32>
    %337 = arith.mulf %335, %336 : vector<96x128xf32>
    %338 = vector.broadcast %187 : vector<1x128xf32> to vector<96x128xf32>
    %339 = arith.addf %337, %338 : vector<96x128xf32>
    %cst_324 = arith.constant 0.000000e+00 : f32
    %340 = vector.broadcast %cst_324 : f32 to vector<96x128xf32>
    %341 = arith.maximumf %339, %340 : vector<96x128xf32>
    %342 = arith.truncf %341 : vector<96x128xf32> to vector<96x128xbf16>
    %c192_325 = arith.constant 192 : index
    %c0_326 = arith.constant 0 : index
    %343 = vector.load %arg17[%c192_325, %c0_326] : memref<288x128xbf16, #tpu.memory_space<vmem>>, vector<96x128xbf16>
    tpu.vector_store %arg17[%c192_325, %c0_326], %342 {strides = array<i32>} : memref<288x128xbf16, #tpu.memory_space<vmem>>, vector<96x128xbf16>,
    %c0_327 = arith.constant 0 : index
    %c0_328 = arith.constant 0 : index
    %344 = vector.load %arg17[%c0_327, %c0_328] : memref<288x128xbf16, #tpu.memory_space<vmem>>, vector<288x128xbf16>
    %c0_329 = arith.constant 0 : index
    %c0_330 = arith.constant 0 : index
    %345 = vector.load %arg6[%c0_329, %c0_330] : memref<160x288xbf16, #tpu.memory_space<vmem>>, vector<160x288xbf16>
    %cst_331 = arith.constant dense<0.000000e+00> : vector<160x128xf32>
    %346 = tpu.matmul %345, %344, %cst_331 {dimension_numbers = #tpu.dot_dimension_numbers<[1], [0], [0], [1], [0, 0, 1, 1], [], []>} : vector<160x288xbf16>, vector<288x128xbf16>, vector<160x128xf32> -> vector<160x128xf32>
    %347 = arith.truncf %346 : vector<160x128xf32> to vector<160x128xbf16>
    %c0_332 = arith.constant 0 : index
    %c0_333 = arith.constant 0 : index
    %348 = vector.load %arg14[%c0_332, %c0_333] : memref<160x128xbf16, #tpu.memory_space<vmem>>, vector<160x128xbf16>
    tpu.vector_store %arg14[%c0_332, %c0_333], %347 {strides = array<i32>} : memref<160x128xbf16, #tpu.memory_space<vmem>>, vector<160x128xbf16>,
    %c3_334 = arith.constant 3 : index
    %c0_335 = arith.constant 0 : index
    %c0_336 = arith.constant 0 : index
    %349 = vector.load %arg3[%c3_334, %c0_335, %c0_336] : memref<6x2x128xf32, #tpu.memory_space<vmem>>, vector<1x2x128xf32>
    %350 = vector.shape_cast %349 : vector<1x2x128xf32> to vector<2x128xf32>
    %351 = vector.extract_strided_slice %350 {offsets = [0, 0], sizes = [1, 128], strides = [1, 1]} : vector<2x128xf32> to vector<1x128xf32>
    %352 = vector.extract_strided_slice %350 {offsets = [1, 0], sizes = [1, 128], strides = [1, 1]} : vector<2x128xf32> to vector<1x128xf32>
    %c0_337 = arith.constant 0 : index
    %c0_338 = arith.constant 0 : index
    %353 = vector.load %arg14[%c0_337, %c0_338] : memref<160x128xbf16, #tpu.memory_space<vmem>>, vector<96x128xbf16>
    %c19_339 = arith.constant 19 : index
    %c0_340 = arith.constant 0 : index
    %c0_341 = arith.constant 0 : index
    %354 = vector.load %arg2[%c19_339, %c0_340, %c0_341] : memref<46x128x128xbf16, #tpu.memory_space<vmem>>, vector<1x128x128xbf16>
    %355 = vector.shape_cast %354 : vector<1x128x128xbf16> to vector<128x128xbf16>
    %cst_342 = arith.constant dense<0.000000e+00> : vector<96x128xf32>
    %356 = tpu.matmul %353, %355, %cst_342 {dimension_numbers = #tpu.dot_dimension_numbers<[1], [0], [0], [1], [0, 0, 1, 1], [], []>} : vector<96x128xbf16>, vector<128x128xbf16>, vector<96x128xf32> -> vector<96x128xf32>
    %c2_343 = arith.constant 2 : index
    %c0_344 = arith.constant 0 : index
    %357 = vector.load %arg14[%c2_343, %c0_344] : memref<160x128xbf16, #tpu.memory_space<vmem>>, vector<96x128xbf16>
    %c20_345 = arith.constant 20 : index
    %c0_346 = arith.constant 0 : index
    %c0_347 = arith.constant 0 : index
    %358 = vector.load %arg2[%c20_345, %c0_346, %c0_347] : memref<46x128x128xbf16, #tpu.memory_space<vmem>>, vector<1x128x128xbf16>
    %359 = vector.shape_cast %358 : vector<1x128x128xbf16> to vector<128x128xbf16>
    %cst_348 = arith.constant dense<0.000000e+00> : vector<96x128xf32>
    %360 = tpu.matmul %357, %359, %cst_348 {dimension_numbers = #tpu.dot_dimension_numbers<[1], [0], [0], [1], [0, 0, 1, 1], [], []>} : vector<96x128xbf16>, vector<128x128xbf16>, vector<96x128xf32> -> vector<96x128xf32>
    %361 = arith.addf %356, %360 : vector<96x128xf32>
    %c4_349 = arith.constant 4 : index
    %c0_350 = arith.constant 0 : index
    %362 = vector.load %arg14[%c4_349, %c0_350] : memref<160x128xbf16, #tpu.memory_space<vmem>>, vector<96x128xbf16>
    %c21 = arith.constant 21 : index
    %c0_351 = arith.constant 0 : index
    %c0_352 = arith.constant 0 : index
    %363 = vector.load %arg2[%c21, %c0_351, %c0_352] : memref<46x128x128xbf16, #tpu.memory_space<vmem>>, vector<1x128x128xbf16>
    %364 = vector.shape_cast %363 : vector<1x128x128xbf16> to vector<128x128xbf16>
    %cst_353 = arith.constant dense<0.000000e+00> : vector<96x128xf32>
    %365 = tpu.matmul %362, %364, %cst_353 {dimension_numbers = #tpu.dot_dimension_numbers<[1], [0], [0], [1], [0, 0, 1, 1], [], []>} : vector<96x128xbf16>, vector<128x128xbf16>, vector<96x128xf32> -> vector<96x128xf32>
    %366 = arith.addf %361, %365 : vector<96x128xf32>
    %c24 = arith.constant 24 : index
    %c0_354 = arith.constant 0 : index
    %367 = vector.load %arg14[%c24, %c0_354] : memref<160x128xbf16, #tpu.memory_space<vmem>>, vector<96x128xbf16>
    %c22 = arith.constant 22 : index
    %c0_355 = arith.constant 0 : index
    %c0_356 = arith.constant 0 : index
    %368 = vector.load %arg2[%c22, %c0_355, %c0_356] : memref<46x128x128xbf16, #tpu.memory_space<vmem>>, vector<1x128x128xbf16>
    %369 = vector.shape_cast %368 : vector<1x128x128xbf16> to vector<128x128xbf16>
    %cst_357 = arith.constant dense<0.000000e+00> : vector<96x128xf32>
    %370 = tpu.matmul %367, %369, %cst_357 {dimension_numbers = #tpu.dot_dimension_numbers<[1], [0], [0], [1], [0, 0, 1, 1], [], []>} : vector<96x128xbf16>, vector<128x128xbf16>, vector<96x128xf32> -> vector<96x128xf32>
    %371 = arith.addf %366, %370 : vector<96x128xf32>
    %c26 = arith.constant 26 : index
    %c0_358 = arith.constant 0 : index
    %372 = vector.load %arg14[%c26, %c0_358] : memref<160x128xbf16, #tpu.memory_space<vmem>>, vector<96x128xbf16>
    %c23 = arith.constant 23 : index
    %c0_359 = arith.constant 0 : index
    %c0_360 = arith.constant 0 : index
    %373 = vector.load %arg2[%c23, %c0_359, %c0_360] : memref<46x128x128xbf16, #tpu.memory_space<vmem>>, vector<1x128x128xbf16>
    %374 = vector.shape_cast %373 : vector<1x128x128xbf16> to vector<128x128xbf16>
    %cst_361 = arith.constant dense<0.000000e+00> : vector<96x128xf32>
    %375 = tpu.matmul %372, %374, %cst_361 {dimension_numbers = #tpu.dot_dimension_numbers<[1], [0], [0], [1], [0, 0, 1, 1], [], []>} : vector<96x128xbf16>, vector<128x128xbf16>, vector<96x128xf32> -> vector<96x128xf32>
    %376 = arith.addf %371, %375 : vector<96x128xf32>
    %c28 = arith.constant 28 : index
    %c0_362 = arith.constant 0 : index
    %377 = vector.load %arg14[%c28, %c0_362] : memref<160x128xbf16, #tpu.memory_space<vmem>>, vector<96x128xbf16>
    %c24_363 = arith.constant 24 : index
    %c0_364 = arith.constant 0 : index
    %c0_365 = arith.constant 0 : index
    %378 = vector.load %arg2[%c24_363, %c0_364, %c0_365] : memref<46x128x128xbf16, #tpu.memory_space<vmem>>, vector<1x128x128xbf16>
    %379 = vector.shape_cast %378 : vector<1x128x128xbf16> to vector<128x128xbf16>
    %cst_366 = arith.constant dense<0.000000e+00> : vector<96x128xf32>
    %380 = tpu.matmul %377, %379, %cst_366 {dimension_numbers = #tpu.dot_dimension_numbers<[1], [0], [0], [1], [0, 0, 1, 1], [], []>} : vector<96x128xbf16>, vector<128x128xbf16>, vector<96x128xf32> -> vector<96x128xf32>
    %381 = arith.addf %376, %380 : vector<96x128xf32>
    %c48 = arith.constant 48 : index
    %c0_367 = arith.constant 0 : index
    %382 = vector.load %arg14[%c48, %c0_367] : memref<160x128xbf16, #tpu.memory_space<vmem>>, vector<96x128xbf16>
    %c25 = arith.constant 25 : index
    %c0_368 = arith.constant 0 : index
    %c0_369 = arith.constant 0 : index
    %383 = vector.load %arg2[%c25, %c0_368, %c0_369] : memref<46x128x128xbf16, #tpu.memory_space<vmem>>, vector<1x128x128xbf16>
    %384 = vector.shape_cast %383 : vector<1x128x128xbf16> to vector<128x128xbf16>
    %cst_370 = arith.constant dense<0.000000e+00> : vector<96x128xf32>
    %385 = tpu.matmul %382, %384, %cst_370 {dimension_numbers = #tpu.dot_dimension_numbers<[1], [0], [0], [1], [0, 0, 1, 1], [], []>} : vector<96x128xbf16>, vector<128x128xbf16>, vector<96x128xf32> -> vector<96x128xf32>
    %386 = arith.addf %381, %385 : vector<96x128xf32>
    %c50 = arith.constant 50 : index
    %c0_371 = arith.constant 0 : index
    %387 = vector.load %arg14[%c50, %c0_371] : memref<160x128xbf16, #tpu.memory_space<vmem>>, vector<96x128xbf16>
    %c26_372 = arith.constant 26 : index
    %c0_373 = arith.constant 0 : index
    %c0_374 = arith.constant 0 : index
    %388 = vector.load %arg2[%c26_372, %c0_373, %c0_374] : memref<46x128x128xbf16, #tpu.memory_space<vmem>>, vector<1x128x128xbf16>
    %389 = vector.shape_cast %388 : vector<1x128x128xbf16> to vector<128x128xbf16>
    %cst_375 = arith.constant dense<0.000000e+00> : vector<96x128xf32>
    %390 = tpu.matmul %387, %389, %cst_375 {dimension_numbers = #tpu.dot_dimension_numbers<[1], [0], [0], [1], [0, 0, 1, 1], [], []>} : vector<96x128xbf16>, vector<128x128xbf16>, vector<96x128xf32> -> vector<96x128xf32>
    %391 = arith.addf %386, %390 : vector<96x128xf32>
    %c52 = arith.constant 52 : index
    %c0_376 = arith.constant 0 : index
    %392 = vector.load %arg14[%c52, %c0_376] : memref<160x128xbf16, #tpu.memory_space<vmem>>, vector<96x128xbf16>
    %c27 = arith.constant 27 : index
    %c0_377 = arith.constant 0 : index
    %c0_378 = arith.constant 0 : index
    %393 = vector.load %arg2[%c27, %c0_377, %c0_378] : memref<46x128x128xbf16, #tpu.memory_space<vmem>>, vector<1x128x128xbf16>
    %394 = vector.shape_cast %393 : vector<1x128x128xbf16> to vector<128x128xbf16>
    %cst_379 = arith.constant dense<0.000000e+00> : vector<96x128xf32>
    %395 = tpu.matmul %392, %394, %cst_379 {dimension_numbers = #tpu.dot_dimension_numbers<[1], [0], [0], [1], [0, 0, 1, 1], [], []>} : vector<96x128xbf16>, vector<128x128xbf16>, vector<96x128xf32> -> vector<96x128xf32>
    %396 = arith.addf %391, %395 : vector<96x128xf32>
    %397 = vector.broadcast %351 : vector<1x128xf32> to vector<96x128xf32>
    %398 = arith.mulf %396, %397 : vector<96x128xf32>
    %399 = vector.broadcast %352 : vector<1x128xf32> to vector<96x128xf32>
    %400 = arith.addf %398, %399 : vector<96x128xf32>
    %cst_380 = arith.constant 0.000000e+00 : f32
    %401 = vector.broadcast %cst_380 : f32 to vector<96x128xf32>
    %402 = arith.maximumf %400, %401 : vector<96x128xf32>
    %403 = arith.truncf %402 : vector<96x128xf32> to vector<96x128xbf16>
    %c0_381 = arith.constant 0 : index
    %c0_382 = arith.constant 0 : index
    %404 = vector.load %arg7[%c0_381, %c0_382] : memref<112x96xbf16, #tpu.memory_space<vmem>>, vector<112x96xbf16>
    %cst_383 = arith.constant dense<0.000000e+00> : vector<112x128xf32>
    %405 = tpu.matmul %404, %403, %cst_383 {dimension_numbers = #tpu.dot_dimension_numbers<[1], [0], [0], [1], [0, 0, 1, 1], [], []>} : vector<112x96xbf16>, vector<96x128xbf16>, vector<112x128xf32> -> vector<112x128xf32>
    %406 = arith.truncf %405 : vector<112x128xf32> to vector<112x128xbf16>
    %c0_384 = arith.constant 0 : index
    %c0_385 = arith.constant 0 : index
    %407 = vector.load %arg15[%c0_384, %c0_385] : memref<112x128xbf16, #tpu.memory_space<vmem>>, vector<112x128xbf16>
    tpu.vector_store %arg15[%c0_384, %c0_385], %406 {strides = array<i32>} : memref<112x128xbf16, #tpu.memory_space<vmem>>, vector<112x128xbf16>,
    %c4_386 = arith.constant 4 : index
    %c0_387 = arith.constant 0 : index
    %c0_388 = arith.constant 0 : index
    %408 = vector.load %arg3[%c4_386, %c0_387, %c0_388] : memref<6x2x128xf32, #tpu.memory_space<vmem>>, vector<1x2x128xf32>
    %409 = vector.shape_cast %408 : vector<1x2x128xf32> to vector<2x128xf32>
    %410 = vector.extract_strided_slice %409 {offsets = [0, 0], sizes = [1, 128], strides = [1, 1]} : vector<2x128xf32> to vector<1x128xf32>
    %411 = vector.extract_strided_slice %409 {offsets = [1, 0], sizes = [1, 128], strides = [1, 1]} : vector<2x128xf32> to vector<1x128xf32>
    %c0_389 = arith.constant 0 : index
    %c0_390 = arith.constant 0 : index
    %412 = vector.load %arg15[%c0_389, %c0_390] : memref<112x128xbf16, #tpu.memory_space<vmem>>, vector<80x128xbf16>
    %c28_391 = arith.constant 28 : index
    %c0_392 = arith.constant 0 : index
    %c0_393 = arith.constant 0 : index
    %413 = vector.load %arg2[%c28_391, %c0_392, %c0_393] : memref<46x128x128xbf16, #tpu.memory_space<vmem>>, vector<1x128x128xbf16>
    %414 = vector.shape_cast %413 : vector<1x128x128xbf16> to vector<128x128xbf16>
    %cst_394 = arith.constant dense<0.000000e+00> : vector<80x128xf32>
    %415 = tpu.matmul %412, %414, %cst_394 {dimension_numbers = #tpu.dot_dimension_numbers<[1], [0], [0], [1], [0, 0, 1, 1], [], []>} : vector<80x128xbf16>, vector<128x128xbf16>, vector<80x128xf32> -> vector<80x128xf32>
    %c1_395 = arith.constant 1 : index
    %c0_396 = arith.constant 0 : index
    %416 = vector.load %arg15[%c1_395, %c0_396] : memref<112x128xbf16, #tpu.memory_space<vmem>>, vector<80x128xbf16>
    %c29 = arith.constant 29 : index
    %c0_397 = arith.constant 0 : index
    %c0_398 = arith.constant 0 : index
    %417 = vector.load %arg2[%c29, %c0_397, %c0_398] : memref<46x128x128xbf16, #tpu.memory_space<vmem>>, vector<1x128x128xbf16>
    %418 = vector.shape_cast %417 : vector<1x128x128xbf16> to vector<128x128xbf16>
    %cst_399 = arith.constant dense<0.000000e+00> : vector<80x128xf32>
    %419 = tpu.matmul %416, %418, %cst_399 {dimension_numbers = #tpu.dot_dimension_numbers<[1], [0], [0], [1], [0, 0, 1, 1], [], []>} : vector<80x128xbf16>, vector<128x128xbf16>, vector<80x128xf32> -> vector<80x128xf32>
    %420 = arith.addf %415, %419 : vector<80x128xf32>
    %c2_400 = arith.constant 2 : index
    %c0_401 = arith.constant 0 : index
    %421 = vector.load %arg15[%c2_400, %c0_401] : memref<112x128xbf16, #tpu.memory_space<vmem>>, vector<80x128xbf16>
    %c30 = arith.constant 30 : index
    %c0_402 = arith.constant 0 : index
    %c0_403 = arith.constant 0 : index
    %422 = vector.load %arg2[%c30, %c0_402, %c0_403] : memref<46x128x128xbf16, #tpu.memory_space<vmem>>, vector<1x128x128xbf16>
    %423 = vector.shape_cast %422 : vector<1x128x128xbf16> to vector<128x128xbf16>
    %cst_404 = arith.constant dense<0.000000e+00> : vector<80x128xf32>
    %424 = tpu.matmul %421, %423, %cst_404 {dimension_numbers = #tpu.dot_dimension_numbers<[1], [0], [0], [1], [0, 0, 1, 1], [], []>} : vector<80x128xbf16>, vector<128x128xbf16>, vector<80x128xf32> -> vector<80x128xf32>
    %425 = arith.addf %420, %424 : vector<80x128xf32>
    %c10_405 = arith.constant 10 : index
    %c0_406 = arith.constant 0 : index
    %426 = vector.load %arg15[%c10_405, %c0_406] : memref<112x128xbf16, #tpu.memory_space<vmem>>, vector<80x128xbf16>
    %c31 = arith.constant 31 : index
    %c0_407 = arith.constant 0 : index
    %c0_408 = arith.constant 0 : index
    %427 = vector.load %arg2[%c31, %c0_407, %c0_408] : memref<46x128x128xbf16, #tpu.memory_space<vmem>>, vector<1x128x128xbf16>
    %428 = vector.shape_cast %427 : vector<1x128x128xbf16> to vector<128x128xbf16>
    %cst_409 = arith.constant dense<0.000000e+00> : vector<80x128xf32>
    %429 = tpu.matmul %426, %428, %cst_409 {dimension_numbers = #tpu.dot_dimension_numbers<[1], [0], [0], [1], [0, 0, 1, 1], [], []>} : vector<80x128xbf16>, vector<128x128xbf16>, vector<80x128xf32> -> vector<80x128xf32>
    %430 = arith.addf %425, %429 : vector<80x128xf32>
    %c11_410 = arith.constant 11 : index
    %c0_411 = arith.constant 0 : index
    %431 = vector.load %arg15[%c11_410, %c0_411] : memref<112x128xbf16, #tpu.memory_space<vmem>>, vector<80x128xbf16>
    %c32 = arith.constant 32 : index
    %c0_412 = arith.constant 0 : index
    %c0_413 = arith.constant 0 : index
    %432 = vector.load %arg2[%c32, %c0_412, %c0_413] : memref<46x128x128xbf16, #tpu.memory_space<vmem>>, vector<1x128x128xbf16>
    %433 = vector.shape_cast %432 : vector<1x128x128xbf16> to vector<128x128xbf16>
    %cst_414 = arith.constant dense<0.000000e+00> : vector<80x128xf32>
    %434 = tpu.matmul %431, %433, %cst_414 {dimension_numbers = #tpu.dot_dimension_numbers<[1], [0], [0], [1], [0, 0, 1, 1], [], []>} : vector<80x128xbf16>, vector<128x128xbf16>, vector<80x128xf32> -> vector<80x128xf32>
    %435 = arith.addf %430, %434 : vector<80x128xf32>
    %c12_415 = arith.constant 12 : index
    %c0_416 = arith.constant 0 : index
    %436 = vector.load %arg15[%c12_415, %c0_416] : memref<112x128xbf16, #tpu.memory_space<vmem>>, vector<80x128xbf16>
    %c33 = arith.constant 33 : index
    %c0_417 = arith.constant 0 : index
    %c0_418 = arith.constant 0 : index
    %437 = vector.load %arg2[%c33, %c0_417, %c0_418] : memref<46x128x128xbf16, #tpu.memory_space<vmem>>, vector<1x128x128xbf16>
    %438 = vector.shape_cast %437 : vector<1x128x128xbf16> to vector<128x128xbf16>
    %cst_419 = arith.constant dense<0.000000e+00> : vector<80x128xf32>
    %439 = tpu.matmul %436, %438, %cst_419 {dimension_numbers = #tpu.dot_dimension_numbers<[1], [0], [0], [1], [0, 0, 1, 1], [], []>} : vector<80x128xbf16>, vector<128x128xbf16>, vector<80x128xf32> -> vector<80x128xf32>
    %440 = arith.addf %435, %439 : vector<80x128xf32>
    %c20_420 = arith.constant 20 : index
    %c0_421 = arith.constant 0 : index
    %441 = vector.load %arg15[%c20_420, %c0_421] : memref<112x128xbf16, #tpu.memory_space<vmem>>, vector<80x128xbf16>
    %c34 = arith.constant 34 : index
    %c0_422 = arith.constant 0 : index
    %c0_423 = arith.constant 0 : index
    %442 = vector.load %arg2[%c34, %c0_422, %c0_423] : memref<46x128x128xbf16, #tpu.memory_space<vmem>>, vector<1x128x128xbf16>
    %443 = vector.shape_cast %442 : vector<1x128x128xbf16> to vector<128x128xbf16>
    %cst_424 = arith.constant dense<0.000000e+00> : vector<80x128xf32>
    %444 = tpu.matmul %441, %443, %cst_424 {dimension_numbers = #tpu.dot_dimension_numbers<[1], [0], [0], [1], [0, 0, 1, 1], [], []>} : vector<80x128xbf16>, vector<128x128xbf16>, vector<80x128xf32> -> vector<80x128xf32>
    %445 = arith.addf %440, %444 : vector<80x128xf32>
    %c21_425 = arith.constant 21 : index
    %c0_426 = arith.constant 0 : index
    %446 = vector.load %arg15[%c21_425, %c0_426] : memref<112x128xbf16, #tpu.memory_space<vmem>>, vector<80x128xbf16>
    %c35 = arith.constant 35 : index
    %c0_427 = arith.constant 0 : index
    %c0_428 = arith.constant 0 : index
    %447 = vector.load %arg2[%c35, %c0_427, %c0_428] : memref<46x128x128xbf16, #tpu.memory_space<vmem>>, vector<1x128x128xbf16>
    %448 = vector.shape_cast %447 : vector<1x128x128xbf16> to vector<128x128xbf16>
    %cst_429 = arith.constant dense<0.000000e+00> : vector<80x128xf32>
    %449 = tpu.matmul %446, %448, %cst_429 {dimension_numbers = #tpu.dot_dimension_numbers<[1], [0], [0], [1], [0, 0, 1, 1], [], []>} : vector<80x128xbf16>, vector<128x128xbf16>, vector<80x128xf32> -> vector<80x128xf32>
    %450 = arith.addf %445, %449 : vector<80x128xf32>
    %c22_430 = arith.constant 22 : index
    %c0_431 = arith.constant 0 : index
    %451 = vector.load %arg15[%c22_430, %c0_431] : memref<112x128xbf16, #tpu.memory_space<vmem>>, vector<80x128xbf16>
    %c36_432 = arith.constant 36 : index
    %c0_433 = arith.constant 0 : index
    %c0_434 = arith.constant 0 : index
    %452 = vector.load %arg2[%c36_432, %c0_433, %c0_434] : memref<46x128x128xbf16, #tpu.memory_space<vmem>>, vector<1x128x128xbf16>
    %453 = vector.shape_cast %452 : vector<1x128x128xbf16> to vector<128x128xbf16>
    %cst_435 = arith.constant dense<0.000000e+00> : vector<80x128xf32>
    %454 = tpu.matmul %451, %453, %cst_435 {dimension_numbers = #tpu.dot_dimension_numbers<[1], [0], [0], [1], [0, 0, 1, 1], [], []>} : vector<80x128xbf16>, vector<128x128xbf16>, vector<80x128xf32> -> vector<80x128xf32>
    %455 = arith.addf %450, %454 : vector<80x128xf32>
    %456 = vector.broadcast %410 : vector<1x128xf32> to vector<80x128xf32>
    %457 = arith.mulf %455, %456 : vector<80x128xf32>
    %458 = vector.broadcast %411 : vector<1x128xf32> to vector<80x128xf32>
    %459 = arith.addf %457, %458 : vector<80x128xf32>
    %cst_436 = arith.constant 0.000000e+00 : f32
    %460 = vector.broadcast %cst_436 : f32 to vector<80x128xf32>
    %461 = arith.maximumf %459, %460 : vector<80x128xf32>
    %462 = arith.truncf %461 : vector<80x128xf32> to vector<80x128xbf16>
    %c0_437 = arith.constant 0 : index
    %c0_438 = arith.constant 0 : index
    %463 = vector.load %arg8[%c0_437, %c0_438] : memref<80x80xbf16, #tpu.memory_space<vmem>>, vector<80x80xbf16>
    %cst_439 = arith.constant dense<0.000000e+00> : vector<80x128xf32>
    %464 = tpu.matmul %463, %462, %cst_439 {dimension_numbers = #tpu.dot_dimension_numbers<[1], [0], [0], [1], [0, 0, 1, 1], [], []>} : vector<80x80xbf16>, vector<80x128xbf16>, vector<80x128xf32> -> vector<80x128xf32>
    %465 = arith.truncf %464 : vector<80x128xf32> to vector<80x128xbf16>
    %c0_440 = arith.constant 0 : index
    %c0_441 = arith.constant 0 : index
    %466 = vector.load %arg16[%c0_440, %c0_441] : memref<80x128xbf16, #tpu.memory_space<vmem>>, vector<80x128xbf16>
    tpu.vector_store %arg16[%c0_440, %c0_441], %465 {strides = array<i32>} : memref<80x128xbf16, #tpu.memory_space<vmem>>, vector<80x128xbf16>,
    %c5_442 = arith.constant 5 : index
    %c0_443 = arith.constant 0 : index
    %c0_444 = arith.constant 0 : index
    %467 = vector.load %arg3[%c5_442, %c0_443, %c0_444] : memref<6x2x128xf32, #tpu.memory_space<vmem>>, vector<1x2x128xf32>
    %468 = vector.shape_cast %467 : vector<1x2x128xf32> to vector<2x128xf32>
    %469 = vector.extract_strided_slice %468 {offsets = [0, 0], sizes = [1, 128], strides = [1, 1]} : vector<2x128xf32> to vector<1x128xf32>
    %470 = vector.extract_strided_slice %468 {offsets = [1, 0], sizes = [1, 128], strides = [1, 1]} : vector<2x128xf32> to vector<1x128xf32>
    %c0_445 = arith.constant 0 : index
    %c0_446 = arith.constant 0 : index
    %471 = vector.load %arg16[%c0_445, %c0_446] : memref<80x128xbf16, #tpu.memory_space<vmem>>, vector<32x128xbf16>
    %c37_447 = arith.constant 37 : index
    %c0_448 = arith.constant 0 : index
    %c0_449 = arith.constant 0 : index
    %472 = vector.load %arg2[%c37_447, %c0_448, %c0_449] : memref<46x128x128xbf16, #tpu.memory_space<vmem>>, vector<1x128x128xbf16>
    %473 = vector.shape_cast %472 : vector<1x128x128xbf16> to vector<128x128xbf16>
    %cst_450 = arith.constant dense<0.000000e+00> : vector<32x128xf32>
    %474 = tpu.matmul %471, %473, %cst_450 {dimension_numbers = #tpu.dot_dimension_numbers<[1], [0], [0], [1], [0, 0, 1, 1], [], []>} : vector<32x128xbf16>, vector<128x128xbf16>, vector<32x128xf32> -> vector<32x128xf32>
    %c2_451 = arith.constant 2 : index
    %c0_452 = arith.constant 0 : index
    %475 = vector.load %arg16[%c2_451, %c0_452] : memref<80x128xbf16, #tpu.memory_space<vmem>>, vector<32x128xbf16>
    %c38_453 = arith.constant 38 : index
    %c0_454 = arith.constant 0 : index
    %c0_455 = arith.constant 0 : index
    %476 = vector.load %arg2[%c38_453, %c0_454, %c0_455] : memref<46x128x128xbf16, #tpu.memory_space<vmem>>, vector<1x128x128xbf16>
    %477 = vector.shape_cast %476 : vector<1x128x128xbf16> to vector<128x128xbf16>
    %cst_456 = arith.constant dense<0.000000e+00> : vector<32x128xf32>
    %478 = tpu.matmul %475, %477, %cst_456 {dimension_numbers = #tpu.dot_dimension_numbers<[1], [0], [0], [1], [0, 0, 1, 1], [], []>} : vector<32x128xbf16>, vector<128x128xbf16>, vector<32x128xf32> -> vector<32x128xf32>
    %479 = arith.addf %474, %478 : vector<32x128xf32>
    %c4_457 = arith.constant 4 : index
    %c0_458 = arith.constant 0 : index
    %480 = vector.load %arg16[%c4_457, %c0_458] : memref<80x128xbf16, #tpu.memory_space<vmem>>, vector<32x128xbf16>
    %c39 = arith.constant 39 : index
    %c0_459 = arith.constant 0 : index
    %c0_460 = arith.constant 0 : index
    %481 = vector.load %arg2[%c39, %c0_459, %c0_460] : memref<46x128x128xbf16, #tpu.memory_space<vmem>>, vector<1x128x128xbf16>
    %482 = vector.shape_cast %481 : vector<1x128x128xbf16> to vector<128x128xbf16>
    %cst_461 = arith.constant dense<0.000000e+00> : vector<32x128xf32>
    %483 = tpu.matmul %480, %482, %cst_461 {dimension_numbers = #tpu.dot_dimension_numbers<[1], [0], [0], [1], [0, 0, 1, 1], [], []>} : vector<32x128xbf16>, vector<128x128xbf16>, vector<32x128xf32> -> vector<32x128xf32>
    %484 = arith.addf %479, %483 : vector<32x128xf32>
    %c16_462 = arith.constant 16 : index
    %c0_463 = arith.constant 0 : index
    %485 = vector.load %arg16[%c16_462, %c0_463] : memref<80x128xbf16, #tpu.memory_space<vmem>>, vector<32x128xbf16>
    %c40 = arith.constant 40 : index
    %c0_464 = arith.constant 0 : index
    %c0_465 = arith.constant 0 : index
    %486 = vector.load %arg2[%c40, %c0_464, %c0_465] : memref<46x128x128xbf16, #tpu.memory_space<vmem>>, vector<1x128x128xbf16>
    %487 = vector.shape_cast %486 : vector<1x128x128xbf16> to vector<128x128xbf16>
    %cst_466 = arith.constant dense<0.000000e+00> : vector<32x128xf32>
    %488 = tpu.matmul %485, %487, %cst_466 {dimension_numbers = #tpu.dot_dimension_numbers<[1], [0], [0], [1], [0, 0, 1, 1], [], []>} : vector<32x128xbf16>, vector<128x128xbf16>, vector<32x128xf32> -> vector<32x128xf32>
    %489 = arith.addf %484, %488 : vector<32x128xf32>
    %c18_467 = arith.constant 18 : index
    %c0_468 = arith.constant 0 : index
    %490 = vector.load %arg16[%c18_467, %c0_468] : memref<80x128xbf16, #tpu.memory_space<vmem>>, vector<32x128xbf16>
    %c41 = arith.constant 41 : index
    %c0_469 = arith.constant 0 : index
    %c0_470 = arith.constant 0 : index
    %491 = vector.load %arg2[%c41, %c0_469, %c0_470] : memref<46x128x128xbf16, #tpu.memory_space<vmem>>, vector<1x128x128xbf16>
    %492 = vector.shape_cast %491 : vector<1x128x128xbf16> to vector<128x128xbf16>
    %cst_471 = arith.constant dense<0.000000e+00> : vector<32x128xf32>
    %493 = tpu.matmul %490, %492, %cst_471 {dimension_numbers = #tpu.dot_dimension_numbers<[1], [0], [0], [1], [0, 0, 1, 1], [], []>} : vector<32x128xbf16>, vector<128x128xbf16>, vector<32x128xf32> -> vector<32x128xf32>
    %494 = arith.addf %489, %493 : vector<32x128xf32>
    %c20_472 = arith.constant 20 : index
    %c0_473 = arith.constant 0 : index
    %495 = vector.load %arg16[%c20_472, %c0_473] : memref<80x128xbf16, #tpu.memory_space<vmem>>, vector<32x128xbf16>
    %c42 = arith.constant 42 : index
    %c0_474 = arith.constant 0 : index
    %c0_475 = arith.constant 0 : index
    %496 = vector.load %arg2[%c42, %c0_474, %c0_475] : memref<46x128x128xbf16, #tpu.memory_space<vmem>>, vector<1x128x128xbf16>
    %497 = vector.shape_cast %496 : vector<1x128x128xbf16> to vector<128x128xbf16>
    %cst_476 = arith.constant dense<0.000000e+00> : vector<32x128xf32>
    %498 = tpu.matmul %495, %497, %cst_476 {dimension_numbers = #tpu.dot_dimension_numbers<[1], [0], [0], [1], [0, 0, 1, 1], [], []>} : vector<32x128xbf16>, vector<128x128xbf16>, vector<32x128xf32> -> vector<32x128xf32>
    %499 = arith.addf %494, %498 : vector<32x128xf32>
    %c32_477 = arith.constant 32 : index
    %c0_478 = arith.constant 0 : index
    %500 = vector.load %arg16[%c32_477, %c0_478] : memref<80x128xbf16, #tpu.memory_space<vmem>>, vector<32x128xbf16>
    %c43 = arith.constant 43 : index
    %c0_479 = arith.constant 0 : index
    %c0_480 = arith.constant 0 : index
    %501 = vector.load %arg2[%c43, %c0_479, %c0_480] : memref<46x128x128xbf16, #tpu.memory_space<vmem>>, vector<1x128x128xbf16>
    %502 = vector.shape_cast %501 : vector<1x128x128xbf16> to vector<128x128xbf16>
    %cst_481 = arith.constant dense<0.000000e+00> : vector<32x128xf32>
    %503 = tpu.matmul %500, %502, %cst_481 {dimension_numbers = #tpu.dot_dimension_numbers<[1], [0], [0], [1], [0, 0, 1, 1], [], []>} : vector<32x128xbf16>, vector<128x128xbf16>, vector<32x128xf32> -> vector<32x128xf32>
    %504 = arith.addf %499, %503 : vector<32x128xf32>
    %c34_482 = arith.constant 34 : index
    %c0_483 = arith.constant 0 : index
    %505 = vector.load %arg16[%c34_482, %c0_483] : memref<80x128xbf16, #tpu.memory_space<vmem>>, vector<32x128xbf16>
    %c44 = arith.constant 44 : index
    %c0_484 = arith.constant 0 : index
    %c0_485 = arith.constant 0 : index
    %506 = vector.load %arg2[%c44, %c0_484, %c0_485] : memref<46x128x128xbf16, #tpu.memory_space<vmem>>, vector<1x128x128xbf16>
    %507 = vector.shape_cast %506 : vector<1x128x128xbf16> to vector<128x128xbf16>
    %cst_486 = arith.constant dense<0.000000e+00> : vector<32x128xf32>
    %508 = tpu.matmul %505, %507, %cst_486 {dimension_numbers = #tpu.dot_dimension_numbers<[1], [0], [0], [1], [0, 0, 1, 1], [], []>} : vector<32x128xbf16>, vector<128x128xbf16>, vector<32x128xf32> -> vector<32x128xf32>
    %509 = arith.addf %504, %508 : vector<32x128xf32>
    %c36_487 = arith.constant 36 : index
    %c0_488 = arith.constant 0 : index
    %510 = vector.load %arg16[%c36_487, %c0_488] : memref<80x128xbf16, #tpu.memory_space<vmem>>, vector<32x128xbf16>
    %c45 = arith.constant 45 : index
    %c0_489 = arith.constant 0 : index
    %c0_490 = arith.constant 0 : index
    %511 = vector.load %arg2[%c45, %c0_489, %c0_490] : memref<46x128x128xbf16, #tpu.memory_space<vmem>>, vector<1x128x128xbf16>
    %512 = vector.shape_cast %511 : vector<1x128x128xbf16> to vector<128x128xbf16>
    %cst_491 = arith.constant dense<0.000000e+00> : vector<32x128xf32>
    %513 = tpu.matmul %510, %512, %cst_491 {dimension_numbers = #tpu.dot_dimension_numbers<[1], [0], [0], [1], [0, 0, 1, 1], [], []>} : vector<32x128xbf16>, vector<128x128xbf16>, vector<32x128xf32> -> vector<32x128xf32>
    %514 = arith.addf %509, %513 : vector<32x128xf32>
    %515 = vector.broadcast %469 : vector<1x128xf32> to vector<32x128xf32>
    %516 = arith.mulf %514, %515 : vector<32x128xf32>
    %517 = vector.broadcast %470 : vector<1x128xf32> to vector<32x128xf32>
    %518 = arith.addf %516, %517 : vector<32x128xf32>
    %cst_492 = arith.constant 0.000000e+00 : f32
    %519 = vector.broadcast %cst_492 : f32 to vector<32x128xf32>
    %520 = arith.maximumf %518, %519 : vector<32x128xf32>
    %521 = tpu.iota {dimensions = array<i32: 0>} : vector<32x128xi32>
    %c7_i32 = arith.constant 7 : i32
    %522 = vector.broadcast %c7_i32 : i32 to vector<32x128xi32>
    %523 = arith.andi %521, %522 : vector<32x128xi32>
    %c4_i32 = arith.constant 4 : i32
    %524 = vector.broadcast %c4_i32 : i32 to vector<32x128xi32>
    %525 = arith.cmpi slt, %523, %524 : vector<32x128xi32>
    %cst_493 = arith.constant 0.000000e+00 : f32
    %526 = vector.broadcast %cst_493 : f32 to vector<32x128xf32>
    %527 = arith.select %525, %520, %526 : vector<32x128xi1>, vector<32x128xf32>
    %cst_494 = arith.constant dense<0.000000e+00> : vector<128xf32>
    %528 = vector.multi_reduction <add>, %527, %cst_494 [0] : vector<32x128xf32> to vector<128xf32>
    %529 = vector.shape_cast %528 : vector<128xf32> to vector<1x128xf32>
    %cst_495 = arith.constant 1.600000e+01 : f32
    %530 = vector.broadcast %cst_495 : f32 to vector<1x128xf32>
    %531 = arith.divf %529, %530 : vector<1x128xf32>
    %c0_496 = arith.constant 0 : index
    %c0_497 = arith.constant 0 : index
    %532 = vector.load %arg9[%c0_496, %c0_497] : memref<128x128xf32, #tpu.memory_space<vmem>>, vector<128x128xf32>
    %cst_498 = arith.constant dense<0.000000e+00> : vector<1x128xf32>
    %533 = tpu.matmul %531, %532, %cst_498 {dimension_numbers = #tpu.dot_dimension_numbers<[1], [0], [0], [1], [0, 0, 1, 1], [], []>} : vector<1x128xf32>, vector<128x128xf32>, vector<1x128xf32> -> vector<1x128xf32>
    %c0_499 = arith.constant 0 : index
    %c0_500 = arith.constant 0 : index
    %534 = vector.load %arg10[%c0_499, %c0_500] : memref<1x128xf32, #tpu.memory_space<vmem>>, vector<1x128xf32>
    %535 = arith.addf %533, %534 : vector<1x128xf32>
    %536 = vector.shape_cast %535 : vector<1x128xf32> to vector<1x128xf32>
    %537 = vector.broadcast %536 : vector<1x128xf32> to vector<8x128xf32>
    %c0_501 = arith.constant 0 : index
    %c0_502 = arith.constant 0 : index
    %538 = vector.load %arg11[%c0_501, %c0_502] : memref<8x128xf32, #tpu.memory_space<vmem>>, vector<8x128xf32>
    tpu.vector_store %arg11[%c0_501, %c0_502], %537 {strides = array<i32>} : memref<8x128xf32, #tpu.memory_space<vmem>>, vector<8x128xf32>,
    return
  }
  func.func @transform_0(%arg0: i32) -> (i32, i32) {
    %c0_i32 = arith.constant 0 : i32
    %c0_i32_0 = arith.constant 0 : i32
    return %arg0, %c0_i32 : i32, i32
  }
  func.func @transform_1(%arg0: i32) -> (i32, i32, i32) {
    %c0_i32 = arith.constant 0 : i32
    %c0_i32_0 = arith.constant 0 : i32
    %c0_i32_1 = arith.constant 0 : i32
    %c0_i32_2 = arith.constant 0 : i32
    return %c0_i32, %c0_i32_0, %c0_i32_1 : i32, i32, i32
  }
  func.func @transform_2(%arg0: i32) -> (i32, i32, i32) {
    %c0_i32 = arith.constant 0 : i32
    %c0_i32_0 = arith.constant 0 : i32
    %c0_i32_1 = arith.constant 0 : i32
    %c0_i32_2 = arith.constant 0 : i32
    return %c0_i32, %c0_i32_0, %c0_i32_1 : i32, i32, i32
  }
  func.func @transform_3(%arg0: i32) -> (i32, i32) {
    %c0_i32 = arith.constant 0 : i32
    %c0_i32_0 = arith.constant 0 : i32
    %c0_i32_1 = arith.constant 0 : i32
    return %c0_i32, %c0_i32_0 : i32, i32
  }
  func.func @transform_4(%arg0: i32) -> (i32, i32) {
    %c0_i32 = arith.constant 0 : i32
    %c0_i32_0 = arith.constant 0 : i32
    %c0_i32_1 = arith.constant 0 : i32
    return %c0_i32, %c0_i32_0 : i32, i32
  }
  func.func @transform_5(%arg0: i32) -> (i32, i32) {
    %c0_i32 = arith.constant 0 : i32
    %c0_i32_0 = arith.constant 0 : i32
    %c0_i32_1 = arith.constant 0 : i32
    return %c0_i32, %c0_i32_0 : i32, i32
  }
  func.func @transform_6(%arg0: i32) -> (i32, i32) {
    %c0_i32 = arith.constant 0 : i32
    %c0_i32_0 = arith.constant 0 : i32
    %c0_i32_1 = arith.constant 0 : i32
    return %c0_i32, %c0_i32_0 : i32, i32
  }
  func.func @transform_7(%arg0: i32) -> (i32, i32) {
    %c0_i32 = arith.constant 0 : i32
    %c0_i32_0 = arith.constant 0 : i32
    %c0_i32_1 = arith.constant 0 : i32
    return %c0_i32, %c0_i32_0 : i32, i32
  }
  func.func @transform_8(%arg0: i32) -> (i32, i32) {
    %c0_i32 = arith.constant 0 : i32
    %c0_i32_0 = arith.constant 0 : i32
    %c0_i32_1 = arith.constant 0 : i32
    return %c0_i32, %c0_i32_0 : i32, i32
  }
  func.func @transform_9(%arg0: i32) -> (i32, i32) {
    %c0_i32 = arith.constant 0 : i32
    %c0_i32_0 = arith.constant 0 : i32
    %c0_i32_1 = arith.constant 0 : i32
    return %c0_i32, %c0_i32_0 : i32, i32
  }
  func.func @transform_10(%arg0: i32) -> (i32, i32) {
    %c0_i32 = arith.constant 0 : i32
    %c0_i32_0 = arith.constant 0 : i32
    return %arg0, %c0_i32 : i32, i32
  }
}

</mosaic_0001>

<bundles_post_ra>
// kernel: forward_pallas.1
= control target key start
LH: loop header
LB: loop body
LE: loop exit
PB: predicated region body
PF: predicated region fallthrough
CT: control target
= control target key end

     0   :  { %s26261_s13 = smov 0   ;;  %s31261_s0 = inlined_call_operand.vmem [shape: bf16[512,128], index: 0, kind: input, shape index: {}]   ;;  %s31262_s1 = inlined_call_operand.vmem [shape: bf16[46,128,128], index: 1, kind: input, shape index: {}]   ;;  %s31263_s2 = inlined_call_operand.vmem [shape: f32[6,2,128], index: 2, kind: input, shape index: {}]   ;;  %s31264_s3 = inlined_call_operand.vmem [shape: bf16[336,256], index: 3, kind: input, shape index: {}]   ;;  %s31265_s4 = inlined_call_operand.vmem [shape: bf16[336,288], index: 4, kind: input, shape index: {}]   ;;  %s31266_s5 = inlined_call_operand.vmem [shape: bf16[160,288], index: 5, kind: input, shape index: {}]   ;;  %s31267_s6 = inlined_call_operand.vmem [shape: bf16[112,96], index: 6, kind: input, shape index: {}]   ;;  %s31268_s7 = inlined_call_operand.vmem [shape: bf16[80,80], index: 7, kind: input, shape index: {}]   ;;  %s31269_s8 = inlined_call_operand.vmem [shape: f32[128,128], index: 8, kind: input, shape index: {}]   ;;  %s31270_s9 = inlined_call_operand.vmem [shape: f32[1,128], index: 9, kind: input, shape index: {}]   ;;  %s31271_s10 = inlined_call_operand.vmem [shape: f32[16,128], index: 10, kind: output, shape index: {}]  }
   0x1 LB: > { %s26267_s14 = sadd.s32 4294967295, %s26200_s13   ;;  %p18352_p0 = scmp.ge.s32.totalorder %s26200_s13, 1  ;;  %s26200_s13 = sphi %s26261_s13, %s20_s13  }
   0x2   : > { %p313_p1 = scmp.lt.s32.totalorder %s26200_s13, 3 }
   0x4   : > { %p314_p2 = pnand %p18352_p0, %p313_p1 }
   0x6   : > { %317 = sbr.rel (%p314_p2) target bundleno = 4948 (0x1354), region = 60 }
   0xd   : > { %v25288_v0 = vld [vmem:[%s31262_s1] sm:$0xff]   ;;  %s18353_s17 = sshll.u32 %s26267_s14, 5  ;;  %v25289_v1 = vld [vmem:[%s31262_s1 + $0x8] sm:$0xff]   ;;  %v25290_v2 = vld [vmem:[%s31262_s1 + $0x10] sm:$0xff]   ;;  %v31272_v24 = vmov 0   ;;  %v715_v26 = vlaneseq  ;;  %vm1715_vm1 = vcmask 1046528  }
   0xe   : > { %p351_p3 = scmp.lt.s32.totalorder %s18353_s17, 63  ;;  %21785 = vmatprep.subr.bf16.mxu0 %v25288_v0  ;;  %v25291_v3 = vld [vmem:[%s31262_s1 + $0x18] sm:$0xff]   ;;  %v25292_v5 = vld [vmem:[%s31262_s1 + $0x20] sm:$0xff]   ;;  %v25293_v6 = vld [vmem:[%s31262_s1 + $0x28] sm:$0xff]   ;;  %1087 = vmatprep.subr.bf16.mxu1 %v31272_v24  ;;  %vm1373_vm0 = vsmask.f32 7424 }
   0xf   : > { %21786 = vmatpush3.bf16.msra.mxu0 %v25288_v0  ;;  %v25294_v7 = vld [vmem:[%s31262_s1 + $0x30] sm:$0xff]   ;;  %v25295_v8 = vld [vmem:[%s31262_s1 + $0x38] sm:$0xff]   ;;  %v25314_v25 = vld [vmem:[%s31264_s3 + $0x4] ss:$8 sps:$4 sm:$0xff]   ;;  %v26321_v27 = vshrl.u32 %v715_v26, 7  ;;  %vm2315_vm2 = vcmask 1045504  }
  0x10   : > { %s31370_s17 = smov (!%p351_p3, %s18353_s17), 63  ;;  %21787 = vmatprep.subr.bf16.mxu0 %v25289_v1  ;;  %1119 = vmatprep.mubr.bf16.mxu1 %v25314_v25  ;;  %v361_v29 = vld [vmem:[%s31263_s2] sm:$0x3]  ;;  %vm2085_vm3 = vsmask.f32 6400  ;;  %vm2915_vm4 = vcmask 1044480  }
  0x11   : > { %s18354_s22 = sshll.u32 %s31370_s17, 2  ;;  %31318 = vst [vmem:[#allocation8_spill] sm:$0xff] %v26321_v27  ;;  %v26324_v28 = vsub.s32 0, %v26321_v27  ;;  %v26330_v30 = vsub.s32 1, %v26321_v27  ;;  %vm2685_vm5 = vsmask.f32 5376 }
  0x12   : > { %s26284_s25 = scalar_lea.vmem %s31261_s0, %s18354_s22  ;;  %vm26204_vm6 = vmmov 0   ;;  %vm7103_vm7 = vcmask 261120   ;;  %vm13985_vm8 = vcmask 1043456   ;;  %vm14167_vm9 = vcmask 1042432   ;;  %p356_p4 = scmp.lt.s32.totalorder %s26267_s14, 1 }
  0x13   : > { %21788 = vmatpush3.bf16.msra.mxu0 %v25289_v1  ;;  %v25296_v4 = vld [vmem:[%s26284_s25] sm:$0xff]   ;;  %v25297_v9 = vld [vmem:[%s26284_s25 + $0x8] sm:$0xff]   ;;  %v25298_v10 = vld [vmem:[%s26284_s25 + $0x10] sm:$0xff]   ;;  %31319 = vst [vmem:[#allocation9_spill] sm:$0xff] %v26324_v28  ;;  %v26333_v31 = vrot.slane %v361_v29, %v26324_v28  ;;  %v26336_v32 = vrot.slane %v361_v29, %v26330_v30  ;;  %vm14349_vm10 = vcmask 1041408   ;;  %vm15145_vm11 = vcmask 785408  }
  0x14   : > { %21789 = vmatprep.subr.bf16.mxu0 %v25290_v2  ;;  %21801 = vmatprep.mubr.bf16.mxu0 %v25296_v4  ;;  %v25299_v11 = vld [vmem:[%s26284_s25 + $0x18] sm:$0xff]   ;;  %v25300_v12 = vld [vmem:[%s26284_s25 + $0x20] sm:$0xff]   ;;  %v25301_v13 = vld [vmem:[%s26284_s25 + $0x28] sm:$0xff]   ;;  %31320 = vst [vmem:[#allocation10_spill] sm:$0xff] %v26330_v30  ;;  %vm15960_vm12 = vsmask.f32 2304 }
  0x15   : > { %v25302_v14 = vld [vmem:[%s26284_s25 + $0x30] sm:$0xff]   ;;  %v25303_v15 = vld [vmem:[%s26284_s25 + $0x38] sm:$0xff]   ;;  %v25304_v16 = vld [vmem:[%s26284_s25 + $0x40] sm:$0xff]   ;;  %vm16925_vm13 = vcmask 654336   ;;  %s31372_s14 = smov (!%p356_p4, %s26267_s14), 1 }
  0x16   : > { %v25305_v17 = vld [vmem:[%s26284_s25 + $0x48] sm:$0xff]   ;;  %v25306_v18 = vld [vmem:[%s26284_s25 + $0x50] sm:$0xff]   ;;  %v25307_v19 = vld [vmem:[%s26284_s25 + $0x58] sm:$0xff]   ;;  %s18355_s16 = sshll.u32 %s31372_s14, 3 }
  0x17   : > { %21790 = vmatpush3.bf16.msra.mxu0 %v25290_v2  ;;  %v25308_v20 = vld [vmem:[%s26284_s25 + $0x60] sm:$0xff]   ;;  %v25309_v21 = vld [vmem:[%s26284_s25 + $0x68] sm:$0xff]   ;;  %v25310_v22 = vld [vmem:[%s26284_s25 + $0x70] sm:$0xff]   ;;  %s359_s19 = scalar_lea.vmem %s31271_s10, %s18355_s16 }
  0x18   : > { %21791 = vmatprep.subr.bf16.mxu0 %v25291_v3  ;;  %v25311_v23 = vld [vmem:[%s26284_s25 + $0x78] sm:$0xff]  }
  0x1b   : > { %21792 = vmatpush3.bf16.msra.mxu0 %v25291_v3 }
  0x1c   : > { %21793 = vmatprep.subr.bf16.mxu0 %v25292_v5 }
  0x1f   : > { %21794 = vmatpush3.bf16.msra.mxu0 %v25292_v5 }
  0x20   : > { %21795 = vmatprep.subr.bf16.mxu0 %v25293_v6 }
  0x23   : > { %21796 = vmatpush3.bf16.msra.mxu0 %v25293_v6 }
  0x24   : > { %21797 = vmatprep.subr.bf16.mxu0 %v25294_v7 }
  0x27   : > { %21798 = vmatpush3.bf16.msra.mxu0 %v25294_v7 }
  0x28   : > { %21799 = vmatprep.subr.bf16.mxu0 %v25295_v8 }
  0x2b   : > { %21800 = vmatpush3.bf16.msra.mxu0 %v25295_v8 }
  0x2e   : > { %21802 = vmatmul.mubr.bf16.vlgmr.msra.gmra.mrb[0].mxu0 %v25297_v9 }
  0x2f   : > { %21805 = vmatprep.mubr.bf16.mxu0 %v25298_v10 }
  0x36   : > { %21806 = vmatmul.mubr.bf16.gmra.mrb[4].mxu0 %v25299_v11 }
  0x37   : > { %21809 = vmatprep.mubr.bf16.mxu0 %v25300_v12 }
  0x3e   : > { %21810 = vmatmul.mubr.bf16.gmra.mrb[8].mxu0 %v25301_v13 }
  0x3f   : > { %21813 = vmatprep.mubr.bf16.mxu0 %v25302_v14 }
  0x46   : > { %21814 = vmatmul.mubr.bf16.gmra.mrb[12].mxu0 %v25303_v15 }
  0x47   : > { %21817 = vmatprep.mubr.bf16.mxu0 %v25304_v16 }
  0x4e   : > { %21818 = vmatmul.mubr.bf16.gmra.mrb[16].mxu0 %v25305_v17 }
  0x4f   : > { %21821 = vmatprep.mubr.bf16.mxu0 %v25306_v18 }
  0x56   : > { %21822 = vmatmul.mubr.bf16.gmra.mrb[20].mxu0 %v25307_v19 }
  0x57   : > { %21825 = vmatprep.mubr.bf16.mxu0 %v25308_v20 }
  0x5e   : > { %21826 = vmatmul.mubr.bf16.gmra.mrb[24].mxu0 %v25309_v21 }
  0x5f   : > { %21829 = vmatprep.mubr.bf16.mxu0 %v25310_v22 }
  0x66   : > { %21830 = vmatmul.mubr.bf16.gmra.mrb[28].mxu0 %v25311_v23 }
 0x101   : > { %v21803_v33 = vpop.f32.mrb[0].mxu0 }
 0x102   : > { %v721_v34 = vmul.f32 %v21803_v33, %v26333_v31  ;;  %v588_v35 = vpop.f32.mrb[1].mxu0 }
 0x103   : > { %v719_v36 = vmul.f32 %v26333_v31, %v588_v35  ;;  %v21804_v37 = vpop.f32.mrb[2].mxu0 }
 0x104   : > { %v757_v38 = vadd.f32 %v26336_v32, %v721_v34  ;;  %v722_v39 = vmul.f32 %v21804_v37, %v26333_v31  ;;  %v591_v40 = vpop.f32.mrb[3].mxu0 }
 0x105   : > { %v755_v41 = vadd.f32 %v26336_v32, %v719_v36  ;;  %v720_v42 = vmul.f32 %v26333_v31, %v591_v40 }
 0x106   : > { %v789_v43 = vmax.f32 %v757_v38, 0.0  ;;  %v758_v44 = vadd.f32 %v26336_v32, %v722_v39 }
 0x107   : > { %v787_v45 = vmax.f32 %v755_v41, 0.0  ;;  %v756_v46 = vadd.f32 %v26336_v32, %v720_v42 }
 0x108   : > { %v790_v47 = vmax.f32 %v758_v44, 0.0 }
 0x109   : > { %v788_v48 = vmax.f32 %v756_v46, 0.0  ;;  %v21807_v49 = vpop.f32.mrb[4].mxu0 }
 0x10a   : > { %v725_v50 = vmul.f32 %v21807_v49, %v26333_v31  ;;  %v604_v51 = vpop.f32.mrb[5].mxu0  ;;  %v820_v52 = vpack.c.bf16 %v790_v47, %v789_v43 }
 0x10b   : > { %v723_v53 = vmul.f32 %v26333_v31, %v604_v51  ;;  %v21808_v54 = vpop.f32.mrb[6].mxu0  ;;  %v819_v55 = vpack.c.bf16 %v788_v48, %v787_v45 }
 0x10c   : > { %v761_v56 = vadd.f32 %v26336_v32, %v725_v50  ;;  %v726_v57 = vmul.f32 %v21808_v54, %v26333_v31  ;;  %v607_v58 = vpop.f32.mrb[7].mxu0 }
 0x10d   : > { %v759_v59 = vadd.f32 %v26336_v32, %v723_v53  ;;  %v724_v60 = vmul.f32 %v26333_v31, %v607_v58  ;;  %1088 = vmatpush1.bf16.msra.mxu1 %v819_v55 }
 0x10e   : > { %v793_v61 = vmax.f32 %v761_v56, 0.0  ;;  %v762_v62 = vadd.f32 %v26336_v32, %v726_v57  ;;  %1089 = vmatprep.subr.bf16.mxu1 %v31272_v24 }
 0x10f   : > { %v791_v63 = vmax.f32 %v759_v59, 0.0  ;;  %v760_v0 = vadd.f32 %v26336_v32, %v724_v60 }
 0x110   : > { %v794_v1 = vmax.f32 %v762_v62, 0.0 }
 0x111   : > { %v792_v2 = vmax.f32 %v760_v0, 0.0  ;;  %v21811_v3 = vpop.f32.mrb[8].mxu0  ;;  %1090 = vmatpush1.bf16.msra.mxu1 %v820_v52 }
 0x112   : > { %v729_v4 = vmul.f32 %v21811_v3, %v26333_v31  ;;  %v620_v5 = vpop.f32.mrb[9].mxu0  ;;  %1091 = vmatprep.subr.bf16.mxu1 %v31272_v24  ;;  %v822_v6 = vpack.c.bf16 %v794_v1, %v793_v61 }
 0x113   : > { %v727_v7 = vmul.f32 %v26333_v31, %v620_v5  ;;  %v21812_v8 = vpop.f32.mrb[10].mxu0  ;;  %v821_v9 = vpack.c.bf16 %v792_v2, %v791_v63 }
 0x114   : > { %v765_v10 = vadd.f32 %v26336_v32, %v729_v4  ;;  %v730_v11 = vmul.f32 %v21812_v8, %v26333_v31  ;;  %v623_v12 = vpop.f32.mrb[11].mxu0 }
 0x115   : > { %v763_v13 = vadd.f32 %v26336_v32, %v727_v7  ;;  %v728_v14 = vmul.f32 %v26333_v31, %v623_v12  ;;  %1092 = vmatpush1.bf16.msra.mxu1 %v821_v9 }
 0x116   : > { %v797_v15 = vmax.f32 %v765_v10, 0.0  ;;  %v766_v16 = vadd.f32 %v26336_v32, %v730_v11  ;;  %1093 = vmatprep.subr.bf16.mxu1 %v31272_v24 }
 0x117   : > { %v795_v17 = vmax.f32 %v763_v13, 0.0  ;;  %v764_v18 = vadd.f32 %v26336_v32, %v728_v14 }
 0x118   : > { %v798_v19 = vmax.f32 %v766_v16, 0.0 }
 0x119   : > { %v796_v20 = vmax.f32 %v764_v18, 0.0  ;;  %v21815_v21 = vpop.f32.mrb[12].mxu0  ;;  %1094 = vmatpush1.bf16.msra.mxu1 %v822_v6 }
 0x11a   : > { %v733_v22 = vmul.f32 %v21815_v21, %v26333_v31  ;;  %v636_v23 = vpop.f32.mrb[13].mxu0  ;;  %1095 = vmatprep.subr.bf16.mxu1 %v31272_v24  ;;  %v824_v25 = vpack.c.bf16 %v798_v19, %v797_v15 }
 0x11b   : > { %v731_v26 = vmul.f32 %v26333_v31, %v636_v23  ;;  %v21816_v29 = vpop.f32.mrb[14].mxu0  ;;  %v823_v33 = vpack.c.bf16 %v796_v20, %v795_v17 }
 0x11c   : > { %v769_v34 = vadd.f32 %v26336_v32, %v733_v22  ;;  %v734_v35 = vmul.f32 %v21816_v29, %v26333_v31  ;;  %v639_v36 = vpop.f32.mrb[15].mxu0 }
 0x11d   : > { %v767_v37 = vadd.f32 %v26336_v32, %v731_v26  ;;  %v732_v38 = vmul.f32 %v26333_v31, %v639_v36  ;;  %1096 = vmatpush1.bf16.msra.mxu1 %v823_v33  ;;  %v25354_v33 = vld [vmem:[%s31262_s1 + $0x80] sm:$0xff]  }
 0x11e   : > { %v770_v39 = vadd.f32 %v26336_v32, %v734_v35  ;;  %1097 = vmatprep.subr.bf16.mxu1 %v31272_v24  ;;  %v801_v40 = vmax.f32 %v769_v34, 0.0  ;;  %21833 = vmatprep.subr.bf16.mxu0 %v25354_v33 }
 0x11f   : > { %v768_v41 = vadd.f32 %v26336_v32, %v732_v38  ;;  %v799_v42 = vmax.f32 %v767_v37, 0.0  ;;  %21834 = vmatpush3.bf16.msra.mxu0 %v25354_v33  ;;  %v25353_v33 = vld [vmem:[%s31264_s3 + $0xd0] ss:$8 sps:$4 sm:$0xff]  }
 0x120   : > { %v802_v43 = vmax.f32 %v770_v39, 0.0 }
 0x121   : > { %v800_v44 = vmax.f32 %v768_v41, 0.0  ;;  %v21819_v45 = vpop.f32.mrb[16].mxu0  ;;  %1098 = vmatpush1.bf16.msra.mxu1 %v824_v25 }
 0x122   : > { %v737_v46 = vmul.f32 %v21819_v45, %v26333_v31  ;;  %v652_v47 = vpop.f32.mrb[17].mxu0  ;;  %1099 = vmatprep.subr.bf16.mxu1 %v31272_v24  ;;  %v826_v48 = vpack.c.bf16 %v802_v43, %v801_v40 }
 0x123   : > { %v735_v49 = vmul.f32 %v26333_v31, %v652_v47  ;;  %v21820_v50 = vpop.f32.mrb[18].mxu0  ;;  %v825_v51 = vpack.c.bf16 %v800_v44, %v799_v42 }
 0x124   : > { %v773_v52 = vadd.f32 %v26336_v32, %v737_v46  ;;  %v738_v53 = vmul.f32 %v21820_v50, %v26333_v31  ;;  %v655_v54 = vpop.f32.mrb[19].mxu0 }
 0x125   : > { %v771_v55 = vadd.f32 %v26336_v32, %v735_v49  ;;  %v736_v56 = vmul.f32 %v26333_v31, %v655_v54  ;;  %1100 = vmatpush1.bf16.msra.mxu1 %v825_v51 }
 0x126   : > { %v774_v57 = vadd.f32 %v26336_v32, %v738_v53  ;;  %1101 = vmatprep.subr.bf16.mxu1 %v31272_v24  ;;  %v805_v58 = vmax.f32 %v773_v52, 0.0 }
 0x127   : > { %v772_v59 = vadd.f32 %v26336_v32, %v736_v56  ;;  %v803_v60 = vmax.f32 %v771_v55, 0.0 }
 0x128   : > { %v806_v61 = vmax.f32 %v774_v57, 0.0 }
 0x129   : > { %v804_v62 = vmax.f32 %v772_v59, 0.0  ;;  %v21823_v63 = vpop.f32.mrb[20].mxu0  ;;  %1102 = vmatpush1.bf16.msra.mxu1 %v826_v48 }
 0x12a   : > { %v741_v0 = vmul.f32 %v21823_v63, %v26333_v31  ;;  %v668_v1 = vpop.f32.mrb[21].mxu0  ;;  %1103 = vmatprep.subr.bf16.mxu1 %v31272_v24  ;;  %v828_v2 = vpack.c.bf16 %v806_v61, %v805_v58  ;;  %v25318_v63 = vld [vmem:[%s31264_s3 + $0x24] ss:$8 sps:$4 sm:$0xff]  }
 0x12b   : > { %v739_v3 = vmul.f32 %v26333_v31, %v668_v1  ;;  %v21824_v4 = vpop.f32.mrb[22].mxu0  ;;  %v827_v5 = vpack.c.bf16 %v804_v62, %v803_v60  ;;  %v25317_v62 = vld [vmem:[%s31264_s3 + $0x10] ss:$8 sps:$4 sm:$0xff]   ;;  %v25321_v1 = vld [vmem:[%s31264_s3 + $0x34] ss:$8 sps:$4 sm:$0xff]  }
 0x12c   : > { %v777_v6 = vadd.f32 %v26336_v32, %v741_v0  ;;  %v742_v7 = vmul.f32 %v21824_v4, %v26333_v31  ;;  %v671_v8 = vpop.f32.mrb[23].mxu0  ;;  %v25320_v0 = vld [vmem:[%s31264_s3 + $0x20] ss:$8 sps:$4 sm:$0xff]  }
 0x12d   : > { %v775_v9 = vadd.f32 %v26336_v32, %v739_v3  ;;  %v740_v10 = vmul.f32 %v26333_v31, %v671_v8  ;;  %1104 = vmatpush1.bf16.msra.mxu1 %v827_v5  ;;  %v25324_v3 = vld [vmem:[%s31264_s3 + $0x44] ss:$8 sps:$4 sm:$0xff]   ;;  %v25326_v4 = vld [vmem:[%s31264_s3 + $0x40] ss:$8 sps:$4 sm:$0xff]   ;;  %v25327_v5 = vld [vmem:[%s31264_s3 + $0x54] ss:$8 sps:$4 sm:$0xff]  }
 0x12e   : > { %v778_v11 = vadd.f32 %v26336_v32, %v742_v7  ;;  %1105 = vmatprep.subr.bf16.mxu1 %v31272_v24  ;;  %v809_v12 = vmax.f32 %v777_v6, 0.0  ;;  %v25329_v6 = vld [vmem:[%s31264_s3 + $0x50] ss:$8 sps:$4 sm:$0xff]   ;;  %v25330_v7 = vld [vmem:[%s31264_s3 + $0x64] ss:$8 sps:$4 sm:$0xff]  }
 0x12f   : > { %v776_v13 = vadd.f32 %v26336_v32, %v740_v10  ;;  %v807_v14 = vmax.f32 %v775_v9, 0.0  ;;  %v25332_v8 = vld [vmem:[%s31264_s3 + $0x60] ss:$8 sps:$4 sm:$0xff]   ;;  %v25333_v9 = vld [vmem:[%s31264_s3 + $0x74] ss:$8 sps:$4 sm:$0xff]  }
 0x130   : > { %v810_v15 = vmax.f32 %v778_v11, 0.0  ;;  %v25335_v10 = vld [vmem:[%s31264_s3 + $0x70] ss:$8 sps:$4 sm:$0xff]   ;;  %v25336_v11 = vld [vmem:[%s31264_s3 + $0x84] ss:$8 sps:$4 sm:$0xff]  }
 0x131   : > { %v808_v16 = vmax.f32 %v776_v13, 0.0  ;;  %v21827_v17 = vpop.f32.mrb[24].mxu0  ;;  %1106 = vmatpush1.bf16.msra.mxu1 %v828_v2  ;;  %v25323_v2 = vld [vmem:[%s31264_s3 + $0x30] ss:$8 sps:$4 sm:$0xff]   ;;  %v25339_v13 = vld [vmem:[%s31264_s3 + $0x94] ss:$8 sps:$4 sm:$0xff]  }
 0x132   : > { %v745_v18 = vmul.f32 %v21827_v17, %v26333_v31  ;;  %v684_v19 = vpop.f32.mrb[25].mxu0  ;;  %1107 = vmatprep.subr.bf16.mxu1 %v31272_v24  ;;  %v830_v20 = vpack.c.bf16 %v810_v15, %v809_v12  ;;  %v25338_v12 = vld [vmem:[%s31264_s3 + $0x80] ss:$8 sps:$4 sm:$0xff]   ;;  %v25342_v15 = vld [vmem:[%s31264_s3 + $0xa4] ss:$8 sps:$4 sm:$0xff]  }
 0x133   : > { %v743_v21 = vmul.f32 %v26333_v31, %v684_v19  ;;  %v21828_v22 = vpop.f32.mrb[26].mxu0  ;;  %v829_v23 = vpack.c.bf16 %v808_v16, %v807_v14  ;;  %v25341_v14 = vld [vmem:[%s31264_s3 + $0x90] ss:$8 sps:$4 sm:$0xff]   ;;  %v25344_v16 = vld [vmem:[%s31264_s3 + $0xa0] ss:$8 sps:$4 sm:$0xff]  }
 0x134   : > { %v781_v25 = vadd.f32 %v26336_v32, %v745_v18  ;;  %v746_v26 = vmul.f32 %v21828_v22, %v26333_v31  ;;  %v687_v29 = vpop.f32.mrb[27].mxu0  ;;  %v25345_v17 = vld [vmem:[%s31264_s3 + $0xb4] ss:$8 sps:$4 sm:$0xff]   ;;  %v25355_v18 = vld [vmem:[%s31262_s1 + $0x88] sm:$0xff]   ;;  %v25347_v19 = vld [vmem:[%s31264_s3 + $0xb0] ss:$8 sps:$4 sm:$0xff]  }
 0x135   : > { %v779_v34 = vadd.f32 %v26336_v32, %v743_v21  ;;  %v744_v35 = vmul.f32 %v26333_v31, %v687_v29  ;;  %1108 = vmatpush1.bf16.msra.mxu1 %v829_v23  ;;  %21835 = vmatprep.subr.bf16.mxu0 %v25355_v18  ;;  %v25356_v21 = vld [vmem:[%s31262_s1 + $0x90] sm:$0xff]   ;;  %v25357_v22 = vld [vmem:[%s31262_s1 + $0x98] sm:$0xff]   ;;  %v25350_v23 = vld [vmem:[%s31264_s3 + $0xc0] ss:$8 sps:$4 sm:$0xff]  }
 0x136   : > { %v782_v36 = vadd.f32 %v26336_v32, %v746_v26  ;;  %1109 = vmatprep.subr.bf16.mxu1 %v31272_v24  ;;  %v813_v37 = vmax.f32 %v781_v25, 0.0  ;;  %21836 = vmatpush3.bf16.msra.mxu0 %v25355_v18  ;;  %v25351_v25 = vld [vmem:[%s31264_s3 + $0xd4] ss:$8 sps:$4 sm:$0xff]   ;;  %v25358_v26 = vld [vmem:[%s31262_s1 + $0xa0] sm:$0xff]   ;;  %v25359_v29 = vld [vmem:[%s31262_s1 + $0xa8] sm:$0xff]  }
 0x137   : > { %v780_v38 = vadd.f32 %v26336_v32, %v744_v35  ;;  %v811_v39 = vmax.f32 %v779_v34, 0.0  ;;  %21837 = vmatprep.subr.bf16.mxu0 %v25356_v21  ;;  %v25360_v34 = vld [vmem:[%s31264_s3 + $0xe4] ss:$8 sps:$4 sm:$0xff]   ;;  %v25363_v35 = vld [vmem:[%s31262_s1 + $0xb0] sm:$0xff]  }
 0x138   : > { %v814_v40 = vmax.f32 %v782_v36, 0.0  ;;  %v25364_v36 = vld [vmem:[%s31262_s1 + $0xb8] sm:$0xff]  }
 0x139   : > { %v812_v41 = vmax.f32 %v780_v38, 0.0  ;;  %v21831_v42 = vpop.f32.mrb[28].mxu0  ;;  %1110 = vmatpush1.bf16.msra.mxu1 %v830_v20  ;;  %v25348_v20 = vld [vmem:[%s31264_s3 + $0xc4] ss:$8 sps:$4 sm:$0xff]   ;;  %v25365_v38 = vld [vmem:[%s31264_s3 + $0xf4] ss:$8 sps:$4 sm:$0xff]  }
 0x13a   : > { %v749_v43 = vmul.f32 %v21831_v42, %v26333_v31  ;;  %v700_v44 = vpop.f32.mrb[29].mxu0  ;;  %1111 = vmatprep.subr.bf16.mxu1 %v31272_v24  ;;  %v832_v45 = vpack.c.bf16 %v814_v40, %v813_v37  ;;  %21838 = vmatpush3.bf16.msra.mxu0 %v25356_v21  ;;  %v25362_v37 = vld [vmem:[%s31264_s3 + $0xe0] ss:$8 sps:$4 sm:$0xff]   ;;  %v25368_v40 = vld [vmem:[%s31264_s3 + $0x104] ss:$8 sps:$4 sm:$0xff]  }
 0x13b   : > { %v747_v46 = vmul.f32 %v26333_v31, %v700_v44  ;;  %v21832_v47 = vpop.f32.mrb[30].mxu0  ;;  %v831_v48 = vpack.c.bf16 %v812_v41, %v811_v39  ;;  %21839 = vmatprep.subr.bf16.mxu0 %v25357_v22  ;;  %v25367_v39 = vld [vmem:[%s31264_s3 + $0xf0] ss:$8 sps:$4 sm:$0xff]   ;;  %v25370_v41 = vld [vmem:[%s31264_s3 + $0x100] ss:$8 sps:$4 sm:$0xff]  }
 0x13c   : > { %v785_v49 = vadd.f32 %v26336_v32, %v749_v43  ;;  %v750_v50 = vmul.f32 %v21832_v47, %v26333_v31  ;;  %v703_v51 = vpop.f32.mrb[31].mxu0  ;;  %v26543_v42 = vld [vmem:[%s31262_s1 + $0x40] sm:$0xff]   ;;  %v25373_v43 = vld [vmem:[%s31264_s3 + $0x114] ss:$8 sps:$4 sm:$0xff]   ;;  %v25375_v44 = vld [vmem:[%s31264_s3 + $0x110] ss:$8 sps:$4 sm:$0xff]  }
 0x13d   : > { %v783_v52 = vadd.f32 %v26336_v32, %v747_v46  ;;  %v748_v53 = vmul.f32 %v26333_v31, %v703_v51  ;;  %1112 = vmatpush1.bf16.msra.mxu1 %v831_v48  ;;  %v25312_v31 = vld [vmem:[%s31264_s3] ss:$8 sps:$4 sm:$0xff]   ;;  %v25385_v48 = vld [vmem:[%s31264_s3 + $0x134] ss:$8 sps:$4 sm:$0xff]   ;;  %v25387_v51 = vld [vmem:[%s31264_s3 + $0x130] ss:$8 sps:$4 sm:$0xff]  }
 0x13e   : > { %v786_v54 = vadd.f32 %v26336_v32, %v750_v50  ;;  %1113 = vmatprep.subr.bf16.mxu1 %v31272_v24  ;;  %v817_v56 = vmax.f32 %v785_v49, 0.0  ;;  %21840 = vmatpush3.bf16.msra.mxu0 %v25357_v22  ;;  %v25380_v46 = vld [vmem:[%s31264_s3 + $0x120] ss:$8 sps:$4 sm:$0xff]   ;;  %v25389_v50 = vld [vmem:[%s31262_s1 + $0x90] sm:$0xff]  }
 0x13f   : > { %v784_v55 = vadd.f32 %v26336_v32, %v748_v53  ;;  %v815_v58 = vmax.f32 %v783_v52, 0.0  ;;  %v25315_v32 = vld [vmem:[%s31264_s3 + $0x14] ss:$8 sps:$4 sm:$0xff]   ;;  %21841 = vmatprep.subr.bf16.mxu0 %v25358_v26  ;;  %v25382_v47 = vld [vmem:[%s31262_s1 + $0x80] sm:$0xff]   ;;  %v25384_v49 = vld [vmem:[%s31262_s1 + $0x88] sm:$0xff]  }
 0x140   : > { %v818_v57 = vmax.f32 %v786_v54, 0.0  ;;  %v25392_v52 = vld [vmem:[%s31264_s3 + $0x144] ss:$8 sps:$4 sm:$0xff]   ;;  %v25391_v53 = vld [vmem:[%s31262_s1 + $0x98] sm:$0xff]  }
 0x141   : > { %v816_v59 = vmax.f32 %v784_v55, 0.0  ;;  %1114 = vmatpush1.bf16.msra.mxu1 %v832_v45  ;;  %v25378_v45 = vld [vmem:[%s31264_s3 + $0x124] ss:$8 sps:$4 sm:$0xff]   ;;  %v25394_v55 = vld [vmem:[%s31264_s3 + $0x140] ss:$8 sps:$4 sm:$0xff]  }
 0x142   : > { %1115 = vmatprep.subr.bf16.mxu1 %v31272_v24  ;;  %v834_v60 = vpack.c.bf16 %v818_v57, %v817_v56  ;;  %21842 = vmatpush3.bf16.msra.mxu0 %v25358_v26  ;;  %v25396_v54 = vld [vmem:[%s31262_s1 + $0xa0] sm:$0xff]   ;;  %v25398_v56 = vld [vmem:[%s31262_s1 + $0xa8] sm:$0xff]   ;;  %v25400_v57 = vld [vmem:[%s31262_s1 + $0xb0] sm:$0xff]  }
 0x143   : > { %v833_v61 = vpack.c.bf16 %v816_v59, %v815_v58  ;;  %21843 = vmatprep.subr.bf16.mxu0 %v25359_v29  ;;  %v25402_v58 = vld [vmem:[%s31262_s1 + $0xb8] sm:$0xff]   ;;  %v26597_v59 = vld [vmem:[%s31262_s1 + $0x40] sm:$0xff]  }
 0x145   : > { %1116 = vmatpush1.bf16.msra.mxu1 %v833_v61 }
 0x146   : > { %1117 = vmatprep.subr.bf16.mxu1 %v31272_v24  ;;  %21844 = vmatpush3.bf16.msra.mxu0 %v25359_v29  ;;  %v25372_v29 = vld [vmem:[%s31262_s1 + $0x48] sm:$0xff]  }
 0x147   : > { %21845 = vmatprep.subr.bf16.mxu0 %v25363_v35 }
 0x149   : > { %1118 = vmatpush1.bf16.msra.mxu1 %v834_v60 }
 0x14a   : > { %21846 = vmatpush3.bf16.msra.mxu0 %v25363_v35  ;;  %22085 = vmatprep.subr.bf16.mxu1 %v25382_v47 }
 0x14b   : > { %21847 = vmatprep.subr.bf16.mxu0 %v25364_v36 }
 0x14c   : > { %1120 = vmatmul.mubr.bf16.vlgmr.msra.gmra.mrb[0].mxu1 %v25312_v31 }
 0x14d   : > { %1127 = vmatprep.mubr.bf16.mxu1 %v25315_v32  ;;  %22086 = vmatpush3.bf16.msra.mxu1 %v25382_v47 }
 0x14e   : > { %21848 = vmatpush3.bf16.msra.mxu0 %v25364_v36  ;;  %22087 = vmatprep.subr.bf16.mxu1 %v25384_v49 }
 0x14f   : > { %21861 = vmatprep.subr.bf16.mxu0 %v26543_v42 }
 0x151   : > { %22088 = vmatpush3.bf16.msra.mxu1 %v25384_v49 }
 0x152   : > { %22089 = vmatprep.subr.bf16.mxu1 %v25389_v50 }
 0x154   : > { %1128 = vmatmul.mubr.bf16.gmra.mrb[4].mxu1 %v25317_v62 }
 0x155   : > { %1135 = vmatprep.mubr.bf16.mxu1 %v25318_v63  ;;  %22090 = vmatpush3.bf16.msra.mxu1 %v25389_v50 }
 0x156   : > { %22091 = vmatprep.subr.bf16.mxu1 %v25391_v53 }
 0x159   : > { %22092 = vmatpush3.bf16.msra.mxu1 %v25391_v53 }
 0x15a   : > { %22093 = vmatprep.subr.bf16.mxu1 %v25396_v54 }
 0x15c   : > { %1136 = vmatmul.mubr.bf16.gmra.mrb[8].mxu1 %v25320_v0 }
 0x15d   : > { %1143 = vmatprep.mubr.bf16.mxu1 %v25321_v1  ;;  %22094 = vmatpush3.bf16.msra.mxu1 %v25396_v54 }
 0x15e   : > { %22095 = vmatprep.subr.bf16.mxu1 %v25398_v56 }
 0x161   : > { %22096 = vmatpush3.bf16.msra.mxu1 %v25398_v56 }
 0x162   : > { %22097 = vmatprep.subr.bf16.mxu1 %v25400_v57 }
 0x164   : > { %1144 = vmatmul.mubr.bf16.gmra.mrb[12].mxu1 %v25323_v2 }
 0x165   : > { %1151 = vmatprep.mubr.bf16.mxu1 %v25324_v3  ;;  %22098 = vmatpush3.bf16.msra.mxu1 %v25400_v57 }
 0x166   : > { %22099 = vmatprep.subr.bf16.mxu1 %v25402_v58 }
 0x169   : > { %22100 = vmatpush3.bf16.msra.mxu1 %v25402_v58 }
 0x16a   : > { %22113 = vmatprep.subr.bf16.mxu1 %v26597_v59 }
 0x16c   : > { %1152 = vmatmul.mubr.bf16.gmra.mrb[16].mxu1 %v25326_v4 }
 0x16d   : > { %1159 = vmatprep.mubr.bf16.mxu1 %v25327_v5 }
 0x174   : > { %1160 = vmatmul.mubr.bf16.gmra.mrb[20].mxu1 %v25329_v6 }
 0x175   : > { %1167 = vmatprep.mubr.bf16.mxu1 %v25330_v7 }
 0x17c   : > { %1168 = vmatmul.mubr.bf16.gmra.mrb[24].mxu1 %v25332_v8 }
 0x17d   : > { %1175 = vmatprep.mubr.bf16.mxu1 %v25333_v9 }
 0x184   : > { %1176 = vmatmul.mubr.bf16.gmra.mrb[28].mxu1 %v25335_v10 }
 0x185   : > { %1183 = vmatprep.mubr.bf16.mxu1 %v25336_v11 }
 0x18c   : > { %1184 = vmatmul.mubr.bf16.gmra.mrb[32].mxu1 %v25338_v12 }
 0x18d   : > { %1191 = vmatprep.mubr.bf16.mxu1 %v25339_v13 }
 0x194   : > { %1192 = vmatmul.mubr.bf16.gmra.mrb[36].mxu1 %v25341_v14 }
 0x195   : > { %1199 = vmatprep.mubr.bf16.mxu1 %v25342_v15 }
 0x19c   : > { %1200 = vmatmul.mubr.bf16.gmra.mrb[40].mxu1 %v25344_v16 }
 0x19d   : > { %1207 = vmatprep.mubr.bf16.mxu1 %v25345_v17 }
 0x1a4   : > { %1208 = vmatmul.mubr.bf16.gmra.mrb[44].mxu1 %v25347_v19 }
 0x1a5   : > { %1215 = vmatprep.mubr.bf16.mxu1 %v25348_v20 }
 0x1ac   : > { %1216 = vmatmul.mubr.bf16.gmra.mrb[48].mxu1 %v25350_v23 }
 0x1ad   : > { %1223 = vmatprep.mubr.bf16.mxu1 %v25351_v25 }
 0x1b4   : > { %1224 = vmatmul.mubr.bf16.gmra.mrb[52].mxu1 %v25353_v33 }
 0x1b5   : > { %1231 = vmatprep.mubr.bf16.mxu1 %v25360_v34 }
 0x1bc   : > { %1232 = vmatmul.mubr.bf16.gmra.mrb[56].mxu1 %v25362_v37 }
 0x1bd   : > { %1239 = vmatprep.mubr.bf16.mxu1 %v25365_v38 }
 0x1c4   : > { %1240 = vmatmul.mubr.bf16.gmra.mrb[60].mxu1 %v25367_v39 }
 0x1c5   : > { %1247 = vmatprep.mubr.bf16.mxu1 %v25368_v40  ;;  %v25376_v40 = vld [vmem:[%s31262_s1 + $0x50] sm:$0xff]  }
 0x1cc   : > { %1248 = vmatmul.mubr.bf16.gmra.mrb[64].mxu1 %v25370_v41 }
 0x1cd   : > { %1255 = vmatprep.mubr.bf16.mxu1 %v25373_v43 }
 0x1d4   : > { %1256 = vmatmul.mubr.bf16.gmra.mrb[68].mxu1 %v25375_v44 }
 0x1d5   : > { %1263 = vmatprep.mubr.bf16.mxu1 %v25378_v45 }
 0x1dc   : > { %1264 = vmatmul.mubr.bf16.gmra.mrb[72].mxu1 %v25380_v46 }
 0x1dd   : > { %1271 = vmatprep.mubr.bf16.mxu1 %v25385_v48 }
 0x1e4   : > { %1272 = vmatmul.mubr.bf16.gmra.mrb[76].mxu1 %v25387_v51 }
 0x1e5   : > { %1279 = vmatprep.mubr.bf16.mxu1 %v25392_v52  ;;  %v25377_v52 = vld [vmem:[%s31262_s1 + $0x58] sm:$0xff]  }
 0x1ec   : > { %1280 = vmatmul.mubr.bf16.gmra.mrb[80].mxu1 %v25394_v55 }
 0x21f   : > { %v1121_v60 = vpop.f32.mrb[0].mxu1 }
 0x220   : > { %v1123_v61 = vpop.f32.mrb[1].mxu1 }
 0x221   : > { %v1124_v31 = vpop.f32.mrb[2].mxu1 }
 0x222   : > { %v26600_v32 = vpack.c.bf16 %v1124_v31, %v1121_v60  ;;  %v1126_v62 = vpop.f32.mrb[3].mxu1  ;;  %v25381_v31 = vld [vmem:[%s31262_s1 + $0x60] sm:$0xff]  }
 0x224   : > { %1309 = vst [vmem:[#allocation2] sm:$0xff] %v26600_v32  ;;  %v1377_v63 = vshll.u32 %v26600_v32, 16  ;;  %v1375_v6 = vshrl.u32 %v26600_v32, 16 }
 0x226   : > { %v1379_v5 = vrot.slane %v1377_v63, 1 }
 0x227   : > { %v1129_v0 = vpop.f32.mrb[4].mxu1 }
 0x228   : > { %v1131_v1 = vpop.f32.mrb[5].mxu1  ;;  %v1380_v8 = vor.u32 %v1379_v5, %v1375_v6 }
 0x229   : > { %v1132_v2 = vpop.f32.mrb[6].mxu1 }
 0x22a   : > { %v26604_v3 = vpack.c.bf16 %v1132_v2, %v1129_v0  ;;  %v1134_v4 = vpop.f32.mrb[7].mxu1 }
 0x22c   : > { %1310 = vst [vmem:[#allocation2 + $0x8] sm:$0xff] %v26604_v3  ;;  %v1382_v7 = vshll.u32 %v26604_v3, 16  ;;  %v1386_v16 = vshrl.u32 %v26604_v3, 16  ;;  %v1717_v19 = vrot.slane %v26604_v3, 1 }
 0x22e   : > { %v1384_v9 = vrot.slane %v1382_v7, 1 }
 0x22f   : > { %v1137_v10 = vpop.f32.mrb[8].mxu1 }
 0x230   : > { %v1139_v11 = vpop.f32.mrb[9].mxu1  ;;  %v1385_v12 = vsel %vm1373_vm0, %v1380_v8, %v1384_v9  ;;  %v1388_v21 = vor.u32 %v1386_v16, %v1384_v9  ;;  %v25383_v9 = vld [vmem:[%s31262_s1 + $0x68] sm:$0xff]   ;;  %v25388_v16 = vld [vmem:[%s31262_s1 + $0x70] sm:$0xff]  }
 0x231   : > { %v1140_v13 = vpop.f32.mrb[10].mxu1  ;;  %21849 = vmatprep.mubr.bf16.mxu0 %v1385_v12 }
 0x232   : > { %v26610_v14 = vpack.c.bf16 %v1140_v13, %v1137_v10  ;;  %v1142_v15 = vpop.f32.mrb[11].mxu1 }
 0x234   : > { %1311 = vst [vmem:[#allocation2 + $0x10] sm:$0xff] %v26610_v14  ;;  %v1390_v17 = vshll.u32 %v26610_v14, 16  ;;  %v1394_v18 = vshrl.u32 %v26610_v14, 16  ;;  %v26618_v20 = vrot.slane %v26610_v14, 1  ;;  %v31277_v46 = vrot.slane %v26610_v14, 2 }
 0x236   : > { %v1392_v22 = vrot.slane %v1390_v17, 1  ;;  %v26624_v23 = vsel %vm1715_vm1, %v1717_v19, %v26618_v20  ;;  %v2097_v25 = vrot.slane %v1394_v18, 1  ;;  %v2100_v33 = vrot.slane %v1390_v17, 2 }
 0x237   : > { %v1145_v26 = vpop.f32.mrb[12].mxu1 }
 0x238   : > { %v1147_v34 = vpop.f32.mrb[13].mxu1  ;;  %v1393_v35 = vsel %vm1373_vm0, %v1388_v21, %v1392_v22  ;;  %v26630_v37 = vor.u32 %v2100_v33, %v2097_v25  ;;  %v1396_v45 = vor.u32 %v1394_v18, %v1392_v22 }
 0x239   : > { %v1148_v36 = vpop.f32.mrb[14].mxu1  ;;  %21850 = vmatmul.mubr.bf16.vlgmr.msra.gmra.mrb[32].mxu0 %v1393_v35 }
 0x23a   : > { %v26632_v38 = vpack.c.bf16 %v1148_v36, %v1145_v26  ;;  %v1150_v39 = vpop.f32.mrb[15].mxu1  ;;  %21862 = vmatpush3.bf16.msra.mxu0 %v26543_v42 }
 0x23b   : > { %21863 = vmatprep.subr.bf16.mxu0 %v25372_v29 }
 0x23c   : > { %1312 = vst [vmem:[#allocation2 + $0x18] sm:$0xff] %v26632_v38  ;;  %v1398_v41 = vshll.u32 %v26632_v38, 16  ;;  %v1402_v43 = vshrl.u32 %v26632_v38, 16  ;;  %v1721_v44 = vrot.slane %v26632_v38, 1  ;;  %v2319_v47 = vrot.slane %v26632_v38, 2 }
 0x23e   : > { %v1400_v42 = vrot.slane %v1398_v41, 1  ;;  %21864 = vmatpush3.bf16.msra.mxu0 %v25372_v29  ;;  %v26646_v48 = vsel %vm1715_vm1, %v26618_v20, %v1721_v44  ;;  %v2106_v49 = vrot.slane %v1402_v43, 1  ;;  %v2109_v50 = vrot.slane %v1398_v41, 2 }
 0x23f   : > { %v1153_v51 = vpop.f32.mrb[16].mxu1  ;;  %21865 = vmatprep.subr.bf16.mxu0 %v25376_v40  ;;  %v26654_v53 = vsel %vm2315_vm2, %v31277_v46, %v2319_v47 }
 0x240   : > { %v1155_v54 = vpop.f32.mrb[17].mxu1  ;;  %v1401_v55 = vsel %vm1373_vm0, %v1396_v45, %v1400_v42  ;;  %v2110_v56 = vor.u32 %v2109_v50, %v2106_v49  ;;  %v1404_v2 = vor.u32 %v1402_v43, %v1400_v42 }
 0x241   : > { %v1156_v57 = vpop.f32.mrb[18].mxu1  ;;  %21853 = vmatprep.mubr.bf16.mxu0 %v1401_v55 }
 0x242   : > { %v26657_v58 = vpack.c.bf16 %v1156_v57, %v1153_v51  ;;  %v1158_v60 = vpop.f32.mrb[19].mxu1  ;;  %21866 = vmatpush3.bf16.msra.mxu0 %v25376_v40  ;;  %v26661_v61 = vsel %vm2085_vm3, %v26630_v37, %v2110_v56 }
 0x243   : > { %21867 = vmatprep.subr.bf16.mxu0 %v25377_v52  ;;  %v26689_v22 = vld [vmem:[#allocation2 + $0x18] sm:$0xff]  ;;  %v25395_v60 = vld [vmem:[%s31262_s1 + $0xc0] sm:$0xff]  }
 0x244   : > { %1313 = vst [vmem:[#allocation2 + $0x20] sm:$0xff] %v26657_v58  ;;  %v1406_v62 = vshll.u32 %v26657_v58, 16  ;;  %v1410_v63 = vshrl.u32 %v26657_v58, 16  ;;  %v1723_v0 = vrot.slane %v26657_v58, 1  ;;  %v2321_v1 = vrot.slane %v26657_v58, 2 }
 0x245   : > { %v31275_v36 = vrot.slane %v26689_v22, 3 }
 0x246   : > { %v1408_v4 = vrot.slane %v1406_v62, 1  ;;  %21868 = vmatpush3.bf16.msra.mxu0 %v25377_v52  ;;  %v26672_v5 = vsel %vm1715_vm1, %v1721_v44, %v1723_v0  ;;  %v2115_v6 = vrot.slane %v1410_v63, 1  ;;  %v2118_v7 = vrot.slane %v1406_v62, 2 }
 0x247   : > { %v1161_v8 = vpop.f32.mrb[20].mxu1  ;;  %21869 = vmatprep.subr.bf16.mxu0 %v25381_v31  ;;  %v26678_v10 = vsel %vm2315_vm2, %v2319_v47, %v2321_v1  ;;  %v25390_v47 = vld [vmem:[%s31262_s1 + $0x78] sm:$0xff]  }
 0x248   : > { %v1163_v11 = vpop.f32.mrb[21].mxu1  ;;  %v1409_v12 = vsel %vm1373_vm0, %v1404_v2, %v1408_v4  ;;  %v2119_v13 = vor.u32 %v2118_v7, %v2115_v6  ;;  %v1412_v35 = vor.u32 %v1410_v63, %v1408_v4 }
 0x249   : > { %v1164_v15 = vpop.f32.mrb[22].mxu1  ;;  %21854 = vmatmul.mubr.bf16.gmra.mrb[36].mxu0 %v1409_v12 }
 0x24a   : > { %v26684_v17 = vpack.c.bf16 %v1164_v15, %v1161_v8  ;;  %v1166_v18 = vpop.f32.mrb[23].mxu1  ;;  %21870 = vmatpush3.bf16.msra.mxu0 %v25381_v31  ;;  %v26687_v21 = vsel %vm2085_vm3, %v2110_v56, %v2119_v13 }
 0x24b   : > { %21871 = vmatprep.subr.bf16.mxu0 %v25383_v9  ;;  %v2478_v25 = vld [vmem:[#allocation2 + $0x20] sm:$0xff] }
 0x24c   : > { %1314 = vst [vmem:[#allocation2 + $0x28] sm:$0xff] %v26684_v17  ;;  %v1414_v26 = vshll.u32 %v26684_v17, 16  ;;  %v1418_v29 = vshrl.u32 %v26684_v17, 16  ;;  %v26695_v33 = vrot.slane %v26684_v17, 1  ;;  %v2323_v34 = vrot.slane %v26684_v17, 2 }
 0x24d   : > { %v2919_v39 = vrot.slane %v2478_v25, 3 }
 0x24e   : > { %v1416_v40 = vrot.slane %v1414_v26, 1  ;;  %21872 = vmatpush3.bf16.msra.mxu0 %v25383_v9  ;;  %v26701_v41 = vsel %vm1715_vm1, %v1723_v0, %v26695_v33  ;;  %v2124_v43 = vrot.slane %v1418_v29, 1  ;;  %v2127_v44 = vrot.slane %v1414_v26, 2 }
 0x24f   : > { %v1169_v45 = vpop.f32.mrb[24].mxu1  ;;  %21873 = vmatprep.subr.bf16.mxu0 %v25388_v16  ;;  %v26707_v42 = vsel %vm2315_vm2, %v2321_v1, %v2323_v34  ;;  %v26713_v52 = vsel %vm2915_vm4, %v31275_v36, %v2919_v39 }
 0x250   : > { %v1171_v49 = vpop.f32.mrb[25].mxu1  ;;  %v1417_v50 = vsel %vm1373_vm0, %v1412_v35, %v1416_v40  ;;  %v2128_v51 = vor.u32 %v2127_v44, %v2124_v43 }
 0x251   : > { %v1172_v54 = vpop.f32.mrb[26].mxu1  ;;  %21857 = vmatprep.mubr.bf16.mxu0 %v1417_v50 }
 0x252   : > { %v26715_v55 = vpack.c.bf16 %v1172_v54, %v1169_v45  ;;  %v1174_v56 = vpop.f32.mrb[27].mxu1  ;;  %21874 = vmatpush3.bf16.msra.mxu0 %v25388_v16  ;;  %v26718_v57 = vsel %vm2085_vm3, %v2119_v13, %v2128_v51 }
 0x253   : > { %21875 = vmatprep.subr.bf16.mxu0 %v25390_v47  ;;  %v2479_v31 = vld [vmem:[#allocation2 + $0x28] sm:$0xff] }
 0x254   : > { %1315 = vst [vmem:[#allocation2 + $0x30] sm:$0xff] %v26715_v55  ;;  %v3172_v62 = vshrl.u32 %v26715_v55, 16  ;;  %v3174_v63 = vshll.u32 %v26715_v55, 16  ;;  %v31278_v0 = vrot.slane %v26715_v55, 1  ;;  %v31276_v1 = vrot.slane %v26715_v55, 2 }
 0x255   : > { %v2921_v2 = vrot.slane %v2479_v31, 3 }
 0x256   : > { %21876 = vmatpush3.bf16.msra.mxu0 %v25390_v47  ;;  %v26732_v4 = vsel %vm1715_vm1, %v26695_v33, %v31278_v0  ;;  %v2133_v6 = vrot.slane %v3172_v62, 1  ;;  %v2136_v7 = vrot.slane %v3174_v63, 2  ;;  %v26737_v9 = vsel %vm2315_vm2, %v2323_v34, %v31276_v1 }
 0x257   : > { %v1177_v8 = vpop.f32.mrb[28].mxu1  ;;  %21889 = vmatprep.subr.bf16.mxu0 %v25395_v60  ;;  %v26742_v13 = vsel %vm2915_vm4, %v2919_v39, %v2921_v2  ;;  %v3176_v25 = vrot.slane %v3174_v63, 1  ;;  %v1420_v39 = vor.u32 %v1418_v29, %v1416_v40 }
 0x258   : > { %v1179_v11 = vpop.f32.mrb[29].mxu1  ;;  %v26739_v12 = vor.u32 %v2136_v7, %v2133_v6 }
 0x259   : > { %v1180_v15 = vpop.f32.mrb[30].mxu1  ;;  %v3177_v47 = vor.u32 %v3176_v25, %v3172_v62 }
 0x25a   : > { %v26744_v16 = vpack.c.bf16 %v1180_v15, %v1177_v8  ;;  %v1182_v18 = vpop.f32.mrb[31].mxu1  ;;  %v26748_v26 = vsel %vm2085_vm3, %v2128_v51, %v26739_v12 }
 0x25b   : > { %v26750_v35 = vld [vmem:[#allocation2 + $0x30] sm:$0x1] }
 0x25c   : > { %1316 = vst [vmem:[#allocation2 + $0x38] sm:$0xff] %v26744_v16  ;;  %v1422_v34 = vshll.u32 %v26750_v35, 16  ;;  %v3179_v43 = vshll.u32 %v26744_v16, 16  ;;  %v26755_v44 = vld [vmem:[#allocation2 + $0x30] sm:$0xff]  ;;  %v3183_v63 = vshrl.u32 %v26744_v16, 16  ;;  %v31279_v11 = vrot.slane %v26744_v16, 1 }
 0x25d   : > { %v2923_v54 = vrot.slane %v26755_v44, 3 }
 0x25e   : > { %v1424_v45 = vrot.slane %v1422_v34, 1  ;;  %v3181_v49 = vrot.slane %v3179_v43, 1 }
 0x25f   : > { %v1185_v50 = vpop.f32.mrb[32].mxu1  ;;  %v26762_v7 = vsel %vm2915_vm4, %v2921_v2, %v2923_v54  ;;  %v25397_v2 = vld [vmem:[%s31262_s1 + $0xc8] sm:$0xff]  }
 0x260   : > { %v1425_v51 = vsel %vm1373_vm0, %v1420_v39, %v1424_v45  ;;  %v1187_v56 = vpop.f32.mrb[33].mxu1  ;;  %v3182_v31 = vsel %vm1373_vm0, %v3177_v47, %v3181_v49  ;;  %v3185_v62 = vor.u32 %v3183_v63, %v3181_v49  ;;  %v25406_v39 = vld [vmem:[%s31262_s1 + $0x48] sm:$0xff]  }
 0x261   : > { %21858 = vmatmul.mubr.bf16.gmra.mrb[40].mxu0 %v1425_v51  ;;  %v1188_v6 = vpop.f32.mrb[34].mxu1  ;;  %22101 = vmatprep.mubr.bf16.mxu1 %v3182_v31  ;;  %v25399_v56 = vld [vmem:[%s31262_s1 + $0xd0] sm:$0xff]  }
 0x262   : > { %21877 = vmatprep.mubr.bf16.mxu0 %v26600_v32  ;;  %v26765_v29 = vpack.c.bf16 %v1188_v6, %v1185_v50  ;;  %v1190_v40 = vpop.f32.mrb[35].mxu1 }
 0x264   : > { %1317 = vst [vmem:[#allocation2 + $0x40] sm:$0xff] %v26765_v29  ;;  %v3187_v8 = vshll.u32 %v26765_v29, 16  ;;  %v26771_v15 = vrot.slane %v26765_v29, 1  ;;  %v3191_v25 = vshrl.u32 %v26765_v29, 16 }
 0x266   : > { %v3189_v18 = vrot.slane %v3187_v8, 1  ;;  %v26778_v32 = vsel %vm1715_vm1, %v31279_v11, %v26771_v15  ;;  %v3889_v45 = vrot.slane %v3191_v25, 1  ;;  %v3892_v49 = vrot.slane %v3187_v8, 2 }
 0x267   : > { %v1193_v34 = vpop.f32.mrb[36].mxu1 }
 0x268   : > { %v1195_v43 = vpop.f32.mrb[37].mxu1  ;;  %v3190_v44 = vsel %vm1373_vm0, %v3185_v62, %v3189_v18  ;;  %v26795_v31 = vor.u32 %v3892_v49, %v3889_v45  ;;  %v3193_v63 = vor.u32 %v3191_v25, %v3189_v18  ;;  %v26803_v62 = vld [vmem:[#allocation2 + $0x38] sm:$0xff] }
 0x269   : > { %21878 = vmatmul.mubr.bf16.vlgmr.msra.gmra.mrb[32].mxu0 %v26604_v3  ;;  %v1196_v47 = vpop.f32.mrb[38].mxu1  ;;  %22102 = vmatmul.mubr.bf16.vlgmr.msra.gmra.mrb[84].mxu1 %v3190_v44  ;;  %v31274_v18 = vrot.slane %v26803_v62, 3 }
 0x26a   : > { %21890 = vmatpush3.bf16.msra.mxu0 %v25395_v60  ;;  %21881 = vmatprep.mubr.bf16.mxu0 %v26610_v14  ;;  %v26789_v50 = vpack.c.bf16 %v1196_v47, %v1193_v34  ;;  %v1198_v51 = vpop.f32.mrb[39].mxu1  ;;  %v25408_v60 = vld [vmem:[%s31262_s1 + $0x50] sm:$0xff]   ;;  %v25401_v34 = vld [vmem:[%s31262_s1 + $0xd8] sm:$0xff]  }
 0x26b   : > { %21891 = vmatprep.subr.bf16.mxu0 %v25397_v2  ;;  %22114 = vmatpush3.bf16.msra.mxu1 %v26597_v59 }
 0x26c   : > { %1318 = vst [vmem:[#allocation2 + $0x48] sm:$0xff] %v26789_v50  ;;  %22115 = vmatprep.subr.bf16.mxu1 %v25406_v39  ;;  %v3195_v6 = vshll.u32 %v26789_v50, 16  ;;  %v3516_v40 = vrot.slane %v26789_v50, 1  ;;  %v3199_v45 = vshrl.u32 %v26789_v50, 16 }
 0x26e   : > { %21892 = vmatpush3.bf16.msra.mxu0 %v25397_v2  ;;  %v3197_v8 = vrot.slane %v3195_v6, 1  ;;  %v26807_v59 = vsel %vm1715_vm1, %v26771_v15, %v3516_v40  ;;  %v25410_v2 = vld [vmem:[%s31262_s1 + $0x58] sm:$0xff]  }
 0x26f   : > { %21893 = vmatprep.subr.bf16.mxu0 %v25399_v56  ;;  %v1201_v43 = vpop.f32.mrb[40].mxu1  ;;  %22116 = vmatpush3.bf16.msra.mxu1 %v25406_v39  ;;  %v26822_v39 = vsel %vm2915_vm4, %v2923_v54, %v31274_v18  ;;  %v3898_v18 = vrot.slane %v3199_v45, 1 }
 0x270   : > { %v1203_v25 = vpop.f32.mrb[41].mxu1  ;;  %22117 = vmatprep.subr.bf16.mxu1 %v25408_v60  ;;  %v3198_v44 = vsel %vm1373_vm0, %v3193_v63, %v3197_v8  ;;  %v25403_v63 = vld [vmem:[%s31262_s1 + $0xe0] sm:$0xff]   ;;  %v3201_v54 = vor.u32 %v3199_v45, %v3197_v8  ;;  %v25407_v45 = vld [vmem:[%s31262_s1 + $0xf0] sm:$0xff]  }
 0x271   : > { %21882 = vmatmul.mubr.bf16.gmra.mrb[36].mxu0 %v26632_v38  ;;  %v1204_v47 = vpop.f32.mrb[42].mxu1  ;;  %22105 = vmatprep.mubr.bf16.mxu1 %v3198_v44  ;;  %v1690_v25 = vld [vmem:[#allocation2] sm:$0xfe] }
 0x272   : > { %21894 = vmatpush3.bf16.msra.mxu0 %v25399_v56  ;;  %21885 = vmatprep.mubr.bf16.mxu0 %v26657_v58  ;;  %v26825_v49 = vpack.c.bf16 %v1204_v47, %v1201_v43  ;;  %v1206_v51 = vpop.f32.mrb[43].mxu1  ;;  %v25412_v38 = vld [vmem:[%s31262_s1 + $0x60] sm:$0xff]   ;;  %v1716_v43 = vrot.slane %v1690_v25, 1  ;;  %v25414_v25 = vld [vmem:[%s31262_s1 + $0x68] sm:$0xff]  }
 0x273   : > { %21895 = vmatprep.subr.bf16.mxu0 %v25401_v34  ;;  %22118 = vmatpush3.bf16.msra.mxu1 %v25408_v60  ;;  %v25405_v51 = vld [vmem:[%s31262_s1 + $0xe8] sm:$0xff]  }
 0x274   : > { %1319 = vst [vmem:[#allocation2 + $0x50] sm:$0xff] %v26825_v49  ;;  %22119 = vmatprep.subr.bf16.mxu1 %v25410_v2  ;;  %v3203_v58 = vshll.u32 %v26825_v49, 16  ;;  %v3518_v56 = vrot.slane %v26825_v49, 1  ;;  %v1718_v36 = vsel %vm1715_vm1, %v1716_v43, %v1717_v19  ;;  %v25409_v43 = vld [vmem:[%s31262_s1 + $0xf8] sm:$0xff]  }
 0x276   : > { %21896 = vmatpush3.bf16.msra.mxu0 %v25401_v34  ;;  %v3205_v44 = vrot.slane %v3203_v58, 1  ;;  %v26837_v47 = vsel %vm1715_vm1, %v3516_v40, %v3518_v56  ;;  %v3207_v34 = vshrl.u32 %v26825_v49, 16  ;;  %v3901_v40 = vrot.slane %v3195_v6, 2 }
 0x277   : > { %21897 = vmatprep.subr.bf16.mxu0 %v25403_v63  ;;  %v1209_v60 = vpop.f32.mrb[44].mxu1  ;;  %22120 = vmatpush3.bf16.msra.mxu1 %v25410_v2 }
 0x278   : > { %v1211_v24 = vpop.f32.mrb[45].mxu1  ;;  %22121 = vmatprep.subr.bf16.mxu1 %v25412_v38  ;;  %v3206_v8 = vsel %vm1373_vm0, %v3201_v54, %v3205_v44  ;;  %v3902_v54 = vor.u32 %v3901_v40, %v3898_v18  ;;  %v3209_v3 = vor.u32 %v3207_v34, %v3205_v44  ;;  %v3907_v44 = vrot.slane %v3207_v34, 1 }
 0x279   : > { %21886 = vmatmul.mubr.bf16.gmra.mrb[40].mxu0 %v26684_v17  ;;  %v1212_v1 = vpop.f32.mrb[46].mxu1  ;;  %22106 = vmatmul.mubr.bf16.gmra.mrb[88].mxu1 %v3206_v8  ;;  %v25416_v17 = vld [vmem:[%s31262_s1 + $0x70] sm:$0xff]  }
 0x27a   : > { %21898 = vmatpush3.bf16.msra.mxu0 %v25403_v63  ;;  %21905 = vmatprep.mubr.bf16.mxu0 %v1718_v36  ;;  %v26851_v24 = vpack.c.bf16 %v1212_v1, %v1209_v60  ;;  %v1214_v2 = vpop.f32.mrb[47].mxu1  ;;  %v26866_v1 = vsel %vm2085_vm3, %v26795_v31, %v3902_v54  ;;  %v3910_v60 = vrot.slane %v3203_v58, 2  ;;  %v25411_v58 = vld [vmem:[%s31262_s1 + $0x100] sm:$0xff]  }
 0x27b   : > { %21899 = vmatprep.subr.bf16.mxu0 %v25405_v51  ;;  %22122 = vmatpush3.bf16.msra.mxu1 %v25412_v38 }
 0x27c   : > { %1320 = vst [vmem:[#allocation2 + $0x58] sm:$0xff] %v26851_v24  ;;  %22123 = vmatprep.subr.bf16.mxu1 %v25414_v25  ;;  %v3211_v19 = vshll.u32 %v26851_v24, 16  ;;  %v26862_v36 = vrot.slane %v26851_v24, 1  ;;  %v3215_v18 = vshrl.u32 %v26851_v24, 16  ;;  %v3911_v0 = vor.u32 %v3910_v60, %v3907_v44 }
 0x27e   : > { %21900 = vmatpush3.bf16.msra.mxu0 %v25405_v51  ;;  %v3213_v6 = vrot.slane %v3211_v19, 1  ;;  %v26871_v63 = vsel %vm1715_vm1, %v3518_v56, %v26862_v36  ;;  %v25418_v51 = vld [vmem:[%s31262_s1 + $0x78] sm:$0xff]   ;;  %v3916_v2 = vrot.slane %v3215_v18, 1  ;;  %v3919_v56 = vrot.slane %v3211_v19, 2 }
 0x27f   : > { %v1217_v38 = vpop.f32.mrb[48].mxu1  ;;  %21901 = vmatprep.subr.bf16.mxu0 %v25407_v45  ;;  %22124 = vmatpush3.bf16.msra.mxu1 %v25414_v25  ;;  %v26886_v34 = vsel %vm2085_vm3, %v3902_v54, %v3911_v0 }
 0x280   : > { %v1219_v8 = vpop.f32.mrb[49].mxu1  ;;  %v3214_v40 = vsel %vm1373_vm0, %v3209_v3, %v3213_v6  ;;  %22125 = vmatprep.subr.bf16.mxu1 %v25416_v17  ;;  %v3920_v25 = vor.u32 %v3919_v56, %v3916_v2 }
 0x281   : > { %v1220_v46 = vpop.f32.mrb[50].mxu1  ;;  %22109 = vmatprep.mubr.bf16.mxu1 %v3214_v40 }
 0x282   : > { %v26880_v11 = vpack.c.bf16 %v1220_v46, %v1217_v38  ;;  %21902 = vmatpush3.bf16.msra.mxu0 %v25407_v45  ;;  %v1222_v27 = vpop.f32.mrb[51].mxu1  ;;  %v25420_v46 = vld [vmem:[%s31262_s1 + $0xc0] sm:$0xff]  }
 0x283   : > { %21903 = vmatprep.subr.bf16.mxu0 %v25409_v43  ;;  %22126 = vmatpush3.bf16.msra.mxu1 %v25416_v17  ;;  %v26894_v27 = vsel %vm2085_vm3, %v3911_v0, %v3920_v25  ;;  %v25413_v17 = vld [vmem:[%s31262_s1 + $0x108] sm:$0xff]  }
 0x284   : > { %1321 = vst [vmem:[#allocation2 + $0x60] sm:$0xff] %v26880_v11  ;;  %22127 = vmatprep.subr.bf16.mxu1 %v25418_v51  ;;  %v3710_v45 = vrot.slane %v26880_v11, 1  ;;  %v3923_v3 = vshrl.u32 %v26880_v11, 16  ;;  %v3926_v19 = vshll.u32 %v26880_v11, 16 }
 0x286   : > { %21904 = vmatpush3.bf16.msra.mxu0 %v25409_v43  ;;  %v26902_v54 = vsel %vm1715_vm1, %v26862_v36, %v3710_v45  ;;  %v3925_v0 = vrot.slane %v3923_v3, 1  ;;  %v3928_v44 = vrot.slane %v3926_v19, 2 }
 0x287   : > { %21917 = vmatprep.subr.bf16.mxu0 %v25411_v58  ;;  %22128 = vmatpush3.bf16.msra.mxu1 %v25418_v51  ;;  %v1225_v38 = vpop.f32.mrb[52].mxu1  ;;  %v25415_v51 = vld [vmem:[%s31262_s1 + $0x110] sm:$0xff]  }
 0x288   : > { %22141 = vmatprep.subr.bf16.mxu1 %v25420_v46  ;;  %v1227_v60 = vpop.f32.mrb[53].mxu1  ;;  %v26908_v8 = vor.u32 %v3928_v44, %v3925_v0  ;;  %v25421_v44 = vld [vmem:[%s31262_s1 + $0x128] sm:$0xff]  }
 0x289   : > { %21906 = vmatmul.mubr.bf16.vlgmr.msra.gmra.mrb[32].mxu0 %v26624_v23  ;;  %v1228_v43 = vpop.f32.mrb[54].mxu1  ;;  %v3217_v23 = vor.u32 %v3215_v18, %v3213_v6  ;;  %v25419_v6 = vld [vmem:[%s31262_s1 + $0x120] sm:$0xff]   ;;  %v1727_v18 = vrot.slane %v26750_v35, 1  ;;  %v4107_v35 = vrot.slane %v26765_v29, 2 }
 0x28a   : > { %21909 = vmatprep.mubr.bf16.mxu0 %v26646_v48  ;;  %21918 = vmatpush3.bf16.msra.mxu0 %v25411_v58  ;;  %v1301_v40 = vpack.c.bf16 %v1228_v43, %v1225_v38  ;;  %v1230_v2 = vpop.f32.mrb[55].mxu1  ;;  %v26918_v3 = vsel %vm2085_vm3, %v3920_v25, %v26908_v8  ;;  %v25417_v58 = vld [vmem:[%s31262_s1 + $0x118] sm:$0xff]   ;;  %v26927_v25 = vld [vmem:[#allocation2 + $0x8] sm:$0xfe] }
 0x28b   : > { %21919 = vmatprep.subr.bf16.mxu0 %v25413_v17  ;;  %v26914_v56 = vld [vmem:[#allocation2 + $0x60] sm:$0x1]  ;;  %v1728_v60 = vsel %vm1715_vm1, %v26695_v33, %v1727_v18  ;;  %v25422_v43 = vld [vmem:[%s31262_s1 + $0xc8] sm:$0xff]   ;;  %v4109_v2 = vrot.slane %v26789_v50, 2  ;;  %v25423_v33 = vld [vmem:[%s31262_s1 + $0x130] sm:$0xff]  }
 0x28c   : > { %v3219_v19 = vshll.u32 %v26914_v56, 16  ;;  %1322 = vst [vmem:[#allocation2 + $0x68] sm:$0xff] %v1301_v40 }
 0x28e   : > { %21920 = vmatpush3.bf16.msra.mxu0 %v25413_v17  ;;  %v3221_v0 = vrot.slane %v3219_v19, 1  ;;  %v1907_v17 = vrot.slane %v26927_v25, 1  ;;  %v4111_v19 = vrot.slane %v26825_v49, 2 }
 0x28f   : > { %21921 = vmatprep.subr.bf16.mxu0 %v25415_v51 }
 0x290   : > { %v3222_v38 = vsel %vm1373_vm0, %v3217_v23, %v3221_v0  ;;  %v1909_v40 = vsel %vm1715_vm1, %v1907_v17, %v26618_v20  ;;  %v25424_v20 = vld [vmem:[%s31262_s1 + $0xd0] sm:$0xff]   ;;  %v25426_v23 = vld [vmem:[%s31262_s1 + $0xd8] sm:$0xff]   ;;  %v4113_v0 = vrot.slane %v26851_v24, 2  ;;  %v25429_v17 = vld [vmem:[%s31262_s1 + $0x148] sm:$0xff]  }
 0x291   : > { %21910 = vmatmul.mubr.bf16.gmra.mrb[36].mxu0 %v26672_v5  ;;  %22110 = vmatmul.mubr.bf16.gmra.mrb[92].mxu1 %v3222_v38  ;;  %v25427_v38 = vld [vmem:[%s31262_s1 + $0x140] sm:$0xff]  }
 0x292   : > { %21913 = vmatprep.mubr.bf16.mxu0 %v26701_v41  ;;  %21922 = vmatpush3.bf16.msra.mxu0 %v25415_v51  ;;  %v26958_v51 = vsel %vm2315_vm2, %v4107_v35, %v4109_v2  ;;  %v26977_v18 = vsel %vm2315_vm2, %v4111_v19, %v4113_v0 }
 0x293   : > { %22129 = vmatprep.mubr.bf16.mxu1 %v26715_v55  ;;  %21923 = vmatprep.subr.bf16.mxu0 %v25417_v58 }
 0x296   : > { %21924 = vmatpush3.bf16.msra.mxu0 %v25417_v58  ;;  %v26971_v58 = vsel %vm2315_vm2, %v4109_v2, %v4111_v19 }
 0x297   : > { %21925 = vmatprep.subr.bf16.mxu0 %v25419_v6 }
 0x299   : > { %21914 = vmatmul.mubr.bf16.gmra.mrb[40].mxu0 %v1728_v60  ;;  %22130 = vmatmul.mubr.bf16.vlgmr.msra.gmra.mrb[84].mxu1 %v26744_v16  ;;  %v4115_v60 = vrot.slane %v26880_v11, 2 }
 0x29a   : > { %21926 = vmatpush3.bf16.msra.mxu0 %v25419_v6  ;;  %21933 = vmatprep.mubr.bf16.mxu0 %v1909_v40  ;;  %v3487_v6 = vld [vmem:[#allocation2 + $0x30] sm:$0xfe] }
 0x29b   : > { %22142 = vmatpush3.bf16.msra.mxu1 %v25420_v46  ;;  %21927 = vmatprep.subr.bf16.mxu0 %v25421_v44  ;;  %v25425_v46 = vld [vmem:[%s31262_s1 + $0x138] sm:$0xff]   ;;  %v26998_v2 = vsel %vm2315_vm2, %v4113_v0, %v4115_v60 }
 0x29c   : > { %22143 = vmatprep.subr.bf16.mxu1 %v25422_v43  ;;  %22133 = vmatprep.mubr.bf16.mxu1 %v26765_v29 }
 0x29e   : > { %21928 = vmatpush3.bf16.msra.mxu0 %v25421_v44  ;;  %v25430_v44 = vld [vmem:[%s31262_s1 + $0xe8] sm:$0xff]  }
 0x29f   : > { %22144 = vmatpush3.bf16.msra.mxu1 %v25422_v43  ;;  %21929 = vmatprep.subr.bf16.mxu0 %v25423_v33  ;;  %v31321_v43 = vrot.slane %v26744_v16, 1  ;;  %v2087_v16 = vshrl.u32 %v26927_v25, 16 }
 0x2a0   : > { %22145 = vmatprep.subr.bf16.mxu1 %v25424_v20 }
 0x2a1   : > { %22134 = vmatmul.mubr.bf16.gmra.mrb[88].mxu1 %v26789_v50  ;;  %v25428_v50 = vld [vmem:[%s31262_s1 + $0xe0] sm:$0xff]  }
 0x2a2   : > { %21930 = vmatpush3.bf16.msra.mxu0 %v25423_v33  ;;  %22137 = vmatprep.mubr.bf16.mxu1 %v26825_v49  ;;  %v3511_v49 = vrot.slane %v3487_v6, 1  ;;  %v25433_v33 = vld [vmem:[%s31262_s1 + $0x158] sm:$0xff]  }
 0x2a3   : > { %22146 = vmatpush3.bf16.msra.mxu1 %v25424_v20  ;;  %21931 = vmatprep.subr.bf16.mxu0 %v25425_v46  ;;  %v25434_v20 = vld [vmem:[%s31262_s1 + $0xf8] sm:$0xff]  }
 0x2a4   : > { %22147 = vmatprep.subr.bf16.mxu1 %v25426_v23  ;;  %v3513_v40 = vsel %vm1715_vm1, %v3511_v49, %v31321_v43  ;;  %v25438_v49 = vld [vmem:[%s31262_s1 + $0x108] sm:$0xff]  }
 0x2a5   : > { %v27034_v43 = vld [vmem:[#allocation2 + $0x48] sm:$0xff] }
 0x2a6   : > { %21932 = vmatpush3.bf16.msra.mxu0 %v25425_v46  ;;  %v1882_v46 = vld [vmem:[#allocation2 + $0x38] sm:$0x1] }
 0x2a7   : > { %22148 = vmatpush3.bf16.msra.mxu1 %v25426_v23  ;;  %21945 = vmatprep.subr.bf16.mxu0 %v25427_v38  ;;  %v2089_v23 = vrot.slane %v2087_v16, 1  ;;  %v1918_v0 = vrot.slane %v1882_v46, 1  ;;  %v4702_v16 = vrot.slane %v27034_v43, 3  ;;  %v25441_v46 = vld [vmem:[%s31262_s1 + $0x178] sm:$0xff]  }
 0x2a8   : > { %22149 = vmatprep.subr.bf16.mxu1 %v25428_v50 }
 0x2a9   : > { %21934 = vmatmul.mubr.bf16.vlgmr.msra.gmra.mrb[32].mxu0 %v26646_v48  ;;  %22138 = vmatmul.mubr.bf16.gmra.mrb[92].mxu1 %v26851_v24  ;;  %v25431_v48 = vld [vmem:[%s31262_s1 + $0x150] sm:$0xff]   ;;  %v2090_v24 = vshll.u32 %v26927_v25, 16  ;;  %v25435_v25 = vld [vmem:[%s31262_s1 + $0x160] sm:$0xff]  }
 0x2aa   : > { %21937 = vmatprep.mubr.bf16.mxu0 %v26672_v5  ;;  %21946 = vmatpush3.bf16.msra.mxu0 %v25427_v38  ;;  %v25432_v5 = vld [vmem:[%s31262_s1 + $0xf0] sm:$0xff]   ;;  %v25436_v38 = vld [vmem:[%s31262_s1 + $0x100] sm:$0xff]  }
 0x2ab   : > { %22150 = vmatpush3.bf16.msra.mxu1 %v25428_v50  ;;  %22157 = vmatprep.mubr.bf16.mxu1 %v3513_v40  ;;  %v2092_v19 = vrot.slane %v2090_v24, 2  ;;  %v25437_v50 = vld [vmem:[%s31262_s1 + $0x168] sm:$0xff]  }
 0x2ac   : > { %21947 = vmatprep.subr.bf16.mxu0 %v25429_v17  ;;  %22151 = vmatprep.subr.bf16.mxu1 %v25430_v44 }
 0x2ae   : > { %21948 = vmatpush3.bf16.msra.mxu0 %v25429_v17  ;;  %v1233_v17 = vpop.f32.mrb[56].mxu1 }
 0x2af   : > { %22152 = vmatpush3.bf16.msra.mxu1 %v25430_v44  ;;  %21949 = vmatprep.subr.bf16.mxu0 %v25431_v48  ;;  %v1235_v40 = vpop.f32.mrb[57].mxu1 }
 0x2b0   : > { %22153 = vmatprep.subr.bf16.mxu1 %v25432_v5 }
 0x2b1   : > { %21938 = vmatmul.mubr.bf16.gmra.mrb[36].mxu0 %v26701_v41  ;;  %v2093_v41 = vor.u32 %v2092_v19, %v2089_v23  ;;  %v25442_v19 = vld [vmem:[%s31262_s1 + $0x118] sm:$0xff]  }
 0x2b2   : > { %21941 = vmatprep.mubr.bf16.mxu0 %v26732_v4  ;;  %21950 = vmatpush3.bf16.msra.mxu0 %v25431_v48  ;;  %v31322_v4 = vrot.slane %v26715_v55, 1  ;;  %v25439_v48 = vld [vmem:[%s31262_s1 + $0x170] sm:$0xff]  }
 0x2b3   : > { %22154 = vmatpush3.bf16.msra.mxu1 %v25432_v5  ;;  %21951 = vmatprep.subr.bf16.mxu0 %v25433_v33  ;;  %v2102_v44 = vsel %vm2085_vm3, %v2093_v41, %v26630_v37  ;;  %v27039_v5 = vld [vmem:[#allocation2 + $0x50] sm:$0xff]  ;;  %v1236_v37 = vpop.f32.mrb[58].mxu1  ;;  %v27072_v41 = vld [vmem:[#allocation2 + $0x38] sm:$0xfe] }
 0x2b4   : > { %22155 = vmatprep.subr.bf16.mxu1 %v25434_v20  ;;  %v1919_v6 = vsel %vm1715_vm1, %v31322_v4, %v1918_v0  ;;  %v31283_v24 = vrot.slane %v27039_v5, 3  ;;  %v3522_v0 = vrot.slane %v26914_v56, 1  ;;  %v25445_v56 = vld [vmem:[%s31262_s1 + $0x188] sm:$0xff]  }
 0x2b6   : > { %21952 = vmatpush3.bf16.msra.mxu0 %v25433_v33  ;;  %v27047_v33 = vpack.c.bf16 %v1236_v37, %v1233_v17  ;;  %v27057_v23 = vsel %vm2915_vm4, %v4702_v16, %v31283_v24  ;;  %v3523_v4 = vsel %vm1715_vm1, %v26862_v36, %v3522_v0  ;;  %v25448_v17 = vld [vmem:[%s31262_s1 + $0x130] sm:$0xff]  }
 0x2b7   : > { %22156 = vmatpush3.bf16.msra.mxu1 %v25434_v20  ;;  %21953 = vmatprep.subr.bf16.mxu0 %v25435_v25  ;;  %v1238_v20 = vpop.f32.mrb[59].mxu1 }
 0x2b8   : > { %22169 = vmatprep.subr.bf16.mxu1 %v25436_v38  ;;  %1323 = vst [vmem:[#allocation2 + $0x70] sm:$0xff] %v27047_v33 }
 0x2b9   : > { %21942 = vmatmul.mubr.bf16.gmra.mrb[40].mxu0 %v1919_v6  ;;  %v3701_v6 = vrot.slane %v27072_v41, 1 }
 0x2ba   : > { %22158 = vmatmul.mubr.bf16.vlgmr.msra.gmra.mrb[84].mxu1 %v26778_v32  ;;  %21954 = vmatpush3.bf16.msra.mxu0 %v25435_v25  ;;  %v25440_v32 = vld [vmem:[%s31262_s1 + $0x110] sm:$0xff]   ;;  %v25443_v25 = vld [vmem:[%s31262_s1 + $0x180] sm:$0xff]  }
 0x2bb   : > { %21961 = vmatprep.mubr.bf16.mxu0 %v2102_v44  ;;  %22170 = vmatpush3.bf16.msra.mxu1 %v25436_v38  ;;  %v25444_v38 = vld [vmem:[%s31262_s1 + $0x120] sm:$0xff]   ;;  %v3703_v36 = vsel %vm1715_vm1, %v3701_v6, %v26771_v15  ;;  %v25449_v15 = vld [vmem:[%s31262_s1 + $0x198] sm:$0xff]  }
 0x2bc   : > { %21955 = vmatprep.subr.bf16.mxu0 %v25437_v50  ;;  %22171 = vmatprep.subr.bf16.mxu1 %v25438_v49 }
 0x2bd   : > { %22161 = vmatprep.mubr.bf16.mxu1 %v26807_v59 }
 0x2be   : > { %21956 = vmatpush3.bf16.msra.mxu0 %v25437_v50  ;;  %v25446_v50 = vld [vmem:[%s31262_s1 + $0x128] sm:$0xff]  }
 0x2bf   : > { %22172 = vmatpush3.bf16.msra.mxu1 %v25438_v49  ;;  %21957 = vmatprep.subr.bf16.mxu0 %v25439_v48  ;;  %v27084_v49 = vld [vmem:[#allocation2 + $0x38] sm:$0x3] }
 0x2c0   : > { %22173 = vmatprep.subr.bf16.mxu1 %v25440_v32  ;;  %v2140_v44 = vshrl.u32 %v27084_v49, 16  ;;  %v2143_v40 = vshll.u32 %v27084_v49, 16 }
 0x2c2   : > { %22162 = vmatmul.mubr.bf16.gmra.mrb[88].mxu1 %v26837_v47  ;;  %21958 = vmatpush3.bf16.msra.mxu0 %v25439_v48  ;;  %v25450_v48 = vld [vmem:[%s31262_s1 + $0x138] sm:$0xff]   ;;  %v2145_v37 = vrot.slane %v2143_v40, 2 }
 0x2c3   : > { %22174 = vmatpush3.bf16.msra.mxu1 %v25440_v32  ;;  %21959 = vmatprep.subr.bf16.mxu0 %v25441_v46  ;;  %v2142_v32 = vrot.slane %v2140_v44, 1 }
 0x2c4   : > { %22175 = vmatprep.subr.bf16.mxu1 %v25442_v19  ;;  %22165 = vmatprep.mubr.bf16.mxu1 %v26871_v63 }
 0x2c6   : > { %21960 = vmatpush3.bf16.msra.mxu0 %v25441_v46  ;;  %v2295_v46 = vld [vmem:[#allocation2 + $0x8] sm:$0xfc] }
 0x2c7   : > { %22176 = vmatpush3.bf16.msra.mxu1 %v25442_v19  ;;  %21973 = vmatprep.subr.bf16.mxu0 %v25443_v25  ;;  %v2316_v6 = vrot.slane %v2295_v46, 2 }
 0x2c8   : > { %22177 = vmatprep.subr.bf16.mxu1 %v25444_v38 }
 0x2c9   : > { %21962 = vmatmul.mubr.bf16.vlgmr.msra.gmra.mrb[32].mxu0 %v26661_v61  ;;  %v25447_v61 = vld [vmem:[%s31262_s1 + $0x190] sm:$0xff]  }
 0x2ca   : > { %22166 = vmatmul.mubr.bf16.gmra.mrb[92].mxu1 %v3523_v4  ;;  %21965 = vmatprep.mubr.bf16.mxu0 %v26687_v21  ;;  %v1241_v21 = vpop.f32.mrb[60].mxu1  ;;  %v25451_v4 = vld [vmem:[%s31262_s1 + $0x1a0] sm:$0xff]  }
 0x2cb   : > { %21974 = vmatpush3.bf16.msra.mxu0 %v25443_v25  ;;  %22178 = vmatpush3.bf16.msra.mxu1 %v25444_v38  ;;  %v1243_v20 = vpop.f32.mrb[61].mxu1  ;;  %v2146_v38 = vor.u32 %v2145_v37, %v2142_v32  ;;  %v3879_v37 = vshrl.u32 %v27072_v41, 16 }
 0x2cc   : > { %22185 = vmatprep.mubr.bf16.mxu1 %v3703_v36  ;;  %21975 = vmatprep.subr.bf16.mxu0 %v25445_v56  ;;  %v1244_v19 = vpop.f32.mrb[62].mxu1  ;;  %v25454_v36 = vld [vmem:[%s31262_s1 + $0x148] sm:$0xff]   ;;  %v3882_v20 = vshll.u32 %v27072_v41, 16 }
 0x2cd   : > { %22179 = vmatprep.subr.bf16.mxu1 %v25446_v50  ;;  %v27105_v25 = vpack.c.bf16 %v1244_v19, %v1241_v21  ;;  %v1246_v0 = vpop.f32.mrb[63].mxu1  ;;  %v25458_v19 = vld [vmem:[%s31262_s1 + $0x158] sm:$0xff]  }
 0x2ce   : > { %v3677_v0 = vld [vmem:[#allocation2 + $0x68] sm:$0x1] }
 0x2cf   : > { %21976 = vmatpush3.bf16.msra.mxu0 %v25445_v56  ;;  %22180 = vmatpush3.bf16.msra.mxu1 %v25446_v50  ;;  %1324 = vst [vmem:[#allocation2 + $0x78] sm:$0xff] %v27105_v25  ;;  %v2147_v56 = vsel %vm2085_vm3, %v26739_v12, %v2146_v38  ;;  %v25453_v50 = vld [vmem:[%s31262_s1 + $0x1a8] sm:$0xff]   ;;  %v4976_v32 = vshrl.u32 %v27105_v25, 16 }
 0x2d0   : > { %21977 = vmatprep.subr.bf16.mxu0 %v25447_v61  ;;  %22181 = vmatprep.subr.bf16.mxu1 %v25448_v17 }
 0x2d1   : > { %21966 = vmatmul.mubr.bf16.gmra.mrb[36].mxu0 %v26718_v57  ;;  %v25452_v57 = vld [vmem:[%s31262_s1 + $0x140] sm:$0xff]  }
 0x2d2   : > { %21969 = vmatprep.mubr.bf16.mxu0 %v26748_v26  ;;  %v1249_v26 = vpop.f32.mrb[64].mxu1 }
 0x2d3   : > { %21978 = vmatpush3.bf16.msra.mxu0 %v25447_v61  ;;  %22182 = vmatpush3.bf16.msra.mxu1 %v25448_v17  ;;  %v1251_v61 = vpop.f32.mrb[65].mxu1  ;;  %v31323_v17 = vrot.slane %v26610_v14, 2  ;;  %v25456_v14 = vld [vmem:[%s31262_s1 + $0x150] sm:$0xff]  }
 0x2d4   : > { %21979 = vmatprep.subr.bf16.mxu0 %v25449_v15  ;;  %22183 = vmatprep.subr.bf16.mxu1 %v25450_v48  ;;  %v1252_v12 = vpop.f32.mrb[66].mxu1  ;;  %v3884_v61 = vrot.slane %v3882_v20, 2 }
 0x2d5   : > { %v2318_v44 = vsel %vm2315_vm2, %v2316_v6, %v31323_v17  ;;  %v27126_v40 = vpack.c.bf16 %v1252_v12, %v1249_v26  ;;  %v1254_v21 = vpop.f32.mrb[67].mxu1  ;;  %v5675_v26 = vrot.slane %v4976_v32, 1  ;;  %v25460_v12 = vld [vmem:[%s31262_s1 + $0x160] sm:$0xff]  }
 0x2d6   : > { %v1257_v46 = vpop.f32.mrb[68].mxu1 }
 0x2d7   : > { %21980 = vmatpush3.bf16.msra.mxu0 %v25449_v15  ;;  %22184 = vmatpush3.bf16.msra.mxu1 %v25450_v48  ;;  %v25455_v15 = vld [vmem:[%s31262_s1 + $0x1b0] sm:$0xff]   ;;  %1325 = vst [vmem:[#allocation2 + $0x80] sm:$0xff] %v27126_v40  ;;  %v4972_v48 = vshll.u32 %v27105_v25, 16  ;;  %v1259_v38 = vpop.f32.mrb[69].mxu1 }
 0x2d8   : > { %21981 = vmatprep.subr.bf16.mxu0 %v25451_v4  ;;  %22197 = vmatprep.subr.bf16.mxu1 %v25452_v57  ;;  %v1260_v41 = vpop.f32.mrb[70].mxu1 }
 0x2d9   : > { %21970 = vmatmul.mubr.bf16.gmra.mrb[40].mxu0 %v2147_v56  ;;  %v5678_v56 = vrot.slane %v4972_v48, 2  ;;  %v27157_v17 = vpack.c.bf16 %v1260_v41, %v1257_v46 }
 0x2da   : > { %22186 = vmatmul.mubr.bf16.vlgmr.msra.gmra.mrb[84].mxu1 %v26807_v59  ;;  %21989 = vmatprep.mubr.bf16.mxu0 %v2318_v44  ;;  %v4968_v59 = vshrl.u32 %v27047_v33, 16  ;;  %v1262_v44 = vpop.f32.mrb[71].mxu1 }
 0x2db   : > { %21982 = vmatpush3.bf16.msra.mxu0 %v25451_v4  ;;  %22198 = vmatpush3.bf16.msra.mxu1 %v25452_v57  ;;  %v4964_v4 = vshll.u32 %v27047_v33, 16  ;;  %1326 = vst [vmem:[#allocation2 + $0x88] sm:$0xff] %v27157_v17  ;;  %v1265_v38 = vpop.f32.mrb[72].mxu1  ;;  %v25526_v33 = vld [vmem:[%s31262_s1 + $0x48] sm:$0xff]  }
 0x2dc   : > { %21983 = vmatprep.subr.bf16.mxu0 %v25453_v50  ;;  %22199 = vmatprep.subr.bf16.mxu1 %v25454_v36  ;;  %v5666_v57 = vrot.slane %v4968_v59, 1 }
 0x2dd   : > { %22189 = vmatprep.mubr.bf16.mxu1 %v26837_v47  ;;  %v25457_v47 = vld [vmem:[%s31262_s1 + $0x1b8] sm:$0xff]   ;;  %v5669_v6 = vrot.slane %v4964_v4, 2 }
 0x2df   : > { %21984 = vmatpush3.bf16.msra.mxu0 %v25453_v50  ;;  %22200 = vmatpush3.bf16.msra.mxu1 %v25454_v36  ;;  %v3712_v50 = vrot.slane %v3677_v0, 1  ;;  %v3881_v36 = vrot.slane %v3879_v37, 1  ;;  %v27165_v21 = vor.u32 %v5669_v6, %v5666_v57  ;;  %v4984_v37 = vshrl.u32 %v27126_v40, 16  ;;  %v1267_v57 = vpop.f32.mrb[73].mxu1 }
 0x2e0   : > { %21985 = vmatprep.subr.bf16.mxu0 %v25455_v15  ;;  %22201 = vmatprep.subr.bf16.mxu1 %v25456_v14 }
 0x2e1   : > { %v3713_v46 = vsel %vm1715_vm1, %v3710_v45, %v3712_v50  ;;  %v3885_v0 = vor.u32 %v3884_v61, %v3881_v36  ;;  %v1268_v45 = vpop.f32.mrb[74].mxu1  ;;  %v25463_v36 = vld [vmem:[%s31262_s1 + $0x1d0] sm:$0xff]  }
 0x2e2   : > { %22190 = vmatmul.mubr.bf16.gmra.mrb[88].mxu1 %v26871_v63  ;;  %v25459_v63 = vld [vmem:[%s31262_s1 + $0x1c0] sm:$0xff]   ;;  %v1270_v50 = vpop.f32.mrb[75].mxu1 }
 0x2e3   : > { %21986 = vmatpush3.bf16.msra.mxu0 %v25455_v15  ;;  %22202 = vmatpush3.bf16.msra.mxu1 %v25456_v14  ;;  %v5679_v15 = vor.u32 %v5678_v56, %v5675_v26  ;;  %v4980_v14 = vshll.u32 %v27126_v40, 16  ;;  %v3894_v26 = vsel %vm2085_vm3, %v3885_v0, %v26795_v31  ;;  %v1306_v56 = vpack.c.bf16 %v1268_v45, %v1265_v38  ;;  %v25466_v38 = vld [vmem:[%s31262_s1 + $0x178] sm:$0xff]   ;;  %v25467_v50 = vld [vmem:[%s31262_s1 + $0x1e0] sm:$0xff]  }
 0x2e4   : > { %21987 = vmatprep.subr.bf16.mxu0 %v25457_v47  ;;  %22203 = vmatprep.subr.bf16.mxu1 %v25458_v19  ;;  %v31284_v31 = vshrl.u32 %v27157_v17, 16 }
 0x2e5   : > { %22193 = vmatprep.mubr.bf16.mxu1 %v26902_v54  ;;  %v27173_v20 = vsel %vm2085_vm3, %v27165_v21, %v5679_v15  ;;  %v5684_v54 = vrot.slane %v4984_v37, 1  ;;  %v5687_v41 = vrot.slane %v4980_v14, 2  ;;  %1327 = vst [vmem:[#allocation2 + $0x90] sm:$0xff] %v1306_v56 }
 0x2e6   : > { %v5693_v44 = vrot.slane %v31284_v31, 1  ;;  %v27251_v31 = vld [vmem:[#allocation2 + $0x68] sm:$0x3] }
 0x2e7   : > { %21988 = vmatpush3.bf16.msra.mxu0 %v25457_v47  ;;  %22204 = vmatpush3.bf16.msra.mxu1 %v25458_v19  ;;  %v25461_v47 = vld [vmem:[%s31262_s1 + $0x1c8] sm:$0xff]   ;;  %v5688_v6 = vor.u32 %v5687_v41, %v5684_v54 }
 0x2e8   : > { %22001 = vmatprep.subr.bf16.mxu0 %v25459_v63  ;;  %22205 = vmatprep.subr.bf16.mxu1 %v25460_v12  ;;  %v25462_v19 = vld [vmem:[%s31262_s1 + $0x168] sm:$0xff]  }
 0x2e9   : > { %v27196_v61 = vsel %vm2085_vm3, %v5679_v15, %v5688_v6  ;;  %v25465_v15 = vld [vmem:[%s31262_s1 + $0x1d8] sm:$0xff]  }
 0x2ea   : > { %21990 = vmatmul.mubr.bf16.vlgmr.msra.gmra.mrb[32].mxu0 %v26654_v53  ;;  %22194 = vmatmul.mubr.bf16.gmra.mrb[92].mxu1 %v3713_v46  ;;  %v25464_v53 = vld [vmem:[%s31262_s1 + $0x170] sm:$0xff]   ;;  %v1273_v46 = vpop.f32.mrb[76].mxu1 }
 0x2eb   : > { %21993 = vmatprep.mubr.bf16.mxu0 %v26678_v10  ;;  %22002 = vmatpush3.bf16.msra.mxu0 %v25459_v63  ;;  %v31286_v10 = vshll.u32 %v27157_v17, 16  ;;  %v27205_v63 = vld [vmem:[#allocation2 + $0x78] sm:$0xff]  ;;  %v1275_v54 = vpop.f32.mrb[77].mxu1 }
 0x2ec   : > { %22206 = vmatpush3.bf16.msra.mxu1 %v25460_v12  ;;  %22213 = vmatprep.mubr.bf16.mxu1 %v3894_v26  ;;  %v6045_v12 = vld [vmem:[#allocation2 + $0x80] sm:$0xff]  ;;  %v1276_v57 = vpop.f32.mrb[78].mxu1 }
 0x2ed   : > { %22003 = vmatprep.subr.bf16.mxu0 %v25461_v47  ;;  %22207 = vmatprep.subr.bf16.mxu1 %v25462_v19  ;;  %v5696_v0 = vrot.slane %v31286_v10, 2  ;;  %v27218_v45 = vpack.c.bf16 %v1276_v57, %v1273_v46  ;;  %v1278_v26 = vpop.f32.mrb[79].mxu1  ;;  %v25483_v10 = vld [vmem:[%s31262_s1 + $0x220] sm:$0xff]  }
 0x2ee   : > { %v31324_v26 = vrot.slane %v26715_v55, 2 }
 0x2ef   : > { %22004 = vmatpush3.bf16.msra.mxu0 %v25461_v47  ;;  %v5697_v41 = vor.u32 %v5696_v0, %v5693_v44  ;;  %v31282_v47 = vrot.slane %v27205_v63, 3  ;;  %1328 = vst [vmem:[#allocation2 + $0x98] sm:$0xff] %v27218_v45  ;;  %v27236_v44 = vld [vmem:[#allocation2 + $0x10] sm:$0xfc]  ;;  %v6046_v0 = vld [vmem:[#allocation2 + $0x88] sm:$0xff] }
 0x2f0   : > { %22208 = vmatpush3.bf16.msra.mxu1 %v25462_v19  ;;  %22005 = vmatprep.subr.bf16.mxu0 %v25463_v36  ;;  %v6481_v19 = vrot.slane %v6045_v12, 3  ;;  %v5703_v12 = vshll.u32 %v1306_v56, 16  ;;  %v2507_v24 = vrot.slane %v27236_v44, 2 }
 0x2f1   : > { %22209 = vmatprep.subr.bf16.mxu1 %v25464_v53  ;;  %v27224_v54 = vsel %vm2085_vm3, %v5688_v6, %v5697_v41  ;;  %v27238_v6 = vld [vmem:[#allocation2 + $0x18] sm:$0xff] }
 0x2f2   : > { %21994 = vmatmul.mubr.bf16.gmra.mrb[36].mxu0 %v26707_v42  ;;  %v27229_v42 = vsel %vm2915_vm4, %v31282_v47, %v6481_v19  ;;  %v2508_v46 = vrot.slane %v27238_v6, 2 }
 0x2f3   : > { %21997 = vmatprep.mubr.bf16.mxu0 %v26737_v9  ;;  %22006 = vmatpush3.bf16.msra.mxu0 %v25463_v36  ;;  %v2327_v9 = vrot.slane %v27084_v49, 2  ;;  %v25468_v36 = vld [vmem:[%s31262_s1 + $0x180] sm:$0xff]   ;;  %v5705_v49 = vrot.slane %v5703_v12, 2  ;;  %v3932_v12 = vshrl.u32 %v27251_v31, 16 }
 0x2f4   : > { %22210 = vmatpush3.bf16.msra.mxu1 %v25464_v53  ;;  %22007 = vmatprep.subr.bf16.mxu0 %v25465_v15  ;;  %v5700_v53 = vshrl.u32 %v1306_v56, 16  ;;  %v25469_v56 = vld [vmem:[%s31262_s1 + $0x1e8] sm:$0xff]   ;;  %v2509_v55 = vsel %vm2315_vm2, %v2507_v24, %v2508_v46  ;;  %v6047_v24 = vld [vmem:[#allocation2 + $0x90] sm:$0xff] }
 0x2f5   : > { %22211 = vmatprep.subr.bf16.mxu1 %v25466_v38  ;;  %v2328_v47 = vsel %vm2315_vm2, %v31324_v26, %v2327_v9  ;;  %v25471_v9 = vld [vmem:[%s31262_s1 + $0x1f0] sm:$0xff]   ;;  %v3935_v26 = vshll.u32 %v27251_v31, 16 }
 0x2f6   : > { %v5702_v57 = vrot.slane %v5700_v53, 1  ;;  %v6483_v53 = vrot.slane %v6046_v0, 3 }
 0x2f7   : > { %22008 = vmatpush3.bf16.msra.mxu0 %v25465_v15  ;;  %v25470_v15 = vld [vmem:[%s31262_s1 + $0x188] sm:$0xff]  }
 0x2f8   : > { %22212 = vmatpush3.bf16.msra.mxu1 %v25466_v38  ;;  %22009 = vmatprep.subr.bf16.mxu0 %v25467_v50  ;;  %v27253_v38 = vor.u32 %v5705_v49, %v5702_v57  ;;  %v27267_v0 = vsel %vm2915_vm4, %v6481_v19, %v6483_v53  ;;  %v25474_v19 = vld [vmem:[%s31262_s1 + $0x198] sm:$0xff]   ;;  %v6485_v57 = vrot.slane %v6047_v24, 3  ;;  %v25475_v49 = vld [vmem:[%s31262_s1 + $0x200] sm:$0xff]  }
 0x2f9   : > { %22225 = vmatprep.subr.bf16.mxu1 %v25468_v36 }
 0x2fa   : > { %21998 = vmatmul.mubr.bf16.gmra.mrb[40].mxu0 %v2328_v47  ;;  %v27264_v47 = vsel %vm2085_vm3, %v5697_v41, %v27253_v38  ;;  %v25473_v41 = vld [vmem:[%s31262_s1 + $0x1f8] sm:$0xff]  }
 0x2fb   : > { %22214 = vmatmul.mubr.bf16.vlgmr.msra.gmra.mrb[84].mxu1 %v26866_v1  ;;  %22010 = vmatpush3.bf16.msra.mxu0 %v25467_v50  ;;  %v25472_v1 = vld [vmem:[%s31262_s1 + $0x190] sm:$0xff]   ;;  %v3934_v50 = vrot.slane %v3932_v12, 1  ;;  %v27294_v12 = vld [vmem:[#allocation2 + $0x28] sm:$0xff] }
 0x2fc   : > { %22017 = vmatprep.mubr.bf16.mxu0 %v2509_v55  ;;  %22226 = vmatpush3.bf16.msra.mxu1 %v25468_v36  ;;  %v3937_v36 = vrot.slane %v3935_v26, 2  ;;  %v2512_v26 = vrot.slane %v27294_v12, 2 }
 0x2fd   : > { %22011 = vmatprep.subr.bf16.mxu0 %v25469_v56  ;;  %22227 = vmatprep.subr.bf16.mxu1 %v25470_v15 }
 0x2fe   : > { %22217 = vmatprep.mubr.bf16.mxu1 %v26886_v34  ;;  %v27281_v34 = vsel %vm2915_vm4, %v6483_v53, %v6485_v57  ;;  %v4087_v53 = vld [vmem:[#allocation2 + $0x38] sm:$0xfc] }
 0x2ff   : > { %22012 = vmatpush3.bf16.msra.mxu0 %v25469_v56  ;;  %v3938_v56 = vor.u32 %v3937_v36, %v3934_v50  ;;  %v4106_v24 = vrot.slane %v4087_v53, 2  ;;  %v25477_v36 = vld [vmem:[%s31262_s1 + $0x208] sm:$0xff]   ;;  %v2687_v53 = vshrl.u32 %v27236_v44, 16 }
 0x300   : > { %22228 = vmatpush3.bf16.msra.mxu1 %v25470_v15  ;;  %22013 = vmatprep.subr.bf16.mxu0 %v25471_v9  ;;  %v27287_v15 = vld [vmem:[#allocation2 + $0x20] sm:$0xff] }
 0x301   : > { %22229 = vmatprep.subr.bf16.mxu1 %v25472_v1  ;;  %v2510_v55 = vrot.slane %v27287_v15, 2 }
 0x303   : > { %22218 = vmatmul.mubr.bf16.gmra.mrb[88].mxu1 %v26894_v27  ;;  %22014 = vmatpush3.bf16.msra.mxu0 %v25471_v9  ;;  %v25476_v27 = vld [vmem:[%s31262_s1 + $0x1a0] sm:$0xff]   ;;  %v31285_v9 = vrot.slane %v27218_v45, 3  ;;  %v2511_v50 = vsel %vm2315_vm2, %v2508_v46, %v2510_v55  ;;  %v27315_v46 = vld [vmem:[#allocation2 + $0x30] sm:$0xff] }
 0x304   : > { %22230 = vmatpush3.bf16.msra.mxu1 %v25472_v1  ;;  %22015 = vmatprep.subr.bf16.mxu0 %v25473_v41  ;;  %v3939_v1 = vsel %vm2085_vm3, %v26908_v8, %v3938_v56  ;;  %v4108_v8 = vsel %vm2315_vm2, %v4106_v24, %v4107_v35  ;;  %v25479_v56 = vld [vmem:[%s31262_s1 + $0x210] sm:$0xff]   ;;  %v2695_v35 = vshrl.u32 %v27238_v6, 16 }
 0x305   : > { %22231 = vmatprep.subr.bf16.mxu1 %v25474_v19  ;;  %22221 = vmatprep.mubr.bf16.mxu1 %v26918_v3  ;;  %v27300_v3 = vsel %vm2915_vm4, %v6485_v57, %v31285_v9  ;;  %v25478_v57 = vld [vmem:[%s31262_s1 + $0x1a8] sm:$0xff]  }
 0x307   : > { %22016 = vmatpush3.bf16.msra.mxu0 %v25473_v41  ;;  %v2513_v41 = vsel %vm2315_vm2, %v2510_v55, %v2512_v26  ;;  %v25480_v55 = vld [vmem:[%s31262_s1 + $0x1b0] sm:$0xff]  }
 0x308   : > { %22232 = vmatpush3.bf16.msra.mxu1 %v25474_v19  ;;  %22029 = vmatprep.subr.bf16.mxu0 %v25475_v49  ;;  %v2514_v19 = vrot.slane %v27315_v46, 2 }
 0x309   : > { %22233 = vmatprep.subr.bf16.mxu1 %v25476_v27 }
 0x30a   : > { %22018 = vmatmul.mubr.bf16.vlgmr.msra.gmra.mrb[32].mxu0 %v2511_v50  ;;  %v2515_v24 = vsel %vm2315_vm2, %v2512_v26, %v2514_v19  ;;  %v25481_v50 = vld [vmem:[%s31262_s1 + $0x218] sm:$0xff]  }
 0x30b   : > { %22222 = vmatmul.mubr.bf16.gmra.mrb[92].mxu1 %v3939_v1  ;;  %22021 = vmatprep.mubr.bf16.mxu0 %v2513_v41  ;;  %v2690_v1 = vshll.u32 %v27236_v44, 16  ;;  %v25482_v41 = vld [vmem:[%s31262_s1 + $0x1b8] sm:$0xff]   ;;  %v2689_v44 = vrot.slane %v2687_v53, 2 }
 0x30c   : > { %22030 = vmatpush3.bf16.msra.mxu0 %v25475_v49  ;;  %22234 = vmatpush3.bf16.msra.mxu1 %v25476_v27  ;;  %v27324_v49 = vld [vmem:[#allocation2 + $0x38] sm:$0xff]  ;;  %v2698_v27 = vshll.u32 %v27238_v6, 16 }
 0x30d   : > { %22241 = vmatprep.mubr.bf16.mxu1 %v4108_v8  ;;  %22031 = vmatprep.subr.bf16.mxu0 %v25477_v36  ;;  %v2516_v29 = vrot.slane %v27324_v49, 2  ;;  %v2692_v26 = vrot.slane %v2690_v1, 3  ;;  %v2704_v1 = vshrl.u32 %v27287_v15, 16 }
 0x30e   : > { %22235 = vmatprep.subr.bf16.mxu1 %v25478_v57  ;;  %v2700_v8 = vrot.slane %v2698_v27, 3  ;;  %v25486_v27 = vld [vmem:[%s31262_s1 + $0x1c8] sm:$0xff]  }
 0x30f   : > { %v2517_v6 = vsel %vm2315_vm2, %v2514_v19, %v2516_v29 }
 0x310   : > { %22032 = vmatpush3.bf16.msra.mxu0 %v25477_v36  ;;  %22236 = vmatpush3.bf16.msra.mxu1 %v25478_v57  ;;  %v2482_v36 = vld [vmem:[#allocation2 + $0x40] sm:$0x3]  ;;  %v2697_v57 = vrot.slane %v2695_v35, 2  ;;  %v2693_v35 = vor.u32 %v2692_v26, %v2689_v44  ;;  %v27379_v26 = vld [vmem:[#allocation2 + $0x40] sm:$0xfc] }
 0x311   : > { %22033 = vmatprep.subr.bf16.mxu0 %v25479_v56  ;;  %22237 = vmatprep.subr.bf16.mxu1 %v25480_v55  ;;  %v2518_v9 = vrot.slane %v2482_v36, 2  ;;  %v25492_v44 = vld [vmem:[%s31262_s1 + $0x1e0] sm:$0xff]  }
 0x312   : > { %22022 = vmatmul.mubr.bf16.gmra.mrb[36].mxu0 %v2515_v24  ;;  %v25484_v24 = vld [vmem:[%s31262_s1 + $0x1c0] sm:$0xff]   ;;  %v2701_v19 = vor.u32 %v2700_v8, %v2697_v57 }
 0x313   : > { %22025 = vmatprep.mubr.bf16.mxu0 %v2517_v6  ;;  %v2706_v6 = vrot.slane %v2704_v1, 2  ;;  %v25491_v8 = vld [vmem:[%s31262_s1 + $0x240] sm:$0xff]  }
 0x314   : > { %22034 = vmatpush3.bf16.msra.mxu0 %v25479_v56  ;;  %22238 = vmatpush3.bf16.msra.mxu1 %v25480_v55  ;;  %v2519_v56 = vsel %vm2315_vm2, %v2516_v29, %v2518_v9  ;;  %v25485_v55 = vld [vmem:[%s31262_s1 + $0x228] sm:$0xff]   ;;  %v2702_v53 = vsel %vm2685_vm5, %v2693_v35, %v2701_v19  ;;  %v25487_v9 = vld [vmem:[%s31262_s1 + $0x230] sm:$0xff]   ;;  %v2725_v35 = vshll.u32 %v27315_v46, 16 }
 0x315   : > { %22035 = vmatprep.subr.bf16.mxu0 %v25481_v50  ;;  %22239 = vmatprep.subr.bf16.mxu1 %v25482_v41  ;;  %v25488_v29 = vld [vmem:[%s31262_s1 + $0x1d0] sm:$0xff]  }
 0x316   : > { %v2727_v11 = vrot.slane %v2725_v35, 3  ;;  %v25499_v35 = vld [vmem:[%s31262_s1 + $0x260] sm:$0xff]  }
 0x318   : > { %22036 = vmatpush3.bf16.msra.mxu0 %v25481_v50  ;;  %22240 = vmatpush3.bf16.msra.mxu1 %v25482_v41  ;;  %v2707_v50 = vshll.u32 %v27287_v15, 16  ;;  %v25489_v41 = vld [vmem:[%s31262_s1 + $0x238] sm:$0xff]  }
 0x319   : > { %22037 = vmatprep.subr.bf16.mxu0 %v25483_v10  ;;  %22253 = vmatprep.subr.bf16.mxu1 %v25484_v24 }
 0x31a   : > { %22026 = vmatmul.mubr.bf16.gmra.mrb[40].mxu0 %v2519_v56  ;;  %v2709_v36 = vrot.slane %v2707_v50, 3  ;;  %v2731_v56 = vshrl.u32 %v27324_v49, 16 }
 0x31b   : > { %22242 = vmatmul.mubr.bf16.vlgmr.msra.gmra.mrb[84].mxu1 %v26958_v51  ;;  %22045 = vmatprep.mubr.bf16.mxu0 %v2702_v53  ;;  %v2713_v51 = vshrl.u32 %v27294_v12, 16  ;;  %v4296_v53 = vrot.slane %v27379_v26, 2 }
 0x31c   : > { %22038 = vmatpush3.bf16.msra.mxu0 %v25483_v10  ;;  %22254 = vmatpush3.bf16.msra.mxu1 %v25484_v24  ;;  %v2716_v10 = vshll.u32 %v27294_v12, 16  ;;  %v4117_v12 = vrot.slane %v27251_v31, 2  ;;  %v2722_v24 = vshrl.u32 %v27315_v46, 16  ;;  %v25493_v46 = vld [vmem:[%s31262_s1 + $0x248] sm:$0xff]   ;;  %v2733_v1 = vrot.slane %v2731_v56, 2  ;;  %v27421_v56 = vld [vmem:[#allocation2 + $0x58] sm:$0xff] }
 0x31d   : > { %22039 = vmatprep.subr.bf16.mxu0 %v25485_v55  ;;  %22255 = vmatprep.subr.bf16.mxu1 %v25486_v27  ;;  %v2715_v15 = vrot.slane %v2713_v51, 2  ;;  %v27399_v51 = vld [vmem:[#allocation2 + $0x40] sm:$0x7] }
 0x31e   : > { %22245 = vmatprep.mubr.bf16.mxu1 %v26971_v58  ;;  %v25490_v58 = vld [vmem:[%s31262_s1 + $0x1d8] sm:$0xff]   ;;  %v2718_v57 = vrot.slane %v2716_v10, 3  ;;  %v25495_v10 = vld [vmem:[%s31262_s1 + $0x250] sm:$0xff]  }
 0x320   : > { %22040 = vmatpush3.bf16.msra.mxu0 %v25485_v55  ;;  %22256 = vmatpush3.bf16.msra.mxu1 %v25486_v27  ;;  %v2719_v31 = vor.u32 %v2718_v57, %v2715_v15  ;;  %v2734_v55 = vshll.u32 %v27324_v49, 16  ;;  %v4118_v27 = vsel %vm2315_vm2, %v4115_v60, %v4117_v12  ;;  %v25494_v49 = vld [vmem:[%s31262_s1 + $0x1e8] sm:$0xff]   ;;  %v25497_v57 = vld [vmem:[%s31262_s1 + $0x258] sm:$0xff]  }
 0x321   : > { %22041 = vmatprep.subr.bf16.mxu0 %v25487_v9  ;;  %22257 = vmatprep.subr.bf16.mxu1 %v25488_v29 }
 0x322   : > { %v2736_v50 = vrot.slane %v2734_v55, 3  ;;  %v25500_v55 = vld [vmem:[%s31262_s1 + $0x200] sm:$0xff]  }
 0x323   : > { %22246 = vmatmul.mubr.bf16.gmra.mrb[88].mxu1 %v26977_v18  ;;  %v2710_v18 = vor.u32 %v2709_v36, %v2706_v6  ;;  %v2740_v6 = vshrl.u32 %v27399_v51, 16  ;;  %v2743_v36 = vshll.u32 %v27399_v51, 16 }
 0x324   : > { %22042 = vmatpush3.bf16.msra.mxu0 %v25487_v9  ;;  %22258 = vmatpush3.bf16.msra.mxu1 %v25488_v29  ;;  %v2724_v29 = vrot.slane %v2722_v24, 2  ;;  %v2737_v15 = vor.u32 %v2736_v50, %v2733_v1  ;;  %v31325_v50 = vrot.slane %v26689_v22, 3  ;;  %v27449_v22 = vld [vmem:[#allocation2 + $0x68] sm:$0xff] }
 0x325   : > { %22043 = vmatprep.subr.bf16.mxu0 %v25489_v41  ;;  %22259 = vmatprep.subr.bf16.mxu1 %v25490_v58  ;;  %v2711_v9 = vsel %vm2685_vm5, %v2701_v19, %v2710_v18  ;;  %v2720_v60 = vsel %vm2685_vm5, %v2710_v18, %v2719_v31  ;;  %v2745_v18 = vrot.slane %v2743_v36, 3  ;;  %v4474_v36 = vshrl.u32 %v27379_v26, 16 }
 0x326   : > { %22249 = vmatprep.mubr.bf16.mxu1 %v26998_v2  ;;  %v4297_v2 = vrot.slane %v27034_v43, 2 }
 0x328   : > { %22044 = vmatpush3.bf16.msra.mxu0 %v25489_v41  ;;  %22260 = vmatpush3.bf16.msra.mxu1 %v25490_v58  ;;  %v4298_v19 = vsel %vm2315_vm2, %v4296_v53, %v4297_v2  ;;  %v2728_v41 = vor.u32 %v2727_v11, %v2724_v29  ;;  %v25496_v58 = vld [vmem:[%s31262_s1 + $0x1f0] sm:$0xff]   ;;  %v25501_v29 = vld [vmem:[%s31262_s1 + $0x268] sm:$0xff]  }
 0x329   : > { %22057 = vmatprep.subr.bf16.mxu0 %v25491_v8  ;;  %22261 = vmatprep.subr.bf16.mxu1 %v25492_v44  ;;  %v2895_v53 = vld [vmem:[#allocation2 + $0x10] sm:$0xf8]  ;;  %v25502_v11 = vld [vmem:[%s31262_s1 + $0x208] sm:$0xff]  }
 0x32a   : > { %v2729_v12 = vsel %vm2685_vm5, %v2719_v31, %v2728_v41  ;;  %v2738_v24 = vsel %vm2685_vm5, %v2728_v41, %v2737_v15  ;;  %v25503_v41 = vld [vmem:[%s31262_s1 + $0x270] sm:$0xff]  }
 0x32b   : > { %22046 = vmatmul.mubr.bf16.vlgmr.msra.gmra.mrb[32].mxu0 %v2711_v9  ;;  %22250 = vmatmul.mubr.bf16.gmra.mrb[92].mxu1 %v4118_v27  ;;  %v4299_v27 = vrot.slane %v27039_v5, 2  ;;  %v4301_v9 = vrot.slane %v27421_v56, 2 }
 0x32c   : > { %22049 = vmatprep.mubr.bf16.mxu0 %v2720_v60  ;;  %22058 = vmatpush3.bf16.msra.mxu0 %v25491_v8  ;;  %v25498_v8 = vld [vmem:[%s31262_s1 + $0x1f8] sm:$0xff]   ;;  %v27435_v60 = vld [vmem:[#allocation2 + $0x60] sm:$0xff] }
 0x32d   : > { %22262 = vmatpush3.bf16.msra.mxu1 %v25492_v44  ;;  %22269 = vmatprep.mubr.bf16.mxu1 %v4298_v19  ;;  %v2742_v44 = vrot.slane %v2740_v6, 2  ;;  %v4300_v1 = vsel %vm2315_vm2, %v4297_v2, %v4299_v27  ;;  %v25504_v2 = vld [vmem:[%s31262_s1 + $0x210] sm:$0xff]   ;;  %v4305_v6 = vrot.slane %v27449_v22, 2 }
 0x32e   : > { %22059 = vmatprep.subr.bf16.mxu0 %v25493_v46  ;;  %22263 = vmatprep.subr.bf16.mxu1 %v25494_v49 }
 0x32f   : > { %v2746_v31 = vor.u32 %v2745_v18, %v2742_v44  ;;  %v25505_v44 = vld [vmem:[%s31262_s1 + $0x278] sm:$0xff]  }
 0x330   : > { %22060 = vmatpush3.bf16.msra.mxu0 %v25493_v46  ;;  %v25506_v18 = vld [vmem:[%s31262_s1 + $0x218] sm:$0xff]  }
 0x331   : > { %22264 = vmatpush3.bf16.msra.mxu1 %v25494_v49  ;;  %22061 = vmatprep.subr.bf16.mxu0 %v25495_v10  ;;  %v2747_v46 = vsel %vm2685_vm5, %v2737_v15, %v2746_v31  ;;  %v2916_v49 = vrot.slane %v2895_v53, 3  ;;  %v4477_v15 = vshll.u32 %v27379_v26, 16 }
 0x332   : > { %22265 = vmatprep.subr.bf16.mxu1 %v25496_v58 }
 0x333   : > { %22050 = vmatmul.mubr.bf16.gmra.mrb[36].mxu0 %v2729_v12  ;;  %v2918_v19 = vsel %vm2915_vm4, %v2916_v49, %v31325_v50  ;;  %v4485_v12 = vshll.u32 %v27034_v43, 16  ;;  %v4479_v31 = vrot.slane %v4477_v15, 3  ;;  %v25510_v50 = vld [vmem:[%s31262_s1 + $0x88] sm:$0xff]   ;;  %v25513_v15 = vld [vmem:[%s31262_s1 + $0x238] sm:$0xff]  }
 0x334   : > { %22053 = vmatprep.mubr.bf16.mxu0 %v2738_v24  ;;  %22062 = vmatpush3.bf16.msra.mxu0 %v25495_v10  ;;  %v4302_v10 = vsel %vm2315_vm2, %v4299_v27, %v4301_v9  ;;  %v4272_v24 = vld [vmem:[#allocation2 + $0x70] sm:$0x3] }
 0x335   : > { %22266 = vmatpush3.bf16.msra.mxu1 %v25496_v58  ;;  %22063 = vmatprep.subr.bf16.mxu0 %v25497_v57  ;;  %v4303_v58 = vrot.slane %v27435_v60, 2  ;;  %v4487_v27 = vrot.slane %v4485_v12, 3  ;;  %v4307_v53 = vrot.slane %v4272_v24, 2  ;;  %v25514_v12 = vld [vmem:[%s31262_s1 + $0x98] sm:$0xff]  }
 0x336   : > { %22267 = vmatprep.subr.bf16.mxu1 %v25498_v8 }
 0x337   : > { %v4306_v26 = vsel %vm2315_vm2, %v4303_v58, %v4305_v6 }
 0x338   : > { %22064 = vmatpush3.bf16.msra.mxu0 %v25497_v57  ;;  %v4482_v57 = vshrl.u32 %v27034_v43, 16  ;;  %v25528_v43 = vld [vmem:[%s31262_s1 + $0x50] sm:$0xff]  }
 0x339   : > { %22268 = vmatpush3.bf16.msra.mxu1 %v25498_v8  ;;  %22065 = vmatprep.subr.bf16.mxu0 %v25499_v35  ;;  %v4304_v8 = vsel %vm2315_vm2, %v4301_v9, %v4303_v58  ;;  %v25508_v9 = vld [vmem:[%s31262_s1 + $0x80] sm:$0xff]   ;;  %v4500_v58 = vshrl.u32 %v27421_v56, 16 }
 0x33a   : > { %22281 = vmatprep.subr.bf16.mxu1 %v25500_v55 }
 0x33b   : > { %22054 = vmatmul.mubr.bf16.gmra.mrb[40].mxu0 %v2747_v46  ;;  %v25507_v46 = vld [vmem:[%s31262_s1 + $0x220] sm:$0xff]  }
 0x33c   : > { %22270 = vmatmul.mubr.bf16.vlgmr.msra.gmra.mrb[84].mxu1 %v4300_v1  ;;  %22066 = vmatpush3.bf16.msra.mxu0 %v25499_v35  ;;  %v4476_v35 = vrot.slane %v4474_v36, 2  ;;  %v25509_v1 = vld [vmem:[%s31262_s1 + $0x228] sm:$0xff]   ;;  %v4951_v36 = vshll.u32 %v27435_v60, 16 }
 0x33d   : > { %22073 = vmatprep.mubr.bf16.mxu0 %v2918_v19  ;;  %22282 = vmatpush3.bf16.msra.mxu1 %v25500_v55  ;;  %v4484_v55 = vrot.slane %v4482_v57, 2  ;;  %v1281_v57 = vpop.f32.mrb[80].mxu1 }
 0x33e   : > { %22067 = vmatprep.subr.bf16.mxu0 %v25501_v29  ;;  %22283 = vmatprep.subr.bf16.mxu1 %v25502_v11  ;;  %v4480_v49 = vor.u32 %v4479_v31, %v4476_v35  ;;  %v4502_v35 = vrot.slane %v4500_v58, 2 }
 0x33f   : > { %22273 = vmatprep.mubr.bf16.mxu1 %v4302_v10  ;;  %v25511_v10 = vld [vmem:[%s31262_s1 + $0x230] sm:$0xff]  }
 0x340   : > { %22068 = vmatpush3.bf16.msra.mxu0 %v25501_v29  ;;  %v27470_v29 = vor.u32 %v4487_v27, %v4484_v55  ;;  %v4949_v27 = vshrl.u32 %v27435_v60, 16 }
 0x341   : > { %22284 = vmatpush3.bf16.msra.mxu1 %v25502_v11  ;;  %22069 = vmatprep.subr.bf16.mxu0 %v25503_v41  ;;  %v4308_v11 = vsel %vm2315_vm2, %v4305_v6, %v4307_v53  ;;  %v27493_v6 = vld [vmem:[#allocation2 + $0x68] sm:$0xff] }
 0x342   : > { %22285 = vmatprep.subr.bf16.mxu1 %v25504_v2  ;;  %v4489_v19 = vsel %vm2685_vm5, %v4480_v49, %v27470_v29  ;;  %v4956_v24 = vshll.u32 %v27493_v6, 16 }
 0x344   : > { %22274 = vmatmul.mubr.bf16.gmra.mrb[88].mxu1 %v4304_v8  ;;  %22070 = vmatpush3.bf16.msra.mxu0 %v25503_v41  ;;  %v4491_v41 = vshrl.u32 %v27039_v5, 16 }
 0x345   : > { %22286 = vmatpush3.bf16.msra.mxu1 %v25504_v2  ;;  %22071 = vmatprep.subr.bf16.mxu0 %v25505_v44  ;;  %v4503_v2 = vshll.u32 %v27421_v56, 16 }
 0x346   : > { %22287 = vmatprep.subr.bf16.mxu1 %v25506_v18  ;;  %22277 = vmatprep.mubr.bf16.mxu1 %v4306_v26  ;;  %v4493_v8 = vrot.slane %v4491_v41, 2  ;;  %v1283_v26 = vpop.f32.mrb[81].mxu1  ;;  %v25517_v41 = vld [vmem:[%s31262_s1 + $0x248] sm:$0xff]  }
 0x347   : > { %v4505_v31 = vrot.slane %v4503_v2, 3  ;;  %v1284_v55 = vpop.f32.mrb[82].mxu1  ;;  %v25518_v2 = vld [vmem:[%s31262_s1 + $0xa8] sm:$0xff]  }
 0x348   : > { %22072 = vmatpush3.bf16.msra.mxu0 %v25505_v44  ;;  %v1286_v53 = vpop.f32.mrb[83].mxu1 }
 0x349   : > { %22288 = vmatpush3.bf16.msra.mxu1 %v25506_v18  ;;  %22337 = vmatprep.subr.bf16.mxu0 %v25508_v9  ;;  %v4953_v18 = vrot.slane %v4951_v36, 1 }
 0x34a   : > { %22289 = vmatprep.subr.bf16.mxu1 %v25507_v46 }
 0x34b   : > { %22074 = vmatmul.mubr.bf16.vlgmr.msra.gmra.mrb[32].mxu0 %v26713_v52  ;;  %v25512_v52 = vld [vmem:[%s31262_s1 + $0x90] sm:$0xff]  }
 0x34c   : > { %22278 = vmatmul.mubr.bf16.gmra.mrb[92].mxu1 %v4308_v11  ;;  %22077 = vmatprep.mubr.bf16.mxu0 %v26742_v13  ;;  %v4494_v13 = vshll.u32 %v27039_v5, 16  ;;  %v4954_v11 = vor.u32 %v4953_v18, %v4949_v27 }
 0x34d   : > { %22290 = vmatpush3.bf16.msra.mxu1 %v25507_v46  ;;  %22297 = vmatprep.mubr.bf16.mxu1 %v4489_v19  ;;  %v25515_v46 = vld [vmem:[%s31262_s1 + $0x240] sm:$0xff]   ;;  %v4518_v19 = vshrl.u32 %v27449_v22, 16 }
 0x34e   : > { %22338 = vmatpush3.bf16.msra.mxu0 %v25508_v9  ;;  %22291 = vmatprep.subr.bf16.mxu1 %v25509_v1  ;;  %v4496_v44 = vrot.slane %v4494_v13, 3  ;;  %v2927_v9 = vrot.slane %v27399_v51, 3  ;;  %v31326_v51 = vrot.slane %v26803_v62, 3  ;;  %v4514_v62 = vrot.slane %v4951_v36, 3  ;;  %v25520_v36 = vld [vmem:[%s31262_s1 + $0xb0] sm:$0xff]  }
 0x34f   : > { %22339 = vmatprep.subr.bf16.mxu0 %v25510_v50 }
 0x350   : > { %v4497_v49 = vor.u32 %v4496_v44, %v4493_v8  ;;  %v27528_v44 = vld [vmem:[#allocation2 + $0x70] sm:$0x7] }
 0x351   : > { %22292 = vmatpush3.bf16.msra.mxu1 %v25509_v1  ;;  %v4958_v1 = vrot.slane %v4956_v24, 1  ;;  %v4527_v24 = vshrl.u32 %v27528_v44, 16  ;;  %v4530_v26 = vshll.u32 %v27528_v44, 16 }
 0x352   : > { %22340 = vmatpush3.bf16.msra.mxu0 %v25510_v50  ;;  %22293 = vmatprep.subr.bf16.mxu1 %v25511_v10  ;;  %v4506_v50 = vor.u32 %v4505_v31, %v4502_v35  ;;  %v4498_v13 = vsel %vm2685_vm5, %v27470_v29, %v4497_v49  ;;  %v25519_v29 = vld [vmem:[%s31262_s1 + $0x250] sm:$0xff]   ;;  %v25521_v31 = vld [vmem:[%s31262_s1 + $0x258] sm:$0xff]  }
 0x353   : > { %22078 = vmatmul.mubr.bf16.gmra.mrb[36].mxu0 %v26762_v7  ;;  %22341 = vmatprep.subr.bf16.mxu0 %v25512_v52  ;;  %v1308_v7 = vpack.c.bf16 %v1284_v55, %v1281_v57  ;;  %v4959_v58 = vsel %vm1373_vm0, %v4954_v11, %v4958_v1  ;;  %v4532_v53 = vrot.slane %v4530_v26, 3  ;;  %v4682_v11 = vld [vmem:[#allocation2 + $0x40] sm:$0xf8]  ;;  %v31329_v26 = vmov 0  }
 0x354   : > { %22081 = vmatprep.mubr.bf16.mxu0 %v26822_v39  ;;  %v25516_v39 = vld [vmem:[%s31262_s1 + $0xa0] sm:$0xff]   ;;  %v4507_v57 = vsel %vm2685_vm5, %v4497_v49, %v4506_v50  ;;  %v4966_v49 = vrot.slane %v4964_v4, 1  ;;  %v4974_v4 = vrot.slane %v4972_v48, 1 }
 0x355   : > { %22294 = vmatpush3.bf16.msra.mxu1 %v25511_v10  ;;  %1329 = vst [vmem:[#allocation2 + $0xa0] sm:$0xff] %v1308_v7  ;;  %v4521_v10 = vshll.u32 %v27449_v22, 16  ;;  %v4529_v7 = vrot.slane %v4527_v24, 2  ;;  %v4706_v24 = vrot.slane %v27421_v56, 3  ;;  %v4708_v56 = vrot.slane %v27435_v60, 3 }
 0x356   : > { %22342 = vmatpush3.bf16.msra.mxu0 %v25512_v52  ;;  %22295 = vmatprep.subr.bf16.mxu1 %v25513_v15  ;;  %v2928_v52 = vsel %vm2915_vm4, %v31326_v51, %v2927_v9  ;;  %v4960_v9 = vshrl.u32 %v27493_v6, 16  ;;  %v4701_v51 = vrot.slane %v4682_v11, 3  ;;  %v27640_v11 = vld [vmem:[#allocation2 + $0x78] sm:$0xff] }
 0x357   : > { %22343 = vmatprep.subr.bf16.mxu0 %v25514_v12  ;;  %v4523_v8 = vrot.slane %v4521_v10, 3 }
 0x358   : > { %v4962_v10 = vor.u32 %v4960_v9, %v4958_v1 }
 0x359   : > { %22296 = vmatpush3.bf16.msra.mxu1 %v25513_v15  ;;  %v4511_v15 = vrot.slane %v4949_v27, 2  ;;  %v25522_v27 = vld [vmem:[%s31262_s1 + $0xb8] sm:$0xff]  }
 0x35a   : > { %22344 = vmatpush3.bf16.msra.mxu0 %v25514_v12  ;;  %22309 = vmatprep.subr.bf16.mxu1 %v25515_v46  ;;  %v4520_v12 = vrot.slane %v4518_v19, 2  ;;  %v25524_v19 = vld [vmem:[%s31262_s1 + $0x40] sm:$0xff]   ;;  %v4967_v1 = vsel %vm1373_vm0, %v4962_v10, %v4966_v49 }
 0x35b   : > { %22082 = vmatmul.mubr.bf16.gmra.mrb[40].mxu0 %v2928_v52  ;;  %22345 = vmatprep.subr.bf16.mxu0 %v25516_v39  ;;  %v4515_v18 = vor.u32 %v4514_v62, %v4511_v15  ;;  %v4970_v52 = vor.u32 %v4968_v59, %v4966_v49  ;;  %v4703_v59 = vsel %vm2915_vm4, %v4701_v51, %v4702_v16  ;;  %v31327_v62 = vshll.u32 %v27157_v17, 16  ;;  %v27631_v49 = vld [vmem:[#allocation2 + $0x70] sm:$0xff]  ;;  %v25539_v10 = vld [vmem:[%s31262_s1 + $0xe0] sm:$0xff]  }
 0x35c   : > { %22298 = vmatmul.mubr.bf16.vlgmr.msra.gmra.mrb[84].mxu1 %v4498_v13  ;;  %22353 = vmatprep.mubr.bf16.mxu0 %v4959_v58  ;;  %v4524_v35 = vor.u32 %v4523_v8, %v4520_v12  ;;  %v25525_v13 = vld [vmem:[%s31262_s1 + $0x268] sm:$0xff]   ;;  %v25527_v58 = vld [vmem:[%s31262_s1 + $0x270] sm:$0xff]   ;;  %v4978_v15 = vor.u32 %v4976_v32, %v4974_v4  ;;  %v25530_v32 = vld [vmem:[%s31262_s1 + $0x58] sm:$0xff]   ;;  %v31328_v8 = vshrl.u32 %v27157_v17, 16 }
 0x35d   : > { %22301 = vmatprep.mubr.bf16.mxu1 %v4507_v57  ;;  %22310 = vmatpush3.bf16.msra.mxu1 %v25515_v46  ;;  %v4516_v55 = vsel %vm2685_vm5, %v4506_v50, %v4515_v18  ;;  %v4533_v50 = vor.u32 %v4532_v53, %v4529_v7  ;;  %v4975_v48 = vsel %vm1373_vm0, %v4970_v52, %v4974_v4  ;;  %v4990_v57 = vrot.slane %v31327_v62, 1  ;;  %v27585_v12 = vld [vmem:[#allocation2 + $0x90] sm:$0x1]  ;;  %v25534_v53 = vld [vmem:[%s31262_s1 + $0x78] sm:$0xff]   ;;  %v25540_v4 = vld [vmem:[%s31262_s1 + $0xe8] sm:$0xff]  }
 0x35e   : > { %22346 = vmatpush3.bf16.msra.mxu0 %v25516_v39  ;;  %22311 = vmatprep.subr.bf16.mxu1 %v25517_v41  ;;  %v4525_v46 = vsel %vm2685_vm5, %v4515_v18, %v4524_v35  ;;  %v25523_v39 = vld [vmem:[%s31262_s1 + $0x260] sm:$0xff]   ;;  %v4996_v40 = vshll.u32 %v27585_v12, 16  ;;  %v5289_v52 = vrot.slane %v27493_v6, 1 }
 0x35f   : > { %22347 = vmatprep.subr.bf16.mxu0 %v25518_v2 }
 0x360   : > { %v4998_v18 = vrot.slane %v4996_v40, 1  ;;  %v25547_v40 = vld [vmem:[%s31262_s1 + $0x120] sm:$0xff]  }
 0x361   : > { %22312 = vmatpush3.bf16.msra.mxu1 %v25517_v41  ;;  %v4534_v41 = vsel %vm2685_vm5, %v4524_v35, %v4533_v50  ;;  %v27643_v50 = vld [vmem:[#allocation2 + $0x80] sm:$0xff] }
 0x362   : > { %22348 = vmatpush3.bf16.msra.mxu0 %v25518_v2  ;;  %22313 = vmatprep.subr.bf16.mxu1 %v25519_v29  ;;  %v4982_v2 = vrot.slane %v4980_v14, 1  ;;  %v25529_v14 = vld [vmem:[%s31262_s1 + $0x278] sm:$0xff]  }
 0x363   : > { %22349 = vmatprep.subr.bf16.mxu0 %v25520_v36 }
 0x364   : > { %22302 = vmatmul.mubr.bf16.gmra.mrb[88].mxu1 %v4516_v55  ;;  %v4986_v16 = vor.u32 %v4984_v37, %v4982_v2  ;;  %v4983_v25 = vsel %vm1373_vm0, %v4978_v15, %v4982_v2  ;;  %v25532_v55 = vld [vmem:[%s31262_s1 + $0x68] sm:$0xff]  }
 0x365   : > { %22305 = vmatprep.mubr.bf16.mxu1 %v4525_v46  ;;  %22314 = vmatpush3.bf16.msra.mxu1 %v25519_v29  ;;  %v4994_v29 = vor.u32 %v31328_v8, %v4990_v57  ;;  %v25536_v46 = vld [vmem:[%s31262_s1 + $0xc8] sm:$0xff]  }
 0x366   : > { %22350 = vmatpush3.bf16.msra.mxu0 %v25520_v36  ;;  %22315 = vmatprep.subr.bf16.mxu1 %v25521_v31  ;;  %v4991_v37 = vsel %vm1373_vm0, %v4986_v16, %v4990_v57  ;;  %v25531_v36 = vld [vmem:[%s31262_s1 + $0x60] sm:$0xff]   ;;  %v5295_v16 = vrot.slane %v27643_v50, 1  ;;  %v25546_v57 = vld [vmem:[%s31262_s1 + $0x118] sm:$0xff]  }
 0x367   : > { %22351 = vmatprep.subr.bf16.mxu0 %v25522_v27  ;;  %v4999_v35 = vsel %vm1373_vm0, %v4994_v29, %v4998_v18  ;;  %v25548_v29 = vld [vmem:[%s31262_s1 + $0x128] sm:$0xff]  }
 0x369   : > { %22316 = vmatpush3.bf16.msra.mxu1 %v25521_v31  ;;  %v31330_v31 = vrot.slane %v27039_v5, 3  ;;  %v4710_v5 = vrot.slane %v27449_v22, 3  ;;  %v25535_v22 = vld [vmem:[%s31262_s1 + $0xc0] sm:$0xff]  }
 0x36a   : > { %22352 = vmatpush3.bf16.msra.mxu0 %v25522_v27  ;;  %22317 = vmatprep.subr.bf16.mxu1 %v25523_v39  ;;  %v4709_v27 = vsel %vm2915_vm4, %v4706_v24, %v4708_v56 }
 0x36b   : > { %22365 = vmatprep.subr.bf16.mxu0 %v25524_v19  ;;  %v4707_v17 = vsel %vm2915_vm4, %v31330_v31, %v4706_v24  ;;  %v4711_v7 = vsel %vm2915_vm4, %v4708_v56, %v4710_v5  ;;  %v25549_v24 = vld [vmem:[%s31262_s1 + $0x130] sm:$0xff]   ;;  %v25552_v31 = vld [vmem:[%s31262_s1 + $0x148] sm:$0xff]  }
 0x36c   : > { %22306 = vmatmul.mubr.bf16.gmra.mrb[92].mxu1 %v4534_v41  ;;  %v27653_v41 = vld [vmem:[#allocation2 + $0x88] sm:$0xff] }
 0x36d   : > { %22354 = vmatmul.mubr.bf16.vlgmr.msra.gmra.mrb[44].mxu0 %v4967_v1  ;;  %22318 = vmatpush3.bf16.msra.mxu1 %v25523_v39  ;;  %v25538_v39 = vld [vmem:[%s31262_s1 + $0xd8] sm:$0xff]   ;;  %v25541_v1 = vld [vmem:[%s31262_s1 + $0xf0] sm:$0xff]   ;;  %v5297_v62 = vrot.slane %v27653_v41, 1 }
 0x36e   : > { %22325 = vmatprep.mubr.bf16.mxu1 %v4703_v59  ;;  %22357 = vmatprep.mubr.bf16.mxu0 %v4975_v48  ;;  %v5291_v59 = vrot.slane %v27631_v49, 1  ;;  %v5293_v48 = vrot.slane %v27640_v11, 1 }
 0x36f   : > { %22366 = vmatpush3.bf16.msra.mxu0 %v25524_v19  ;;  %22319 = vmatprep.subr.bf16.mxu1 %v25525_v13  ;;  %v5264_v19 = vld [vmem:[#allocation2 + $0x60] sm:$0xfe] }
 0x370   : > { %22367 = vmatprep.subr.bf16.mxu0 %v25526_v33  ;;  %v5288_v51 = vrot.slane %v5264_v19, 1  ;;  %v5292_v2 = vsel %vm1715_vm1, %v5289_v52, %v5291_v59  ;;  %v5294_v15 = vsel %vm1715_vm1, %v5291_v59, %v5293_v48 }
 0x371   : > { %22320 = vmatpush3.bf16.msra.mxu1 %v25525_v13 }
 0x372   : > { %22321 = vmatprep.subr.bf16.mxu1 %v25527_v58  ;;  %v5290_v13 = vsel %vm1715_vm1, %v5288_v51, %v5289_v52  ;;  %v25557_v51 = vld [vmem:[%s31262_s1 + $0x170] sm:$0xff]   ;;  %v25558_v52 = vld [vmem:[%s31262_s1 + $0x178] sm:$0xff]  }
 0x373   : > { %22368 = vmatpush3.bf16.msra.mxu0 %v25526_v33  ;;  %v25543_v33 = vld [vmem:[%s31262_s1 + $0x100] sm:$0xff]  }
 0x374   : > { %22369 = vmatprep.subr.bf16.mxu0 %v25528_v43 }
 0x375   : > { %22358 = vmatmul.mubr.bf16.gmra.mrb[48].mxu0 %v4983_v25  ;;  %22322 = vmatpush3.bf16.msra.mxu1 %v25527_v58  ;;  %v25544_v58 = vld [vmem:[%s31262_s1 + $0x108] sm:$0xff]   ;;  %v5298_v25 = vsel %vm1715_vm1, %v5295_v16, %v5297_v62 }
 0x376   : > { %22361 = vmatprep.mubr.bf16.mxu0 %v4991_v37  ;;  %22323 = vmatprep.subr.bf16.mxu1 %v25529_v14  ;;  %v5299_v37 = vrot.slane %v27585_v12, 1  ;;  %v25550_v12 = vld [vmem:[%s31262_s1 + $0x138] sm:$0xff]  }
 0x377   : > { %22370 = vmatpush3.bf16.msra.mxu0 %v25528_v43  ;;  %v25545_v43 = vld [vmem:[%s31262_s1 + $0x110] sm:$0xff]  }
 0x378   : > { %22371 = vmatprep.subr.bf16.mxu0 %v25530_v32  ;;  %v5300_v18 = vsel %vm1715_vm1, %v5297_v62, %v5299_v37 }
 0x379   : > { %22324 = vmatpush3.bf16.msra.mxu1 %v25529_v14  ;;  %v5296_v14 = vsel %vm1715_vm1, %v5293_v48, %v5295_v16  ;;  %v25564_v16 = vld [vmem:[%s31262_s1 + $0x1a8] sm:$0xff]  }
 0x37a   : > { %7167 = vmatprep.subr.bf16.mxu1 %v31329_v26 }
 0x37b   : > { %22372 = vmatpush3.bf16.msra.mxu0 %v25530_v32  ;;  %v5448_v32 = vld [vmem:[#allocation2 + $0x68] sm:$0xfe] }
 0x37c   : > { %22326 = vmatmul.mubr.bf16.vlgmr.msra.gmra.mrb[84].mxu1 %v27057_v23  ;;  %22373 = vmatprep.subr.bf16.mxu0 %v25531_v36  ;;  %v25533_v23 = vld [vmem:[%s31262_s1 + $0x70] sm:$0xff]   ;;  %v5478_v8 = vrot.slane %v5448_v32, 1 }
 0x37d   : > { %22362 = vmatmul.mubr.bf16.gmra.mrb[52].mxu0 %v4999_v35  ;;  %22329 = vmatprep.mubr.bf16.mxu1 %v4707_v17  ;;  %v25551_v35 = vld [vmem:[%s31262_s1 + $0x140] sm:$0xff]   ;;  %v25553_v17 = vld [vmem:[%s31262_s1 + $0x150] sm:$0xff]  }
 0x37e   : > { %22381 = vmatprep.mubr.bf16.mxu0 %v27435_v60  ;;  %v4712_v60 = vrot.slane %v27528_v44, 3  ;;  %v25537_v44 = vld [vmem:[%s31262_s1 + $0xd0] sm:$0xff]  }
 0x37f   : > { %22374 = vmatpush3.bf16.msra.mxu0 %v25531_v36  ;;  %v5480_v36 = vsel %vm1715_vm1, %v5478_v8, %v5291_v59  ;;  %v25570_v8 = vld [vmem:[%s31262_s1 + $0x1d8] sm:$0xff]  }
 0x380   : > { %22375 = vmatprep.subr.bf16.mxu0 %v25532_v55  ;;  %v4713_v9 = vsel %vm2915_vm4, %v4710_v5, %v4712_v60  ;;  %v5659_v5 = vshll.u32 %v5448_v32, 16 }
 0x383   : > { %22376 = vmatpush3.bf16.msra.mxu0 %v25532_v55  ;;  %v27707_v55 = vld [vmem:[#allocation2 + $0x90] sm:$0xff] }
 0x384   : > { %22330 = vmatmul.mubr.bf16.gmra.mrb[88].mxu1 %v4709_v27  ;;  %22377 = vmatprep.subr.bf16.mxu0 %v25533_v23  ;;  %v5487_v56 = vrot.slane %v27707_v55, 1  ;;  %v25554_v27 = vld [vmem:[%s31262_s1 + $0x158] sm:$0xff]   ;;  %v5892_v37 = vrot.slane %v27707_v55, 2 }
 0x385   : > { %22333 = vmatprep.mubr.bf16.mxu1 %v4711_v7 }
 0x386   : > { %v5488_v7 = vsel %vm1715_vm1, %v5297_v62, %v5487_v56  ;;  %v25565_v62 = vld [vmem:[%s31262_s1 + $0x1b0] sm:$0xff]  }
 0x387   : > { %22378 = vmatpush3.bf16.msra.mxu0 %v25533_v23  ;;  %v5656_v23 = vshrl.u32 %v5448_v32, 16 }
 0x388   : > { %22379 = vmatprep.subr.bf16.mxu0 %v25534_v53 }
 0x389   : > { %v5658_v60 = vrot.slane %v5656_v23, 1 }
 0x38b   : > { %22380 = vmatpush3.bf16.msra.mxu0 %v25534_v53  ;;  %v5454_v53 = vld [vmem:[#allocation2 + $0x98] sm:$0x1] }
 0x38c   : > { %22334 = vmatmul.mubr.bf16.gmra.mrb[92].mxu1 %v4713_v9  ;;  %22393 = vmatprep.subr.bf16.mxu0 %v25535_v22  ;;  %v25555_v9 = vld [vmem:[%s31262_s1 + $0x160] sm:$0xff]  }
 0x38e   : > { %22382 = vmatmul.mubr.bf16.vlgmr.msra.gmra.mrb[44].mxu0 %v27493_v6  ;;  %v25542_v6 = vld [vmem:[%s31262_s1 + $0xf8] sm:$0xff]  }
 0x38f   : > { %22385 = vmatprep.mubr.bf16.mxu0 %v27631_v49  ;;  %22394 = vmatpush3.bf16.msra.mxu0 %v25535_v22  ;;  %v5661_v22 = vrot.slane %v5659_v5, 2 }
 0x390   : > { %22395 = vmatprep.subr.bf16.mxu0 %v25536_v46 }
 0x393   : > { %22396 = vmatpush3.bf16.msra.mxu0 %v25536_v46  ;;  %v5489_v46 = vrot.slane %v5454_v53, 1 }
 0x394   : > { %22397 = vmatprep.subr.bf16.mxu0 %v25537_v44 }
 0x395   : > { %v5490_v19 = vsel %vm1715_vm1, %v5487_v56, %v5489_v46  ;;  %v25572_v56 = vld [vmem:[%s31262_s1 + $0x1e8] sm:$0xff]   ;;  %v25573_v46 = vld [vmem:[%s31262_s1 + $0x1f0] sm:$0xff]  }
 0x396   : > { %22386 = vmatmul.mubr.bf16.gmra.mrb[48].mxu0 %v27640_v11 }
 0x397   : > { %22389 = vmatprep.mubr.bf16.mxu0 %v27643_v50  ;;  %22398 = vmatpush3.bf16.msra.mxu0 %v25537_v44  ;;  %v5662_v44 = vor.u32 %v5661_v22, %v5658_v60 }
 0x398   : > { %22399 = vmatprep.subr.bf16.mxu0 %v25538_v39 }
 0x39b   : > { %22400 = vmatpush3.bf16.msra.mxu0 %v25538_v39  ;;  %v25556_v39 = vld [vmem:[%s31262_s1 + $0x168] sm:$0xff]  }
 0x39c   : > { %22401 = vmatprep.subr.bf16.mxu0 %v25539_v10 }
 0x39e   : > { %22390 = vmatmul.mubr.bf16.gmra.mrb[52].mxu0 %v27653_v41 }
 0x39f   : > { %22402 = vmatpush3.bf16.msra.mxu0 %v25539_v10  ;;  %22409 = vmatprep.mubr.bf16.mxu0 %v5290_v13  ;;  %v5671_v10 = vsel %vm2085_vm3, %v5662_v44, %v27165_v21  ;;  %v25560_v21 = vld [vmem:[%s31262_s1 + $0x188] sm:$0xff]   ;;  %v27736_v13 = vld [vmem:[#allocation2 + $0x98] sm:$0x3] }
 0x3a0   : > { %22403 = vmatprep.subr.bf16.mxu0 %v25540_v4 }
 0x3a3   : > { %22404 = vmatpush3.bf16.msra.mxu0 %v25540_v4  ;;  %v25559_v4 = vld [vmem:[%s31262_s1 + $0x180] sm:$0xff]  }
 0x3a4   : > { %22405 = vmatprep.subr.bf16.mxu0 %v25541_v1 }
 0x3a7   : > { %22406 = vmatpush3.bf16.msra.mxu0 %v25541_v1  ;;  %v25561_v1 = vld [vmem:[%s31262_s1 + $0x190] sm:$0xff]  }
 0x3a8   : > { %22407 = vmatprep.subr.bf16.mxu0 %v25542_v6 }
 0x3ab   : > { %22408 = vmatpush3.bf16.msra.mxu0 %v25542_v6  ;;  %v5709_v6 = vshrl.u32 %v27736_v13, 16 }
 0x3ac   : > { %22421 = vmatprep.subr.bf16.mxu0 %v25543_v33 }
 0x3ad   : > { %v5711_v59 = vrot.slane %v5709_v6, 1 }
 0x3ae   : > { %22410 = vmatmul.mubr.bf16.vlgmr.msra.gmra.mrb[44].mxu0 %v5292_v2 }
 0x3af   : > { %22413 = vmatprep.mubr.bf16.mxu0 %v5294_v15  ;;  %22422 = vmatpush3.bf16.msra.mxu0 %v25543_v33  ;;  %v5712_v33 = vshll.u32 %v27736_v13, 16 }
 0x3b0   : > { %22423 = vmatprep.subr.bf16.mxu0 %v25544_v58 }
 0x3b1   : > { %v5714_v48 = vrot.slane %v5712_v33, 2 }
 0x3b3   : > { %22424 = vmatpush3.bf16.msra.mxu0 %v25544_v58  ;;  %v25563_v58 = vld [vmem:[%s31262_s1 + $0x1a0] sm:$0xff]   ;;  %v5715_v2 = vor.u32 %v5714_v48, %v5711_v59 }
 0x3b4   : > { %22425 = vmatprep.subr.bf16.mxu0 %v25545_v43 }
 0x3b6   : > { %22414 = vmatmul.mubr.bf16.gmra.mrb[48].mxu0 %v5296_v14 }
 0x3b7   : > { %22417 = vmatprep.mubr.bf16.mxu0 %v5298_v25  ;;  %22426 = vmatpush3.bf16.msra.mxu0 %v25545_v43  ;;  %v5884_v43 = vrot.slane %v27631_v49, 2  ;;  %v25566_v49 = vld [vmem:[%s31262_s1 + $0x1b8] sm:$0xff]  }
 0x3b8   : > { %22427 = vmatprep.subr.bf16.mxu0 %v25546_v57 }
 0x3bb   : > { %22428 = vmatpush3.bf16.msra.mxu0 %v25546_v57  ;;  %v5886_v57 = vrot.slane %v27640_v11, 2  ;;  %v25569_v11 = vld [vmem:[%s31262_s1 + $0x1d0] sm:$0xff]  }
 0x3bc   : > { %22429 = vmatprep.subr.bf16.mxu0 %v25547_v40 }
 0x3bd   : > { %v5887_v32 = vsel %vm2315_vm2, %v5884_v43, %v5886_v57 }
 0x3be   : > { %22418 = vmatmul.mubr.bf16.gmra.mrb[52].mxu0 %v5300_v18 }
 0x3bf   : > { %22430 = vmatpush3.bf16.msra.mxu0 %v25547_v40  ;;  %22437 = vmatprep.mubr.bf16.mxu0 %v5480_v36  ;;  %v27785_v36 = vld [vmem:[#allocation2 + $0x70] sm:$0xfc] }
 0x3c0   : > { %22431 = vmatprep.subr.bf16.mxu0 %v25548_v29 }
 0x3c3   : > { %22432 = vmatpush3.bf16.msra.mxu0 %v25548_v29 }
 0x3c4   : > { %22433 = vmatprep.subr.bf16.mxu0 %v25549_v24 }
 0x3c7   : > { %22434 = vmatpush3.bf16.msra.mxu0 %v25549_v24  ;;  %v25571_v24 = vld [vmem:[%s31262_s1 + $0x1e0] sm:$0xff]  }
 0x3c8   : > { %22435 = vmatprep.subr.bf16.mxu0 %v25550_v12 }
 0x3cb   : > { %22436 = vmatpush3.bf16.msra.mxu0 %v25550_v12  ;;  %v5894_v12 = vrot.slane %v27736_v13, 2 }
 0x3cc   : > { %22449 = vmatprep.subr.bf16.mxu0 %v25551_v35 }
 0x3cd   : > { %v5895_v5 = vsel %vm2315_vm2, %v5892_v37, %v5894_v12 }
 0x3ce   : > { %22438 = vmatmul.mubr.bf16.vlgmr.msra.gmra.mrb[44].mxu0 %v5294_v15 }
 0x3cf   : > { %22441 = vmatprep.mubr.bf16.mxu0 %v5296_v14  ;;  %22450 = vmatpush3.bf16.msra.mxu0 %v25551_v35  ;;  %v5888_v14 = vrot.slane %v27643_v50, 2  ;;  %v5890_v50 = vrot.slane %v27653_v41, 2  ;;  %v18422_v41 = vld [vmem:[%s31263_s2 + $0x2] sm:$0x3]  ;;  %v6073_v35 = vrot.slane %v27785_v36, 2 }
 0x3d0   : > { %22451 = vmatprep.subr.bf16.mxu0 %v25552_v31  ;;  %v27799_v55 = vrot.slane %v18422_v41, %v26324_v28  ;;  %v27805_v23 = vrot.slane %v18422_v41, %v26330_v30 }
 0x3d1   : > { %v5889_v40 = vsel %vm2315_vm2, %v5886_v57, %v5888_v14  ;;  %v5891_v29 = vsel %vm2315_vm2, %v5888_v14, %v5890_v50  ;;  %v5893_v18 = vsel %vm2315_vm2, %v5890_v50, %v5892_v37  ;;  %v27835_v14 = vld [vmem:[#allocation2 + $0x88] sm:$0xff] }
 0x3d3   : > { %22452 = vmatpush3.bf16.msra.mxu0 %v25552_v31  ;;  %v27795_v31 = vld [vmem:[#allocation2 + $0x78] sm:$0xff] }
 0x3d4   : > { %22453 = vmatprep.subr.bf16.mxu0 %v25553_v17 }
 0x3d6   : > { %22442 = vmatmul.mubr.bf16.gmra.mrb[48].mxu0 %v5298_v25  ;;  %v25568_v25 = vld [vmem:[%s31262_s1 + $0x1c8] sm:$0xff]  }
 0x3d7   : > { %22445 = vmatprep.mubr.bf16.mxu0 %v5488_v7  ;;  %22454 = vmatpush3.bf16.msra.mxu0 %v25553_v17  ;;  %v6074_v17 = vrot.slane %v27795_v31, 2 }
 0x3d8   : > { %22455 = vmatprep.subr.bf16.mxu0 %v25554_v27 }
 0x3db   : > { %22456 = vmatpush3.bf16.msra.mxu0 %v25554_v27  ;;  %v6075_v27 = vsel %vm2315_vm2, %v6073_v35, %v6074_v17 }
 0x3dc   : > { %22457 = vmatprep.subr.bf16.mxu0 %v25555_v9 }
 0x3de   : > { %22446 = vmatmul.mubr.bf16.gmra.mrb[52].mxu0 %v5490_v19 }
 0x3df   : > { %22458 = vmatpush3.bf16.msra.mxu0 %v25555_v9  ;;  %22465 = vmatprep.mubr.bf16.mxu0 %v5671_v10 }
 0x3e0   : > { %22459 = vmatprep.subr.bf16.mxu0 %v25556_v39 }
 0x3e3   : > { %22460 = vmatpush3.bf16.msra.mxu0 %v25556_v39 }
 0x3e4   : > { %22461 = vmatprep.subr.bf16.mxu0 %v25557_v51 }
 0x3e7   : > { %22462 = vmatpush3.bf16.msra.mxu0 %v25557_v51 }
 0x3e8   : > { %22463 = vmatprep.subr.bf16.mxu0 %v25558_v52 }
 0x3eb   : > { %22464 = vmatpush3.bf16.msra.mxu0 %v25558_v52 }
 0x3ec   : > { %22477 = vmatprep.subr.bf16.mxu0 %v25559_v4 }
 0x3ee   : > { %22466 = vmatmul.mubr.bf16.vlgmr.msra.gmra.mrb[44].mxu0 %v27173_v20  ;;  %v25562_v20 = vld [vmem:[%s31262_s1 + $0x198] sm:$0xff]  }
 0x3ef   : > { %22469 = vmatprep.mubr.bf16.mxu0 %v27196_v61  ;;  %22478 = vmatpush3.bf16.msra.mxu0 %v25559_v4  ;;  %v5864_v61 = vld [vmem:[#allocation2 + $0x68] sm:$0xfc] }
 0x3f0   : > { %22479 = vmatprep.subr.bf16.mxu0 %v25560_v21  ;;  %v5883_v15 = vrot.slane %v5864_v61, 2 }
 0x3f3   : > { %22480 = vmatpush3.bf16.msra.mxu0 %v25560_v21  ;;  %v25574_v21 = vld [vmem:[%s31262_s1 + $0x1f8] sm:$0xff]  }
 0x3f4   : > { %22481 = vmatprep.subr.bf16.mxu0 %v25561_v1 }
 0x3f6   : > { %22470 = vmatmul.mubr.bf16.gmra.mrb[48].mxu0 %v27224_v54  ;;  %v5716_v54 = vsel %vm2085_vm3, %v27253_v38, %v5715_v2  ;;  %v25567_v38 = vld [vmem:[%s31262_s1 + $0x1c0] sm:$0xff]  }
 0x3f7   : > { %22473 = vmatprep.mubr.bf16.mxu0 %v27264_v47  ;;  %22482 = vmatpush3.bf16.msra.mxu0 %v25561_v1  ;;  %v5885_v47 = vsel %vm2315_vm2, %v5883_v15, %v5884_v43  ;;  %v25575_v43 = vld [vmem:[%s31262_s1 + $0x200] sm:$0xff]  }
 0x3f8   : > { %22483 = vmatprep.subr.bf16.mxu0 %v25562_v20 }
 0x3fb   : > { %22484 = vmatpush3.bf16.msra.mxu0 %v25562_v20 }
 0x3fc   : > { %22485 = vmatprep.subr.bf16.mxu0 %v25563_v58 }
 0x3fe   : > { %22474 = vmatmul.mubr.bf16.gmra.mrb[52].mxu0 %v5716_v54 }
 0x3ff   : > { %22486 = vmatpush3.bf16.msra.mxu0 %v25563_v58  ;;  %22493 = vmatprep.mubr.bf16.mxu0 %v5885_v47 }
 0x400   : > { %22487 = vmatprep.subr.bf16.mxu0 %v25564_v16 }
 0x403   : > { %22488 = vmatpush3.bf16.msra.mxu0 %v25564_v16 }
 0x404   : > { %22489 = vmatprep.subr.bf16.mxu0 %v25565_v62 }
 0x407   : > { %22490 = vmatpush3.bf16.msra.mxu0 %v25565_v62  ;;  %v27830_v62 = vld [vmem:[#allocation2 + $0x80] sm:$0xff] }
 0x408   : > { %22491 = vmatprep.subr.bf16.mxu0 %v25566_v49 }
 0x40b   : > { %22492 = vmatpush3.bf16.msra.mxu0 %v25566_v49  ;;  %v6076_v49 = vrot.slane %v27830_v62, 2 }
 0x40c   : > { %22505 = vmatprep.subr.bf16.mxu0 %v25567_v38 }
 0x40e   : > { %22494 = vmatmul.mubr.bf16.vlgmr.msra.gmra.mrb[44].mxu0 %v5887_v32 }
 0x40f   : > { %22497 = vmatprep.mubr.bf16.mxu0 %v5889_v40  ;;  %22506 = vmatpush3.bf16.msra.mxu0 %v25567_v38 }
 0x410   : > { %22507 = vmatprep.subr.bf16.mxu0 %v25568_v25 }
 0x413   : > { %22508 = vmatpush3.bf16.msra.mxu0 %v25568_v25  ;;  %v6078_v25 = vrot.slane %v27835_v14, 2 }
 0x414   : > { %22509 = vmatprep.subr.bf16.mxu0 %v25569_v11 }
 0x415   : > { %v6079_v41 = vsel %vm2315_vm2, %v6076_v49, %v6078_v25 }
 0x416   : > { %22498 = vmatmul.mubr.bf16.gmra.mrb[48].mxu0 %v5891_v29 }
 0x417   : > { %22501 = vmatprep.mubr.bf16.mxu0 %v5893_v18  ;;  %22510 = vmatpush3.bf16.msra.mxu0 %v25569_v11  ;;  %v25576_v11 = vld [vmem:[%s31262_s1 + $0x208] sm:$0xff]  }
 0x418   : > { %22511 = vmatprep.subr.bf16.mxu0 %v25570_v8 }
 0x41b   : > { %22512 = vmatpush3.bf16.msra.mxu0 %v25570_v8  ;;  %v6077_v8 = vsel %vm2315_vm2, %v6074_v17, %v6076_v49  ;;  %v25577_v17 = vld [vmem:[%s31262_s1 + $0x210] sm:$0xff]  }
 0x41c   : > { %22513 = vmatprep.subr.bf16.mxu0 %v25571_v24 }
 0x41e   : > { %22502 = vmatmul.mubr.bf16.gmra.mrb[52].mxu0 %v5895_v5  ;;  %v22075_v7 = vpop.f32.mrb[32].mxu0 }
 0x41f   : > { %22514 = vmatpush3.bf16.msra.mxu0 %v25571_v24  ;;  %22521 = vmatprep.mubr.bf16.mxu0 %v6075_v27  ;;  %v3082_v53 = vmul.f32 %v22075_v7, %v27799_v55  ;;  %v3017_v60 = vpop.f32.mrb[33].mxu0 }
 0x420   : > { %v3080_v22 = vmul.f32 %v27799_v55, %v3017_v60  ;;  %22515 = vmatprep.subr.bf16.mxu0 %v25572_v56  ;;  %v22076_v9 = vpop.f32.mrb[34].mxu0  ;;  %v6254_v60 = vshll.u32 %v27785_v36, 16 }
 0x421   : > { %v3098_v44 = vadd.f32 %v27805_v23, %v3082_v53  ;;  %v3083_v39 = vmul.f32 %v22076_v9, %v27799_v55  ;;  %v3020_v19 = vpop.f32.mrb[35].mxu0  ;;  %v6251_v53 = vshrl.u32 %v27785_v36, 16 }
 0x422   : > { %v3096_v10 = vadd.f32 %v27805_v23, %v3080_v22  ;;  %v3081_v51 = vmul.f32 %v27799_v55, %v3020_v19  ;;  %v6259_v19 = vshrl.u32 %v27795_v31, 16 }
 0x423   : > { %v3099_v52 = vadd.f32 %v27805_v23, %v3083_v39  ;;  %22516 = vmatpush3.bf16.msra.mxu0 %v25572_v56  ;;  %v3110_v13 = vmax.f32 %v3098_v44, 0.0  ;;  %v27856_v44 = vld [vmem:[#allocation2 + $0x90] sm:$0xff] }
 0x424   : > { %v3097_v4 = vadd.f32 %v27805_v23, %v3081_v51  ;;  %22517 = vmatprep.subr.bf16.mxu0 %v25573_v46  ;;  %v3108_v6 = vmax.f32 %v3096_v10, 0.0  ;;  %v6080_v39 = vrot.slane %v27856_v44, 2 }
 0x425   : > { %v3111_v1 = vmax.f32 %v3099_v52, 0.0  ;;  %v27862_v52 = vld [vmem:[#allocation2 + $0x98] sm:$0xff] }
 0x426   : > { %v3109_v33 = vmax.f32 %v3097_v4, 0.0  ;;  %v22079_v20 = vpop.f32.mrb[36].mxu0  ;;  %v6082_v36 = vrot.slane %v27862_v52, 2  ;;  %v6262_v4 = vshll.u32 %v27795_v31, 16 }
 0x427   : > { %v3121_v59 = vpack.c.bf16 %v3111_v1, %v3110_v13  ;;  %22518 = vmatpush3.bf16.msra.mxu0 %v25573_v46  ;;  %v3086_v48 = vmul.f32 %v22079_v20, %v27799_v55  ;;  %v3033_v61 = vpop.f32.mrb[37].mxu0  ;;  %v25578_v1 = vld [vmem:[%s31262_s1 + $0x218] sm:$0xff]  }
 0x428   : > { %v3120_v58 = vpack.c.bf16 %v3109_v33, %v3108_v6  ;;  %v3084_v2 = vmul.f32 %v27799_v55, %v3033_v61  ;;  %22519 = vmatprep.subr.bf16.mxu0 %v25574_v21  ;;  %v22080_v15 = vpop.f32.mrb[38].mxu0  ;;  %v6253_v6 = vrot.slane %v6251_v53, 2  ;;  %v6256_v33 = vrot.slane %v6254_v60, 3  ;;  %v25584_v53 = vld [vmem:[%s31262_s1 + $0x248] sm:$0xff]  }
 0x429   : > { %v3102_v16 = vadd.f32 %v27805_v23, %v3086_v48  ;;  %v3087_v54 = vmul.f32 %v22080_v15, %v27799_v55  ;;  %v3036_v47 = vpop.f32.mrb[39].mxu0  ;;  %v6081_v48 = vsel %vm2315_vm2, %v6078_v25, %v6080_v39  ;;  %v6261_v61 = vrot.slane %v6259_v19, 2  ;;  %v6049_v15 = vld [vmem:[#allocation2 + $0xa0] sm:$0x3]  ;;  %v25580_v25 = vld [vmem:[%s31262_s1 + $0x228] sm:$0xff]  }
 0x42a   : > { %v3100_v38 = vadd.f32 %v27805_v23, %v3084_v2  ;;  %v3085_v57 = vmul.f32 %v27799_v55, %v3036_v47  ;;  %7168 = vmatpush1.bf16.msra.mxu1 %v3120_v58  ;;  %v6083_v2 = vsel %vm2315_vm2, %v6080_v39, %v6082_v36  ;;  %v25579_v47 = vld [vmem:[%s31262_s1 + $0x220] sm:$0xff]   ;;  %v6084_v49 = vrot.slane %v6049_v15, 2 }
 0x42b   : > { %v3103_v32 = vadd.f32 %v27805_v23, %v3087_v54  ;;  %22520 = vmatpush3.bf16.msra.mxu0 %v25574_v21  ;;  %7169 = vmatprep.subr.bf16.mxu1 %v31329_v26  ;;  %v3114_v50 = vmax.f32 %v3102_v16, 0.0  ;;  %v27907_v19 = vld [vmem:[#allocation2 + $0xa0] sm:$0x7] }
 0x42c   : > { %v3101_v40 = vadd.f32 %v27805_v23, %v3085_v57  ;;  %22533 = vmatprep.subr.bf16.mxu0 %v25575_v43  ;;  %v3112_v29 = vmax.f32 %v3100_v38, 0.0  ;;  %v6257_v38 = vor.u32 %v6256_v33, %v6253_v6  ;;  %v6307_v6 = vshll.u32 %v27907_v19, 16 }
 0x42d   : > { %v3115_v37 = vmax.f32 %v3103_v32, 0.0  ;;  %v6085_v32 = vsel %vm2315_vm2, %v6082_v36, %v6084_v49  ;;  %v25585_v36 = vld [vmem:[%s31262_s1 + $0x250] sm:$0xff]  }
 0x42e   : > { %v3113_v18 = vmax.f32 %v3101_v40, 0.0  ;;  %22522 = vmatmul.mubr.bf16.vlgmr.msra.gmra.mrb[44].mxu0 %v6077_v8  ;;  %v22083_v24 = vpop.f32.mrb[40].mxu0  ;;  %7170 = vmatpush1.bf16.msra.mxu1 %v3121_v59  ;;  %v6277_v8 = vshrl.u32 %v27835_v14, 16 }
 0x42f   : > { %v3123_v12 = vpack.c.bf16 %v3115_v37, %v3114_v50  ;;  %22525 = vmatprep.mubr.bf16.mxu0 %v6079_v41  ;;  %22534 = vmatpush3.bf16.msra.mxu0 %v25575_v43  ;;  %v3090_v35 = vmul.f32 %v22083_v24, %v27799_v55  ;;  %v3049_v56 = vpop.f32.mrb[41].mxu0  ;;  %v6264_v43 = vrot.slane %v6262_v4, 3  ;;  %v6268_v50 = vshrl.u32 %v27830_v62, 16 }
 0x430   : > { %v3122_v5 = vpack.c.bf16 %v3113_v18, %v3112_v29  ;;  %v3088_v27 = vmul.f32 %v27799_v55, %v3049_v56  ;;  %22535 = vmatprep.subr.bf16.mxu0 %v25576_v11  ;;  %v22084_v7 = vpop.f32.mrb[42].mxu0  ;;  %7171 = vmatprep.subr.bf16.mxu1 %v31329_v26  ;;  %v6271_v37 = vshll.u32 %v27830_v62, 16  ;;  %v6280_v29 = vshll.u32 %v27835_v14, 16  ;;  %v25582_v18 = vld [vmem:[%s31262_s1 + $0x238] sm:$0xff]   ;;  %v25583_v62 = vld [vmem:[%s31262_s1 + $0x240] sm:$0xff]  }
 0x431   : > { %v3106_v22 = vadd.f32 %v27805_v23, %v3090_v35  ;;  %v3091_v9 = vmul.f32 %v22084_v7, %v27799_v55  ;;  %v3052_v46 = vpop.f32.mrb[43].mxu0  ;;  %v6265_v57 = vor.u32 %v6264_v43, %v6261_v61  ;;  %v6270_v41 = vrot.slane %v6268_v50, 2 }
 0x432   : > { %v3104_v10 = vadd.f32 %v27805_v23, %v3088_v27  ;;  %v3089_v51 = vmul.f32 %v27799_v55, %v3052_v46  ;;  %7172 = vmatpush1.bf16.msra.mxu1 %v3122_v5  ;;  %v6273_v24 = vrot.slane %v6271_v37, 3  ;;  %v6282_v35 = vrot.slane %v6280_v29, 3 }
 0x433   : > { %v3107_v21 = vadd.f32 %v27805_v23, %v3091_v9  ;;  %22536 = vmatpush3.bf16.msra.mxu0 %v25576_v11  ;;  %7173 = vmatprep.subr.bf16.mxu1 %v31329_v26  ;;  %v3118_v20 = vmax.f32 %v3106_v22, 0.0  ;;  %v6266_v40 = vsel %vm2685_vm5, %v6257_v38, %v6265_v57  ;;  %v25581_v11 = vld [vmem:[%s31262_s1 + $0x230] sm:$0xff]   ;;  %v6286_v5 = vshrl.u32 %v27856_v44, 16 }
 0x434   : > { %v3105_v13 = vadd.f32 %v27805_v23, %v3089_v51  ;;  %22537 = vmatprep.subr.bf16.mxu0 %v25577_v17  ;;  %v3116_v31 = vmax.f32 %v3104_v10, 0.0  ;;  %v6274_v56 = vor.u32 %v6273_v24, %v6270_v41  ;;  %v6289_v14 = vshll.u32 %v27856_v44, 16 }
 0x435   : > { %v3119_v59 = vmax.f32 %v3107_v21, 0.0  ;;  %v6295_v7 = vshrl.u32 %v27862_v52, 16  ;;  %v6288_v22 = vrot.slane %v6286_v5, 2 }
 0x436   : > { %v3117_v58 = vmax.f32 %v3105_v13, 0.0  ;;  %22526 = vmatmul.mubr.bf16.gmra.mrb[48].mxu0 %v6081_v48  ;;  %7174 = vmatpush1.bf16.msra.mxu1 %v3123_v12  ;;  %v6279_v12 = vrot.slane %v6277_v8, 2  ;;  %v6275_v60 = vsel %vm2685_vm5, %v6265_v57, %v6274_v56  ;;  %v6291_v9 = vrot.slane %v6289_v14, 3  ;;  %v25587_v8 = vld [vmem:[%s31262_s1 + $0x260] sm:$0xff]  }
 0x437   : > { %v3125_v16 = vpack.c.bf16 %v3119_v59, %v3118_v20  ;;  %22529 = vmatprep.mubr.bf16.mxu0 %v6083_v2  ;;  %22538 = vmatpush3.bf16.msra.mxu0 %v25577_v17  ;;  %v6298_v17 = vshll.u32 %v27862_v52, 16  ;;  %v6297_v39 = vrot.slane %v6295_v7, 2  ;;  %v25586_v2 = vld [vmem:[%s31262_s1 + $0x258] sm:$0xff]   ;;  %v25588_v7 = vld [vmem:[%s31262_s1 + $0x268] sm:$0xff]  }
 0x438   : > { %v3124_v54 = vpack.c.bf16 %v3117_v58, %v3116_v31  ;;  %22539 = vmatprep.subr.bf16.mxu0 %v25578_v1  ;;  %7175 = vmatprep.subr.bf16.mxu1 %v31329_v26  ;;  %v6283_v27 = vor.u32 %v6282_v35, %v6279_v12  ;;  %v6292_v13 = vor.u32 %v6291_v9, %v6288_v22  ;;  %v31331_v9 = vrot.slane %v27205_v63, 3 }
 0x439   : > { %v6300_v44 = vrot.slane %v6298_v17, 3 }
 0x43a   : > { %7176 = vmatpush1.bf16.msra.mxu1 %v3124_v54  ;;  %v6284_v46 = vsel %vm2685_vm5, %v6274_v56, %v6283_v27  ;;  %v6293_v43 = vsel %vm2685_vm5, %v6283_v27, %v6292_v13  ;;  %v6309_v54 = vrot.slane %v6307_v6, 3 }
 0x43b   : > { %22540 = vmatpush3.bf16.msra.mxu0 %v25578_v1  ;;  %7177 = vmatprep.subr.bf16.mxu1 %v31329_v26  ;;  %v6304_v1 = vshrl.u32 %v27907_v19, 16  ;;  %v6301_v48 = vor.u32 %v6300_v44, %v6297_v39 }
 0x43c   : > { %22541 = vmatprep.subr.bf16.mxu0 %v25579_v47 }
 0x43d   : > { %v6302_v38 = vsel %vm2685_vm5, %v6292_v13, %v6301_v48 }
 0x43e   : > { %22530 = vmatmul.mubr.bf16.gmra.mrb[52].mxu0 %v6085_v32  ;;  %7178 = vmatpush1.bf16.msra.mxu1 %v3125_v16  ;;  %v6306_v16 = vrot.slane %v6304_v1, 2 }
 0x43f   : > { %22542 = vmatpush3.bf16.msra.mxu0 %v25579_v47  ;;  %22549 = vmatprep.mubr.bf16.mxu0 %v6266_v40  ;;  %v6459_v40 = vld [vmem:[#allocation2 + $0x70] sm:$0xf8] }
 0x440   : > { %22543 = vmatprep.subr.bf16.mxu0 %v25580_v25  ;;  %7179 = vmatprep.subr.bf16.mxu1 %v31329_v26  ;;  %v6310_v24 = vor.u32 %v6309_v54, %v6306_v16  ;;  %v6478_v56 = vrot.slane %v6459_v40, 3 }
 0x443   : > { %22544 = vmatpush3.bf16.msra.mxu0 %v25580_v25 }
 0x444   : > { %22545 = vmatprep.subr.bf16.mxu0 %v25581_v11 }
 0x447   : > { %22546 = vmatpush3.bf16.msra.mxu0 %v25581_v11 }
 0x448   : > { %22547 = vmatprep.subr.bf16.mxu0 %v25582_v18 }
 0x44b   : > { %22548 = vmatpush3.bf16.msra.mxu0 %v25582_v18 }
 0x44c   : > { %22561 = vmatprep.subr.bf16.mxu0 %v25583_v62 }
 0x44e   : > { %22550 = vmatmul.mubr.bf16.vlgmr.msra.gmra.mrb[44].mxu0 %v6275_v60 }
 0x44f   : > { %22553 = vmatprep.mubr.bf16.mxu0 %v6284_v46  ;;  %22562 = vmatpush3.bf16.msra.mxu0 %v25583_v62  ;;  %v22327_v10 = vpop.f32.mrb[84].mxu1  ;;  %v6480_v46 = vsel %vm2915_vm4, %v6478_v56, %v31331_v9 }
 0x450   : > { %v4863_v51 = vmul.f32 %v22327_v10, %v27799_v55  ;;  %v4802_v52 = vpop.f32.mrb[85].mxu1  ;;  %22563 = vmatprep.subr.bf16.mxu0 %v25584_v53 }
 0x451   : > { %v4861_v4 = vmul.f32 %v4802_v52, %v27799_v55  ;;  %v22328_v21 = vpop.f32.mrb[86].mxu1 }
 0x452   : > { %v4875_v33 = vadd.f32 %v4863_v51, %v27805_v23  ;;  %v4864_v20 = vmul.f32 %v22328_v21, %v27799_v55  ;;  %v4805_v59 = vpop.f32.mrb[87].mxu1 }
 0x453   : > { %v4873_v61 = vadd.f32 %v4861_v4, %v27805_v23  ;;  %22564 = vmatpush3.bf16.msra.mxu0 %v25584_v53  ;;  %v4862_v31 = vmul.f32 %v4805_v59, %v27799_v55  ;;  %v6311_v53 = vsel %vm2685_vm5, %v6301_v48, %v6310_v24  ;;  %v25589_v4 = vld [vmem:[%s31262_s1 + $0x270] sm:$0xff]  }
 0x454   : > { %v4876_v58 = vadd.f32 %v4864_v20, %v27805_v23  ;;  %22565 = vmatprep.subr.bf16.mxu0 %v25585_v36  ;;  %v4887_v47 = vmax.f32 %v4875_v33, 0.0 }
 0x455   : > { %v4874_v15 = vadd.f32 %v4862_v31, %v27805_v23  ;;  %v4885_v57 = vmax.f32 %v4873_v61, 0.0  ;;  %v25590_v61 = vld [vmem:[%s31262_s1 + $0x278] sm:$0xff]  }
 0x456   : > { %v4888_v49 = vmax.f32 %v4876_v58, 0.0  ;;  %22554 = vmatmul.mubr.bf16.gmra.mrb[48].mxu0 %v6293_v43 }
 0x457   : > { %v4886_v25 = vmax.f32 %v4874_v15, 0.0  ;;  %22557 = vmatprep.mubr.bf16.mxu0 %v6302_v38  ;;  %22566 = vmatpush3.bf16.msra.mxu0 %v25585_v36  ;;  %v22331_v32 = vpop.f32.mrb[88].mxu1 }
 0x458   : > { %v4898_v11 = vpack.c.bf16 %v4888_v49, %v4887_v47  ;;  %v4867_v50 = vmul.f32 %v22331_v32, %v27799_v55  ;;  %v4818_v37 = vpop.f32.mrb[89].mxu1  ;;  %22567 = vmatprep.subr.bf16.mxu0 %v25586_v2  ;;  %v6489_v47 = vrot.slane %v27907_v19, 3  ;;  %v31332_v49 = vrot.slane %v27218_v45, 3 }
 0x459   : > { %v4897_v29 = vpack.c.bf16 %v4886_v25, %v4885_v57  ;;  %v4865_v18 = vmul.f32 %v4818_v37, %v27799_v55  ;;  %v22332_v41 = vpop.f32.mrb[90].mxu1 }
 0x45a   : > { %v4879_v12 = vadd.f32 %v4867_v50, %v27805_v23  ;;  %v4868_v35 = vmul.f32 %v22332_v41, %v27799_v55  ;;  %v4821_v62 = vpop.f32.mrb[91].mxu1  ;;  %v6490_v38 = vsel %vm2915_vm4, %v31332_v49, %v6489_v47  ;;  %v25594_v47 = vld [vmem:[%s31265_s4 + $0x1c] ss:$12 sps:$4 sm:$0xff]   ;;  %v25598_v49 = vld [vmem:[%s31265_s4 + $0x34] ss:$12 sps:$4 sm:$0xff]  }
 0x45b   : > { %v4877_v5 = vadd.f32 %v4865_v18, %v27805_v23  ;;  %22568 = vmatpush3.bf16.msra.mxu0 %v25586_v2  ;;  %v4866_v14 = vmul.f32 %v4821_v62, %v27799_v55  ;;  %7180 = vmatpush1.bf16.msra.mxu1 %v4897_v29 }
 0x45c   : > { %v4880_v27 = vadd.f32 %v4868_v35, %v27805_v23  ;;  %22569 = vmatprep.subr.bf16.mxu0 %v25587_v8  ;;  %7181 = vmatprep.subr.bf16.mxu1 %v31329_v26  ;;  %v4891_v60 = vmax.f32 %v4879_v12, 0.0 }
 0x45d   : > { %v4878_v17 = vadd.f32 %v4866_v14, %v27805_v23  ;;  %v4889_v39 = vmax.f32 %v4877_v5, 0.0 }
 0x45e   : > { %v4892_v22 = vmax.f32 %v4880_v27, 0.0  ;;  %22558 = vmatmul.mubr.bf16.gmra.mrb[52].mxu0 %v6311_v53 }
 0x45f   : > { %v4890_v44 = vmax.f32 %v4878_v17, 0.0  ;;  %22570 = vmatpush3.bf16.msra.mxu0 %v25587_v8  ;;  %22577 = vmatprep.mubr.bf16.mxu0 %v6480_v46  ;;  %v22335_v10 = vpop.f32.mrb[92].mxu1 }
 0x460   : > { %v4900_v51 = vpack.c.bf16 %v4892_v22, %v4891_v60  ;;  %v4871_v52 = vmul.f32 %v22335_v10, %v27799_v55  ;;  %7182 = vmatpush1.bf16.msra.mxu1 %v4898_v11  ;;  %v4834_v36 = vpop.f32.mrb[93].mxu1  ;;  %22571 = vmatprep.subr.bf16.mxu0 %v25588_v7 }
 0x461   : > { %v4899_v21 = vpack.c.bf16 %v4890_v44, %v4889_v39  ;;  %v4869_v63 = vmul.f32 %v4834_v36, %v27799_v55  ;;  %v22336_v13 = vpop.f32.mrb[94].mxu1  ;;  %7183 = vmatprep.subr.bf16.mxu1 %v31329_v26 }
 0x462   : > { %v4883_v1 = vadd.f32 %v4871_v52, %v27805_v23  ;;  %v4872_v6 = vmul.f32 %v22336_v13, %v27799_v55  ;;  %v4837_v33 = vpop.f32.mrb[95].mxu1 }
 0x463   : > { %v4881_v20 = vadd.f32 %v4869_v63, %v27805_v23  ;;  %22572 = vmatpush3.bf16.msra.mxu0 %v25588_v7  ;;  %v4870_v59 = vmul.f32 %v4837_v33, %v27799_v55 }
 0x464   : > { %v4884_v48 = vadd.f32 %v4872_v6, %v27805_v23  ;;  %7184 = vmatpush1.bf16.msra.mxu1 %v4899_v21  ;;  %22573 = vmatprep.subr.bf16.mxu0 %v25589_v4  ;;  %v4895_v58 = vmax.f32 %v4883_v1, 0.0 }
 0x465   : > { %v4882_v31 = vadd.f32 %v4870_v59, %v27805_v23  ;;  %7185 = vmatprep.subr.bf16.mxu1 %v31329_v26  ;;  %v4893_v15 = vmax.f32 %v4881_v20, 0.0 }
 0x466   : > { %v4896_v2 = vmax.f32 %v4884_v48, 0.0 }
 0x467   : > { %v4894_v43 = vmax.f32 %v4882_v31, 0.0  ;;  %22574 = vmatpush3.bf16.msra.mxu0 %v25589_v4 }
 0x468   : > { %v4902_v16 = vpack.c.bf16 %v4896_v2, %v4895_v58  ;;  %7186 = vmatpush1.bf16.msra.mxu1 %v4900_v51  ;;  %22575 = vmatprep.subr.bf16.mxu0 %v25590_v61 }
 0x469   : > { %v4901_v54 = vpack.c.bf16 %v4894_v43, %v4893_v15  ;;  %7187 = vmatprep.subr.bf16.mxu1 %v31329_v26  ;;  %v25591_v15 = vld [vmem:[%s31265_s4] ss:$12 sps:$4 sm:$0xff]  }
 0x46b   : > { %22576 = vmatpush3.bf16.msra.mxu0 %v25590_v61 }
 0x46c   : > { %7188 = vmatpush1.bf16.msra.mxu1 %v4901_v54 }
 0x46d   : > { %7189 = vmatprep.subr.bf16.mxu1 %v31329_v26 }
 0x46e   : > { %22578 = vmatmul.mubr.bf16.vlgmr.msra.gmra.mrb[44].mxu0 %v27229_v42  ;;  %v25593_v42 = vld [vmem:[%s31265_s4 + $0x4] ss:$12 sps:$4 sm:$0xff]  }
 0x46f   : > { %22581 = vmatprep.mubr.bf16.mxu0 %v27267_v0  ;;  %7199 = vmatprep.mubr.bf16.mxu1 %v25593_v42  ;;  %v31287_v0 = vmov 0.0   ;;  %v25601_v42 = vld [vmem:[%s31265_s4 + $0x20] ss:$12 sps:$4 sm:$0xff]  }
 0x470   : > { %7190 = vmatpush1.bf16.msra.mxu1 %v4902_v16  ;;  %22589 = vmatprep.subr.bf16.mxu0 %v31287_v0 }
 0x471   : > { %7191 = vmatprep.subr.bf16.mxu1 %v31329_v26 }
 0x476   : > { %22582 = vmatmul.mubr.bf16.gmra.mrb[48].mxu0 %v27281_v34 }
 0x477   : > { %22585 = vmatprep.mubr.bf16.mxu0 %v27300_v3 }
 0x47e   : > { %22586 = vmatmul.mubr.bf16.gmra.mrb[52].mxu0 %v6490_v38  ;;  %v25600_v38 = vld [vmem:[%s31265_s4 + $0x30] ss:$12 sps:$4 sm:$0xff]  }
 0x47f   : > { %22593 = vmatprep.mubr.msk.bf16.mxu0 %vm26204_vm6, %v31287_v0 }
 0x541   : > { %v22579_v34 = vpop.f32.mrb[44].mxu0 }
 0x542   : > { %v6640_v3 = vmul.f32 %v22579_v34, %v27799_v55  ;;  %v6579_v19 = vpop.f32.mrb[45].mxu0  ;;  %v25602_v34 = vld [vmem:[%s31265_s4 + $0x4c] ss:$12 sps:$4 sm:$0xff]  }
 0x543   : > { %v6638_v45 = vmul.f32 %v6579_v19, %v27799_v55  ;;  %v22580_v57 = vpop.f32.mrb[46].mxu0  ;;  %v25605_v19 = vld [vmem:[%s31265_s4 + $0x38] ss:$12 sps:$4 sm:$0xff]  }
 0x544   : > { %v6652_v25 = vadd.f32 %v6640_v3, %v27805_v23  ;;  %v6641_v32 = vmul.f32 %v22580_v57, %v27799_v55  ;;  %v6582_v40 = vpop.f32.mrb[47].mxu0  ;;  %v25604_v3 = vld [vmem:[%s31265_s4 + $0x48] ss:$12 sps:$4 sm:$0xff]   ;;  %v25608_v57 = vld [vmem:[%s31265_s4 + $0x60] ss:$12 sps:$4 sm:$0xff]  }
 0x545   : > { %v6650_v11 = vadd.f32 %v6638_v45, %v27805_v23  ;;  %v6639_v50 = vmul.f32 %v6582_v40, %v27799_v55  ;;  %v25606_v45 = vld [vmem:[%s31265_s4 + $0x64] ss:$12 sps:$4 sm:$0xff]  }
 0x546   : > { %v6653_v37 = vadd.f32 %v6641_v32, %v27805_v23  ;;  %v6664_v29 = vmax.f32 %v6652_v25, 0.0  ;;  %v25609_v25 = vld [vmem:[%s31265_s4 + $0x50] ss:$12 sps:$4 sm:$0xff]   ;;  %v25612_v40 = vld [vmem:[%s31265_s4 + $0x78] ss:$12 sps:$4 sm:$0xff]  }
 0x547   : > { %v6651_v8 = vadd.f32 %v6639_v50, %v27805_v23  ;;  %v6662_v41 = vmax.f32 %v6650_v11, 0.0  ;;  %v25610_v32 = vld [vmem:[%s31265_s4 + $0x7c] ss:$12 sps:$4 sm:$0xff]   ;;  %v25614_v50 = vld [vmem:[%s31265_s4 + $0x94] ss:$12 sps:$4 sm:$0xff]  }
 0x548   : > { %v6665_v18 = vmax.f32 %v6653_v37, 0.0  ;;  %v25613_v11 = vld [vmem:[%s31265_s4 + $0x68] ss:$12 sps:$4 sm:$0xff]   ;;  %v25616_v37 = vld [vmem:[%s31265_s4 + $0x90] ss:$12 sps:$4 sm:$0xff]  }
 0x549   : > { %v6663_v24 = vmax.f32 %v6651_v8, 0.0  ;;  %v22583_v12 = vpop.f32.mrb[48].mxu0  ;;  %v25617_v8 = vld [vmem:[%s31265_s4 + $0x80] ss:$12 sps:$4 sm:$0xff]  }
 0x54a   : > { %v6675_v35 = vpack.c.bf16 %v6665_v18, %v6664_v29  ;;  %v6644_v62 = vmul.f32 %v22583_v12, %v27799_v55  ;;  %v6595_v56 = vpop.f32.mrb[49].mxu0  ;;  %v25618_v29 = vld [vmem:[%s31265_s4 + $0xac] ss:$12 sps:$4 sm:$0xff]   ;;  %v25620_v18 = vld [vmem:[%s31265_s4 + $0xa8] ss:$12 sps:$4 sm:$0xff]  }
 0x54b   : > { %v6674_v5 = vpack.c.bf16 %v6663_v24, %v6662_v41  ;;  %v6642_v14 = vmul.f32 %v6595_v56, %v27799_v55  ;;  %v22584_v27 = vpop.f32.mrb[50].mxu0  ;;  %v25621_v41 = vld [vmem:[%s31265_s4 + $0x98] ss:$12 sps:$4 sm:$0xff]   ;;  %v25624_v12 = vld [vmem:[%s31265_s4 + $0xc0] ss:$12 sps:$4 sm:$0xff]  }
 0x54c   : > { %v6656_v7 = vadd.f32 %v6644_v62, %v27805_v23  ;;  %v6645_v17 = vmul.f32 %v22584_v27, %v27799_v55  ;;  %v6598_v53 = vpop.f32.mrb[51].mxu0  ;;  %v25622_v24 = vld [vmem:[%s31265_s4 + $0xc4] ss:$12 sps:$4 sm:$0xff]   ;;  %v25626_v62 = vld [vmem:[%s31265_s4 + $0xdc] ss:$12 sps:$4 sm:$0xff]  }
 0x54d   : > { %v6654_v60 = vadd.f32 %v6642_v14, %v27805_v23  ;;  %v6643_v22 = vmul.f32 %v6598_v53, %v27799_v55  ;;  %7192 = vmatpush1.bf16.msra.mxu1 %v6674_v5  ;;  %v25628_v56 = vld [vmem:[%s31265_s4 + $0xd8] ss:$12 sps:$4 sm:$0xff]   ;;  %v25659_v5 = vld [vmem:[%s31265_s4 + $0xc8] ss:$12 sps:$4 sm:$0xff]  }
 0x54e   : > { %v6657_v9 = vadd.f32 %v6645_v17, %v27805_v23  ;;  %7193 = vmatprep.subr.bf16.mxu1 %v31329_v26  ;;  %v6668_v39 = vmax.f32 %v6656_v7, 0.0  ;;  %v25629_v14 = vld [vmem:[%s31265_s4 + $0xf4] ss:$12 sps:$4 sm:$0xff]   ;;  %v25631_v7 = vld [vmem:[%s31265_s4 + $0xf0] ss:$12 sps:$4 sm:$0xff]  }
 0x54f   : > { %v6655_v46 = vadd.f32 %v6643_v22, %v27805_v23  ;;  %v6666_v10 = vmax.f32 %v6654_v60, 0.0  ;;  %v25668_v27 = vld [vmem:[%s31262_s1 + $0x2c0] sm:$0xff]   ;;  %v25632_v17 = vld [vmem:[%s31265_s4 + $0x10c] ss:$12 sps:$4 sm:$0xff]   ;;  %v25634_v53 = vld [vmem:[%s31265_s4 + $0x108] ss:$12 sps:$4 sm:$0xff]  }
 0x550   : > { %v6669_v44 = vmax.f32 %v6657_v9, 0.0  ;;  %v25635_v60 = vld [vmem:[%s31265_s4 + $0x124] ss:$12 sps:$4 sm:$0xff]   ;;  %v25671_v22 = vld [vmem:[%s31262_s1 + $0x2c8] sm:$0xff]  }
 0x551   : > { %v6667_v51 = vmax.f32 %v6655_v46, 0.0  ;;  %v22587_v52 = vpop.f32.mrb[52].mxu0  ;;  %7194 = vmatpush1.bf16.msra.mxu1 %v6675_v35  ;;  %v25625_v35 = vld [vmem:[%s31265_s4 + $0xb0] ss:$12 sps:$4 sm:$0xff]   ;;  %v25637_v9 = vld [vmem:[%s31265_s4 + $0x120] ss:$12 sps:$4 sm:$0xff]  }
 0x552   : > { %v6677_v36 = vpack.c.bf16 %v6669_v44, %v6668_v39  ;;  %v6648_v4 = vmul.f32 %v22587_v52, %v27799_v55  ;;  %v6611_v21 = vpop.f32.mrb[53].mxu0  ;;  %7195 = vmatprep.subr.bf16.mxu1 %v31329_v26  ;;  %v25638_v46 = vld [vmem:[%s31265_s4 + $0x13c] ss:$12 sps:$4 sm:$0xff]   ;;  %v25673_v39 = vld [vmem:[%s31262_s1 + $0x2d0] sm:$0xff]   ;;  %v25640_v44 = vld [vmem:[%s31265_s4 + $0x138] ss:$12 sps:$4 sm:$0xff]  }
 0x553   : > { %v6676_v63 = vpack.c.bf16 %v6667_v51, %v6666_v10  ;;  %v6646_v13 = vmul.f32 %v6611_v21, %v27799_v55  ;;  %v22588_v1 = vpop.f32.mrb[54].mxu0  ;;  %v25641_v10 = vld [vmem:[%s31265_s4 + $0x154] ss:$12 sps:$4 sm:$0xff]   ;;  %v25675_v51 = vld [vmem:[%s31262_s1 + $0x2d8] sm:$0xff]   ;;  %v25678_v21 = vld [vmem:[%s31262_s1 + $0x2e8] sm:$0xff]  }
 0x554   : > { %v6660_v6 = vadd.f32 %v6648_v4, %v27805_v23  ;;  %v6649_v33 = vmul.f32 %v22588_v1, %v27799_v55  ;;  %v6614_v20 = vpop.f32.mrb[55].mxu0  ;;  %v25676_v52 = vld [vmem:[%s31262_s1 + $0x2e0] sm:$0xff]   ;;  %v25644_v4 = vld [vmem:[%s31265_s4 + $0x16c] ss:$12 sps:$4 sm:$0xff]  }
 0x555   : > { %v6658_v59 = vadd.f32 %v6646_v13, %v27805_v23  ;;  %v6647_v48 = vmul.f32 %v6614_v20, %v27799_v55  ;;  %7196 = vmatpush1.bf16.msra.mxu1 %v6676_v63  ;;  %v25679_v63 = vld [vmem:[%s31262_s1 + $0x2f0] sm:$0xff]   ;;  %v25650_v20 = vld [vmem:[%s31265_s4 + $0x19c] ss:$12 sps:$4 sm:$0xff]  }
 0x556   : > { %v6661_v61 = vadd.f32 %v6649_v33, %v27805_v23  ;;  %7197 = vmatprep.subr.bf16.mxu1 %v31329_v26  ;;  %v6672_v58 = vmax.f32 %v6660_v6, 0.0  ;;  %v25596_v26 = vld [vmem:[%s31265_s4 + $0x18] ss:$12 sps:$4 sm:$0xff]   ;;  %v25646_v13 = vld [vmem:[%s31265_s4 + $0x168] ss:$12 sps:$4 sm:$0xff]  }
 0x557   : > { %v6659_v31 = vadd.f32 %v6647_v48, %v27805_v23  ;;  %v6670_v43 = vmax.f32 %v6658_v59, 0.0  ;;  %v25597_v23 = vld [vmem:[%s31265_s4 + $0x8] ss:$12 sps:$4 sm:$0xff]   ;;  %v25647_v1 = vld [vmem:[%s31265_s4 + $0x184] ss:$12 sps:$4 sm:$0xff]   ;;  %v25681_v6 = vld [vmem:[%s31262_s1 + $0x2f8] sm:$0xff]  }
 0x558   : > { %v6673_v2 = vmax.f32 %v6661_v61, 0.0  ;;  %v25649_v33 = vld [vmem:[%s31265_s4 + $0x180] ss:$12 sps:$4 sm:$0xff]   ;;  %v25652_v59 = vld [vmem:[%s31265_s4 + $0x198] ss:$12 sps:$4 sm:$0xff]  }
 0x559   : > { %v6671_v16 = vmax.f32 %v6659_v31, 0.0  ;;  %7198 = vmatpush1.bf16.msra.mxu1 %v6677_v36  ;;  %v25643_v36 = vld [vmem:[%s31265_s4 + $0x150] ss:$12 sps:$4 sm:$0xff]   ;;  %v25653_v48 = vld [vmem:[%s31265_s4 + $0x1b4] ss:$12 sps:$4 sm:$0xff]  }
 0x55a   : > { %v6679_v54 = vpack.c.bf16 %v6673_v2, %v6672_v58  ;;  %24342 = vmatprep.subr.bf16.mxu1 %v31287_v0  ;;  %v28196_v61 = vld [vmem:[%s31262_s1 + $0x280] sm:$0xff]   ;;  %v25655_v31 = vld [vmem:[%s31265_s4 + $0x1b0] ss:$12 sps:$4 sm:$0xff]   ;;  %v25656_v58 = vld [vmem:[%s31265_s4 + $0x1cc] ss:$12 sps:$4 sm:$0xff]  }
 0x55b   : > { %v6678_v55 = vpack.c.bf16 %v6671_v16, %v6670_v43  ;;  %v25658_v2 = vld [vmem:[%s31265_s4 + $0x1c8] ss:$12 sps:$4 sm:$0xff]   ;;  %v25662_v43 = vld [vmem:[%s31265_s4 + $0x1e0] ss:$12 sps:$4 sm:$0xff]  }
 0x55c   : > { %7200 = vmatmul.mubr.bf16.vlgmr.msra.gmra.mrb[96].mxu1 %v25591_v15  ;;  %v25660_v15 = vld [vmem:[%s31265_s4 + $0x1e4] ss:$12 sps:$4 sm:$0xff]   ;;  %v25663_v16 = vld [vmem:[%s31265_s4 + $0xe0] ss:$12 sps:$4 sm:$0xff]  }
 0x55d   : > { %22590 = vmatpush3.bf16.msra.mxu0 %v6678_v55  ;;  %24344 = vmatpush3.bf16.msra.mxu1 %v6678_v55  ;;  %v25665_v55 = vld [vmem:[%s31265_s4 + $0x110] ss:$12 sps:$4 sm:$0xff]  }
 0x55e   : > { %22591 = vmatprep.subr.bf16.mxu0 %v31287_v0  ;;  %24343 = vmatprep.subr.bf16.mxu1 %v31287_v0 }
 0x55f   : > { %7207 = vmatprep.mubr.bf16.mxu1 %v25594_v47  ;;  %v25666_v47 = vld [vmem:[%s31265_s4 + $0x128] ss:$12 sps:$4 sm:$0xff]  }
 0x561   : > { %22592 = vmatpush3.bf16.msra.mxu0 %v6679_v54  ;;  %24345 = vmatpush3.bf16.msra.mxu1 %v6679_v54  ;;  %v25664_v54 = vld [vmem:[%s31265_s4 + $0xf8] ss:$12 sps:$4 sm:$0xff]  }
 0x562   : > { %22677 = vmatprep.subr.bf16.mxu0 %v25668_v27 }
 0x564   : > { %7208 = vmatmul.mubr.bf16.gmra.mrb[100].mxu1 %v25596_v26  ;;  %22594 = vmatmul.mubr.msk.bf16.vlgmr.msra.gmra.mrb[56].mxu0 %vm7103_vm7, %v25597_v23  ;;  %v25667_v26 = vld [vmem:[%s31265_s4 + $0x140] ss:$12 sps:$4 sm:$0xff]   ;;  %v25669_v23 = vld [vmem:[%s31265_s4 + $0x158] ss:$12 sps:$4 sm:$0xff]  }
 0x565   : > { %7215 = vmatprep.mubr.bf16.mxu1 %v25598_v49  ;;  %22597 = vmatprep.mubr.msk.bf16.mxu0 %vm26204_vm6, %v31287_v0 }
 0x566   : > { %22678 = vmatpush3.bf16.msra.mxu0 %v25668_v27 }
 0x567   : > { %22679 = vmatprep.subr.bf16.mxu0 %v25671_v22 }
 0x56a   : > { %22680 = vmatpush3.bf16.msra.mxu0 %v25671_v22 }
 0x56b   : > { %22681 = vmatprep.subr.bf16.mxu0 %v25673_v39 }
 0x56c   : > { %7216 = vmatmul.mubr.bf16.gmra.mrb[104].mxu1 %v25600_v38  ;;  %22598 = vmatmul.mubr.msk.bf16.gmra.mrb[60].mxu0 %vm7103_vm7, %v25601_v42  ;;  %v25670_v38 = vld [vmem:[%s31265_s4 + $0x170] ss:$12 sps:$4 sm:$0xff]  }
 0x56d   : > { %7223 = vmatprep.mubr.bf16.mxu1 %v25602_v34  ;;  %22601 = vmatprep.mubr.msk.bf16.mxu0 %vm26204_vm6, %v31287_v0 }
 0x56e   : > { %22682 = vmatpush3.bf16.msra.mxu0 %v25673_v39 }
 0x56f   : > { %22683 = vmatprep.subr.bf16.mxu0 %v25675_v51 }
 0x572   : > { %22684 = vmatpush3.bf16.msra.mxu0 %v25675_v51 }
 0x573   : > { %22685 = vmatprep.subr.bf16.mxu0 %v25676_v52 }
 0x574   : > { %7224 = vmatmul.mubr.bf16.gmra.mrb[108].mxu1 %v25604_v3  ;;  %22602 = vmatmul.mubr.msk.bf16.gmra.mrb[64].mxu0 %vm7103_vm7, %v25605_v19  ;;  %v25706_v19 = vld [vmem:[%s31262_s1 + $0x2c0] sm:$0xff]  }
 0x575   : > { %7231 = vmatprep.mubr.bf16.mxu1 %v25606_v45  ;;  %22605 = vmatprep.mubr.msk.bf16.mxu0 %vm26204_vm6, %v31287_v0 }
 0x576   : > { %22686 = vmatpush3.bf16.msra.mxu0 %v25676_v52  ;;  %22929 = vmatprep.subr.bf16.mxu1 %v25706_v19  ;;  %v25714_v52 = vld [vmem:[%s31262_s1 + $0x2e0] sm:$0xff]  }
 0x577   : > { %22687 = vmatprep.subr.bf16.mxu0 %v25678_v21 }
 0x57a   : > { %22688 = vmatpush3.bf16.msra.mxu0 %v25678_v21 }
 0x57b   : > { %22689 = vmatprep.subr.bf16.mxu0 %v25679_v63 }
 0x57c   : > { %7232 = vmatmul.mubr.bf16.gmra.mrb[112].mxu1 %v25608_v57  ;;  %22606 = vmatmul.mubr.msk.bf16.gmra.mrb[68].mxu0 %vm7103_vm7, %v25609_v25 }
 0x57d   : > { %7239 = vmatprep.mubr.bf16.mxu1 %v25610_v32  ;;  %22609 = vmatprep.mubr.msk.bf16.mxu0 %vm26204_vm6, %v31287_v0 }
 0x57e   : > { %22690 = vmatpush3.bf16.msra.mxu0 %v25679_v63 }
 0x57f   : > { %22691 = vmatprep.subr.bf16.mxu0 %v25681_v6 }
 0x582   : > { %22692 = vmatpush3.bf16.msra.mxu0 %v25681_v6 }
 0x583   : > { %22705 = vmatprep.subr.bf16.mxu0 %v28196_v61 }
 0x584   : > { %7240 = vmatmul.mubr.bf16.gmra.mrb[116].mxu1 %v25612_v40  ;;  %22610 = vmatmul.mubr.msk.bf16.gmra.mrb[72].mxu0 %vm7103_vm7, %v25613_v11  ;;  %v25672_v40 = vld [vmem:[%s31265_s4 + $0x188] ss:$12 sps:$4 sm:$0xff]  }
 0x585   : > { %7247 = vmatprep.mubr.bf16.mxu1 %v25614_v50  ;;  %22613 = vmatprep.mubr.msk.bf16.mxu0 %vm26204_vm6, %v31287_v0 }
 0x58c   : > { %7248 = vmatmul.mubr.bf16.gmra.mrb[120].mxu1 %v25616_v37  ;;  %22614 = vmatmul.mubr.msk.bf16.gmra.mrb[76].mxu0 %vm7103_vm7, %v25617_v8 }
 0x58d   : > { %7255 = vmatprep.mubr.bf16.mxu1 %v25618_v29  ;;  %22617 = vmatprep.mubr.msk.bf16.mxu0 %vm26204_vm6, %v31287_v0 }
 0x594   : > { %7256 = vmatmul.mubr.bf16.gmra.mrb[124].mxu1 %v25620_v18  ;;  %22618 = vmatmul.mubr.msk.bf16.gmra.mrb[80].mxu0 %vm7103_vm7, %v25621_v41  ;;  %v25708_v41 = vld [vmem:[%s31262_s1 + $0x2c8] sm:$0xff]  }
 0x595   : > { %7263 = vmatprep.mubr.bf16.mxu1 %v25622_v24  ;;  %22621 = vmatprep.mubr.msk.bf16.mxu0 %vm26204_vm6, %v31287_v0 }
 0x59c   : > { %7264 = vmatmul.mubr.bf16.gmra.mrb[128].mxu1 %v25624_v12  ;;  %22622 = vmatmul.mubr.msk.bf16.gmra.mrb[84].mxu0 %vm7103_vm7, %v25625_v35  ;;  %v25710_v12 = vld [vmem:[%s31262_s1 + $0x2d0] sm:$0xff]  }
 0x59d   : > { %7271 = vmatprep.mubr.bf16.mxu1 %v25626_v62  ;;  %22625 = vmatprep.mubr.msk.bf16.mxu0 %vm26204_vm6, %v31287_v0 }
 0x5a4   : > { %7272 = vmatmul.mubr.bf16.gmra.mrb[132].mxu1 %v25628_v56  ;;  %22626 = vmatmul.mubr.msk.bf16.gmra.mrb[88].mxu0 %vm7103_vm7, %v25659_v5 }
 0x5a5   : > { %7279 = vmatprep.mubr.bf16.mxu1 %v25629_v14  ;;  %v25674_v14 = vld [vmem:[%s31265_s4 + $0x1a0] ss:$12 sps:$4 sm:$0xff]  }
 0x5ac   : > { %7280 = vmatmul.mubr.bf16.gmra.mrb[136].mxu1 %v25631_v7 }
 0x5ad   : > { %7287 = vmatprep.mubr.bf16.mxu1 %v25632_v17 }
 0x5b4   : > { %7288 = vmatmul.mubr.bf16.gmra.mrb[140].mxu1 %v25634_v53 }
 0x5b5   : > { %7295 = vmatprep.mubr.bf16.mxu1 %v25635_v60 }
 0x5bc   : > { %7296 = vmatmul.mubr.bf16.gmra.mrb[144].mxu1 %v25637_v9 }
 0x5bd   : > { %7303 = vmatprep.mubr.bf16.mxu1 %v25638_v46  ;;  %v25712_v46 = vld [vmem:[%s31262_s1 + $0x2d8] sm:$0xff]  }
 0x5c4   : > { %7304 = vmatmul.mubr.bf16.gmra.mrb[148].mxu1 %v25640_v44 }
 0x5c5   : > { %7311 = vmatprep.mubr.bf16.mxu1 %v25641_v10 }
 0x5cc   : > { %7312 = vmatmul.mubr.bf16.gmra.mrb[152].mxu1 %v25643_v36 }
 0x5cd   : > { %7319 = vmatprep.mubr.bf16.mxu1 %v25644_v4 }
 0x5d4   : > { %7320 = vmatmul.mubr.bf16.gmra.mrb[156].mxu1 %v25646_v13  ;;  %v25677_v13 = vld [vmem:[%s31265_s4 + $0x1b8] ss:$12 sps:$4 sm:$0xff]  }
 0x5d5   : > { %7327 = vmatprep.mubr.bf16.mxu1 %v25647_v1 }
 0x5dc   : > { %7328 = vmatmul.mubr.bf16.gmra.mrb[160].mxu1 %v25649_v33 }
 0x5dd   : > { %7335 = vmatprep.mubr.bf16.mxu1 %v25650_v20 }
 0x5e4   : > { %7336 = vmatmul.mubr.bf16.gmra.mrb[164].mxu1 %v25652_v59 }
 0x5e5   : > { %7343 = vmatprep.mubr.bf16.mxu1 %v25653_v48 }
 0x5ec   : > { %7344 = vmatmul.mubr.bf16.gmra.mrb[168].mxu1 %v25655_v31 }
 0x5ed   : > { %7351 = vmatprep.mubr.bf16.mxu1 %v25656_v58 }
 0x5f4   : > { %7352 = vmatmul.mubr.bf16.gmra.mrb[172].mxu1 %v25658_v2 }
 0x5f5   : > { %7359 = vmatprep.mubr.bf16.mxu1 %v25660_v15  ;;  %v25716_v15 = vld [vmem:[%s31262_s1 + $0x2e8] sm:$0xff]  }
 0x5fc   : > { %7360 = vmatmul.mubr.bf16.gmra.mrb[176].mxu1 %v25662_v43 }
 0x5fd   : > { %22629 = vmatprep.mubr.msk.bf16.mxu1 %vm26204_vm6, %v31287_v0 }
 0x604   : > { %22630 = vmatmul.mubr.msk.bf16.vlgmr.msra.gmra.mrb[132].mxu1 %vm7103_vm7, %v25663_v16 }
 0x605   : > { %22633 = vmatprep.mubr.msk.bf16.mxu1 %vm26204_vm6, %v31287_v0  ;;  %22930 = vmatpush3.bf16.msra.mxu1 %v25706_v19  ;;  %v25680_v19 = vld [vmem:[%s31265_s4 + $0x1d0] ss:$12 sps:$4 sm:$0xff]  }
 0x606   : > { %22931 = vmatprep.subr.bf16.mxu1 %v25708_v41 }
 0x609   : > { %22932 = vmatpush3.bf16.msra.mxu1 %v25708_v41 }
 0x60a   : > { %22933 = vmatprep.subr.bf16.mxu1 %v25710_v12 }
 0x60c   : > { %22634 = vmatmul.mubr.msk.bf16.gmra.mrb[136].mxu1 %vm7103_vm7, %v25664_v54 }
 0x60d   : > { %22637 = vmatprep.mubr.msk.bf16.mxu1 %vm26204_vm6, %v31287_v0  ;;  %22934 = vmatpush3.bf16.msra.mxu1 %v25710_v12  ;;  %v25720_v12 = vld [vmem:[%s31262_s1 + $0x2f8] sm:$0xff]  }
 0x60e   : > { %22935 = vmatprep.subr.bf16.mxu1 %v25712_v46 }
 0x611   : > { %22936 = vmatpush3.bf16.msra.mxu1 %v25712_v46  ;;  %v25682_v46 = vld [vmem:[%s31265_s4 + $0x1e8] ss:$12 sps:$4 sm:$0xff]  }
 0x612   : > { %22937 = vmatprep.subr.bf16.mxu1 %v25714_v52 }
 0x614   : > { %22638 = vmatmul.mubr.msk.bf16.gmra.mrb[140].mxu1 %vm7103_vm7, %v25665_v55 }
 0x615   : > { %22641 = vmatprep.mubr.msk.bf16.mxu1 %vm26204_vm6, %v31287_v0  ;;  %22938 = vmatpush3.bf16.msra.mxu1 %v25714_v52 }
 0x616   : > { %22939 = vmatprep.subr.bf16.mxu1 %v25716_v15 }
 0x619   : > { %22940 = vmatpush3.bf16.msra.mxu1 %v25716_v15 }
 0x61c   : > { %22642 = vmatmul.mubr.msk.bf16.gmra.mrb[144].mxu1 %vm7103_vm7, %v25666_v47 }
 0x61d   : > { %22645 = vmatprep.mubr.msk.bf16.mxu1 %vm26204_vm6, %v31287_v0 }
 0x624   : > { %22646 = vmatmul.mubr.msk.bf16.gmra.mrb[148].mxu1 %vm7103_vm7, %v25667_v26 }
 0x625   : > { %22649 = vmatprep.mubr.msk.bf16.mxu1 %vm26204_vm6, %v31287_v0 }
 0x62c   : > { %22650 = vmatmul.mubr.msk.bf16.gmra.mrb[152].mxu1 %vm7103_vm7, %v25669_v23  ;;  %v25718_v23 = vld [vmem:[%s31262_s1 + $0x2f0] sm:$0xff]  }
 0x62d   : > { %22653 = vmatprep.mubr.msk.bf16.mxu1 %vm26204_vm6, %v31287_v0  ;;  %22941 = vmatprep.subr.bf16.mxu1 %v25718_v23 }
 0x62e   : > { %22942 = vmatpush3.bf16.msra.mxu1 %v25718_v23 }
 0x62f   : > { %v7201_v49 = vpop.f32.mrb[96].mxu1  ;;  %22943 = vmatprep.subr.bf16.mxu1 %v25720_v12 }
 0x630   : > { %v7203_v42 = vpop.f32.mrb[97].mxu1 }
 0x631   : > { %v7204_v34 = vpop.f32.mrb[98].mxu1 }
 0x632   : > { %v7206_v3 = vpop.f32.mrb[99].mxu1  ;;  %22944 = vmatpush3.bf16.msra.mxu1 %v25720_v12 }
 0x634   : > { %22654 = vmatmul.mubr.msk.bf16.gmra.mrb[156].mxu1 %vm7103_vm7, %v25670_v38 }
 0x635   : > { %22657 = vmatprep.mubr.msk.bf16.mxu1 %vm26204_vm6, %v31287_v0 }
 0x637   : > { %v7402_v45 = vpop.f32.mrb[56].mxu0  ;;  %v7209_v57 = vpop.f32.mrb[100].mxu1 }
 0x638   : > { %v7403_v25 = vadd.f32 %v7402_v45, %v7201_v49  ;;  %v22595_v32 = vpop.f32.mrb[57].mxu0  ;;  %v7211_v11 = vpop.f32.mrb[101].mxu1 }
 0x639   : > { %v7405_v50 = vpop.f32.mrb[58].mxu0  ;;  %v7212_v37 = vpop.f32.mrb[102].mxu1  ;;  %v25684_v11 = vld [vmem:[%s31262_s1 + $0x288] sm:$0xff]  }
 0x63a   : > { %v7406_v8 = vadd.f32 %v7405_v50, %v7204_v34  ;;  %v22596_v29 = vpop.f32.mrb[59].mxu0  ;;  %v7214_v18 = vpop.f32.mrb[103].mxu1 }
 0x63c   : > { %v28267_v24 = vpack.c.bf16 %v7406_v8, %v7403_v25  ;;  %22658 = vmatmul.mubr.msk.bf16.gmra.mrb[160].mxu1 %vm7103_vm7, %v25672_v40 }
 0x63d   : > { %22661 = vmatprep.mubr.msk.bf16.mxu1 %vm26204_vm6, %v31287_v0 }
 0x63e   : > { %7590 = vst [vmem:[#allocation3] sm:$0xff] %v28267_v24  ;;  %v7657_v7 = vshll.u32 %v28267_v24, 16  ;;  %v7655_v10 = vshrl.u32 %v28267_v24, 16 }
 0x63f   : > { %v7410_v35 = vpop.f32.mrb[60].mxu0  ;;  %v7217_v62 = vpop.f32.mrb[104].mxu1 }
 0x640   : > { %v7411_v56 = vadd.f32 %v7410_v35, %v7209_v57  ;;  %v22599_v5 = vpop.f32.mrb[61].mxu0  ;;  %v7219_v27 = vpop.f32.mrb[105].mxu1  ;;  %v7659_v44 = vrot.slane %v7657_v7, 1 }
 0x641   : > { %v7413_v17 = vpop.f32.mrb[62].mxu0  ;;  %v7220_v53 = vpop.f32.mrb[106].mxu1 }
 0x642   : > { %v7414_v60 = vadd.f32 %v7413_v17, %v7212_v37  ;;  %v22600_v22 = vpop.f32.mrb[63].mxu0  ;;  %v7222_v9 = vpop.f32.mrb[107].mxu1  ;;  %v7660_v6 = vor.u32 %v7659_v44, %v7655_v10 }
 0x644   : > { %v28283_v39 = vpack.c.bf16 %v7414_v60, %v7411_v56  ;;  %22662 = vmatmul.mubr.msk.bf16.gmra.mrb[164].mxu1 %vm7103_vm7, %v25674_v14  ;;  %v25685_v56 = vld [vmem:[%s31262_s1 + $0x290] sm:$0xff]  }
 0x645   : > { %22665 = vmatprep.mubr.msk.bf16.mxu1 %vm26204_vm6, %v31287_v0 }
 0x646   : > { %7591 = vst [vmem:[#allocation3 + $0x8] sm:$0xff] %v28283_v39  ;;  %v7662_v51 = vshll.u32 %v28283_v39, 16  ;;  %v7666_v16 = vshrl.u32 %v28283_v39, 16  ;;  %v7996_v47 = vrot.slane %v28283_v39, 1 }
 0x647   : > { %v7418_v36 = vpop.f32.mrb[64].mxu0  ;;  %v7225_v4 = vpop.f32.mrb[108].mxu1 }
 0x648   : > { %v7419_v21 = vadd.f32 %v7418_v36, %v7217_v62  ;;  %v22603_v63 = vpop.f32.mrb[65].mxu0  ;;  %v7227_v1 = vpop.f32.mrb[109].mxu1  ;;  %v7664_v33 = vrot.slane %v7662_v51, 1 }
 0x649   : > { %v7421_v20 = vpop.f32.mrb[66].mxu0  ;;  %v7228_v59 = vpop.f32.mrb[110].mxu1 }
 0x64a   : > { %v7422_v48 = vadd.f32 %v7421_v20, %v7220_v53  ;;  %v22604_v31 = vpop.f32.mrb[67].mxu0  ;;  %v7230_v58 = vpop.f32.mrb[111].mxu1  ;;  %v7665_v2 = vsel %vm1373_vm0, %v7660_v6, %v7664_v33  ;;  %v7668_v3 = vor.u32 %v7666_v16, %v7664_v33 }
 0x64b   : > { %22693 = vmatprep.mubr.bf16.mxu0 %v7665_v2  ;;  %v25687_v31 = vld [vmem:[%s31262_s1 + $0x2a0] sm:$0xff]  }
 0x64c   : > { %v28301_v43 = vpack.c.bf16 %v7422_v48, %v7419_v21  ;;  %22666 = vmatmul.mubr.msk.bf16.gmra.mrb[168].mxu1 %vm7103_vm7, %v25677_v13  ;;  %v25686_v21 = vld [vmem:[%s31262_s1 + $0x298] sm:$0xff]  }
 0x64d   : > { %22669 = vmatprep.mubr.msk.bf16.mxu1 %vm26204_vm6, %v31287_v0 }
 0x64e   : > { %7592 = vst [vmem:[#allocation3 + $0x10] sm:$0xff] %v28301_v43  ;;  %v7670_v54 = vshll.u32 %v28301_v43, 16  ;;  %v7674_v55 = vshrl.u32 %v28301_v43, 16  ;;  %v28312_v26 = vrot.slane %v28301_v43, 1  ;;  %v8594_v60 = vrot.slane %v28301_v43, 2 }
 0x64f   : > { %v7426_v49 = vpop.f32.mrb[68].mxu0  ;;  %v7233_v38 = vpop.f32.mrb[112].mxu1 }
 0x650   : > { %v7427_v42 = vadd.f32 %v7426_v49, %v7225_v4  ;;  %v22607_v34 = vpop.f32.mrb[69].mxu0  ;;  %v7235_v45 = vpop.f32.mrb[113].mxu1  ;;  %v7672_v57 = vrot.slane %v7670_v54, 1  ;;  %v28324_v25 = vsel %vm1715_vm1, %v7996_v47, %v28312_v26  ;;  %v8375_v50 = vrot.slane %v7674_v55, 1 }
 0x651   : > { %v7429_v32 = vpop.f32.mrb[70].mxu0  ;;  %v7236_v40 = vpop.f32.mrb[114].mxu1  ;;  %v8378_v37 = vrot.slane %v7670_v54, 2 }
 0x652   : > { %v7430_v8 = vadd.f32 %v7429_v32, %v7228_v59  ;;  %v22608_v29 = vpop.f32.mrb[71].mxu0  ;;  %v7238_v18 = vpop.f32.mrb[115].mxu1  ;;  %v7673_v41 = vsel %vm1373_vm0, %v7668_v3, %v7672_v57  ;;  %v7676_v53 = vor.u32 %v7674_v55, %v7672_v57 }
 0x653   : > { %22694 = vmatmul.mubr.bf16.vlgmr.msra.gmra.mrb[92].mxu0 %v7673_v41  ;;  %v28333_v35 = vor.u32 %v8378_v37, %v8375_v50 }
 0x654   : > { %v28335_v62 = vpack.c.bf16 %v7430_v8, %v7427_v42  ;;  %22670 = vmatmul.mubr.msk.bf16.gmra.mrb[172].mxu1 %vm7103_vm7, %v25680_v19  ;;  %22706 = vmatpush3.bf16.msra.mxu0 %v28196_v61 }
 0x655   : > { %22673 = vmatprep.mubr.msk.bf16.mxu1 %vm26204_vm6, %v31287_v0  ;;  %22707 = vmatprep.subr.bf16.mxu0 %v25684_v11 }
 0x656   : > { %7593 = vst [vmem:[#allocation3 + $0x18] sm:$0xff] %v28335_v62  ;;  %v7678_v5 = vshll.u32 %v28335_v62, 16  ;;  %v7682_v14 = vshrl.u32 %v28335_v62, 16  ;;  %v8000_v27 = vrot.slane %v28335_v62, 1  ;;  %v8596_v7 = vrot.slane %v28335_v62, 2 }
 0x657   : > { %v7434_v61 = vpop.f32.mrb[72].mxu0  ;;  %v7241_v17 = vpop.f32.mrb[116].mxu1 }
 0x658   : > { %v7435_v22 = vadd.f32 %v7434_v61, %v7233_v38  ;;  %v22611_v9 = vpop.f32.mrb[73].mxu0  ;;  %v7243_v44 = vpop.f32.mrb[117].mxu1  ;;  %v7680_v10 = vrot.slane %v7678_v5, 1  ;;  %22708 = vmatpush3.bf16.msra.mxu0 %v25684_v11  ;;  %v28355_v51 = vsel %vm1715_vm1, %v28312_v26, %v8000_v27  ;;  %v8384_v52 = vrot.slane %v7682_v14, 1 }
 0x659   : > { %v7437_v36 = vpop.f32.mrb[74].mxu0  ;;  %v7244_v4 = vpop.f32.mrb[118].mxu1  ;;  %22709 = vmatprep.subr.bf16.mxu0 %v25685_v56  ;;  %v8387_v63 = vrot.slane %v7678_v5, 2  ;;  %v28363_v13 = vsel %vm2315_vm2, %v8594_v60, %v8596_v7 }
 0x65a   : > { %v7438_v1 = vadd.f32 %v7437_v36, %v7236_v40  ;;  %v22612_v6 = vpop.f32.mrb[75].mxu0  ;;  %v7246_v33 = vpop.f32.mrb[119].mxu1  ;;  %v7681_v20 = vsel %vm1373_vm0, %v7676_v53, %v7680_v10  ;;  %v7684_v49 = vor.u32 %v7682_v14, %v7680_v10  ;;  %v25688_v40 = vld [vmem:[%s31262_s1 + $0x2a8] sm:$0xff]  }
 0x65b   : > { %22697 = vmatprep.mubr.bf16.mxu0 %v7681_v20  ;;  %v8388_v59 = vor.u32 %v8387_v63, %v8384_v52  ;;  %v25690_v33 = vld [vmem:[%s31262_s1 + $0x2b8] sm:$0xff]  }
 0x65c   : > { %v28366_v48 = vpack.c.bf16 %v7438_v1, %v7435_v22  ;;  %22674 = vmatmul.mubr.msk.bf16.gmra.mrb[176].mxu1 %vm7103_vm7, %v25682_v46  ;;  %22710 = vmatpush3.bf16.msra.mxu0 %v25685_v56  ;;  %v25689_v56 = vld [vmem:[%s31262_s1 + $0x2b0] sm:$0xff]  }
 0x65d   : > { %22711 = vmatprep.subr.bf16.mxu0 %v25686_v21  ;;  %v28374_v58 = vsel %vm2085_vm3, %v28333_v35, %v8388_v59  ;;  %v28406_v9 = vld [vmem:[#allocation3 + $0x18] sm:$0xff] }
 0x65e   : > { %7594 = vst [vmem:[#allocation3 + $0x20] sm:$0xff] %v28366_v48  ;;  %v7686_v2 = vshll.u32 %v28366_v48, 16  ;;  %v7690_v15 = vshrl.u32 %v28366_v48, 16  ;;  %v8002_v16 = vrot.slane %v28366_v48, 1  ;;  %v8598_v54 = vrot.slane %v28366_v48, 2 }
 0x65f   : > { %v7442_v55 = vpop.f32.mrb[76].mxu0  ;;  %v7249_v23 = vpop.f32.mrb[120].mxu1 }
 0x660   : > { %v7443_v38 = vadd.f32 %v7442_v55, %v7241_v17  ;;  %v22615_v42 = vpop.f32.mrb[77].mxu0  ;;  %v7251_v34 = vpop.f32.mrb[121].mxu1  ;;  %v7688_v3 = vrot.slane %v7686_v2, 1  ;;  %22712 = vmatpush3.bf16.msra.mxu0 %v25686_v21  ;;  %v28382_v19 = vsel %vm1715_vm1, %v8000_v27, %v8002_v16  ;;  %v8393_v45 = vrot.slane %v7690_v15, 1 }
 0x661   : > { %v7445_v57 = vpop.f32.mrb[78].mxu0  ;;  %v7252_v32 = vpop.f32.mrb[122].mxu1  ;;  %22713 = vmatprep.subr.bf16.mxu0 %v25687_v31  ;;  %v8396_v11 = vrot.slane %v7686_v2, 2  ;;  %v28388_v50 = vsel %vm2315_vm2, %v8596_v7, %v8598_v54 }
 0x662   : > { %v7446_v37 = vadd.f32 %v7445_v57, %v7244_v4  ;;  %v22616_v8 = vpop.f32.mrb[79].mxu0  ;;  %v7254_v29 = vpop.f32.mrb[123].mxu1  ;;  %v7689_v18 = vsel %vm1373_vm0, %v7684_v49, %v7688_v3  ;;  %v7692_v22 = vor.u32 %v7690_v15, %v7688_v3  ;;  %v28415_v4 = vld [vmem:[%s31262_s1 + $0x280] sm:$0xff]  }
 0x663   : > { %22698 = vmatmul.mubr.bf16.gmra.mrb[96].mxu0 %v7689_v18  ;;  %v8397_v41 = vor.u32 %v8396_v11, %v8393_v45  ;;  %22957 = vmatprep.subr.bf16.mxu1 %v28415_v4 }
 0x664   : > { %v28391_v12 = vpack.c.bf16 %v7446_v37, %v7443_v38  ;;  %22714 = vmatpush3.bf16.msra.mxu0 %v25687_v31 }
 0x665   : > { %22715 = vmatprep.subr.bf16.mxu0 %v25688_v40  ;;  %v28397_v5 = vsel %vm2085_vm3, %v8388_v59, %v8397_v41  ;;  %v28419_v63 = vld [vmem:[#allocation3 + $0x20] sm:$0xff] }
 0x666   : > { %7595 = vst [vmem:[#allocation3 + $0x28] sm:$0xff] %v28391_v12  ;;  %v7694_v14 = vshll.u32 %v28391_v12, 16  ;;  %v7698_v27 = vshrl.u32 %v28391_v12, 16  ;;  %v28403_v7 = vrot.slane %v28391_v12, 1  ;;  %v8600_v61 = vrot.slane %v28391_v12, 2 }
 0x667   : > { %v7450_v17 = vpop.f32.mrb[80].mxu0  ;;  %v7257_v53 = vpop.f32.mrb[124].mxu1  ;;  %v9194_v49 = vrot.slane %v28419_v63, 3 }
 0x668   : > { %v7451_v46 = vadd.f32 %v7450_v17, %v7249_v23  ;;  %v22619_v44 = vpop.f32.mrb[81].mxu0  ;;  %v7259_v10 = vpop.f32.mrb[125].mxu1  ;;  %v7696_v52 = vrot.slane %v7694_v14, 1  ;;  %22716 = vmatpush3.bf16.msra.mxu0 %v25688_v40  ;;  %v28410_v36 = vsel %vm1715_vm1, %v8002_v16, %v28403_v7  ;;  %v8402_v21 = vrot.slane %v7698_v27, 1 }
 0x669   : > { %v7453_v1 = vpop.f32.mrb[82].mxu0  ;;  %v7260_v6 = vpop.f32.mrb[126].mxu1  ;;  %22717 = vmatprep.subr.bf16.mxu0 %v25689_v56  ;;  %v8405_v20 = vrot.slane %v7694_v14, 2  ;;  %v28427_v59 = vsel %vm2315_vm2, %v8598_v54, %v8600_v61  ;;  %v31305_v23 = vrot.slane %v28406_v9, 3  ;;  %v25691_v54 = vld [vmem:[%s31262_s1 + $0x300] sm:$0xff]  }
 0x66a   : > { %v7454_v31 = vadd.f32 %v7453_v1, %v7252_v32  ;;  %v22620_v2 = vpop.f32.mrb[83].mxu0  ;;  %v7697_v15 = vsel %vm1373_vm0, %v7692_v22, %v7696_v52  ;;  %v7262_v16 = vpop.f32.mrb[127].mxu1 }
 0x66b   : > { %22701 = vmatprep.mubr.bf16.mxu0 %v7697_v15  ;;  %v8406_v55 = vor.u32 %v8405_v20, %v8402_v21  ;;  %v28444_v34 = vsel %vm2915_vm4, %v31305_v23, %v9194_v49 }
 0x66c   : > { %v28433_v38 = vpack.c.bf16 %v7454_v31, %v7451_v46  ;;  %22718 = vmatpush3.bf16.msra.mxu0 %v25689_v56  ;;  %v7700_v31 = vor.u32 %v7698_v27, %v7696_v52 }
 0x66d   : > { %22719 = vmatprep.subr.bf16.mxu0 %v25690_v33  ;;  %v28439_v42 = vsel %vm2085_vm3, %v8397_v41, %v8406_v55  ;;  %v28449_v40 = vld [vmem:[#allocation3 + $0x28] sm:$0xff] }
 0x66e   : > { %7596 = vst [vmem:[#allocation3 + $0x30] sm:$0xff] %v28433_v38  ;;  %v9447_v3 = vshrl.u32 %v28433_v38, 16  ;;  %v9449_v45 = vshll.u32 %v28433_v38, 16  ;;  %v9196_v46 = vrot.slane %v28449_v40, 3 }
 0x66f   : > { %v7458_v57 = vpop.f32.mrb[84].mxu0  ;;  %v7265_v32 = vpop.f32.mrb[128].mxu1 }
 0x670   : > { %v7459_v11 = vadd.f32 %v7458_v57, %v7257_v53  ;;  %v22623_v37 = vpop.f32.mrb[85].mxu0  ;;  %22720 = vmatpush3.bf16.msra.mxu0 %v25690_v33  ;;  %v7267_v8 = vpop.f32.mrb[129].mxu1  ;;  %v8411_v29 = vrot.slane %v9447_v3, 1  ;;  %v8414_v56 = vrot.slane %v9449_v45, 2  ;;  %v9451_v21 = vrot.slane %v9449_v45, 1 }
 0x671   : > { %v7461_v18 = vpop.f32.mrb[86].mxu0  ;;  %22733 = vmatprep.subr.bf16.mxu0 %v25691_v54  ;;  %v7268_v41 = vpop.f32.mrb[130].mxu1  ;;  %v28457_v53 = vsel %vm2915_vm4, %v9194_v49, %v9196_v46 }
 0x672   : > { %v7462_v14 = vadd.f32 %v7461_v18, %v7260_v6  ;;  %v22624_v17 = vpop.f32.mrb[87].mxu0  ;;  %v7270_v22 = vpop.f32.mrb[131].mxu1  ;;  %v28452_v44 = vor.u32 %v8414_v56, %v8411_v29  ;;  %v9452_v16 = vor.u32 %v9451_v21, %v9447_v3  ;;  %v25693_v21 = vld [vmem:[%s31262_s1 + $0x310] sm:$0xff]  }
 0x674   : > { %v28454_v10 = vpack.c.bf16 %v7462_v14, %v7459_v11  ;;  %v28463_v33 = vsel %vm2085_vm3, %v8406_v55, %v28452_v44 }
 0x675   : > { %v28459_v1 = vld [vmem:[#allocation3 + $0x30] sm:$0x1] }
 0x676   : > { %7597 = vst [vmem:[#allocation3 + $0x38] sm:$0xff] %v28454_v10  ;;  %v7702_v6 = vshll.u32 %v28459_v1, 16  ;;  %v9454_v20 = vshll.u32 %v28454_v10, 16  ;;  %v28470_v11 = vld [vmem:[#allocation3 + $0x30] sm:$0xff]  ;;  %v9458_v29 = vshrl.u32 %v28454_v10, 16 }
 0x677   : > { %v7466_v2 = vpop.f32.mrb[88].mxu0  ;;  %v9198_v27 = vrot.slane %v28470_v11, 3 }
 0x678   : > { %v7704_v15 = vrot.slane %v7702_v6, 1  ;;  %v9456_v49 = vrot.slane %v9454_v20, 1  ;;  %v7467_v45 = vadd.f32 %v7466_v2, %v7265_v32  ;;  %v22627_v57 = vpop.f32.mrb[89].mxu0  ;;  %v25729_v6 = vld [vmem:[%s31262_s1 + $0x290] sm:$0xff]   ;;  %v7970_v2 = vld [vmem:[#allocation3] sm:$0xfe] }
 0x679   : > { %v7469_v37 = vpop.f32.mrb[90].mxu0  ;;  %v28480_v3 = vsel %vm2915_vm4, %v9196_v46, %v9198_v27  ;;  %v25697_v57 = vld [vmem:[%s31262_s1 + $0x330] sm:$0xff]  }
 0x67a   : > { %v7705_v55 = vsel %vm1373_vm0, %v7700_v31, %v7704_v15  ;;  %v9457_v8 = vsel %vm1373_vm0, %v9452_v16, %v9456_v49  ;;  %v7470_v18 = vadd.f32 %v7469_v37, %v7268_v41  ;;  %v22628_v56 = vpop.f32.mrb[91].mxu0  ;;  %v9460_v32 = vor.u32 %v9458_v29, %v9456_v49  ;;  %v25692_v41 = vld [vmem:[%s31262_s1 + $0x308] sm:$0xff]   ;;  %v25731_v31 = vld [vmem:[%s31262_s1 + $0x298] sm:$0xff]   ;;  %v25695_v15 = vld [vmem:[%s31262_s1 + $0x320] sm:$0xff]  }
 0x67b   : > { %22702 = vmatmul.mubr.bf16.gmra.mrb[100].mxu0 %v7705_v55  ;;  %22945 = vmatprep.mubr.bf16.mxu1 %v9457_v8  ;;  %v25733_v16 = vld [vmem:[%s31262_s1 + $0x2a0] sm:$0xff]   ;;  %v7995_v49 = vrot.slane %v7970_v2, 1  ;;  %v25737_v37 = vld [vmem:[%s31262_s1 + $0x2b0] sm:$0xff]   ;;  %v25700_v29 = vld [vmem:[%s31262_s1 + $0x348] sm:$0xff]  }
 0x67c   : > { %22721 = vmatprep.mubr.bf16.mxu0 %v28267_v24  ;;  %v28477_v52 = vpack.c.bf16 %v7470_v18, %v7467_v45  ;;  %v25727_v24 = vld [vmem:[%s31262_s1 + $0x288] sm:$0xff]   ;;  %v25699_v55 = vld [vmem:[%s31262_s1 + $0x340] sm:$0xff]   ;;  %v25701_v18 = vld [vmem:[%s31262_s1 + $0x350] sm:$0xff]  }
 0x67d   : > { %v28495_v46 = vld [vmem:[#allocation3 + $0x38] sm:$0xff]  ;;  %v7997_v45 = vsel %vm1715_vm1, %v7995_v49, %v7996_v47  ;;  %v25739_v47 = vld [vmem:[%s31262_s1 + $0x2b8] sm:$0xff]  }
 0x67e   : > { %7598 = vst [vmem:[#allocation3 + $0x40] sm:$0xff] %v28477_v52  ;;  %v9462_v14 = vshll.u32 %v28477_v52, 16  ;;  %v31293_v20 = vrot.slane %v28495_v46, 3  ;;  %v28553_v8 = vld [vmem:[%s31262_s1 + $0x300] sm:$0xff]   ;;  %v25702_v56 = vld [vmem:[%s31262_s1 + $0x358] sm:$0xff]  }
 0x680   : > { %v28484_v17 = vrot.slane %v9462_v14, 1 }
 0x682   : > { %v9465_v22 = vsel %vm1373_vm0, %v9460_v32, %v28484_v17  ;;  %v8006_v32 = vrot.slane %v28459_v1, 1  ;;  %v25705_v1 = vld [vmem:[%s31262_s1 + $0x370] sm:$0xff]  }
 0x683   : > { %22722 = vmatmul.mubr.bf16.vlgmr.msra.gmra.mrb[92].mxu0 %v28283_v39  ;;  %22946 = vmatmul.mubr.bf16.vlgmr.msra.gmra.mrb[180].mxu1 %v9465_v22  ;;  %v25698_v39 = vld [vmem:[%s31262_s1 + $0x338] sm:$0xff]  }
 0x684   : > { %22734 = vmatpush3.bf16.msra.mxu0 %v25691_v54  ;;  %22725 = vmatprep.mubr.bf16.mxu0 %v28301_v43  ;;  %v25694_v54 = vld [vmem:[%s31262_s1 + $0x318] sm:$0xff]   ;;  %v8007_v22 = vsel %vm1715_vm1, %v28403_v7, %v8006_v32  ;;  %v25734_v43 = vld [vmem:[%s31262_s1 + $0x3f0] sm:$0xff]  }
 0x685   : > { %22735 = vmatprep.subr.bf16.mxu0 %v25692_v41  ;;  %22958 = vmatpush3.bf16.msra.mxu1 %v28415_v4  ;;  %v28515_v4 = vsel %vm2915_vm4, %v9198_v27, %v31293_v20  ;;  %v25703_v27 = vld [vmem:[%s31262_s1 + $0x360] sm:$0xff]   ;;  %v25740_v20 = vld [vmem:[%s31262_s1 + $0x408] sm:$0xff]  }
 0x686   : > { %22959 = vmatprep.subr.bf16.mxu1 %v25727_v24 }
 0x688   : > { %22736 = vmatpush3.bf16.msra.mxu0 %v25692_v41  ;;  %v25704_v41 = vld [vmem:[%s31262_s1 + $0x368] sm:$0xff]  }
 0x689   : > { %22737 = vmatprep.subr.bf16.mxu0 %v25693_v21  ;;  %22960 = vmatpush3.bf16.msra.mxu1 %v25727_v24 }
 0x68a   : > { %22961 = vmatprep.subr.bf16.mxu1 %v25729_v6 }
 0x68b   : > { %22726 = vmatmul.mubr.bf16.gmra.mrb[96].mxu0 %v28335_v62  ;;  %v25696_v62 = vld [vmem:[%s31262_s1 + $0x328] sm:$0xff]  }
 0x68c   : > { %22738 = vmatpush3.bf16.msra.mxu0 %v25693_v21  ;;  %22729 = vmatprep.mubr.bf16.mxu0 %v28366_v48  ;;  %v25735_v48 = vld [vmem:[%s31262_s1 + $0x2a8] sm:$0xff]   ;;  %v25707_v21 = vld [vmem:[%s31262_s1 + $0x378] sm:$0xff]  }
 0x68d   : > { %22739 = vmatprep.subr.bf16.mxu0 %v25694_v54  ;;  %22962 = vmatpush3.bf16.msra.mxu1 %v25729_v6  ;;  %v25709_v6 = vld [vmem:[%s31262_s1 + $0x380] sm:$0xff]  }
 0x68e   : > { %22963 = vmatprep.subr.bf16.mxu1 %v25731_v31 }
 0x690   : > { %22740 = vmatpush3.bf16.msra.mxu0 %v25694_v54  ;;  %v25713_v54 = vld [vmem:[%s31262_s1 + $0x390] sm:$0xff]  }
 0x691   : > { %22741 = vmatprep.subr.bf16.mxu0 %v25695_v15  ;;  %22964 = vmatpush3.bf16.msra.mxu1 %v25731_v31  ;;  %v8195_v31 = vrot.slane %v28433_v38, 1 }
 0x692   : > { %22965 = vmatprep.subr.bf16.mxu1 %v25733_v16 }
 0x693   : > { %22730 = vmatmul.mubr.bf16.gmra.mrb[100].mxu0 %v28391_v12  ;;  %v25746_v12 = vld [vmem:[%s31262_s1 + $0x420] sm:$0xff]  }
 0x694   : > { %22742 = vmatpush3.bf16.msra.mxu0 %v25695_v15  ;;  %22749 = vmatprep.mubr.bf16.mxu0 %v7997_v45 }
 0x695   : > { %22743 = vmatprep.subr.bf16.mxu0 %v25696_v62  ;;  %22966 = vmatpush3.bf16.msra.mxu1 %v25733_v16  ;;  %v25715_v16 = vld [vmem:[%s31262_s1 + $0x398] sm:$0xff]  }
 0x696   : > { %22967 = vmatprep.subr.bf16.mxu1 %v25735_v48 }
 0x698   : > { %22744 = vmatpush3.bf16.msra.mxu0 %v25696_v62 }
 0x699   : > { %22745 = vmatprep.subr.bf16.mxu0 %v25697_v57  ;;  %22968 = vmatpush3.bf16.msra.mxu1 %v25735_v48  ;;  %v25717_v48 = vld [vmem:[%s31262_s1 + $0x3a0] sm:$0xff]  }
 0x69a   : > { %22969 = vmatprep.subr.bf16.mxu1 %v25737_v37 }
 0x69c   : > { %22746 = vmatpush3.bf16.msra.mxu0 %v25697_v57 }
 0x69d   : > { %22747 = vmatprep.subr.bf16.mxu0 %v25698_v39  ;;  %22970 = vmatpush3.bf16.msra.mxu1 %v25737_v37 }
 0x69e   : > { %22971 = vmatprep.subr.bf16.mxu1 %v25739_v47 }
 0x6a0   : > { %22748 = vmatpush3.bf16.msra.mxu0 %v25698_v39  ;;  %v25721_v39 = vld [vmem:[%s31262_s1 + $0x3b0] sm:$0xff]  }
 0x6a1   : > { %22761 = vmatprep.subr.bf16.mxu0 %v25699_v55  ;;  %22972 = vmatpush3.bf16.msra.mxu1 %v25739_v47 }
 0x6a2   : > { %22985 = vmatprep.subr.bf16.mxu1 %v28553_v8 }
 0x6a3   : > { %22750 = vmatmul.mubr.bf16.vlgmr.msra.gmra.mrb[92].mxu0 %v28324_v25  ;;  %v8155_v25 = vld [vmem:[#allocation3 + $0x8] sm:$0xfe] }
 0x6a4   : > { %22753 = vmatprep.mubr.bf16.mxu0 %v28355_v51  ;;  %22762 = vmatpush3.bf16.msra.mxu0 %v25699_v55  ;;  %v8186_v14 = vrot.slane %v8155_v25, 1  ;;  %v8365_v2 = vshrl.u32 %v8155_v25, 16  ;;  %v8368_v15 = vshll.u32 %v8155_v25, 16 }
 0x6a5   : > { %22763 = vmatprep.subr.bf16.mxu0 %v25700_v29 }
 0x6a6   : > { %v8188_v24 = vsel %vm1715_vm1, %v8186_v14, %v28312_v26  ;;  %v25711_v26 = vld [vmem:[%s31262_s1 + $0x388] sm:$0xff]   ;;  %v8367_v49 = vrot.slane %v8365_v2, 1  ;;  %v8370_v62 = vrot.slane %v8368_v15, 2 }
 0x6a7   : > { %v25724_v2 = vld [vmem:[%s31262_s1 + $0x3c8] sm:$0xff]  }
 0x6a8   : > { %22764 = vmatpush3.bf16.msra.mxu0 %v25700_v29  ;;  %v8371_v57 = vor.u32 %v8370_v62, %v8367_v49  ;;  %v9466_v29 = vshrl.u32 %v28477_v52, 16  ;;  %v28644_v49 = vld [vmem:[#allocation3 + $0x38] sm:$0x3] }
 0x6a9   : > { %22765 = vmatprep.subr.bf16.mxu0 %v25701_v18 }
 0x6aa   : > { %v8380_v37 = vsel %vm2085_vm3, %v8371_v57, %v28333_v35  ;;  %v9468_v32 = vor.u32 %v9466_v29, %v28484_v17 }
 0x6ab   : > { %22754 = vmatmul.mubr.bf16.gmra.mrb[96].mxu0 %v28382_v19 }
 0x6ac   : > { %22757 = vmatprep.mubr.bf16.mxu0 %v28410_v36  ;;  %22766 = vmatpush3.bf16.msra.mxu0 %v25701_v18 }
 0x6ad   : > { %22767 = vmatprep.subr.bf16.mxu0 %v25702_v56 }
 0x6b0   : > { %22768 = vmatpush3.bf16.msra.mxu0 %v25702_v56  ;;  %v25722_v56 = vld [vmem:[%s31262_s1 + $0x3b8] sm:$0xff]  }
 0x6b1   : > { %22769 = vmatprep.subr.bf16.mxu0 %v25703_v27 }
 0x6b3   : > { %22758 = vmatmul.mubr.bf16.gmra.mrb[100].mxu0 %v8007_v22 }
 0x6b4   : > { %22770 = vmatpush3.bf16.msra.mxu0 %v25703_v27  ;;  %22777 = vmatprep.mubr.bf16.mxu0 %v8188_v24  ;;  %v28622_v27 = vld [vmem:[#allocation3 + $0x40] sm:$0xff] }
 0x6b5   : > { %22771 = vmatprep.subr.bf16.mxu0 %v25704_v41  ;;  %v31292_v24 = vrot.slane %v28622_v27, 2 }
 0x6b8   : > { %22772 = vmatpush3.bf16.msra.mxu0 %v25704_v41  ;;  %v25723_v41 = vld [vmem:[%s31262_s1 + $0x3c0] sm:$0xff]  }
 0x6b9   : > { %22773 = vmatprep.subr.bf16.mxu0 %v25705_v1 }
 0x6bc   : > { %22774 = vmatpush3.bf16.msra.mxu0 %v25705_v1 }
 0x6bd   : > { %22775 = vmatprep.subr.bf16.mxu0 %v25707_v21 }
 0x6c0   : > { %22776 = vmatpush3.bf16.msra.mxu0 %v25707_v21 }
 0x6c1   : > { %22789 = vmatprep.subr.bf16.mxu0 %v25709_v6 }
 0x6c3   : > { %22778 = vmatmul.mubr.bf16.vlgmr.msra.gmra.mrb[92].mxu0 %v28355_v51  ;;  %v8196_v51 = vsel %vm1715_vm1, %v28403_v7, %v8195_v31 }
 0x6c4   : > { %22781 = vmatprep.mubr.bf16.mxu0 %v28382_v19  ;;  %22790 = vmatpush3.bf16.msra.mxu0 %v25709_v6  ;;  %v8161_v19 = vld [vmem:[#allocation3 + $0x38] sm:$0x1] }
 0x6c5   : > { %22791 = vmatprep.subr.bf16.mxu0 %v25711_v26  ;;  %v8197_v45 = vrot.slane %v8161_v19, 1 }
 0x6c7   : > { %v8198_v7 = vsel %vm1715_vm1, %v8195_v31, %v8197_v45 }
 0x6c8   : > { %22792 = vmatpush3.bf16.msra.mxu0 %v25711_v26 }
 0x6c9   : > { %22793 = vmatprep.subr.bf16.mxu0 %v25713_v54 }
 0x6cb   : > { %22782 = vmatmul.mubr.bf16.gmra.mrb[96].mxu0 %v28410_v36  ;;  %v25719_v36 = vld [vmem:[%s31262_s1 + $0x3a8] sm:$0xff]  }
 0x6cc   : > { %22785 = vmatprep.mubr.bf16.mxu0 %v8196_v51  ;;  %22794 = vmatpush3.bf16.msra.mxu0 %v25713_v54 }
 0x6cd   : > { %22795 = vmatprep.subr.bf16.mxu0 %v25715_v16 }
 0x6d0   : > { %22796 = vmatpush3.bf16.msra.mxu0 %v25715_v16 }
 0x6d1   : > { %22797 = vmatprep.subr.bf16.mxu0 %v25717_v48 }
 0x6d3   : > { %22786 = vmatmul.mubr.bf16.gmra.mrb[100].mxu0 %v8198_v7  ;;  %v8418_v7 = vshrl.u32 %v28644_v49, 16 }
 0x6d4   : > { %22798 = vmatpush3.bf16.msra.mxu0 %v25717_v48  ;;  %22805 = vmatprep.mubr.bf16.mxu0 %v8380_v37  ;;  %v8421_v37 = vshll.u32 %v28644_v49, 16 }
 0x6d5   : > { %22799 = vmatprep.subr.bf16.mxu0 %v25719_v36 }
 0x6d7   : > { %v7474_v47 = vpop.f32.mrb[132].mxu1 }
 0x6d8   : > { %22800 = vmatpush3.bf16.msra.mxu0 %v25719_v36  ;;  %v22631_v55 = vpop.f32.mrb[133].mxu1 }
 0x6d9   : > { %22801 = vmatprep.subr.bf16.mxu0 %v25721_v39  ;;  %v7477_v18 = vpop.f32.mrb[134].mxu1 }
 0x6da   : > { %v28620_v25 = vpack.c.bf16 %v7477_v18, %v7474_v47  ;;  %v22632_v35 = vpop.f32.mrb[135].mxu1 }
 0x6dc   : > { %7599 = vst [vmem:[#allocation3 + $0x48] sm:$0xff] %v28620_v25  ;;  %22802 = vmatpush3.bf16.msra.mxu0 %v25721_v39  ;;  %v9470_v14 = vshll.u32 %v28620_v25, 16  ;;  %v10171_v22 = vshrl.u32 %v28620_v25, 16  ;;  %v10384_v1 = vrot.slane %v28620_v25, 2  ;;  %v28648_v48 = vrot.slane %v28620_v25, 1 }
 0x6dd   : > { %22803 = vmatprep.subr.bf16.mxu0 %v25722_v56 }
 0x6de   : > { %v9472_v21 = vrot.slane %v9470_v14, 1  ;;  %v28636_v26 = vsel %vm2315_vm2, %v31292_v24, %v10384_v1  ;;  %v10173_v15 = vrot.slane %v10171_v22, 1  ;;  %v10176_v16 = vrot.slane %v9470_v14, 2 }
 0x6df   : > { %v7482_v6 = vpop.f32.mrb[136].mxu1 }
 0x6e0   : > { %22804 = vmatpush3.bf16.msra.mxu0 %v25722_v56  ;;  %v22635_v17 = vpop.f32.mrb[137].mxu1  ;;  %v9473_v54 = vsel %vm1373_vm0, %v9468_v32, %v9472_v21  ;;  %v9476_v62 = vor.u32 %v10171_v22, %v9472_v21  ;;  %v28660_v39 = vor.u32 %v10176_v16, %v10173_v15  ;;  %v25728_v21 = vld [vmem:[%s31262_s1 + $0x3d8] sm:$0xff]   ;;  %v8573_v15 = vld [vmem:[#allocation3 + $0x8] sm:$0xfc] }
 0x6e1   : > { %v7485_v31 = vpop.f32.mrb[138].mxu1  ;;  %22817 = vmatprep.subr.bf16.mxu0 %v25723_v41  ;;  %22949 = vmatprep.mubr.bf16.mxu1 %v9473_v54  ;;  %v8423_v17 = vrot.slane %v8421_v37, 2 }
 0x6e2   : > { %v28642_v51 = vpack.c.bf16 %v7485_v31, %v7482_v6  ;;  %v22636_v19 = vpop.f32.mrb[139].mxu1  ;;  %v8420_v6 = vrot.slane %v8418_v7, 1 }
 0x6e3   : > { %22806 = vmatmul.mubr.bf16.vlgmr.msra.gmra.mrb[92].mxu0 %v28374_v58  ;;  %v25726_v58 = vld [vmem:[%s31262_s1 + $0x3d0] sm:$0xff]  }
 0x6e4   : > { %7600 = vst [vmem:[#allocation3 + $0x50] sm:$0xff] %v28642_v51  ;;  %22809 = vmatprep.mubr.bf16.mxu0 %v28397_v5  ;;  %22818 = vmatpush3.bf16.msra.mxu0 %v25723_v41  ;;  %v9478_v45 = vshll.u32 %v28642_v51, 16  ;;  %v9482_v57 = vshrl.u32 %v28642_v51, 16  ;;  %v9793_v36 = vrot.slane %v28642_v51, 1  ;;  %v10386_v5 = vrot.slane %v28642_v51, 2  ;;  %v28692_v7 = vld [vmem:[#allocation3 + $0x48] sm:$0xff] }
 0x6e5   : > { %22819 = vmatprep.subr.bf16.mxu0 %v25724_v2 }
 0x6e6   : > { %v9480_v47 = vrot.slane %v9478_v45, 1  ;;  %v28665_v55 = vsel %vm1715_vm1, %v28648_v48, %v9793_v36  ;;  %v10182_v29 = vrot.slane %v9482_v57, 1  ;;  %v10185_v18 = vrot.slane %v9478_v45, 2 }
 0x6e7   : > { %v7490_v56 = vpop.f32.mrb[140].mxu1  ;;  %v28668_v35 = vsel %vm2315_vm2, %v10384_v1, %v10386_v5  ;;  %v8424_v45 = vor.u32 %v8423_v17, %v8420_v6  ;;  %v31289_v17 = vrot.slane %v28692_v7, 3 }
 0x6e8   : > { %22820 = vmatpush3.bf16.msra.mxu0 %v25724_v2  ;;  %v22639_v32 = vpop.f32.mrb[141].mxu1  ;;  %v9481_v14 = vsel %vm1373_vm0, %v9476_v62, %v9480_v47  ;;  %v10186_v41 = vor.u32 %v10185_v18, %v10182_v29  ;;  %v9484_v2 = vor.u32 %v9482_v57, %v9480_v47 }
 0x6e9   : > { %v7493_v22 = vpop.f32.mrb[142].mxu1  ;;  %22821 = vmatprep.subr.bf16.mxu0 %v25726_v58  ;;  %22950 = vmatmul.mubr.bf16.gmra.mrb[184].mxu1 %v9481_v14 }
 0x6ea   : > { %v28674_v54 = vpack.c.bf16 %v7493_v22, %v7490_v56  ;;  %v22640_v31 = vpop.f32.mrb[143].mxu1  ;;  %v28678_v1 = vsel %vm2085_vm3, %v28660_v39, %v10186_v41  ;;  %v8593_v56 = vrot.slane %v8573_v15, 2 }
 0x6eb   : > { %22810 = vmatmul.mubr.bf16.gmra.mrb[96].mxu0 %v28439_v42  ;;  %v25730_v42 = vld [vmem:[%s31262_s1 + $0x3e0] sm:$0xff]  }
 0x6ec   : > { %7601 = vst [vmem:[#allocation3 + $0x58] sm:$0xff] %v28674_v54  ;;  %22813 = vmatprep.mubr.bf16.mxu0 %v28463_v33  ;;  %22822 = vmatpush3.bf16.msra.mxu0 %v25726_v58  ;;  %v9486_v16 = vshll.u32 %v28674_v54, 16  ;;  %v9490_v19 = vshrl.u32 %v28674_v54, 16  ;;  %v28686_v62 = vrot.slane %v28674_v54, 1  ;;  %v10388_v57 = vrot.slane %v28674_v54, 2  ;;  %v10543_v33 = vld [vmem:[#allocation3 + $0x50] sm:$0xff] }
 0x6ed   : > { %22823 = vmatprep.subr.bf16.mxu0 %v25728_v21  ;;  %v10979_v31 = vrot.slane %v10543_v33, 3  ;;  %v8595_v33 = vsel %vm2315_vm2, %v8593_v56, %v8594_v60 }
 0x6ee   : > { %v9488_v58 = vrot.slane %v9486_v16, 1  ;;  %v28696_v37 = vsel %vm1715_vm1, %v9793_v36, %v28686_v62  ;;  %v10191_v47 = vrot.slane %v9490_v19, 1  ;;  %v10194_v29 = vrot.slane %v9486_v16, 2  ;;  %v25732_v36 = vld [vmem:[%s31262_s1 + $0x3e8] sm:$0xff]  }
 0x6ef   : > { %v7498_v18 = vpop.f32.mrb[144].mxu1  ;;  %v28701_v32 = vsel %vm2315_vm2, %v10386_v5, %v10388_v57  ;;  %v8425_v5 = vsel %vm2085_vm3, %v28452_v44, %v8424_v45 }
 0x6f0   : > { %22824 = vmatpush3.bf16.msra.mxu0 %v25728_v21  ;;  %v22643_v14 = vpop.f32.mrb[145].mxu1  ;;  %v9489_v22 = vsel %vm1373_vm0, %v9484_v2, %v9488_v58  ;;  %v10195_v6 = vor.u32 %v10194_v29, %v10191_v47  ;;  %v28718_v2 = vsel %vm2915_vm4, %v31289_v17, %v10979_v31 }
 0x6f1   : > { %v7501_v0 = vpop.f32.mrb[146].mxu1  ;;  %22825 = vmatprep.subr.bf16.mxu0 %v25730_v42  ;;  %22953 = vmatprep.mubr.bf16.mxu1 %v9489_v22 }
 0x6f2   : > { %v28708_v16 = vpack.c.bf16 %v7501_v0, %v7498_v18  ;;  %v22644_v21 = vpop.f32.mrb[147].mxu1  ;;  %v28713_v15 = vsel %vm2085_vm3, %v10186_v41, %v10195_v6 }
 0x6f3   : > { %22814 = vmatmul.mubr.bf16.gmra.mrb[100].mxu0 %v8425_v5  ;;  %v28723_v47 = vld [vmem:[#allocation3 + $0x58] sm:$0xff] }
 0x6f4   : > { %7602 = vst [vmem:[#allocation3 + $0x60] sm:$0xff] %v28708_v16  ;;  %22826 = vmatpush3.bf16.msra.mxu0 %v25730_v42  ;;  %22833 = vmatprep.mubr.bf16.mxu0 %v8595_v33  ;;  %v31302_v0 = vrot.slane %v28708_v16, 1  ;;  %v10198_v44 = vshrl.u32 %v28708_v16, 16  ;;  %v10201_v41 = vshll.u32 %v28708_v16, 16  ;;  %v31290_v45 = vrot.slane %v28708_v16, 2 }
 0x6f5   : > { %22827 = vmatprep.subr.bf16.mxu0 %v25732_v36  ;;  %v31291_v60 = vrot.slane %v28723_v47, 3 }
 0x6f6   : > { %v28738_v42 = vsel %vm1715_vm1, %v28686_v62, %v31302_v0  ;;  %v10200_v29 = vrot.slane %v10198_v44, 1  ;;  %v10203_v18 = vrot.slane %v10201_v41, 2  ;;  %v28743_v56 = vsel %vm2315_vm2, %v10388_v57, %v31290_v45  ;;  %v25736_v44 = vld [vmem:[%s31262_s1 + $0x3f8] sm:$0xff]  }
 0x6f7   : > { %v7506_v14 = vpop.f32.mrb[148].mxu1  ;;  %v28748_v22 = vsel %vm2915_vm4, %v10979_v31, %v31291_v60 }
 0x6f8   : > { %22828 = vmatpush3.bf16.msra.mxu0 %v25732_v36  ;;  %v22647_v5 = vpop.f32.mrb[149].mxu1  ;;  %v28750_v21 = vor.u32 %v10203_v18, %v10200_v29 }
 0x6f9   : > { %v7509_v33 = vpop.f32.mrb[150].mxu1  ;;  %22829 = vmatprep.subr.bf16.mxu0 %v25734_v43 }
 0x6fa   : > { %v7582_v41 = vpack.c.bf16 %v7509_v33, %v7506_v14  ;;  %v22648_v17 = vpop.f32.mrb[151].mxu1  ;;  %v28757_v57 = vsel %vm2085_vm3, %v10195_v6, %v28750_v21  ;;  %v9492_v6 = vor.u32 %v9490_v19, %v9488_v58 }
 0x6fb   : > { %v28759_v45 = vld [vmem:[#allocation3 + $0x60] sm:$0x1]  ;;  %v25738_v17 = vld [vmem:[%s31262_s1 + $0x400] sm:$0xff]  }
 0x6fc   : > { %v28761_v31 = vld [vmem:[#allocation3 + $0x60] sm:$0xff]  ;;  %7603 = vst [vmem:[#allocation3 + $0x68] sm:$0xff] %v7582_v41  ;;  %22830 = vmatpush3.bf16.msra.mxu0 %v25734_v43  ;;  %v9494_v36 = vshll.u32 %v28759_v45, 16 }
 0x6fd   : > { %v31294_v29 = vshrl.u32 %v28761_v31, 16  ;;  %v31297_v18 = vshll.u32 %v28761_v31, 16  ;;  %22831 = vmatprep.subr.bf16.mxu0 %v25736_v44 }
 0x6fe   : > { %v9496_v14 = vrot.slane %v9494_v36, 1 }
 0x6ff   : > { %v10786_v5 = vrot.slane %v31294_v29, 2  ;;  %v7514_v33 = vpop.f32.mrb[152].mxu1  ;;  %v10789_v43 = vrot.slane %v31297_v18, 3 }
 0x700   : > { %22832 = vmatpush3.bf16.msra.mxu0 %v25736_v44  ;;  %v22651_v41 = vpop.f32.mrb[153].mxu1  ;;  %v9497_v60 = vsel %vm1373_vm0, %v9492_v6, %v9496_v14 }
 0x701   : > { %v7517_v24 = vpop.f32.mrb[154].mxu1  ;;  %22954 = vmatmul.mubr.bf16.gmra.mrb[188].mxu1 %v9497_v60  ;;  %22845 = vmatprep.subr.bf16.mxu0 %v25738_v17  ;;  %v28779_v19 = vor.u32 %v10789_v43, %v10786_v5  ;;  %v25744_v43 = vld [vmem:[%s31262_s1 + $0x418] sm:$0xff]  }
 0x702   : > { %v7583_v58 = vpack.c.bf16 %v7517_v24, %v7514_v33  ;;  %22973 = vmatprep.mubr.bf16.mxu1 %v28433_v38  ;;  %v22652_v36 = vpop.f32.mrb[155].mxu1  ;;  %v25742_v24 = vld [vmem:[%s31262_s1 + $0x410] sm:$0xff]  }
 0x703   : > { %22834 = vmatmul.mubr.bf16.vlgmr.msra.gmra.mrb[92].mxu0 %v28363_v13  ;;  %v28783_v29 = vld [vmem:[#allocation3 + $0x68] sm:$0xff]  ;;  %v8602_v13 = vrot.slane %v28433_v38, 2 }
 0x704   : > { %7604 = vst [vmem:[#allocation3 + $0x70] sm:$0xff] %v7583_v58  ;;  %22837 = vmatprep.mubr.bf16.mxu0 %v28388_v50  ;;  %22846 = vmatpush3.bf16.msra.mxu0 %v25738_v17  ;;  %v31296_v60 = vshll.u32 %v28783_v29, 16  ;;  %v31295_v44 = vshrl.u32 %v28783_v29, 16  ;;  %v25743_v50 = vld [vmem:[%s31262_s1 + $0x308] sm:$0xff]   ;;  %v25745_v36 = vld [vmem:[%s31262_s1 + $0x310] sm:$0xff]  }
 0x705   : > { %22847 = vmatprep.subr.bf16.mxu0 %v25740_v20 }
 0x706   : > { %v10795_v6 = vrot.slane %v31295_v44, 2  ;;  %v10798_v5 = vrot.slane %v31296_v60, 3  ;;  %v25748_v44 = vld [vmem:[%s31262_s1 + $0x428] sm:$0xff]  }
 0x707   : > { %v7522_v14 = vpop.f32.mrb[156].mxu1 }
 0x708   : > { %22848 = vmatpush3.bf16.msra.mxu0 %v25740_v20  ;;  %v22655_v17 = vpop.f32.mrb[157].mxu1  ;;  %v28805_v58 = vor.u32 %v10798_v5, %v10795_v6  ;;  %v8603_v20 = vsel %vm2315_vm2, %v8600_v61, %v8602_v13  ;;  %v8785_v5 = vrot.slane %v28406_v9, 2 }
 0x709   : > { %v7525_v33 = vpop.f32.mrb[158].mxu1  ;;  %22974 = vmatmul.mubr.bf16.vlgmr.msra.gmra.mrb[180].mxu1 %v28454_v10  ;;  %22849 = vmatprep.subr.bf16.mxu0 %v25742_v24 }
 0x70a   : > { %v7584_v41 = vpack.c.bf16 %v7525_v33, %v7522_v14  ;;  %22986 = vmatpush3.bf16.msra.mxu1 %v28553_v8  ;;  %22977 = vmatprep.mubr.bf16.mxu1 %v28477_v52  ;;  %v22656_v38 = vpop.f32.mrb[159].mxu1  ;;  %v28824_v61 = vsel %vm2685_vm5, %v28779_v19, %v28805_v58  ;;  %v28827_v14 = vld [vmem:[#allocation3 + $0x10] sm:$0xfc] }
 0x70b   : > { %22838 = vmatmul.mubr.bf16.gmra.mrb[96].mxu0 %v28427_v59  ;;  %22987 = vmatprep.subr.bf16.mxu1 %v25743_v50  ;;  %v28814_v17 = vld [vmem:[#allocation3 + $0x70] sm:$0xff]  ;;  %v8604_v59 = vrot.slane %v28644_v49, 2  ;;  %v8784_v49 = vrot.slane %v28827_v14, 2 }
 0x70c   : > { %7605 = vst [vmem:[#allocation3 + $0x78] sm:$0xff] %v7584_v41  ;;  %22841 = vmatprep.mubr.bf16.mxu0 %v8603_v20  ;;  %22850 = vmatpush3.bf16.msra.mxu0 %v25742_v24  ;;  %v31299_v8 = vshll.u32 %v28814_v17, 16  ;;  %v31298_v6 = vshrl.u32 %v28814_v17, 16  ;;  %v25747_v33 = vld [vmem:[%s31262_s1 + $0x318] sm:$0xff]  }
 0x70d   : > { %22851 = vmatprep.subr.bf16.mxu0 %v25744_v43 }
 0x70e   : > { %22988 = vmatpush3.bf16.msra.mxu1 %v25743_v50  ;;  %v11941_v41 = vrot.slane %v31298_v6, 1  ;;  %v11944_v38 = vrot.slane %v31299_v8, 2  ;;  %v8605_v6 = vsel %vm2315_vm2, %v8602_v13, %v8604_v59  ;;  %v25749_v8 = vld [vmem:[%s31262_s1 + $0x320] sm:$0xff]   ;;  %v31306_v59 = vrot.slane %v28454_v10, 1 }
 0x70f   : > { %v7530_v24 = vpop.f32.mrb[160].mxu1  ;;  %22989 = vmatprep.subr.bf16.mxu1 %v25745_v36 }
 0x710   : > { %22852 = vmatpush3.bf16.msra.mxu0 %v25744_v43  ;;  %v22659_v50 = vpop.f32.mrb[161].mxu1  ;;  %v28842_v60 = vor.u32 %v11944_v38, %v11941_v41  ;;  %v25751_v38 = vld [vmem:[%s31262_s1 + $0x328] sm:$0xff]  }
 0x711   : > { %v7533_v20 = vpop.f32.mrb[162].mxu1  ;;  %22978 = vmatmul.mubr.bf16.gmra.mrb[184].mxu1 %v28620_v25  ;;  %22853 = vmatprep.subr.bf16.mxu0 %v25746_v12  ;;  %v9762_v50 = vld [vmem:[#allocation3 + $0x30] sm:$0xfe]  ;;  %v8786_v25 = vsel %vm2315_vm2, %v8784_v49, %v8785_v5 }
 0x712   : > { %v7585_v18 = vpack.c.bf16 %v7533_v20, %v7530_v24  ;;  %22990 = vmatpush3.bf16.msra.mxu1 %v25745_v36  ;;  %22981 = vmatprep.mubr.bf16.mxu1 %v28642_v51  ;;  %v22660_v43 = vpop.f32.mrb[163].mxu1  ;;  %v25750_v36 = vld [vmem:[%s31262_s1 + $0x430] sm:$0xff]  }
 0x713   : > { %22842 = vmatmul.mubr.bf16.gmra.mrb[100].mxu0 %v8605_v6  ;;  %22991 = vmatprep.subr.bf16.mxu1 %v25747_v33  ;;  %v28852_v41 = vld [vmem:[#allocation3 + $0x78] sm:$0xff]  ;;  %v9786_v6 = vrot.slane %v9762_v50, 1  ;;  %v25752_v50 = vld [vmem:[%s31262_s1 + $0x438] sm:$0xff]  }
 0x714   : > { %7606 = vst [vmem:[#allocation3 + $0x80] sm:$0xff] %v7585_v18  ;;  %22854 = vmatpush3.bf16.msra.mxu0 %v25746_v12  ;;  %22861 = vmatprep.mubr.bf16.mxu0 %v8786_v25  ;;  %v31301_v13 = vshll.u32 %v28852_v41, 16  ;;  %v31300_v51 = vshrl.u32 %v28852_v41, 16 }
 0x715   : > { %22855 = vmatprep.subr.bf16.mxu0 %v25748_v44 }
 0x716   : > { %22992 = vmatpush3.bf16.msra.mxu1 %v25747_v33  ;;  %v11950_v24 = vrot.slane %v31300_v51, 1  ;;  %v11953_v18 = vrot.slane %v31301_v13, 2  ;;  %v9788_v33 = vsel %vm1715_vm1, %v9786_v6, %v31306_v59 }
 0x717   : > { %v7538_v12 = vpop.f32.mrb[164].mxu1  ;;  %22993 = vmatprep.subr.bf16.mxu1 %v25749_v8 }
 0x718   : > { %22856 = vmatpush3.bf16.msra.mxu0 %v25748_v44  ;;  %v22663_v20 = vpop.f32.mrb[165].mxu1  ;;  %v11954_v49 = vor.u32 %v11953_v18, %v11950_v24 }
 0x719   : > { %v7541_v43 = vpop.f32.mrb[166].mxu1  ;;  %22982 = vmatmul.mubr.bf16.gmra.mrb[188].mxu1 %v28674_v54  ;;  %22857 = vmatprep.subr.bf16.mxu0 %v25750_v36  ;;  %v25753_v54 = vld [vmem:[%s31262_s1 + $0x330] sm:$0xff]  }
 0x71a   : > { %v7586_v25 = vpack.c.bf16 %v7541_v43, %v7538_v12  ;;  %22994 = vmatpush3.bf16.msra.mxu1 %v25749_v8  ;;  %23001 = vmatprep.mubr.bf16.mxu1 %v9788_v33  ;;  %v22664_v51 = vpop.f32.mrb[167].mxu1  ;;  %v28876_v44 = vsel %vm2085_vm3, %v28842_v60, %v11954_v49  ;;  %v25754_v8 = vld [vmem:[%s31262_s1 + $0x440] sm:$0xff]  }
 0x71b   : > { %31333 = vst [vmem:[#allocation11_spill] sm:$0xff] %v28876_v44  ;;  %22995 = vmatprep.subr.bf16.mxu1 %v25751_v38  ;;  %v28881_v24 = vld [vmem:[#allocation3 + $0x80] sm:$0xff]  ;;  %v8787_v51 = vrot.slane %v28419_v63, 2  ;;  %v28893_v43 = vld [vmem:[#allocation3 + $0x78] sm:$0xff] }
 0x71c   : > { %7607 = vst [vmem:[#allocation3 + $0x88] sm:$0xff] %v7586_v25  ;;  %22858 = vmatpush3.bf16.msra.mxu0 %v25750_v36  ;;  %v31304_v6 = vshll.u32 %v28881_v24, 16  ;;  %v31303_v18 = vshrl.u32 %v28881_v24, 16  ;;  %31334 = vst [vmem:[#allocation12_spill] sm:$0xff] %v28893_v43  ;;  %v28895_v36 = vld [vmem:[#allocation3 + $0x80] sm:$0xff]  ;;  %v8789_v25 = vrot.slane %v28449_v40, 2 }
 0x71d   : > { %22859 = vmatprep.subr.bf16.mxu0 %v25752_v50  ;;  %v12756_v23 = vrot.slane %v28895_v36, 3  ;;  %v8788_v40 = vsel %vm2315_vm2, %v8785_v5, %v8787_v51 }
 0x71e   : > { %22996 = vmatpush3.bf16.msra.mxu1 %v25751_v38  ;;  %v11959_v12 = vrot.slane %v31303_v18, 1  ;;  %v11962_v20 = vrot.slane %v31304_v6, 2  ;;  %v25755_v38 = vld [vmem:[%s31262_s1 + $0x338] sm:$0xff]   ;;  %v25756_v18 = vld [vmem:[%s31262_s1 + $0x448] sm:$0xff]   ;;  %v31309_v6 = vrot.slane %v28893_v43, 3 }
 0x71f   : > { %v7546_v33 = vpop.f32.mrb[168].mxu1  ;;  %22997 = vmatprep.subr.bf16.mxu1 %v25753_v54 }
 0x720   : > { %22860 = vmatpush3.bf16.msra.mxu0 %v25752_v50  ;;  %v22667_v63 = vpop.f32.mrb[169].mxu1  ;;  %v11963_v13 = vor.u32 %v11962_v20, %v11959_v12  ;;  %v8790_v12 = vsel %vm2315_vm2, %v8787_v51, %v8789_v25  ;;  %v25757_v20 = vld [vmem:[%s31262_s1 + $0x340] sm:$0xff]   ;;  %v25758_v51 = vld [vmem:[%s31262_s1 + $0x450] sm:$0xff]  }
 0x721   : > { %v7549_v0 = vpop.f32.mrb[170].mxu1  ;;  %22873 = vmatprep.subr.bf16.mxu0 %v25754_v8 }
 0x722   : > { %v7587_v59 = vpack.c.bf16 %v7549_v0, %v7546_v33  ;;  %22998 = vmatpush3.bf16.msra.mxu1 %v25753_v54  ;;  %v22668_v30 = vpop.f32.mrb[171].mxu1  ;;  %v28910_v50 = vsel %vm2085_vm3, %v11954_v49, %v11963_v13  ;;  %v28921_v0 = vsel %vm2915_vm4, %v31309_v6, %v12756_v23  ;;  %v8791_v54 = vrot.slane %v28470_v11, 2  ;;  %v25759_v11 = vld [vmem:[%s31262_s1 + $0x348] sm:$0xff]  }
 0x723   : > { %31335 = vst [vmem:[#allocation13_spill] sm:$0xff] %v28910_v50  ;;  %22862 = vmatmul.mubr.bf16.vlgmr.msra.gmra.mrb[92].mxu0 %v8788_v40  ;;  %22999 = vmatprep.subr.bf16.mxu1 %v25755_v38  ;;  %v28916_v63 = vld [vmem:[#allocation3 + $0x88] sm:$0xff]  ;;  %31336 = vst [vmem:[#allocation14_spill] sm:$0xff] %v28921_v0  ;;  %v9789_v30 = vrot.slane %v28477_v52, 1  ;;  %v8793_v33 = vrot.slane %v28495_v46, 2  ;;  %v26175_v40 = vld [vmem:[#allocation3 + $0x18] sm:$0xff] }
 0x724   : > { %7608 = vst [vmem:[#allocation3 + $0x90] sm:$0xff] %v7587_v59  ;;  %22865 = vmatprep.mubr.bf16.mxu0 %v8790_v12  ;;  %22874 = vmatpush3.bf16.msra.mxu0 %v25754_v8  ;;  %v31312_v5 = vshll.u32 %v28916_v63, 16  ;;  %v31310_v49 = vshrl.u32 %v28916_v63, 16  ;;  %v12321_v36 = vld [vmem:[#allocation3 + $0x88] sm:$0xff]  ;;  %v8971_v12 = vshrl.u32 %v26175_v40, 16  ;;  %v8974_v6 = vshll.u32 %v26175_v40, 16 }
 0x725   : > { %22875 = vmatprep.subr.bf16.mxu0 %v25756_v18  ;;  %v9792_v50 = vsel %vm1715_vm1, %v9789_v30, %v28648_v48  ;;  %v8792_v44 = vsel %vm2315_vm2, %v8789_v25, %v8791_v54  ;;  %v8794_v25 = vsel %vm2315_vm2, %v8791_v54, %v8793_v33 }
 0x726   : > { %23000 = vmatpush3.bf16.msra.mxu1 %v25755_v38  ;;  %v11968_v59 = vrot.slane %v31310_v49, 1  ;;  %v11971_v8 = vrot.slane %v31312_v5, 2  ;;  %v31337_v38 = vrot.slane %v28454_v10, 1  ;;  %v12758_v5 = vrot.slane %v12321_v36, 3 }
 0x727   : > { %v7554_v52 = vpop.f32.mrb[172].mxu1  ;;  %23013 = vmatprep.subr.bf16.mxu1 %v25757_v20  ;;  %v8966_v10 = vshll.u32 %v28827_v14, 16 }
 0x728   : > { %22876 = vmatpush3.bf16.msra.mxu0 %v25756_v18  ;;  %v22671_v0 = vpop.f32.mrb[173].mxu1  ;;  %v9790_v49 = vsel %vm1715_vm1, %v31337_v38, %v9789_v30  ;;  %v28941_v43 = vor.u32 %v11971_v8, %v11968_v59  ;;  %v25760_v18 = vld [vmem:[%s31262_s1 + $0x458] sm:$0xff]   ;;  %v28956_v30 = vsel %vm2915_vm4, %v12756_v23, %v12758_v5  ;;  %v25761_v59 = vld [vmem:[%s31262_s1 + $0x350] sm:$0xff]   ;;  %v25762_v23 = vld [vmem:[%s31262_s1 + $0x460] sm:$0xff]  }
 0x729   : > { %23002 = vmatmul.mubr.bf16.vlgmr.msra.gmra.mrb[180].mxu1 %v9790_v49  ;;  %v7557_v28 = vpop.f32.mrb[174].mxu1  ;;  %22877 = vmatprep.subr.bf16.mxu0 %v25758_v51  ;;  %v8963_v0 = vshrl.u32 %v28827_v14, 16  ;;  %v8759_v14 = vld [vmem:[#allocation3 + $0x40] sm:$0x3]  ;;  %v8968_v54 = vrot.slane %v8966_v10, 3 }
 0x72a   : > { %v7588_v40 = vpack.c.bf16 %v7557_v28, %v7554_v52  ;;  %23005 = vmatprep.mubr.bf16.mxu1 %v9792_v50  ;;  %23014 = vmatpush3.bf16.msra.mxu1 %v25757_v20  ;;  %v22672_v36 = vpop.f32.mrb[175].mxu1  ;;  %v28953_v49 = vsel %vm2085_vm3, %v11963_v13, %v28941_v43  ;;  %v8973_v28 = vrot.slane %v8971_v12, 2  ;;  %v8976_v50 = vrot.slane %v8974_v6, 3 }
 0x72b   : > { %22866 = vmatmul.mubr.bf16.gmra.mrb[96].mxu0 %v8792_v44  ;;  %23015 = vmatprep.subr.bf16.mxu1 %v25759_v11  ;;  %v28962_v20 = vld [vmem:[#allocation3 + $0x90] sm:$0xff]  ;;  %v8965_v44 = vrot.slane %v8963_v0, 2  ;;  %v8795_v6 = vrot.slane %v8759_v14, 2  ;;  %v25764_v14 = vld [vmem:[%s31262_s1 + $0x468] sm:$0xff]  }
 0x72c   : > { %7609 = vst [vmem:[#allocation3 + $0x98] sm:$0xff] %v7588_v40  ;;  %22869 = vmatprep.mubr.bf16.mxu0 %v8794_v25  ;;  %22878 = vmatpush3.bf16.msra.mxu0 %v25758_v51  ;;  %v31317_v13 = vshrl.u32 %v28962_v20, 16  ;;  %v31315_v8 = vshll.u32 %v28962_v20, 16  ;;  %v12760_v52 = vrot.slane %v28962_v20, 3  ;;  %v28970_v38 = vor.u32 %v8976_v50, %v8973_v28  ;;  %v25763_v51 = vld [vmem:[%s31262_s1 + $0x358] sm:$0xff]  }
 0x72d   : > { %22879 = vmatprep.subr.bf16.mxu0 %v25760_v18  ;;  %v8969_v25 = vor.u32 %v8968_v54, %v8965_v44  ;;  %v25765_v44 = vld [vmem:[%s31262_s1 + $0x360] sm:$0xff]  }
 0x72e   : > { %23016 = vmatpush3.bf16.msra.mxu1 %v25759_v11  ;;  %v12563_v40 = vrot.slane %v31317_v13, 2  ;;  %v12566_v10 = vrot.slane %v31315_v8, 3  ;;  %v28980_v36 = vsel %vm2915_vm4, %v12758_v5, %v12760_v52  ;;  %v26179_v13 = vld [vmem:[#allocation3 + $0x38] sm:$0xff] }
 0x72f   : > { %v7562_v12 = vpop.f32.mrb[176].mxu1  ;;  %23017 = vmatprep.subr.bf16.mxu1 %v25761_v59  ;;  %v8978_v8 = vsel %vm2685_vm5, %v8969_v25, %v28970_v38 }
 0x730   : > { %22880 = vmatpush3.bf16.msra.mxu0 %v25760_v18  ;;  %v22675_v0 = vpop.f32.mrb[177].mxu1  ;;  %v8796_v18 = vsel %vm2315_vm2, %v8793_v33, %v8795_v6  ;;  %v28990_v5 = vor.u32 %v12566_v10, %v12563_v40  ;;  %v9977_v6 = vrot.slane %v28622_v27, 1  ;;  %v26176_v40 = vld [vmem:[#allocation3 + $0x20] sm:$0xff] }
 0x731   : > { %23006 = vmatmul.mubr.bf16.gmra.mrb[184].mxu1 %v28665_v55  ;;  %v7565_v11 = vpop.f32.mrb[178].mxu1  ;;  %22881 = vmatprep.subr.bf16.mxu0 %v25762_v23  ;;  %v28988_v0 = vld [vmem:[#allocation3 + $0x38] sm:$0xfe]  ;;  %v8980_v10 = vshrl.u32 %v26176_v40, 16 }
 0x732   : > { %v7589_v28 = vpack.c.bf16 %v7565_v11, %v7562_v12  ;;  %23009 = vmatprep.mubr.bf16.mxu1 %v28696_v37  ;;  %23018 = vmatpush3.bf16.msra.mxu1 %v25761_v59  ;;  %v22676_v50 = vpop.f32.mrb[179].mxu1  ;;  %v9797_v59 = vrot.slane %v28759_v45, 1  ;;  %v9976_v54 = vrot.slane %v28988_v0, 1  ;;  %v25766_v12 = vld [vmem:[%s31262_s1 + $0x470] sm:$0xff]   ;;  %v8983_v11 = vshll.u32 %v26176_v40, 16  ;;  %v25767_v45 = vld [vmem:[%s31262_s1 + $0x368] sm:$0xff]  }
 0x733   : > { %22870 = vmatmul.mubr.bf16.gmra.mrb[100].mxu0 %v8796_v18  ;;  %23019 = vmatprep.subr.bf16.mxu1 %v25763_v51  ;;  %v28998_v33 = vld [vmem:[#allocation3 + $0x98] sm:$0xff]  ;;  %v25768_v50 = vld [vmem:[%s31262_s1 + $0x478] sm:$0xff]  }
 0x734   : > { %7610 = vst [vmem:[#allocation3 + $0xa0] sm:$0xff] %v7589_v28  ;;  %22882 = vmatpush3.bf16.msra.mxu0 %v25762_v23  ;;  %22889 = vmatprep.mubr.bf16.mxu0 %v8978_v8  ;;  %v26177_v23 = vld [vmem:[#allocation3 + $0x28] sm:$0xff]  ;;  %v31316_v28 = vrot.slane %v28998_v33, 3  ;;  %v9798_v18 = vsel %vm1715_vm1, %v28686_v62, %v9797_v59 }
 0x735   : > { %22883 = vmatprep.subr.bf16.mxu0 %v25764_v14  ;;  %v8989_v8 = vshrl.u32 %v26177_v23, 16  ;;  %v8992_v25 = vshll.u32 %v26177_v23, 16  ;;  %v8985_v23 = vrot.slane %v8983_v11, 3  ;;  %v25769_v62 = vld [vmem:[%s31262_s1 + $0x370] sm:$0xff]   ;;  %v25771_v11 = vld [vmem:[%s31262_s1 + $0x378] sm:$0xff]  }
 0x736   : > { %23020 = vmatpush3.bf16.msra.mxu1 %v25763_v51  ;;  %v9978_v51 = vsel %vm1715_vm1, %v9976_v54, %v9977_v6  ;;  %v29020_v40 = vsel %vm2915_vm4, %v12760_v52, %v31316_v28  ;;  %v26178_v28 = vld [vmem:[#allocation3 + $0x30] sm:$0xff] }
 0x737   : > { %23021 = vmatprep.subr.bf16.mxu1 %v25765_v44  ;;  %v8991_v59 = vrot.slane %v8989_v8, 2  ;;  %v8994_v54 = vrot.slane %v8992_v25, 3  ;;  %v9007_v8 = vshrl.u32 %v26179_v13, 16  ;;  %v9010_v25 = vshll.u32 %v26179_v13, 16  ;;  %v25773_v13 = vld [vmem:[%s31262_s1 + $0x380] sm:$0xff]  }
 0x738   : > { %22884 = vmatpush3.bf16.msra.mxu0 %v25764_v14  ;;  %v8982_v14 = vrot.slane %v8980_v10, 2 }
 0x739   : > { %23010 = vmatmul.mubr.bf16.gmra.mrb[188].mxu1 %v9798_v18  ;;  %22885 = vmatprep.subr.bf16.mxu0 %v25766_v12  ;;  %v25770_v18 = vld [vmem:[%s31262_s1 + $0x480] sm:$0xff]   ;;  %v8995_v10 = vor.u32 %v8994_v54, %v8991_v59  ;;  %v9012_v59 = vrot.slane %v9010_v25, 3  ;;  %v29040_v54 = vld [vmem:[#allocation3 + $0x40] sm:$0x7] }
 0x73a   : > { %23022 = vmatpush3.bf16.msra.mxu1 %v25765_v44  ;;  %23029 = vmatprep.mubr.bf16.mxu1 %v9978_v51  ;;  %v8986_v52 = vor.u32 %v8985_v23, %v8982_v14  ;;  %v8998_v44 = vshrl.u32 %v26178_v28, 16  ;;  %v9001_v51 = vshll.u32 %v26178_v28, 16 }
 0x73b   : > { %23023 = vmatprep.subr.bf16.mxu1 %v25767_v45 }
 0x73c   : > { %22886 = vmatpush3.bf16.msra.mxu0 %v25766_v12  ;;  %v25772_v12 = vld [vmem:[%s31262_s1 + $0x488] sm:$0xff]   ;;  %v9000_v28 = vrot.slane %v8998_v44, 2  ;;  %v9003_v14 = vrot.slane %v9001_v51, 3  ;;  %v8996_v23 = vsel %vm2685_vm5, %v8986_v52, %v8995_v10  ;;  %v9019_v44 = vshll.u32 %v29040_v54, 16 }
 0x73d   : > { %22887 = vmatprep.subr.bf16.mxu0 %v25768_v50 }
 0x73e   : > { %23024 = vmatpush3.bf16.msra.mxu1 %v25767_v45  ;;  %v8987_v45 = vsel %vm2685_vm5, %v28970_v38, %v8986_v52  ;;  %v25774_v38 = vld [vmem:[%s31262_s1 + $0x490] sm:$0xff]   ;;  %v9016_v52 = vshrl.u32 %v29040_v54, 16 }
 0x73f   : > { %23025 = vmatprep.subr.bf16.mxu1 %v25769_v62 }
 0x740   : > { %22888 = vmatpush3.bf16.msra.mxu0 %v25768_v50  ;;  %v9009_v50 = vrot.slane %v9007_v8, 2  ;;  %v25775_v8 = vld [vmem:[%s31262_s1 + $0x388] sm:$0xff]  }
 0x741   : > { %22901 = vmatprep.subr.bf16.mxu0 %v25770_v18 }
 0x742   : > { %23026 = vmatpush3.bf16.msra.mxu1 %v25769_v62  ;;  %v9004_v62 = vor.u32 %v9003_v14, %v9000_v28  ;;  %v9013_v51 = vor.u32 %v9012_v59, %v9009_v50  ;;  %v9021_v28 = vrot.slane %v9019_v44, 3  ;;  %v10157_v14 = vshll.u32 %v28988_v0, 16  ;;  %v25779_v59 = vld [vmem:[%s31262_s1 + $0x398] sm:$0xff]  }
 0x743   : > { %22890 = vmatmul.mubr.bf16.vlgmr.msra.gmra.mrb[92].mxu0 %v8987_v45  ;;  %23027 = vmatprep.subr.bf16.mxu1 %v25771_v11  ;;  %v9018_v45 = vrot.slane %v9016_v52, 2  ;;  %v9952_v52 = vld [vmem:[#allocation3 + $0x68] sm:$0x1] }
 0x744   : > { %22893 = vmatprep.mubr.bf16.mxu0 %v8996_v23  ;;  %22902 = vmatpush3.bf16.msra.mxu0 %v25770_v18  ;;  %v9980_v18 = vsel %vm1715_vm1, %v9977_v6, %v28648_v48  ;;  %v9005_v25 = vsel %vm2685_vm5, %v8995_v10, %v9004_v62  ;;  %v25777_v48 = vld [vmem:[%s31262_s1 + $0x390] sm:$0xff]   ;;  %v10154_v6 = vshrl.u32 %v28988_v0, 16  ;;  %v9171_v10 = vld [vmem:[#allocation3 + $0x10] sm:$0xf8]  ;;  %v10162_v23 = vshrl.u32 %v28622_v27, 16  ;;  %v25780_v0 = vld [vmem:[%s31262_s1 + $0x4a8] sm:$0xff]  }
 0x745   : > { %22903 = vmatprep.subr.bf16.mxu0 %v25772_v12  ;;  %v9022_v50 = vor.u32 %v9021_v28, %v9018_v45  ;;  %v10159_v44 = vrot.slane %v10157_v14, 2  ;;  %v9987_v28 = vrot.slane %v9952_v52, 1  ;;  %v25785_v14 = vld [vmem:[%s31262_s1 + $0x3b0] sm:$0xff]  }
 0x746   : > { %23028 = vmatpush3.bf16.msra.mxu1 %v25771_v11  ;;  %v25776_v11 = vld [vmem:[%s31262_s1 + $0x498] sm:$0xff]   ;;  %v25793_v52 = vld [vmem:[%s31262_s1 + $0x3d0] sm:$0xff]  }
 0x747   : > { %23041 = vmatprep.subr.bf16.mxu1 %v25773_v13 }
 0x748   : > { %22904 = vmatpush3.bf16.msra.mxu0 %v25772_v12  ;;  %v9014_v12 = vsel %vm2685_vm5, %v9004_v62, %v9013_v51  ;;  %v10156_v62 = vrot.slane %v10154_v6, 1 }
 0x749   : > { %23030 = vmatmul.mubr.bf16.vlgmr.msra.gmra.mrb[180].mxu1 %v9980_v18  ;;  %22905 = vmatprep.subr.bf16.mxu0 %v25774_v38  ;;  %v10164_v18 = vrot.slane %v10162_v23, 1  ;;  %v25786_v23 = vld [vmem:[%s31262_s1 + $0x2c0] sm:$0xff]  }
 0x74a   : > { %23033 = vmatprep.mubr.bf16.mxu1 %v28665_v55  ;;  %23042 = vmatpush3.bf16.msra.mxu1 %v25773_v13  ;;  %v25778_v55 = vld [vmem:[%s31262_s1 + $0x4a0] sm:$0xff]   ;;  %v10165_v13 = vshll.u32 %v28622_v27, 16 }
 0x74b   : > { %22894 = vmatmul.mubr.bf16.gmra.mrb[96].mxu0 %v9005_v25  ;;  %23043 = vmatprep.subr.bf16.mxu1 %v25775_v8  ;;  %v9023_v25 = vsel %vm2685_vm5, %v9013_v51, %v9022_v50  ;;  %v31339_v51 = vrot.slane %v28708_v16, 1  ;;  %v25788_v50 = vld [vmem:[%s31262_s1 + $0x2c8] sm:$0xff]  }
 0x74c   : > { %22897 = vmatprep.mubr.bf16.mxu0 %v9014_v12  ;;  %22906 = vmatpush3.bf16.msra.mxu0 %v25774_v38  ;;  %v9191_v38 = vrot.slane %v9171_v10, 3  ;;  %v10160_v12 = vor.u32 %v10159_v44, %v10156_v62  ;;  %v25784_v10 = vld [vmem:[%s31262_s1 + $0x4b8] sm:$0xff]   ;;  %v25791_v62 = vld [vmem:[%s31262_s1 + $0x3c8] sm:$0xff]  }
 0x74d   : > { %22907 = vmatprep.subr.bf16.mxu0 %v25776_v11 }
 0x74e   : > { %23044 = vmatpush3.bf16.msra.mxu1 %v25775_v8  ;;  %v10167_v8 = vrot.slane %v10165_v13, 2  ;;  %v25787_v13 = vld [vmem:[%s31262_s1 + $0x3b8] sm:$0xff]  }
 0x74f   : > { %23045 = vmatprep.subr.bf16.mxu1 %v25777_v48 }
 0x750   : > { %22908 = vmatpush3.bf16.msra.mxu0 %v25776_v11  ;;  %v31338_v11 = vrot.slane %v28406_v9, 3  ;;  %v10168_v6 = vor.u32 %v10167_v8, %v10164_v18  ;;  %v25783_v9 = vld [vmem:[%s31262_s1 + $0x3a8] sm:$0xff]  }
 0x751   : > { %23034 = vmatmul.mubr.bf16.gmra.mrb[184].mxu1 %v28696_v37  ;;  %22909 = vmatprep.subr.bf16.mxu0 %v25778_v55  ;;  %v25781_v37 = vld [vmem:[%s31262_s1 + $0x3a0] sm:$0xff]  }
 0x752   : > { %23037 = vmatprep.mubr.bf16.mxu1 %v28738_v42  ;;  %23046 = vmatpush3.bf16.msra.mxu1 %v25777_v48  ;;  %v9193_v45 = vsel %vm2915_vm4, %v9191_v38, %v31338_v11  ;;  %v25782_v42 = vld [vmem:[%s31262_s1 + $0x4b0] sm:$0xff]   ;;  %v9988_v48 = vsel %vm1715_vm1, %v31339_v51, %v9987_v28 }
 0x753   : > { %22898 = vmatmul.mubr.bf16.gmra.mrb[100].mxu0 %v9023_v25  ;;  %23047 = vmatprep.subr.bf16.mxu1 %v25779_v59  ;;  %v25790_v38 = vld [vmem:[%s31262_s1 + $0x2d0] sm:$0xff]   ;;  %v31341_v25 = vshrl.u32 %v28761_v31, 16 }
 0x754   : > { %22910 = vmatpush3.bf16.msra.mxu0 %v25778_v55  ;;  %22917 = vmatprep.mubr.bf16.mxu0 %v9193_v45  ;;  %v10169_v55 = vsel %vm2085_vm3, %v10160_v12, %v10168_v6  ;;  %v31342_v45 = vshll.u32 %v28783_v29, 16 }
 0x755   : > { %22911 = vmatprep.subr.bf16.mxu0 %v25780_v0 }
 0x756   : > { %23048 = vmatpush3.bf16.msra.mxu1 %v25779_v59  ;;  %v25789_v59 = vld [vmem:[%s31262_s1 + $0x3c0] sm:$0xff]  }
 0x757   : > { %23049 = vmatprep.subr.bf16.mxu1 %v25781_v37 }
 0x758   : > { %22912 = vmatpush3.bf16.msra.mxu0 %v25780_v0  ;;  %v29126_v0 = vld [vmem:[#allocation3 + $0x68] sm:$0x3] }
 0x759   : > { %23038 = vmatmul.mubr.bf16.gmra.mrb[188].mxu1 %v9988_v48  ;;  %22913 = vmatprep.subr.bf16.mxu0 %v25782_v42  ;;  %v10207_v18 = vshrl.u32 %v29126_v0, 16  ;;  %v10210_v8 = vshll.u32 %v29126_v0, 16 }
 0x75a   : > { %23050 = vmatpush3.bf16.msra.mxu1 %v25781_v37  ;;  %23057 = vmatprep.mubr.bf16.mxu1 %v10169_v55  ;;  %v25795_v37 = vld [vmem:[%s31262_s1 + $0x3d8] sm:$0xff]  }
 0x75b   : > { %23051 = vmatprep.subr.bf16.mxu1 %v25783_v9  ;;  %v10209_v28 = vrot.slane %v10207_v18, 1  ;;  %v10212_v12 = vrot.slane %v10210_v8, 2  ;;  %v25805_v8 = vld [vmem:[%s31262_s1 + $0x400] sm:$0xff]  }
 0x75c   : > { %22914 = vmatpush3.bf16.msra.mxu0 %v25782_v42  ;;  %v10362_v42 = vld [vmem:[#allocation3 + $0x38] sm:$0xfc] }
 0x75d   : > { %22915 = vmatprep.subr.bf16.mxu0 %v25784_v10  ;;  %v10213_v51 = vor.u32 %v10212_v12, %v10209_v28  ;;  %v10381_v48 = vrot.slane %v10362_v42, 2  ;;  %v31352_v28 = vshll.u32 %v28916_v63, 16 }
 0x75e   : > { %23052 = vmatpush3.bf16.msra.mxu1 %v25783_v9 }
 0x75f   : > { %23053 = vmatprep.subr.bf16.mxu1 %v25785_v14  ;;  %v10214_v55 = vsel %vm2085_vm3, %v28750_v21, %v10213_v51  ;;  %v31345_v21 = vshll.u32 %v28814_v17, 16  ;;  %v11265_v12 = vrot.slane %v31352_v28, 1  ;;  %v31353_v51 = vshrl.u32 %v28916_v63, 16 }
 0x760   : > { %22916 = vmatpush3.bf16.msra.mxu0 %v25784_v10  ;;  %v31344_v10 = vrot.slane %v28622_v27, 2  ;;  %v25802_v27 = vld [vmem:[%s31262_s1 + $0x280] sm:$0xff]  }
 0x761   : > { %23181 = vmatprep.subr.bf16.mxu0 %v25786_v23 }
 0x762   : > { %23054 = vmatpush3.bf16.msra.mxu1 %v25785_v14  ;;  %v10383_v14 = vsel %vm2315_vm2, %v10381_v48, %v31344_v10  ;;  %v11269_v48 = vor.u32 %v31353_v51, %v11265_v12 }
 0x763   : > { %22918 = vmatmul.mubr.bf16.vlgmr.msra.gmra.mrb[92].mxu0 %v28444_v34  ;;  %23055 = vmatprep.subr.bf16.mxu1 %v25787_v13  ;;  %v10178_v34 = vsel %vm2085_vm3, %v10168_v6, %v28660_v39  ;;  %v31340_v39 = vshll.u32 %v28761_v31, 16  ;;  %v31343_v31 = vrot.slane %v28495_v46, 3  ;;  %v25798_v46 = vld [vmem:[%s31262_s1 + $0x2f0] sm:$0xff]  }
 0x764   : > { %22921 = vmatprep.mubr.bf16.mxu0 %v28457_v53  ;;  %23182 = vmatpush3.bf16.msra.mxu0 %v25786_v23  ;;  %v25792_v53 = vld [vmem:[%s31262_s1 + $0x2d8] sm:$0xff]  }
 0x765   : > { %23183 = vmatprep.subr.bf16.mxu0 %v25788_v50  ;;  %v11228_v44 = vrot.slane %v31340_v39, 1  ;;  %v25800_v23 = vld [vmem:[%s31262_s1 + $0x2f8] sm:$0xff]  }
 0x766   : > { %23056 = vmatpush3.bf16.msra.mxu1 %v25787_v13  ;;  %v25801_v13 = vld [vmem:[%s31262_s1 + $0x3f0] sm:$0xff]   ;;  %v25803_v39 = vld [vmem:[%s31262_s1 + $0x3f8] sm:$0xff]  }
 0x767   : > { %23069 = vmatprep.subr.bf16.mxu1 %v25789_v59  ;;  %v11229_v11 = vor.u32 %v11228_v44, %v31341_v25  ;;  %v25804_v44 = vld [vmem:[%s31262_s1 + $0x288] sm:$0xff]   ;;  %v25806_v25 = vld [vmem:[%s31262_s1 + $0x290] sm:$0xff]  }
 0x768   : > { %23184 = vmatpush3.bf16.msra.mxu0 %v25788_v50  ;;  %v11241_v50 = vrot.slane %v31345_v21, 1  ;;  %v29251_v21 = vld [vmem:[#allocation3 + $0x48] sm:$0xff] }
 0x769   : > { %23058 = vmatmul.mubr.bf16.vlgmr.msra.gmra.mrb[180].mxu1 %v10178_v34  ;;  %23185 = vmatprep.subr.bf16.mxu0 %v25790_v38 }
 0x76a   : > { %23061 = vmatprep.mubr.bf16.mxu1 %v28678_v1  ;;  %23070 = vmatpush3.bf16.msra.mxu1 %v25789_v59  ;;  %v9202_v1 = vrot.slane %v29040_v54, 3  ;;  %v25796_v54 = vld [vmem:[%s31262_s1 + $0x2e8] sm:$0xff]   ;;  %v31346_v59 = vshrl.u32 %v28783_v29, 16 }
 0x76b   : > { %22922 = vmatmul.mubr.bf16.gmra.mrb[96].mxu0 %v28480_v3  ;;  %23071 = vmatprep.subr.bf16.mxu1 %v25791_v62  ;;  %v25794_v3 = vld [vmem:[%s31262_s1 + $0x2e0] sm:$0xff]  }
 0x76c   : > { %22925 = vmatprep.mubr.bf16.mxu0 %v28515_v4  ;;  %23186 = vmatpush3.bf16.msra.mxu0 %v25790_v38  ;;  %v11233_v4 = vrot.slane %v31342_v45, 1  ;;  %v9203_v6 = vsel %vm2915_vm4, %v31343_v31, %v9202_v1  ;;  %v29214_v31 = vld [vmem:[#allocation3 + $0x90] sm:$0x1] }
 0x76d   : > { %23187 = vmatprep.subr.bf16.mxu0 %v25792_v53 }
 0x76e   : > { %23072 = vmatpush3.bf16.msra.mxu1 %v25791_v62  ;;  %v11234_v9 = vsel %vm1373_vm0, %v11229_v11, %v11233_v4  ;;  %v11237_v38 = vor.u32 %v31346_v59, %v11233_v4  ;;  %v31347_v62 = vshrl.u32 %v28814_v17, 16  ;;  %v31350_v11 = vshrl.u32 %v28852_v41, 16  ;;  %v25815_v59 = vld [vmem:[%s31262_s1 + $0x428] sm:$0xff]  }
 0x76f   : > { %23073 = vmatprep.subr.bf16.mxu1 %v25793_v52  ;;  %v31351_v4 = vshrl.u32 %v28881_v24, 16 }
 0x770   : > { %23188 = vmatpush3.bf16.msra.mxu0 %v25792_v53  ;;  %v11245_v34 = vor.u32 %v31347_v62, %v11241_v50  ;;  %v31348_v53 = vshll.u32 %v28852_v41, 16  ;;  %v11242_v29 = vsel %vm1373_vm0, %v11237_v38, %v11241_v50  ;;  %v10572_v50 = vrot.slane %v29251_v21, 2 }
 0x771   : > { %23062 = vmatmul.mubr.bf16.gmra.mrb[184].mxu1 %v28713_v15  ;;  %23189 = vmatprep.subr.bf16.mxu0 %v25794_v3  ;;  %v25797_v15 = vld [vmem:[%s31262_s1 + $0x3e0] sm:$0xff]  }
 0x772   : > { %23065 = vmatprep.mubr.bf16.mxu1 %v28757_v57  ;;  %23074 = vmatpush3.bf16.msra.mxu1 %v25793_v52  ;;  %v25799_v57 = vld [vmem:[%s31262_s1 + $0x3e8] sm:$0xff]   ;;  %v11249_v52 = vrot.slane %v31348_v53, 1  ;;  %v25817_v53 = vld [vmem:[%s31262_s1 + $0x430] sm:$0xff]  }
 0x773   : > { %22926 = vmatmul.mubr.bf16.gmra.mrb[100].mxu0 %v9203_v6  ;;  %23075 = vmatprep.subr.bf16.mxu1 %v25795_v37  ;;  %v25808_v6 = vld [vmem:[%s31262_s1 + $0x298] sm:$0xff]  }
 0x774   : > { %23190 = vmatpush3.bf16.msra.mxu0 %v25794_v3  ;;  %23197 = vmatprep.mubr.bf16.mxu0 %v11234_v9  ;;  %v11250_v18 = vsel %vm1373_vm0, %v11245_v34, %v11249_v52  ;;  %v31349_v3 = vshll.u32 %v28881_v24, 16  ;;  %v11253_v45 = vor.u32 %v31350_v11, %v11249_v52  ;;  %v11271_v9 = vshll.u32 %v29214_v31, 16  ;;  %v25816_v34 = vld [vmem:[%s31262_s1 + $0x2b8] sm:$0xff]  }
 0x775   : > { %23191 = vmatprep.subr.bf16.mxu0 %v25796_v54  ;;  %v25819_v52 = vld [vmem:[%s31262_s1 + $0x438] sm:$0xff]  }
 0x776   : > { %23076 = vmatpush3.bf16.msra.mxu1 %v25795_v37  ;;  %v11257_v1 = vrot.slane %v31349_v3, 1  ;;  %v29289_v3 = vld [vmem:[#allocation3 + $0x58] sm:$0xff] }
 0x777   : > { %23077 = vmatprep.subr.bf16.mxu1 %v25797_v15 }
 0x778   : > { %23192 = vmatpush3.bf16.msra.mxu0 %v25796_v54  ;;  %v11261_v37 = vor.u32 %v31351_v4, %v11257_v1  ;;  %v25807_v54 = vld [vmem:[%s31262_s1 + $0x408] sm:$0xff]   ;;  %v11258_v42 = vsel %vm1373_vm0, %v11253_v45, %v11257_v1  ;;  %v10576_v1 = vrot.slane %v29289_v3, 2  ;;  %v25824_v4 = vld [vmem:[%s31262_s1 + $0x318] sm:$0xff]  }
 0x779   : > { %23066 = vmatmul.mubr.bf16.gmra.mrb[188].mxu1 %v10214_v55  ;;  %23193 = vmatprep.subr.bf16.mxu0 %v25798_v46  ;;  %v25812_v55 = vld [vmem:[%s31262_s1 + $0x2a8] sm:$0xff]  }
 0x77a   : > { %23078 = vmatpush3.bf16.msra.mxu1 %v25797_v15  ;;  %23085 = vmatprep.mubr.bf16.mxu1 %v10383_v14  ;;  %v11266_v15 = vsel %vm1373_vm0, %v11261_v37, %v11265_v12  ;;  %v29241_v14 = vld [vmem:[#allocation3 + $0x40] sm:$0xfc]  ;;  %v25825_v37 = vld [vmem:[%s31262_s1 + $0x450] sm:$0xff]  }
 0x77b   : > { %23079 = vmatprep.subr.bf16.mxu1 %v25799_v57  ;;  %v11539_v12 = vld [vmem:[#allocation3 + $0x60] sm:$0xfe] }
 0x77c   : > { %23194 = vmatpush3.bf16.msra.mxu0 %v25798_v46  ;;  %v11273_v46 = vrot.slane %v11271_v9, 1  ;;  %v10757_v9 = vshrl.u32 %v29251_v21, 16 }
 0x77d   : > { %23195 = vmatprep.subr.bf16.mxu0 %v25800_v23 }
 0x77e   : > { %23080 = vmatpush3.bf16.msra.mxu1 %v25799_v57  ;;  %v25811_v57 = vld [vmem:[%s31262_s1 + $0x418] sm:$0xff]   ;;  %v11274_v10 = vsel %vm1373_vm0, %v11269_v48, %v11273_v46 }
 0x77f   : > { %23081 = vmatprep.subr.bf16.mxu1 %v25801_v13 }
 0x780   : > { %23196 = vmatpush3.bf16.msra.mxu0 %v25800_v23  ;;  %v25813_v23 = vld [vmem:[%s31262_s1 + $0x420] sm:$0xff]  }
 0x781   : > { %23209 = vmatprep.subr.bf16.mxu0 %v25802_v27 }
 0x782   : > { %23082 = vmatpush3.bf16.msra.mxu1 %v25801_v13  ;;  %v10392_v13 = vrot.slane %v29126_v0, 2  ;;  %v31354_v0 = vrot.slane %v28708_v16, 2  ;;  %v25818_v16 = vld [vmem:[%s31262_s1 + $0x300] sm:$0xff]  }
 0x783   : > { %23198 = vmatmul.mubr.bf16.vlgmr.msra.gmra.mrb[104].mxu0 %v11242_v29  ;;  %23083 = vmatprep.subr.bf16.mxu1 %v25803_v39  ;;  %v25821_v29 = vld [vmem:[%s31262_s1 + $0x440] sm:$0xff]  }
 0x784   : > { %23201 = vmatprep.mubr.bf16.mxu0 %v11250_v18  ;;  %23210 = vmatpush3.bf16.msra.mxu0 %v25802_v27  ;;  %v25814_v27 = vld [vmem:[%s31262_s1 + $0x2b0] sm:$0xff]   ;;  %v10393_v38 = vsel %vm2315_vm2, %v31354_v0, %v10392_v13  ;;  %v29286_v18 = vld [vmem:[#allocation3 + $0x50] sm:$0xff]  ;;  %v25831_v0 = vld [vmem:[%s31262_s1 + $0x468] sm:$0xff]  }
 0x785   : > { %23211 = vmatprep.subr.bf16.mxu0 %v25804_v44 }
 0x786   : > { %23084 = vmatpush3.bf16.msra.mxu1 %v25803_v39  ;;  %v25820_v39 = vld [vmem:[%s31262_s1 + $0x308] sm:$0xff]  }
 0x787   : > { %23097 = vmatprep.subr.bf16.mxu1 %v25805_v8 }
 0x788   : > { %23212 = vmatpush3.bf16.msra.mxu0 %v25804_v44  ;;  %v29279_v44 = vld [vmem:[#allocation3 + $0x68] sm:$0xff] }
 0x789   : > { %23086 = vmatmul.mubr.bf16.vlgmr.msra.gmra.mrb[180].mxu1 %v28636_v26  ;;  %23213 = vmatprep.subr.bf16.mxu0 %v25806_v25  ;;  %v25809_v26 = vld [vmem:[%s31262_s1 + $0x410] sm:$0xff]  }
 0x78a   : > { %23089 = vmatprep.mubr.bf16.mxu1 %v28668_v35  ;;  %23098 = vmatpush3.bf16.msra.mxu1 %v25805_v8  ;;  %v25810_v35 = vld [vmem:[%s31262_s1 + $0x2a0] sm:$0xff]   ;;  %v10574_v8 = vrot.slane %v29286_v18, 2 }
 0x78b   : > { %23202 = vmatmul.mubr.bf16.gmra.mrb[108].mxu0 %v11258_v42  ;;  %23099 = vmatprep.subr.bf16.mxu1 %v25807_v54  ;;  %v10752_v42 = vshll.u32 %v29241_v14, 16 }
 0x78c   : > { %23205 = vmatprep.mubr.bf16.mxu0 %v11266_v15  ;;  %23214 = vmatpush3.bf16.msra.mxu0 %v25806_v25  ;;  %v25822_v25 = vld [vmem:[%s31262_s1 + $0x310] sm:$0xff]   ;;  %v10575_v11 = vsel %vm2315_vm2, %v10572_v50, %v10574_v8  ;;  %v10577_v45 = vsel %vm2315_vm2, %v10574_v8, %v10576_v1  ;;  %v10760_v15 = vshll.u32 %v29251_v21, 16  ;;  %v10778_v8 = vshll.u32 %v29289_v3, 16 }
 0x78d   : > { %23215 = vmatprep.subr.bf16.mxu0 %v25808_v6 }
 0x78e   : > { %23100 = vmatpush3.bf16.msra.mxu1 %v25807_v54  ;;  %v10749_v54 = vshrl.u32 %v29241_v14, 16 }
 0x78f   : > { %23101 = vmatprep.subr.bf16.mxu1 %v25809_v26 }
 0x790   : > { %23216 = vmatpush3.bf16.msra.mxu0 %v25808_v6  ;;  %v10580_v6 = vrot.slane %v29279_v44, 2  ;;  %v10751_v48 = vrot.slane %v10749_v54, 2 }
 0x791   : > { %23090 = vmatmul.mubr.bf16.gmra.mrb[184].mxu1 %v28701_v32  ;;  %23217 = vmatprep.subr.bf16.mxu0 %v25810_v35  ;;  %v29246_v32 = vld [vmem:[#allocation3 + $0x60] sm:$0xff] }
 0x792   : > { %23093 = vmatprep.mubr.bf16.mxu1 %v28743_v56  ;;  %23102 = vmatpush3.bf16.msra.mxu1 %v25809_v26  ;;  %v10571_v56 = vrot.slane %v29241_v14, 2  ;;  %v10578_v28 = vrot.slane %v29246_v32, 2  ;;  %v11564_v26 = vrot.slane %v29279_v44, 1  ;;  %v10759_v14 = vrot.slane %v10757_v9, 2  ;;  %v25838_v9 = vld [vmem:[%s31262_s1 + $0x350] sm:$0xff]  }
 0x793   : > { %23206 = vmatmul.mubr.bf16.gmra.mrb[112].mxu0 %v11274_v10  ;;  %23103 = vmatprep.subr.bf16.mxu1 %v25811_v57  ;;  %v10754_v10 = vrot.slane %v10752_v42, 3 }
 0x794   : > { %23218 = vmatpush3.bf16.msra.mxu0 %v25810_v35  ;;  %23225 = vmatprep.mubr.bf16.mxu0 %v29246_v32  ;;  %v10573_v62 = vsel %vm2315_vm2, %v10571_v56, %v10572_v50  ;;  %v25827_v35 = vld [vmem:[%s31262_s1 + $0x458] sm:$0xff]   ;;  %v10579_v51 = vsel %vm2315_vm2, %v10576_v1, %v10578_v28  ;;  %v10581_v46 = vsel %vm2315_vm2, %v10578_v28, %v10580_v6  ;;  %v25829_v56 = vld [vmem:[%s31262_s1 + $0x460] sm:$0xff]   ;;  %v10780_v28 = vrot.slane %v10778_v8, 3 }
 0x795   : > { %23219 = vmatprep.subr.bf16.mxu0 %v25812_v55  ;;  %v10755_v50 = vor.u32 %v10754_v10, %v10751_v48  ;;  %v29352_v1 = vld [vmem:[#allocation3 + $0x70] sm:$0xff]  ;;  %v25841_v10 = vld [vmem:[%s31262_s1 + $0x490] sm:$0xff]   ;;  %v31355_v8 = vrot.slane %v28692_v7, 3  ;;  %v25850_v7 = vld [vmem:[%s31262_s1 + $0x380] sm:$0xff]  }
 0x796   : > { %23104 = vmatpush3.bf16.msra.mxu1 %v25811_v57  ;;  %v25828_v57 = vld [vmem:[%s31262_s1 + $0x328] sm:$0xff]  }
 0x797   : > { %23105 = vmatprep.subr.bf16.mxu1 %v25813_v23 }
 0x798   : > { %23220 = vmatpush3.bf16.msra.mxu0 %v25812_v55  ;;  %v10547_v55 = vld [vmem:[#allocation3 + $0x70] sm:$0x3] }
 0x799   : > { %23094 = vmatmul.mubr.bf16.gmra.mrb[188].mxu1 %v10393_v38  ;;  %23221 = vmatprep.subr.bf16.mxu0 %v25814_v27  ;;  %v10582_v21 = vrot.slane %v10547_v55, 2 }
 0x79a   : > { %23106 = vmatpush3.bf16.msra.mxu1 %v25813_v23  ;;  %23113 = vmatprep.mubr.bf16.mxu1 %v10573_v62  ;;  %v10762_v23 = vrot.slane %v10760_v15, 3  ;;  %v29379_v15 = vld [vmem:[#allocation3 + $0x80] sm:$0xff] }
 0x79b   : > { %23107 = vmatprep.subr.bf16.mxu1 %v25815_v59  ;;  %v10583_v38 = vsel %vm2315_vm2, %v10580_v6, %v10582_v21  ;;  %v25837_v6 = vld [vmem:[%s31262_s1 + $0x480] sm:$0xff]   ;;  %v11574_v21 = vrot.slane %v29214_v31, 1 }
 0x79c   : > { %23222 = vmatpush3.bf16.msra.mxu0 %v25814_v27  ;;  %v10763_v27 = vor.u32 %v10762_v23, %v10759_v14  ;;  %v29404_v14 = vld [vmem:[#allocation3 + $0x68] sm:$0xfe] }
 0x79d   : > { %23223 = vmatprep.subr.bf16.mxu0 %v25816_v34 }
 0x79e   : > { %23108 = vmatpush3.bf16.msra.mxu1 %v25815_v59  ;;  %v25830_v59 = vld [vmem:[%s31262_s1 + $0x330] sm:$0xff]   ;;  %v10764_v62 = vsel %vm2685_vm5, %v10755_v50, %v10763_v27  ;;  %v11753_v50 = vrot.slane %v29404_v14, 1 }
 0x79f   : > { %23109 = vmatprep.subr.bf16.mxu1 %v25817_v53 }
 0x7a0   : > { %23224 = vmatpush3.bf16.msra.mxu0 %v25816_v34  ;;  %v25832_v34 = vld [vmem:[%s31262_s1 + $0x338] sm:$0xff]  }
 0x7a1   : > { %23237 = vmatprep.subr.bf16.mxu0 %v25818_v16 }
 0x7a2   : > { %23110 = vmatpush3.bf16.msra.mxu1 %v25817_v53  ;;  %v25833_v53 = vld [vmem:[%s31262_s1 + $0x470] sm:$0xff]  }
 0x7a3   : > { %23226 = vmatmul.mubr.bf16.vlgmr.msra.gmra.mrb[104].mxu0 %v29279_v44  ;;  %23111 = vmatprep.subr.bf16.mxu1 %v25819_v52 }
 0x7a4   : > { %23229 = vmatprep.mubr.bf16.mxu0 %v28814_v17  ;;  %23238 = vmatpush3.bf16.msra.mxu0 %v25818_v16  ;;  %v25823_v17 = vld [vmem:[%s31262_s1 + $0x448] sm:$0xff]   ;;  %v10766_v16 = vshrl.u32 %v29286_v18, 16 }
 0x7a5   : > { %23239 = vmatprep.subr.bf16.mxu0 %v25820_v39 }
 0x7a6   : > { %23112 = vmatpush3.bf16.msra.mxu1 %v25819_v52  ;;  %v10769_v52 = vshll.u32 %v29286_v18, 16 }
 0x7a7   : > { %23125 = vmatprep.subr.bf16.mxu1 %v25821_v29 }
 0x7a8   : > { %23240 = vmatpush3.bf16.msra.mxu0 %v25820_v39  ;;  %v25834_v39 = vld [vmem:[%s31262_s1 + $0x340] sm:$0xff]  }
 0x7a9   : > { %23114 = vmatmul.mubr.bf16.vlgmr.msra.gmra.mrb[180].mxu1 %v10575_v11  ;;  %23241 = vmatprep.subr.bf16.mxu0 %v25822_v25  ;;  %v25835_v11 = vld [vmem:[%s31262_s1 + $0x478] sm:$0xff]  }
 0x7aa   : > { %23117 = vmatprep.mubr.bf16.mxu1 %v10577_v45  ;;  %23126 = vmatpush3.bf16.msra.mxu1 %v25821_v29  ;;  %v10775_v29 = vshrl.u32 %v29289_v3, 16  ;;  %v10768_v45 = vrot.slane %v10766_v16, 2  ;;  %v25836_v3 = vld [vmem:[%s31262_s1 + $0x348] sm:$0xff]  }
 0x7ab   : > { %23230 = vmatmul.mubr.bf16.gmra.mrb[108].mxu0 %v28852_v41  ;;  %23127 = vmatprep.subr.bf16.mxu1 %v25823_v17  ;;  %v25826_v41 = vld [vmem:[%s31262_s1 + $0x320] sm:$0xff]  }
 0x7ac   : > { %23233 = vmatprep.mubr.bf16.mxu0 %v28881_v24  ;;  %23242 = vmatpush3.bf16.msra.mxu0 %v25822_v25  ;;  %v11563_v24 = vrot.slane %v11539_v12, 1  ;;  %v29355_v25 = vrot.slane %v29352_v1, 1 }
 0x7ad   : > { %23243 = vmatprep.subr.bf16.mxu0 %v25824_v4 }
 0x7ae   : > { %23128 = vmatpush3.bf16.msra.mxu1 %v25823_v17  ;;  %v11565_v13 = vsel %vm1715_vm1, %v11563_v24, %v11564_v26  ;;  %v29357_v17 = vld [vmem:[#allocation3 + $0x78] sm:$0xff]  ;;  %v11567_v12 = vsel %vm1715_vm1, %v11564_v26, %v29355_v25  ;;  %v11570_v24 = vrot.slane %v29379_v15, 1  ;;  %v29383_v26 = vrot.slane %v28916_v63, 1 }
 0x7af   : > { %23129 = vmatprep.subr.bf16.mxu1 %v25825_v37  ;;  %v11568_v18 = vrot.slane %v29357_v17, 1 }
 0x7b0   : > { %23244 = vmatpush3.bf16.msra.mxu0 %v25824_v4  ;;  %v10771_v4 = vrot.slane %v10769_v52, 3  ;;  %v29398_v55 = vsel %vm1715_vm1, %v11570_v24, %v29383_v26  ;;  %v11575_v31 = vsel %vm1715_vm1, %v29383_v26, %v11574_v21  ;;  %v31359_v21 = vshll.u32 %v28962_v20, 16 }
 0x7b1   : > { %23118 = vmatmul.mubr.bf16.gmra.mrb[184].mxu1 %v10579_v51  ;;  %23245 = vmatprep.subr.bf16.mxu0 %v25826_v41  ;;  %v29370_v54 = vsel %vm1715_vm1, %v29355_v25, %v11568_v18 }
 0x7b2   : > { %23121 = vmatprep.mubr.bf16.mxu1 %v10581_v46  ;;  %23130 = vmatpush3.bf16.msra.mxu1 %v25825_v37  ;;  %v10777_v37 = vrot.slane %v10775_v29, 2  ;;  %v25840_v46 = vld [vmem:[%s31262_s1 + $0x358] sm:$0xff]  }
 0x7b3   : > { %23234 = vmatmul.mubr.bf16.gmra.mrb[112].mxu0 %v28916_v63  ;;  %23131 = vmatprep.subr.bf16.mxu1 %v25827_v35  ;;  %v11571_v63 = vsel %vm1715_vm1, %v11568_v18, %v11570_v24  ;;  %v25848_v18 = vld [vmem:[%s31262_s1 + $0x378] sm:$0xff]   ;;  %v10983_v24 = vrot.slane %v29246_v32, 3  ;;  %v25856_v32 = vld [vmem:[%s31262_s1 + $0x3a8] sm:$0xff]  }
 0x7b4   : > { %23246 = vmatpush3.bf16.msra.mxu0 %v25826_v41  ;;  %23253 = vmatprep.mubr.bf16.mxu0 %v11565_v13  ;;  %v10772_v41 = vor.u32 %v10771_v4, %v10768_v45  ;;  %v10781_v42 = vor.u32 %v10780_v28, %v10777_v37  ;;  %v25852_v45 = vld [vmem:[%s31262_s1 + $0x388] sm:$0xff]   ;;  %v25853_v4 = vld [vmem:[%s31262_s1 + $0x390] sm:$0xff]   ;;  %v11931_v28 = vshrl.u32 %v29404_v14, 16 }
 0x7b5   : > { %23247 = vmatprep.subr.bf16.mxu0 %v25828_v57 }
 0x7b6   : > { %23132 = vmatpush3.bf16.msra.mxu1 %v25827_v35  ;;  %v25839_v35 = vld [vmem:[%s31262_s1 + $0x488] sm:$0xff]   ;;  %v10773_v51 = vsel %vm2685_vm5, %v10763_v27, %v10772_v41  ;;  %v10782_v48 = vsel %vm2685_vm5, %v10772_v41, %v10781_v42  ;;  %v25843_v27 = vld [vmem:[%s31262_s1 + $0x498] sm:$0xff]   ;;  %v11729_v41 = vld [vmem:[#allocation3 + $0x98] sm:$0x1] }
 0x7b7   : > { %23133 = vmatprep.subr.bf16.mxu1 %v25829_v56 }
 0x7b8   : > { %23248 = vmatpush3.bf16.msra.mxu0 %v25828_v57  ;;  %v29393_v57 = vld [vmem:[#allocation3 + $0x70] sm:$0x7] }
 0x7b9   : > { %23122 = vmatmul.mubr.bf16.gmra.mrb[188].mxu1 %v10583_v38  ;;  %23249 = vmatprep.subr.bf16.mxu0 %v25830_v59  ;;  %v10802_v23 = vshrl.u32 %v29393_v57, 16  ;;  %v10805_v13 = vshll.u32 %v29393_v57, 16 }
 0x7ba   : > { %23134 = vmatpush3.bf16.msra.mxu1 %v25829_v56  ;;  %23141 = vmatprep.mubr.bf16.mxu1 %v10764_v62  ;;  %v25842_v56 = vld [vmem:[%s31262_s1 + $0x360] sm:$0xff]   ;;  %v25844_v62 = vld [vmem:[%s31262_s1 + $0x368] sm:$0xff]  }
 0x7bb   : > { %23135 = vmatprep.subr.bf16.mxu1 %v25831_v0  ;;  %v10807_v38 = vrot.slane %v10805_v13, 3  ;;  %v31358_v13 = vshrl.u32 %v28962_v20, 16  ;;  %v25862_v20 = vld [vmem:[%s31262_s1 + $0x3d8] sm:$0xff]  }
 0x7bc   : > { %23250 = vmatpush3.bf16.msra.mxu0 %v25830_v59  ;;  %v10791_v59 = vsel %vm2685_vm5, %v10781_v42, %v28779_v19  ;;  %v25845_v19 = vld [vmem:[%s31262_s1 + $0x4a0] sm:$0xff]   ;;  %v11933_v42 = vrot.slane %v11931_v28, 1 }
 0x7bd   : > { %23251 = vmatprep.subr.bf16.mxu0 %v25832_v34 }
 0x7be   : > { %23136 = vmatpush3.bf16.msra.mxu1 %v25831_v0  ;;  %v10804_v0 = vrot.slane %v10802_v23, 2  ;;  %v31357_v23 = vld [vmem:[#allocation11_spill] sm:$0xff] }
 0x7bf   : > { %23137 = vmatprep.subr.bf16.mxu1 %v25833_v53 }
 0x7c0   : > { %23252 = vmatpush3.bf16.msra.mxu0 %v25832_v34  ;;  %v10957_v34 = vld [vmem:[#allocation3 + $0x40] sm:$0xf8]  ;;  %v10808_v16 = vor.u32 %v10807_v38, %v10804_v0  ;;  %v25861_v0 = vld [vmem:[%s31262_s1 + $0x3d0] sm:$0xff]  }
 0x7c1   : > { %23265 = vmatprep.subr.bf16.mxu0 %v25834_v39  ;;  %v10976_v52 = vrot.slane %v10957_v34, 3 }
 0x7c2   : > { %23138 = vmatpush3.bf16.msra.mxu1 %v25833_v53  ;;  %v11755_v53 = vsel %vm1715_vm1, %v11753_v50, %v29355_v25  ;;  %v10809_v29 = vsel %vm2685_vm5, %v28805_v58, %v10808_v16  ;;  %v25851_v58 = vld [vmem:[%s31262_s1 + $0x4b8] sm:$0xff]   ;;  %v11980_v50 = vrot.slane %v31359_v21, 2  ;;  %v12139_v16 = vld [vmem:[#allocation3 + $0x68] sm:$0xfc] }
 0x7c3   : > { %23254 = vmatmul.mubr.bf16.vlgmr.msra.gmra.mrb[104].mxu0 %v11567_v12  ;;  %23139 = vmatprep.subr.bf16.mxu1 %v25835_v11  ;;  %v10978_v25 = vsel %vm2915_vm4, %v10976_v52, %v31355_v8  ;;  %v11934_v12 = vshll.u32 %v29404_v14, 16  ;;  %v25858_v14 = vld [vmem:[%s31262_s1 + $0x3b8] sm:$0xff]   ;;  %v25863_v52 = vld [vmem:[%s31262_s1 + $0x3e0] sm:$0xff]  }
 0x7c4   : > { %23257 = vmatprep.mubr.bf16.mxu0 %v29370_v54  ;;  %23266 = vmatpush3.bf16.msra.mxu0 %v25834_v39  ;;  %v25847_v39 = vld [vmem:[%s31262_s1 + $0x4a8] sm:$0xff]  }
 0x7c5   : > { %23267 = vmatprep.subr.bf16.mxu0 %v25836_v3 }
 0x7c6   : > { %23140 = vmatpush3.bf16.msra.mxu1 %v25835_v11  ;;  %v25849_v11 = vld [vmem:[%s31262_s1 + $0x4b0] sm:$0xff]  }
 0x7c7   : > { %23153 = vmatprep.subr.bf16.mxu1 %v25837_v6 }
 0x7c8   : > { %23268 = vmatpush3.bf16.msra.mxu0 %v25836_v3  ;;  %v29459_v3 = vld [vmem:[#allocation3 + $0x90] sm:$0xff] }
 0x7c9   : > { %23142 = vmatmul.mubr.bf16.vlgmr.msra.gmra.mrb[180].mxu1 %v10773_v51  ;;  %23269 = vmatprep.subr.bf16.mxu0 %v25838_v9  ;;  %v11762_v37 = vrot.slane %v29459_v3, 1  ;;  %v29549_v28 = vrot.slane %v29459_v3, 2  ;;  %v25871_v3 = vld [vmem:[%s31262_s1 + $0x420] sm:$0xff]  }
 0x7ca   : > { %23145 = vmatprep.mubr.bf16.mxu1 %v10782_v48  ;;  %23154 = vmatpush3.bf16.msra.mxu1 %v25837_v6  ;;  %v31356_v48 = vrot.slane %v28723_v47, 3  ;;  %v10987_v47 = vrot.slane %v29393_v57, 3  ;;  %v25860_v57 = vld [vmem:[%s31262_s1 + $0x3c8] sm:$0xff]  }
 0x7cb   : > { %23258 = vmatmul.mubr.bf16.gmra.mrb[108].mxu0 %v11571_v63  ;;  %23155 = vmatprep.subr.bf16.mxu1 %v25839_v35  ;;  %v11763_v6 = vsel %vm1715_vm1, %v29383_v26, %v11762_v37 }
 0x7cc   : > { %23261 = vmatprep.mubr.bf16.mxu0 %v29398_v55  ;;  %23270 = vmatpush3.bf16.msra.mxu0 %v25838_v9  ;;  %v11936_v9 = vrot.slane %v11934_v12, 2  ;;  %v10984_v26 = vsel %vm2915_vm4, %v31356_v48, %v10983_v24  ;;  %v25870_v12 = vld [vmem:[%s31262_s1 + $0x418] sm:$0xff]   ;;  %v31361_v48 = vld [vmem:[#allocation9_spill] sm:$0xff] }
 0x7cd   : > { %23271 = vmatprep.subr.bf16.mxu0 %v25840_v46 }
 0x7ce   : > { %23156 = vmatpush3.bf16.msra.mxu1 %v25839_v35  ;;  %v25855_v35 = vld [vmem:[%s31262_s1 + $0x3a0] sm:$0xff]   ;;  %v11937_v51 = vor.u32 %v11936_v9, %v11933_v42 }
 0x7cf   : > { %23157 = vmatprep.subr.bf16.mxu1 %v25841_v10 }
 0x7d0   : > { %23272 = vmatpush3.bf16.msra.mxu0 %v25840_v46 }
 0x7d1   : > { %23146 = vmatmul.mubr.bf16.gmra.mrb[184].mxu1 %v10791_v59  ;;  %23273 = vmatprep.subr.bf16.mxu0 %v25842_v56  ;;  %v31360_v59 = vld [vmem:[#allocation13_spill] sm:$0xff] }
 0x7d2   : > { %23149 = vmatprep.mubr.bf16.mxu1 %v28824_v61  ;;  %23158 = vmatpush3.bf16.msra.mxu1 %v25841_v10  ;;  %v25846_v61 = vld [vmem:[%s31262_s1 + $0x370] sm:$0xff]  }
 0x7d3   : > { %23262 = vmatmul.mubr.bf16.gmra.mrb[112].mxu0 %v11575_v31  ;;  %23159 = vmatprep.subr.bf16.mxu1 %v25843_v27 }
 0x7d4   : > { %23274 = vmatpush3.bf16.msra.mxu0 %v25842_v56  ;;  %23281 = vmatprep.mubr.bf16.mxu0 %v11755_v53  ;;  %v11977_v56 = vrot.slane %v31358_v13, 1 }
 0x7d5   : > { %23275 = vmatprep.subr.bf16.mxu0 %v25844_v62 }
 0x7d6   : > { %23160 = vmatpush3.bf16.msra.mxu1 %v25843_v27  ;;  %v29506_v27 = vld [vmem:[#allocation3 + $0x98] sm:$0x3]  ;;  %v11981_v31 = vor.u32 %v11980_v50, %v11977_v56  ;;  %v25874_v56 = vld [vmem:[%s31262_s1 + $0x438] sm:$0xff]  }
 0x7d7   : > { %23161 = vmatprep.subr.bf16.mxu1 %v25845_v19  ;;  %v11984_v38 = vshrl.u32 %v29506_v27, 16  ;;  %v12169_v42 = vrot.slane %v29506_v27, 2 }
 0x7d8   : > { %23276 = vmatpush3.bf16.msra.mxu0 %v25844_v62  ;;  %v11987_v62 = vshll.u32 %v29506_v27, 16 }
 0x7d9   : > { %23150 = vmatmul.mubr.bf16.gmra.mrb[188].mxu1 %v10809_v29  ;;  %23277 = vmatprep.subr.bf16.mxu0 %v25846_v61  ;;  %v11986_v34 = vrot.slane %v11984_v38, 1  ;;  %v12159_v29 = vrot.slane %v29352_v1, 2  ;;  %v25866_v1 = vld [vmem:[%s31262_s1 + $0x3f8] sm:$0xff]  }
 0x7da   : > { %23162 = vmatpush3.bf16.msra.mxu1 %v25845_v19  ;;  %23169 = vmatprep.mubr.bf16.mxu1 %v10978_v25  ;;  %v11989_v53 = vrot.slane %v11987_v62, 2  ;;  %v11982_v19 = vsel %vm2085_vm3, %v28941_v43, %v11981_v31  ;;  %v25865_v25 = vld [vmem:[%s31262_s1 + $0x3f0] sm:$0xff]   ;;  %v25875_v62 = vld [vmem:[%s31262_s1 + $0x440] sm:$0xff]  }
 0x7db   : > { %23163 = vmatprep.subr.bf16.mxu1 %v25847_v39 }
 0x7dc   : > { %23278 = vmatpush3.bf16.msra.mxu0 %v25846_v61  ;;  %v11990_v61 = vor.u32 %v11989_v53, %v11986_v34  ;;  %v29599_v53 = vld [vmem:[#allocation3 + $0x80] sm:$0xff] }
 0x7dd   : > { %23279 = vmatprep.subr.bf16.mxu0 %v25848_v18 }
 0x7de   : > { %23164 = vmatpush3.bf16.msra.mxu1 %v25847_v39  ;;  %v12158_v39 = vrot.slane %v12139_v16, 2  ;;  %v11991_v43 = vsel %vm2085_vm3, %v11981_v31, %v11990_v61 }
 0x7df   : > { %23165 = vmatprep.subr.bf16.mxu1 %v25849_v11 }
 0x7e0   : > { %23280 = vmatpush3.bf16.msra.mxu0 %v25848_v18  ;;  %v12160_v8 = vsel %vm2315_vm2, %v12158_v39, %v12159_v29  ;;  %v25867_v18 = vld [vmem:[%s31262_s1 + $0x400] sm:$0xff]   ;;  %v29605_v39 = vld [vmem:[#allocation3 + $0x88] sm:$0xff] }
 0x7e1   : > { %23293 = vmatprep.subr.bf16.mxu0 %v25850_v7 }
 0x7e2   : > { %23166 = vmatpush3.bf16.msra.mxu1 %v25849_v11  ;;  %v12161_v11 = vrot.slane %v29357_v17, 2  ;;  %v25869_v17 = vld [vmem:[%s31262_s1 + $0x410] sm:$0xff]  }
 0x7e3   : > { %23282 = vmatmul.mubr.bf16.vlgmr.msra.gmra.mrb[104].mxu0 %v29370_v54  ;;  %23167 = vmatprep.subr.bf16.mxu1 %v25851_v58  ;;  %v25854_v54 = vld [vmem:[%s31262_s1 + $0x398] sm:$0xff]  }
 0x7e4   : > { %23285 = vmatprep.mubr.bf16.mxu0 %v11571_v63  ;;  %23294 = vmatpush3.bf16.msra.mxu0 %v25850_v7  ;;  %v11946_v63 = vsel %vm2085_vm3, %v11937_v51, %v28842_v60  ;;  %v25859_v60 = vld [vmem:[%s31262_s1 + $0x3c0] sm:$0xff]   ;;  %v12163_v7 = vrot.slane %v29379_v15, 2  ;;  %v12170_v51 = vsel %vm2315_vm2, %v29549_v28, %v12169_v42 }
 0x7e5   : > { %23295 = vmatprep.subr.bf16.mxu0 %v25852_v45 }
 0x7e6   : > { %23168 = vmatpush3.bf16.msra.mxu1 %v25851_v58  ;;  %v25868_v58 = vld [vmem:[%s31262_s1 + $0x408] sm:$0xff]  }
 0x7e8   : > { %23296 = vmatpush3.bf16.msra.mxu0 %v25852_v45  ;;  %v12162_v45 = vsel %vm2315_vm2, %v12159_v29, %v12161_v11  ;;  %v12353_v29 = vrot.slane %v29605_v39, 2 }
 0x7e9   : > { %23170 = vmatmul.mubr.bf16.vlgmr.msra.gmra.mrb[180].mxu1 %v28718_v2  ;;  %23297 = vmatprep.subr.bf16.mxu0 %v25853_v4  ;;  %v10985_v2 = vrot.slane %v29279_v44, 3 }
 0x7ea   : > { %23173 = vmatprep.mubr.bf16.mxu1 %v28748_v22  ;;  %v11764_v22 = vrot.slane %v11729_v41, 1  ;;  %v29557_v41 = vld [vmem:[#allocation3 + $0x70] sm:$0xfc] }
 0x7eb   : > { %23286 = vmatmul.mubr.bf16.gmra.mrb[108].mxu0 %v29398_v55  ;;  %v10986_v46 = vsel %vm2915_vm4, %v10983_v24, %v10985_v2  ;;  %v25857_v55 = vld [vmem:[%s31262_s1 + $0x3b0] sm:$0xff]   ;;  %v10988_v10 = vsel %vm2915_vm4, %v10985_v2, %v10987_v47  ;;  %v12348_v9 = vrot.slane %v29557_v41, 2  ;;  %v29564_v24 = vld [vmem:[#allocation3 + $0x78] sm:$0xff] }
 0x7ec   : > { %23289 = vmatprep.mubr.bf16.mxu0 %v11763_v6  ;;  %23298 = vmatpush3.bf16.msra.mxu0 %v25853_v4  ;;  %v11765_v44 = vsel %vm1715_vm1, %v11762_v37, %v11764_v22  ;;  %v12164_v4 = vsel %vm2315_vm2, %v12161_v11, %v12163_v7  ;;  %v26189_v37 = vld [vmem:[#allocation3 + $0x88] sm:$0xff]  ;;  %v12349_v2 = vrot.slane %v29564_v24, 2  ;;  %v25872_v22 = vld [vmem:[%s31262_s1 + $0x428] sm:$0xff]  }
 0x7ed   : > { %23299 = vmatprep.subr.bf16.mxu0 %v25854_v54  ;;  %v12165_v15 = vrot.slane %v26189_v37, 2  ;;  %v25876_v11 = vld [vmem:[%s31262_s1 + $0x448] sm:$0xff]  }
 0x7ef   : > { %v12168_v6 = vsel %vm2315_vm2, %v12165_v15, %v29549_v28 }
 0x7f0   : > { %23300 = vmatpush3.bf16.msra.mxu0 %v25854_v54  ;;  %v12166_v54 = vsel %vm2315_vm2, %v12163_v7, %v12165_v15 }
 0x7f1   : > { %23174 = vmatmul.mubr.bf16.gmra.mrb[184].mxu1 %v10984_v26  ;;  %23301 = vmatprep.subr.bf16.mxu0 %v25855_v35 }
 0x7f2   : > { %23177 = vmatprep.mubr.bf16.mxu1 %v10986_v46  ;;  %v12350_v46 = vsel %vm2315_vm2, %v12348_v9, %v12349_v2 }
 0x7f3   : > { %23290 = vmatmul.mubr.bf16.gmra.mrb[112].mxu0 %v11765_v44 }
 0x7f4   : > { %23302 = vmatpush3.bf16.msra.mxu0 %v25855_v35  ;;  %23309 = vmatprep.mubr.bf16.mxu0 %v11946_v63  ;;  %v19155_v35 = vld [vmem:[%s31263_s2 + $0x4] sm:$0x3]  ;;  %v25873_v63 = vld [vmem:[%s31262_s1 + $0x430] sm:$0xff]  }
 0x7f5   : > { %23303 = vmatprep.subr.bf16.mxu0 %v25856_v32  ;;  %v29576_v26 = vrot.slane %v19155_v35, %v31361_v48 }
 0x7f8   : > { %23304 = vmatpush3.bf16.msra.mxu0 %v25856_v32  ;;  %v31362_v32 = vld [vmem:[#allocation10_spill] sm:$0xff] }
 0x7f9   : > { %23178 = vmatmul.mubr.bf16.gmra.mrb[188].mxu1 %v10988_v10  ;;  %23305 = vmatprep.subr.bf16.mxu0 %v25857_v55  ;;  %v29580_v44 = vrot.slane %v19155_v35, %v31362_v32  ;;  %v12534_v35 = vshrl.u32 %v29564_v24, 16 }
 0x7fc   : > { %23306 = vmatpush3.bf16.msra.mxu0 %v25857_v55 }
 0x7fd   : > { %23307 = vmatprep.subr.bf16.mxu0 %v25858_v14 }
 0x800   : > { %23308 = vmatpush3.bf16.msra.mxu0 %v25858_v14 }
 0x801   : > { %23321 = vmatprep.subr.bf16.mxu0 %v25859_v60 }
 0x803   : > { %23310 = vmatmul.mubr.bf16.vlgmr.msra.gmra.mrb[104].mxu0 %v31357_v23 }
 0x804   : > { %23313 = vmatprep.mubr.bf16.mxu0 %v31360_v59  ;;  %23322 = vmatpush3.bf16.msra.mxu0 %v25859_v60 }
 0x805   : > { %23323 = vmatprep.subr.bf16.mxu0 %v25860_v57 }
 0x808   : > { %23324 = vmatpush3.bf16.msra.mxu0 %v25860_v57 }
 0x809   : > { %23325 = vmatprep.subr.bf16.mxu0 %v25861_v0 }
 0x80b   : > { %23314 = vmatmul.mubr.bf16.gmra.mrb[108].mxu0 %v28953_v49  ;;  %v25864_v49 = vld [vmem:[%s31262_s1 + $0x3e8] sm:$0xff]  }
 0x80c   : > { %23317 = vmatprep.mubr.bf16.mxu0 %v11982_v19  ;;  %23326 = vmatpush3.bf16.msra.mxu0 %v25861_v0  ;;  %v12351_v19 = vrot.slane %v29599_v53, 2 }
 0x80d   : > { %23327 = vmatprep.subr.bf16.mxu0 %v25862_v20 }
 0x810   : > { %23328 = vmatpush3.bf16.msra.mxu0 %v25862_v20 }
 0x811   : > { %23329 = vmatprep.subr.bf16.mxu0 %v25863_v52 }
 0x813   : > { %23318 = vmatmul.mubr.bf16.gmra.mrb[112].mxu0 %v11991_v43 }
 0x814   : > { %23330 = vmatpush3.bf16.msra.mxu0 %v25863_v52  ;;  %23337 = vmatprep.mubr.bf16.mxu0 %v12160_v8 }
 0x815   : > { %23331 = vmatprep.subr.bf16.mxu0 %v25864_v49 }
 0x818   : > { %23332 = vmatpush3.bf16.msra.mxu0 %v25864_v49 }
 0x819   : > { %23333 = vmatprep.subr.bf16.mxu0 %v25865_v25 }
 0x81c   : > { %23334 = vmatpush3.bf16.msra.mxu0 %v25865_v25 }
 0x81d   : > { %23335 = vmatprep.subr.bf16.mxu0 %v25866_v1 }
 0x820   : > { %23336 = vmatpush3.bf16.msra.mxu0 %v25866_v1 }
 0x821   : > { %23349 = vmatprep.subr.bf16.mxu0 %v25867_v18 }
 0x823   : > { %23338 = vmatmul.mubr.bf16.vlgmr.msra.gmra.mrb[104].mxu0 %v12162_v45  ;;  %v12352_v45 = vsel %vm2315_vm2, %v12349_v2, %v12351_v19  ;;  %v12529_v2 = vshll.u32 %v29557_v41, 16 }
 0x824   : > { %23341 = vmatprep.mubr.bf16.mxu0 %v12164_v4  ;;  %23350 = vmatpush3.bf16.msra.mxu0 %v25867_v18 }
 0x825   : > { %23351 = vmatprep.subr.bf16.mxu0 %v25868_v58 }
 0x828   : > { %23352 = vmatpush3.bf16.msra.mxu0 %v25868_v58 }
 0x829   : > { %23353 = vmatprep.subr.bf16.mxu0 %v25869_v17 }
 0x82b   : > { %23342 = vmatmul.mubr.bf16.gmra.mrb[108].mxu0 %v12166_v54  ;;  %v25877_v54 = vld [vmem:[%s31262_s1 + $0x450] sm:$0xff]  }
 0x82c   : > { %23345 = vmatprep.mubr.bf16.mxu0 %v12168_v6  ;;  %23354 = vmatpush3.bf16.msra.mxu0 %v25869_v17  ;;  %v12354_v17 = vsel %vm2315_vm2, %v12351_v19, %v12353_v29  ;;  %v12526_v6 = vshrl.u32 %v29557_v41, 16 }
 0x82d   : > { %23355 = vmatprep.subr.bf16.mxu0 %v25870_v12 }
 0x830   : > { %23356 = vmatpush3.bf16.msra.mxu0 %v25870_v12 }
 0x831   : > { %23357 = vmatprep.subr.bf16.mxu0 %v25871_v3 }
 0x833   : > { %23346 = vmatmul.mubr.bf16.gmra.mrb[112].mxu0 %v12170_v51 }
 0x834   : > { %23358 = vmatpush3.bf16.msra.mxu0 %v25871_v3  ;;  %23365 = vmatprep.mubr.bf16.mxu0 %v12350_v46 }
 0x835   : > { %23359 = vmatprep.subr.bf16.mxu0 %v25872_v22 }
 0x836   : > { %v22919_v47 = vpop.f32.mrb[92].mxu0 }
 0x837   : > { %v9357_v55 = vmul.f32 %v22919_v47, %v29576_v26  ;;  %v9292_v10 = vpop.f32.mrb[93].mxu0 }
 0x838   : > { %v9355_v14 = vmul.f32 %v29576_v26, %v9292_v10  ;;  %v22920_v60 = vpop.f32.mrb[94].mxu0  ;;  %23360 = vmatpush3.bf16.msra.mxu0 %v25872_v22 }
 0x839   : > { %v9373_v57 = vadd.f32 %v29580_v44, %v9357_v55  ;;  %v9358_v23 = vmul.f32 %v22920_v60, %v29576_v26  ;;  %v9295_v13 = vpop.f32.mrb[95].mxu0  ;;  %23361 = vmatprep.subr.bf16.mxu0 %v25873_v63  ;;  %v12537_v55 = vshll.u32 %v29564_v24, 16 }
 0x83a   : > { %v9371_v21 = vadd.f32 %v29580_v44, %v9355_v14  ;;  %v9356_v50 = vmul.f32 %v29576_v26, %v9295_v13  ;;  %v25878_v13 = vld [vmem:[%s31262_s1 + $0x458] sm:$0xff]  }
 0x83b   : > { %v9374_v27 = vadd.f32 %v29580_v44, %v9358_v23  ;;  %v9385_v0 = vmax.f32 %v9373_v57, 0.0 }
 0x83c   : > { %v9372_v59 = vadd.f32 %v29580_v44, %v9356_v50  ;;  %23362 = vmatpush3.bf16.msra.mxu0 %v25873_v63  ;;  %v9383_v31 = vmax.f32 %v9371_v21, 0.0  ;;  %v29631_v63 = vld [vmem:[#allocation3 + $0x98] sm:$0xff]  ;;  %v12356_v50 = vsel %vm2315_vm2, %v12353_v29, %v29549_v28 }
 0x83d   : > { %v9386_v38 = vmax.f32 %v9374_v27, 0.0  ;;  %23363 = vmatprep.subr.bf16.mxu0 %v25874_v56  ;;  %v12357_v47 = vrot.slane %v29631_v63, 2  ;;  %v12531_v27 = vrot.slane %v12529_v2, 3  ;;  %v12573_v2 = vshll.u32 %v29631_v63, 16 }
 0x83e   : > { %v9384_v20 = vmax.f32 %v9372_v59, 0.0  ;;  %v22923_v34 = vpop.f32.mrb[96].mxu0 }
 0x83f   : > { %v29602_v16 = vpack.c.bf16 %v9386_v38, %v9385_v0  ;;  %v9361_v52 = vmul.f32 %v22923_v34, %v29576_v26  ;;  %v9308_v61 = vpop.f32.mrb[97].mxu0  ;;  %v12358_v0 = vsel %vm2315_vm2, %v29549_v28, %v12357_v47  ;;  %v12324_v38 = vld [vmem:[#allocation3 + $0xa0] sm:$0x3] }
 0x840   : > { %v29608_v49 = vpack.c.bf16 %v9384_v20, %v9383_v31  ;;  %v9359_v43 = vmul.f32 %v29576_v26, %v9308_v61  ;;  %v22924_v8 = vpop.f32.mrb[98].mxu0  ;;  %23364 = vmatpush3.bf16.msra.mxu0 %v25874_v56  ;;  %v12528_v56 = vrot.slane %v12526_v6, 2  ;;  %v12539_v31 = vrot.slane %v12537_v55, 3 }
 0x841   : > { %v9377_v25 = vadd.f32 %v29580_v44, %v9361_v52  ;;  %v9362_v1 = vmul.f32 %v22924_v8, %v29576_v26  ;;  %v9311_v18 = vpop.f32.mrb[99].mxu0  ;;  %23377 = vmatprep.subr.bf16.mxu0 %v25875_v62  ;;  %v25879_v52 = vld [vmem:[%s31262_s1 + $0x460] sm:$0xff]   ;;  %v12575_v55 = vrot.slane %v12573_v2, 3 }
 0x842   : > { %v9375_v7 = vadd.f32 %v29580_v44, %v9359_v43  ;;  %v9360_v58 = vmul.f32 %v29576_v26, %v9311_v18  ;;  %v12359_v43 = vrot.slane %v12324_v38, 2  ;;  %v12532_v28 = vor.u32 %v12531_v27, %v12528_v56  ;;  %v25880_v18 = vld [vmem:[%s31262_s1 + $0x468] sm:$0xff]   ;;  %v25887_v27 = vld [vmem:[%s31262_s1 + $0x4a0] sm:$0xff]  }
 0x843   : > { %v9378_v4 = vadd.f32 %v29580_v44, %v9362_v1  ;;  %23366 = vmatmul.mubr.bf16.vlgmr.msra.gmra.mrb[104].mxu0 %v12352_v45  ;;  %v9389_v15 = vmax.f32 %v9377_v25, 0.0  ;;  %v12543_v45 = vshrl.u32 %v29599_v53, 16  ;;  %v25888_v38 = vld [vmem:[%s31262_s1 + $0x4a8] sm:$0xff]  }
 0x844   : > { %v9376_v37 = vadd.f32 %v29580_v44, %v9360_v58  ;;  %23369 = vmatprep.mubr.bf16.mxu0 %v12354_v17  ;;  %23378 = vmatpush3.bf16.msra.mxu0 %v25875_v62  ;;  %v9387_v3 = vmax.f32 %v9375_v7, 0.0  ;;  %v12536_v62 = vrot.slane %v12534_v35, 2  ;;  %v25881_v58 = vld [vmem:[%s31262_s1 + $0x470] sm:$0xff]   ;;  %v12552_v17 = vshrl.u32 %v29605_v39, 16  ;;  %v25884_v35 = vld [vmem:[%s31262_s1 + $0x488] sm:$0xff]  }
 0x845   : > { %v9390_v12 = vmax.f32 %v9378_v4, 0.0  ;;  %23379 = vmatprep.subr.bf16.mxu0 %v25876_v11  ;;  %v12546_v4 = vshll.u32 %v29599_v53, 16  ;;  %v25883_v53 = vld [vmem:[%s31262_s1 + $0x480] sm:$0xff]  }
 0x846   : > { %v9388_v42 = vmax.f32 %v9376_v37, 0.0  ;;  %v22927_v9 = vpop.f32.mrb[100].mxu0  ;;  %v12540_v25 = vor.u32 %v12539_v31, %v12536_v62  ;;  %v12555_v37 = vshll.u32 %v29605_v39, 16  ;;  %v12554_v6 = vrot.slane %v12552_v17, 2 }
 0x847   : > { %v29628_v22 = vpack.c.bf16 %v9390_v12, %v9389_v15  ;;  %v9365_v51 = vmul.f32 %v22927_v9, %v29576_v26  ;;  %v9324_v46 = vpop.f32.mrb[101].mxu0  ;;  %v25882_v15 = vld [vmem:[%s31262_s1 + $0x478] sm:$0xff]   ;;  %v12545_v12 = vrot.slane %v12543_v45, 2  ;;  %v12570_v39 = vshrl.u32 %v29631_v63, 16  ;;  %v25885_v63 = vld [vmem:[%s31262_s1 + $0x490] sm:$0xff]  }
 0x848   : > { %v29635_v10 = vpack.c.bf16 %v9388_v42, %v9387_v3  ;;  %v9363_v14 = vmul.f32 %v29576_v26, %v9324_v46  ;;  %v22928_v60 = vpop.f32.mrb[102].mxu0  ;;  %23380 = vmatpush3.bf16.msra.mxu0 %v25876_v11  ;;  %v12360_v11 = vsel %vm2315_vm2, %v12357_v47, %v12359_v43  ;;  %v12541_v7 = vsel %vm2685_vm5, %v12532_v28, %v12540_v25 }
 0x849   : > { %v9381_v41 = vadd.f32 %v29580_v44, %v9365_v51  ;;  %v9366_v57 = vmul.f32 %v22928_v60, %v29576_v26  ;;  %v9327_v23 = vpop.f32.mrb[103].mxu0  ;;  %23381 = vmatprep.subr.bf16.mxu0 %v25877_v54  ;;  %v12557_v3 = vrot.slane %v12555_v37, 3  ;;  %v12572_v47 = vrot.slane %v12570_v39, 2 }
 0x84a   : > { %v9379_v21 = vadd.f32 %v29580_v44, %v9363_v14  ;;  %v9364_v24 = vmul.f32 %v29576_v26, %v9327_v23  ;;  %v12508_v14 = vld [vmem:[#allocation3 + $0xa0] sm:$0x7]  ;;  %v25886_v23 = vld [vmem:[%s31262_s1 + $0x498] sm:$0xff]  }
 0x84b   : > { %v9382_v59 = vadd.f32 %v29580_v44, %v9366_v57  ;;  %23370 = vmatmul.mubr.bf16.gmra.mrb[108].mxu0 %v12356_v50  ;;  %v9393_v34 = vmax.f32 %v9381_v41, 0.0  ;;  %v12558_v9 = vor.u32 %v12557_v3, %v12554_v6  ;;  %v12579_v60 = vshrl.u32 %v12508_v14, 16  ;;  %v12734_v50 = vld [vmem:[#allocation3 + $0x70] sm:$0xf8] }
 0x84c   : > { %v9380_v20 = vadd.f32 %v29580_v44, %v9364_v24  ;;  %23373 = vmatprep.mubr.bf16.mxu0 %v12358_v0  ;;  %23382 = vmatpush3.bf16.msra.mxu0 %v25877_v54  ;;  %v9391_v61 = vmax.f32 %v9379_v21, 0.0  ;;  %v12548_v54 = vrot.slane %v12546_v4, 3  ;;  %v12582_v41 = vshll.u32 %v12508_v14, 16 }
 0x84d   : > { %v9394_v19 = vmax.f32 %v9382_v59, 0.0  ;;  %23383 = vmatprep.subr.bf16.mxu0 %v25878_v13  ;;  %v12576_v57 = vor.u32 %v12575_v55, %v12572_v47  ;;  %v12581_v56 = vrot.slane %v12579_v60, 2  ;;  %v12753_v0 = vrot.slane %v12734_v50, 3 }
 0x84e   : > { %v9392_v29 = vmax.f32 %v9380_v20, 0.0  ;;  %v12549_v42 = vor.u32 %v12548_v54, %v12545_v12  ;;  %v12584_v21 = vrot.slane %v12582_v41, 3 }
 0x84f   : > { %v29654_v8 = vpack.c.bf16 %v9394_v19, %v9393_v34  ;;  %v12577_v24 = vsel %vm2685_vm5, %v28990_v5, %v12576_v57  ;;  %v25889_v34 = vld [vmem:[%s31262_s1 + $0x4b0] sm:$0xff]   ;;  %v25890_v19 = vld [vmem:[%s31262_s1 + $0x4b8] sm:$0xff]  }
 0x850   : > { %v29656_v1 = vpack.c.bf16 %v9392_v29, %v9391_v61  ;;  %23384 = vmatpush3.bf16.msra.mxu0 %v25878_v13  ;;  %v12550_v51 = vsel %vm2685_vm5, %v12540_v25, %v12549_v42  ;;  %v12559_v46 = vsel %vm2685_vm5, %v12549_v42, %v12558_v9  ;;  %v12568_v13 = vsel %vm2685_vm5, %v12558_v9, %v28990_v5  ;;  %v31363_v5 = vld [vmem:[#allocation12_spill] sm:$0xff] }
 0x851   : > { %23385 = vmatprep.subr.bf16.mxu0 %v25879_v52  ;;  %v12585_v59 = vor.u32 %v12584_v21, %v12581_v56  ;;  %v31364_v31 = vrot.slane %v31363_v5, 3  ;;  %v12764_v61 = vrot.slane %v12508_v14, 3  ;;  %v31366_v29 = vrot.slane %v28998_v33, 3 }
 0x853   : > { %23374 = vmatmul.mubr.bf16.gmra.mrb[112].mxu0 %v12360_v11  ;;  %v12586_v62 = vsel %vm2685_vm5, %v12576_v57, %v12585_v59  ;;  %v12755_v20 = vsel %vm2915_vm4, %v12753_v0, %v31364_v31  ;;  %v12765_v43 = vsel %vm2915_vm4, %v31366_v29, %v12764_v61 }
 0x854   : > { %23386 = vmatpush3.bf16.msra.mxu0 %v25879_v52  ;;  %23393 = vmatprep.mubr.bf16.mxu0 %v12541_v7  ;;  %v31365_v52 = vld [vmem:[#allocation14_spill] sm:$0xff] }
 0x855   : > { %23387 = vmatprep.subr.bf16.mxu0 %v25880_v18 }
 0x858   : > { %23388 = vmatpush3.bf16.msra.mxu0 %v25880_v18 }
 0x859   : > { %23389 = vmatprep.subr.bf16.mxu0 %v25881_v58 }
 0x85c   : > { %23390 = vmatpush3.bf16.msra.mxu0 %v25881_v58 }
 0x85d   : > { %23391 = vmatprep.subr.bf16.mxu0 %v25882_v15 }
 0x860   : > { %23392 = vmatpush3.bf16.msra.mxu0 %v25882_v15 }
 0x861   : > { %23405 = vmatprep.subr.bf16.mxu0 %v25883_v53 }
 0x863   : > { %23394 = vmatmul.mubr.bf16.vlgmr.msra.gmra.mrb[104].mxu0 %v12550_v51 }
 0x864   : > { %23397 = vmatprep.mubr.bf16.mxu0 %v12559_v46  ;;  %23406 = vmatpush3.bf16.msra.mxu0 %v25883_v53 }
 0x865   : > { %23407 = vmatprep.subr.bf16.mxu0 %v25884_v35 }
 0x868   : > { %23408 = vmatpush3.bf16.msra.mxu0 %v25884_v35 }
 0x869   : > { %23409 = vmatprep.subr.bf16.mxu0 %v25885_v63 }
 0x86b   : > { %23398 = vmatmul.mubr.bf16.gmra.mrb[108].mxu0 %v12568_v13 }
 0x86c   : > { %23401 = vmatprep.mubr.bf16.mxu0 %v12577_v24  ;;  %23410 = vmatpush3.bf16.msra.mxu0 %v25885_v63 }
 0x86d   : > { %23411 = vmatprep.subr.bf16.mxu0 %v25886_v23 }
 0x870   : > { %23412 = vmatpush3.bf16.msra.mxu0 %v25886_v23 }
 0x871   : > { %23413 = vmatprep.subr.bf16.mxu0 %v25887_v27 }
 0x873   : > { %23402 = vmatmul.mubr.bf16.gmra.mrb[112].mxu0 %v12586_v62 }
 0x874   : > { %23414 = vmatpush3.bf16.msra.mxu0 %v25887_v27  ;;  %23421 = vmatprep.mubr.bf16.mxu0 %v12755_v20 }
 0x875   : > { %23415 = vmatprep.subr.bf16.mxu0 %v25888_v38 }
 0x878   : > { %23416 = vmatpush3.bf16.msra.mxu0 %v25888_v38 }
 0x879   : > { %23417 = vmatprep.subr.bf16.mxu0 %v25889_v34 }
 0x87c   : > { %23418 = vmatpush3.bf16.msra.mxu0 %v25889_v34 }
 0x87d   : > { %23419 = vmatprep.subr.bf16.mxu0 %v25890_v19 }
 0x880   : > { %23420 = vmatpush3.bf16.msra.mxu0 %v25890_v19 }
 0x883   : > { %23422 = vmatmul.mubr.bf16.vlgmr.msra.gmra.mrb[104].mxu0 %v31365_v52 }
 0x884   : > { %23425 = vmatprep.mubr.bf16.mxu0 %v28956_v30 }
 0x88b   : > { %23426 = vmatmul.mubr.bf16.gmra.mrb[108].mxu0 %v28980_v36 }
 0x88c   : > { %23429 = vmatprep.mubr.bf16.mxu0 %v29020_v40 }
 0x893   : > { %23430 = vmatmul.mubr.bf16.gmra.mrb[112].mxu0 %v12765_v43 }
 0x8bc   : > { %v23171_v28 = vpop.f32.mrb[180].mxu1 }
 0x8bd   : > { %v11138_v25 = vmul.f32 %v23171_v28, %v29576_v26  ;;  %v11077_v18 = vpop.f32.mrb[181].mxu1  ;;  %v25896_v28 = vld [vmem:[%s31266_s5 + $0x8] ss:$12 sps:$4 sm:$0xff]  }
 0x8be   : > { %v11136_v11 = vmul.f32 %v11077_v18, %v29576_v26  ;;  %v23172_v7 = vpop.f32.mrb[182].mxu1  ;;  %23437 = vmatprep.mubr.msk.bf16.mxu0 %vm7103_vm7, %v25896_v28  ;;  %v25902_v28 = vld [vmem:[%s31266_s5 + $0x38] ss:$12 sps:$4 sm:$0xff]  }
 0x8bf   : > { %v11150_v58 = vadd.f32 %v11138_v25, %v29580_v44  ;;  %v11139_v30 = vmul.f32 %v23172_v7, %v29576_v26  ;;  %v11080_v36 = vpop.f32.mrb[183].mxu1 }
 0x8c0   : > { %v11148_v40 = vadd.f32 %v11136_v11, %v29580_v44  ;;  %v11137_v45 = vmul.f32 %v11080_v36, %v29576_v26 }
 0x8c1   : > { %v11151_v33 = vadd.f32 %v11139_v30, %v29580_v44  ;;  %v11162_v17 = vmax.f32 %v11150_v58, 0.0 }
 0x8c2   : > { %v11149_v4 = vadd.f32 %v11137_v45, %v29580_v44  ;;  %v11160_v15 = vmax.f32 %v11148_v40, 0.0 }
 0x8c3   : > { %v11163_v37 = vmax.f32 %v11151_v33, 0.0 }
 0x8c4   : > { %v11161_v12 = vmax.f32 %v11149_v4, 0.0  ;;  %v23175_v54 = vpop.f32.mrb[184].mxu1 }
 0x8c5   : > { %v29724_v6 = vpack.c.bf16 %v11163_v37, %v11162_v17  ;;  %v11142_v3 = vmul.f32 %v23175_v54, %v29576_v26  ;;  %v11093_v53 = vpop.f32.mrb[185].mxu1 }
 0x8c6   : > { %v29727_v42 = vpack.c.bf16 %v11161_v12, %v11160_v15  ;;  %v11140_v9 = vmul.f32 %v11093_v53, %v29576_v26  ;;  %v23176_v39 = vpop.f32.mrb[186].mxu1 }
 0x8c7   : > { %v11154_v2 = vadd.f32 %v11142_v3, %v29580_v44  ;;  %v11143_v35 = vmul.f32 %v23176_v39, %v29576_v26  ;;  %v11096_v51 = vpop.f32.mrb[187].mxu1 }
 0x8c8   : > { %v11152_v46 = vadd.f32 %v11140_v9, %v29580_v44  ;;  %v11141_v47 = vmul.f32 %v11096_v51, %v29576_v26 }
 0x8c9   : > { %v11155_v55 = vadd.f32 %v11143_v35, %v29580_v44  ;;  %v11166_v63 = vmax.f32 %v11154_v2, 0.0 }
 0x8ca   : > { %v11153_v14 = vadd.f32 %v11141_v47, %v29580_v44  ;;  %v11164_v41 = vmax.f32 %v11152_v46, 0.0 }
 0x8cb   : > { %v11167_v60 = vmax.f32 %v11155_v55, 0.0 }
 0x8cc   : > { %v11165_v57 = vmax.f32 %v11153_v14, 0.0  ;;  %v23179_v23 = vpop.f32.mrb[188].mxu1 }
 0x8cd   : > { %v11146_v13 = vmul.f32 %v23179_v23, %v29576_v26  ;;  %v11109_v56 = vpop.f32.mrb[189].mxu1  ;;  %v11175_v21 = vpack.c.bf16 %v11167_v60, %v11166_v63 }
 0x8ce   : > { %v11144_v24 = vmul.f32 %v11109_v56, %v29576_v26  ;;  %v23180_v50 = vpop.f32.mrb[190].mxu1  ;;  %v11174_v27 = vpack.c.bf16 %v11165_v57, %v11164_v41 }
 0x8cf   : > { %v11158_v59 = vadd.f32 %v11146_v13, %v29580_v44  ;;  %v11147_v0 = vmul.f32 %v23180_v50, %v29576_v26  ;;  %v11112_v38 = vpop.f32.mrb[191].mxu1 }
 0x8d0   : > { %v11156_v62 = vadd.f32 %v11144_v24, %v29580_v44  ;;  %v11145_v5 = vmul.f32 %v11112_v38, %v29576_v26  ;;  %21324 = vmatprep.subr.bf16.mxu1 %v11174_v27 }
 0x8d1   : > { %v11159_v31 = vadd.f32 %v11147_v0, %v29580_v44  ;;  %21325 = vmatpush3.bf16.msra.mxu1 %v29608_v49  ;;  %v11170_v34 = vmax.f32 %v11158_v59, 0.0  ;;  %v25893_v49 = vld [vmem:[%s31266_s5 + $0x4] ss:$12 sps:$4 sm:$0xff]  }
 0x8d2   : > { %v11157_v20 = vadd.f32 %v11145_v5, %v29580_v44  ;;  %21326 = vmatprep.subr.bf16.mxu1 %v11175_v21  ;;  %v11168_v52 = vmax.f32 %v11156_v62, 0.0  ;;  %13231 = vmatprep.mubr.bf16.mxu1 %v25893_v49  ;;  %v25899_v49 = vld [vmem:[%s31266_s5 + $0x34] ss:$12 sps:$4 sm:$0xff]  }
 0x8d3   : > { %v11171_v19 = vmax.f32 %v11159_v31, 0.0  ;;  %v25928_v31 = vld [vmem:[%s31262_s1 + $0x500] sm:$0xff]  }
 0x8d4   : > { %v11169_v61 = vmax.f32 %v11157_v20, 0.0 }
 0x8d5   : > { %21327 = vmatpush3.bf16.msra.mxu1 %v29602_v16  ;;  %v11177_v29 = vpack.c.bf16 %v11171_v19, %v11170_v34 }
 0x8d6   : > { %v11176_v43 = vpack.c.bf16 %v11169_v61, %v11168_v52 }
 0x8d8   : > { %21328 = vmatprep.subr.bf16.mxu1 %v11176_v43  ;;  %v25898_v43 = vld [vmem:[%s31266_s5 + $0x20] ss:$12 sps:$4 sm:$0xff]  }
 0x8d9   : > { %21329 = vmatpush3.bf16.msra.mxu1 %v29635_v10 }
 0x8da   : > { %21330 = vmatprep.subr.bf16.mxu1 %v11177_v29  ;;  %v25929_v29 = vld [vmem:[%s31262_s1 + $0x508] sm:$0xff]  }
 0x8dd   : > { %21331 = vmatpush3.bf16.msra.mxu1 %v29628_v22 }
 0x956   : > { %v23423_v16 = vpop.f32.mrb[104].mxu0 }
 0x957   : > { %v12915_v25 = vmul.f32 %v23423_v16, %v29576_v26  ;;  %v12854_v18 = vpop.f32.mrb[105].mxu0  ;;  %v31367_v16 = vmov 0.0  }
 0x958   : > { %v12913_v10 = vmul.f32 %v12854_v18, %v29576_v26  ;;  %v23424_v11 = vpop.f32.mrb[106].mxu0  ;;  %v25903_v18 = vld [vmem:[%s31266_s5 + $0x50] ss:$12 sps:$4 sm:$0xff]  }
 0x959   : > { %v12927_v22 = vadd.f32 %v12915_v25, %v29580_v44  ;;  %v12916_v7 = vmul.f32 %v23424_v11, %v29576_v26  ;;  %v12857_v58 = vpop.f32.mrb[107].mxu0  ;;  %v25901_v25 = vld [vmem:[%s31266_s5 + $0x30] ss:$12 sps:$4 sm:$0xff]   ;;  %v25910_v11 = vld [vmem:[%s31266_s5 + $0x68] ss:$12 sps:$4 sm:$0xff]  }
 0x95a   : > { %v12925_v30 = vadd.f32 %v12913_v10, %v29580_v44  ;;  %v12914_v36 = vmul.f32 %v12857_v58, %v29576_v26  ;;  %v25904_v10 = vld [vmem:[%s31266_s5 + $0x4c] ss:$12 sps:$4 sm:$0xff]   ;;  %v25907_v58 = vld [vmem:[%s31266_s5 + $0x64] ss:$12 sps:$4 sm:$0xff]  }
 0x95b   : > { %v12928_v40 = vadd.f32 %v12916_v7, %v29580_v44  ;;  %v12939_v33 = vmax.f32 %v12927_v22, 0.0  ;;  %v25906_v22 = vld [vmem:[%s31266_s5 + $0x48] ss:$12 sps:$4 sm:$0xff]   ;;  %v25911_v7 = vld [vmem:[%s31266_s5 + $0x80] ss:$12 sps:$4 sm:$0xff]  }
 0x95c   : > { %v12926_v45 = vadd.f32 %v12914_v36, %v29580_v44  ;;  %v12937_v17 = vmax.f32 %v12925_v30, 0.0  ;;  %v25915_v30 = vld [vmem:[%s31266_s5 + $0x98] ss:$12 sps:$4 sm:$0xff]   ;;  %v25909_v36 = vld [vmem:[%s31266_s5 + $0x60] ss:$12 sps:$4 sm:$0xff]  }
 0x95d   : > { %v12940_v4 = vmax.f32 %v12928_v40, 0.0  ;;  %v25918_v40 = vld [vmem:[%s31266_s5 + $0xb0] ss:$12 sps:$4 sm:$0xff]  }
 0x95e   : > { %v12938_v37 = vmax.f32 %v12926_v45, 0.0  ;;  %v23427_v15 = vpop.f32.mrb[108].mxu0  ;;  %v25912_v45 = vld [vmem:[%s31266_s5 + $0x7c] ss:$12 sps:$4 sm:$0xff]  }
 0x95f   : > { %v12919_v12 = vmul.f32 %v23427_v15, %v29576_v26  ;;  %v12870_v54 = vpop.f32.mrb[109].mxu0  ;;  %v12950_v3 = vpack.c.bf16 %v12940_v4, %v12939_v33  ;;  %v25926_v33 = vld [vmem:[%s31266_s5 + $0xc8] ss:$12 sps:$4 sm:$0xff]   ;;  %v25914_v4 = vld [vmem:[%s31266_s5 + $0x78] ss:$12 sps:$4 sm:$0xff]  }
 0x960   : > { %v12917_v53 = vmul.f32 %v12870_v54, %v29576_v26  ;;  %v23428_v9 = vpop.f32.mrb[110].mxu0  ;;  %v12949_v39 = vpack.c.bf16 %v12938_v37, %v12937_v17  ;;  %v25927_v17 = vld [vmem:[%s31266_s5 + $0xe0] ss:$12 sps:$4 sm:$0xff]   ;;  %v25919_v15 = vld [vmem:[%s31266_s5 + $0x90] ss:$12 sps:$4 sm:$0xff]  }
 0x961   : > { %v12931_v2 = vadd.f32 %v12919_v12, %v29580_v44  ;;  %v12920_v35 = vmul.f32 %v23428_v9, %v29576_v26  ;;  %v12873_v51 = vpop.f32.mrb[111].mxu0  ;;  %v25916_v37 = vld [vmem:[%s31266_s5 + $0x94] ss:$12 sps:$4 sm:$0xff]   ;;  %v25920_v12 = vld [vmem:[%s31266_s5 + $0xac] ss:$12 sps:$4 sm:$0xff]  }
 0x962   : > { %v12929_v46 = vadd.f32 %v12917_v53, %v29580_v44  ;;  %v12918_v47 = vmul.f32 %v12873_v51, %v29576_v26  ;;  %21332 = vmatprep.subr.bf16.mxu1 %v12949_v39  ;;  %v25922_v54 = vld [vmem:[%s31266_s5 + $0xa8] ss:$12 sps:$4 sm:$0xff]   ;;  %v25925_v53 = vld [vmem:[%s31266_s5 + $0xc0] ss:$12 sps:$4 sm:$0xff]   ;;  %v25931_v39 = vld [vmem:[%s31262_s1 + $0x518] sm:$0xff]  }
 0x963   : > { %v12932_v55 = vadd.f32 %v12920_v35, %v29580_v44  ;;  %21333 = vmatpush3.bf16.msra.mxu1 %v29656_v1  ;;  %v12943_v63 = vmax.f32 %v12931_v2, 0.0  ;;  %v25930_v9 = vld [vmem:[%s31262_s1 + $0x510] sm:$0xff]   ;;  %v25932_v2 = vld [vmem:[%s31262_s1 + $0x520] sm:$0xff]   ;;  %v25933_v35 = vld [vmem:[%s31266_s5 + $0xdc] ss:$12 sps:$4 sm:$0xff]  }
 0x964   : > { %v12930_v14 = vadd.f32 %v12918_v47, %v29580_v44  ;;  %21334 = vmatprep.subr.bf16.mxu1 %v12950_v3  ;;  %v12941_v41 = vmax.f32 %v12929_v46, 0.0  ;;  %v25923_v3 = vld [vmem:[%s31266_s5 + $0xc4] ss:$12 sps:$4 sm:$0xff]   ;;  %v25935_v51 = vld [vmem:[%s31262_s1 + $0x528] sm:$0xff]  }
 0x965   : > { %v12944_v60 = vmax.f32 %v12932_v55, 0.0  ;;  %v25936_v46 = vld [vmem:[%s31266_s5 + $0xd8] ss:$12 sps:$4 sm:$0xff]   ;;  %v25937_v47 = vld [vmem:[%s31262_s1 + $0x530] sm:$0xff]  }
 0x966   : > { %v12942_v57 = vmax.f32 %v12930_v14, 0.0  ;;  %v23431_v23 = vpop.f32.mrb[112].mxu0  ;;  %v25938_v55 = vld [vmem:[%s31262_s1 + $0x538] sm:$0xff]   ;;  %v29906_v14 = vld [vmem:[%s31262_s1 + $0x4c0] sm:$0xff]  }
 0x967   : > { %v12923_v13 = vmul.f32 %v23431_v23, %v29576_v26  ;;  %v12886_v56 = vpop.f32.mrb[113].mxu0  ;;  %21335 = vmatpush3.bf16.msra.mxu1 %v29654_v8  ;;  %v12952_v21 = vpack.c.bf16 %v12944_v60, %v12943_v63 }
 0x968   : > { %v12921_v24 = vmul.f32 %v12886_v56, %v29576_v26  ;;  %v23432_v50 = vpop.f32.mrb[114].mxu0  ;;  %v12951_v27 = vpack.c.bf16 %v12942_v57, %v12941_v41 }
 0x969   : > { %v12935_v1 = vadd.f32 %v12923_v13, %v29580_v44  ;;  %v12924_v59 = vmul.f32 %v23432_v50, %v29576_v26  ;;  %v12889_v0 = vpop.f32.mrb[115].mxu0 }
 0x96a   : > { %v12933_v38 = vadd.f32 %v12921_v24, %v29580_v44  ;;  %v12922_v62 = vmul.f32 %v12889_v0, %v29576_v26  ;;  %21336 = vmatprep.subr.bf16.mxu1 %v12951_v27  ;;  %v25891_v26 = vld [vmem:[%s31266_s5] ss:$12 sps:$4 sm:$0xff]  }
 0x96b   : > { %v12936_v5 = vadd.f32 %v12924_v59, %v29580_v44  ;;  %21337 = vmatpush3.bf16.msra.mxu1 %v29727_v42  ;;  %v12947_v20 = vmax.f32 %v12935_v1, 0.0 }
 0x96c   : > { %v12934_v8 = vadd.f32 %v12922_v62, %v29580_v44  ;;  %21338 = vmatprep.subr.bf16.mxu1 %v12952_v21  ;;  %v12945_v19 = vmax.f32 %v12933_v38, 0.0  ;;  %v25894_v44 = vld [vmem:[%s31266_s5 + $0x1c] ss:$12 sps:$4 sm:$0xff]  }
 0x96d   : > { %v12948_v34 = vmax.f32 %v12936_v5, 0.0 }
 0x96e   : > { %v12946_v52 = vmax.f32 %v12934_v8, 0.0 }
 0x96f   : > { %21339 = vmatpush3.bf16.msra.mxu1 %v29724_v6  ;;  %v12954_v61 = vpack.c.bf16 %v12948_v34, %v12947_v20  ;;  %v25897_v6 = vld [vmem:[%s31266_s5 + $0x18] ss:$12 sps:$4 sm:$0xff]  }
 0x970   : > { %v12953_v42 = vpack.c.bf16 %v12946_v52, %v12945_v19  ;;  %23457 = vmatprep.subr.bf16.mxu1 %v25928_v31 }
 0x972   : > { %13232 = vmatmul.mubr.bf16.vlgmr.msra.gmra.mrb[192].mxu1 %v25891_v26  ;;  %23433 = vmatprep.subr.bf16.mxu0 %v12953_v42 }
 0x973   : > { %23434 = vmatpush3.bf16.msra.mxu0 %v12953_v42  ;;  %13239 = vmatprep.mubr.bf16.mxu1 %v25894_v44 }
 0x974   : > { %23435 = vmatprep.subr.bf16.mxu0 %v12954_v61  ;;  %23458 = vmatpush3.bf16.msra.mxu1 %v25928_v31 }
 0x975   : > { %23459 = vmatprep.subr.bf16.mxu1 %v25929_v29 }
 0x977   : > { %23436 = vmatpush3.bf16.msra.mxu0 %v12954_v61 }
 0x978   : > { %23460 = vmatpush3.bf16.msra.mxu1 %v25929_v29  ;;  %23709 = vmatprep.subr.bf16.mxu0 %v31367_v16 }
 0x979   : > { %23461 = vmatprep.subr.bf16.mxu1 %v25930_v9 }
 0x97a   : > { %13240 = vmatmul.mubr.bf16.gmra.mrb[196].mxu1 %v25897_v6  ;;  %23438 = vmatmul.mubr.msk.bf16.vlgmr.msra.gmra.mrb[116].mxu0 %vm7103_vm7, %v25898_v43 }
 0x97b   : > { %13247 = vmatprep.mubr.bf16.mxu1 %v25899_v49  ;;  %23441 = vmatprep.mubr.msk.bf16.mxu0 %vm7103_vm7, %v25902_v28 }
 0x97c   : > { %23462 = vmatpush3.bf16.msra.mxu1 %v25930_v9 }
 0x97d   : > { %23463 = vmatprep.subr.bf16.mxu1 %v25931_v39 }
 0x980   : > { %23464 = vmatpush3.bf16.msra.mxu1 %v25931_v39 }
 0x981   : > { %23465 = vmatprep.subr.bf16.mxu1 %v25932_v2 }
 0x982   : > { %13248 = vmatmul.mubr.bf16.gmra.mrb[200].mxu1 %v25901_v25  ;;  %23442 = vmatmul.mubr.msk.bf16.gmra.mrb[120].mxu0 %vm7103_vm7, %v25903_v18 }
 0x983   : > { %13255 = vmatprep.mubr.bf16.mxu1 %v25904_v10  ;;  %23445 = vmatprep.mubr.msk.bf16.mxu0 %vm7103_vm7, %v25910_v11 }
 0x984   : > { %23466 = vmatpush3.bf16.msra.mxu1 %v25932_v2 }
 0x985   : > { %23467 = vmatprep.subr.bf16.mxu1 %v25935_v51 }
 0x988   : > { %23468 = vmatpush3.bf16.msra.mxu1 %v25935_v51 }
 0x989   : > { %23469 = vmatprep.subr.bf16.mxu1 %v25937_v47 }
 0x98a   : > { %13256 = vmatmul.mubr.bf16.gmra.mrb[204].mxu1 %v25906_v22  ;;  %23446 = vmatmul.mubr.msk.bf16.gmra.mrb[124].mxu0 %vm7103_vm7, %v25911_v7 }
 0x98b   : > { %13263 = vmatprep.mubr.bf16.mxu1 %v25907_v58  ;;  %23449 = vmatprep.mubr.msk.bf16.mxu0 %vm7103_vm7, %v25915_v30 }
 0x98c   : > { %23470 = vmatpush3.bf16.msra.mxu1 %v25937_v47 }
 0x98d   : > { %23471 = vmatprep.subr.bf16.mxu1 %v25938_v55 }
 0x990   : > { %23472 = vmatpush3.bf16.msra.mxu1 %v25938_v55 }
 0x991   : > { %23485 = vmatprep.subr.bf16.mxu1 %v29906_v14 }
 0x992   : > { %13264 = vmatmul.mubr.bf16.gmra.mrb[208].mxu1 %v25909_v36  ;;  %23450 = vmatmul.mubr.msk.bf16.gmra.mrb[128].mxu0 %vm7103_vm7, %v25918_v40 }
 0x993   : > { %13271 = vmatprep.mubr.bf16.mxu1 %v25912_v45  ;;  %23453 = vmatprep.mubr.msk.bf16.mxu0 %vm7103_vm7, %v25926_v33 }
 0x99a   : > { %13272 = vmatmul.mubr.bf16.gmra.mrb[212].mxu1 %v25914_v4  ;;  %23454 = vmatmul.mubr.msk.bf16.gmra.mrb[132].mxu0 %vm7103_vm7, %v25927_v17 }
 0x99b   : > { %13279 = vmatprep.mubr.bf16.mxu1 %v25916_v37  ;;  %23721 = vmatprep.mubr.msk.bf16.mxu0 %vm26204_vm6, %v31367_v16 }
 0x9a2   : > { %13280 = vmatmul.mubr.bf16.gmra.mrb[216].mxu1 %v25919_v15 }
 0x9a3   : > { %13287 = vmatprep.mubr.bf16.mxu1 %v25920_v12 }
 0x9aa   : > { %13288 = vmatmul.mubr.bf16.gmra.mrb[220].mxu1 %v25922_v54  ;;  %v25940_v54 = vld [vmem:[%s31262_s1 + $0x4c8] sm:$0xff]  }
 0x9ab   : > { %13295 = vmatprep.mubr.bf16.mxu1 %v25923_v3 }
 0x9b2   : > { %13296 = vmatmul.mubr.bf16.gmra.mrb[224].mxu1 %v25925_v53 }
 0x9b3   : > { %13303 = vmatprep.mubr.bf16.mxu1 %v25933_v35 }
 0x9ba   : > { %13304 = vmatmul.mubr.bf16.gmra.mrb[228].mxu1 %v25936_v46  ;;  %v25941_v46 = vld [vmem:[%s31262_s1 + $0x4d0] sm:$0xff]  }
 0xa45   : > { %v21340_v63 = vpop.f32.mrb[192].mxu1 }
 0xa46   : > { %v21341_v60 = vpop.f32.mrb[193].mxu1 }
 0xa47   : > { %v21342_v41 = vadd.f32 %v21341_v60, %v21340_v63  ;;  %v21343_v57 = vpop.f32.mrb[194].mxu1 }
 0xa48   : > { %v21344_v23 = vpop.f32.mrb[195].mxu1 }
 0xa49   : > { %v21345_v13 = vadd.f32 %v21344_v23, %v21343_v57 }
 0xa4d   : > { %v21346_v56 = vpop.f32.mrb[196].mxu1  ;;  %v23439_v21 = vpop.f32.mrb[116].mxu0 }
 0xa4e   : > { %v21347_v24 = vpop.f32.mrb[197].mxu1  ;;  %v13346_v50 = vpop.f32.mrb[117].mxu0 }
 0xa4f   : > { %v21348_v27 = vadd.f32 %v21347_v24, %v21346_v56  ;;  %v13347_v1 = vadd.f32 %v21342_v41, %v13346_v50  ;;  %v21349_v59 = vpop.f32.mrb[198].mxu1  ;;  %v23440_v0 = vpop.f32.mrb[118].mxu0  ;;  %v25942_v24 = vld [vmem:[%s31262_s1 + $0x4d8] sm:$0xff]  }
 0xa50   : > { %v21350_v38 = vpop.f32.mrb[199].mxu1  ;;  %v13349_v62 = vpop.f32.mrb[119].mxu0 }
 0xa51   : > { %v13355_v5 = vadd.f32 %v23439_v21, %v21348_v27  ;;  %v21351_v8 = vadd.f32 %v21350_v38, %v21349_v59  ;;  %v13350_v31 = vadd.f32 %v21345_v13, %v13349_v62 }
 0xa53   : > { %v13358_v20 = vadd.f32 %v23440_v0, %v21351_v8  ;;  %v29909_v34 = vpack.c.bf16 %v13350_v31, %v13347_v1  ;;  %v25943_v0 = vld [vmem:[%s31262_s1 + $0x4e0] sm:$0xff]  }
 0xa55   : > { %v29911_v19 = vpack.c.bf16 %v13358_v20, %v13355_v5  ;;  %13435 = vst [vmem:[#allocation4] sm:$0xff] %v29909_v34  ;;  %v21352_v52 = vpop.f32.mrb[200].mxu1  ;;  %v23443_v26 = vpop.f32.mrb[120].mxu0 }
 0xa56   : > { %v21353_v61 = vpop.f32.mrb[201].mxu1  ;;  %v13362_v44 = vpop.f32.mrb[121].mxu0 }
 0xa57   : > { %13436 = vst [vmem:[#allocation4 + $0x8] sm:$0xff] %v29911_v19  ;;  %v21354_v42 = vadd.f32 %v21353_v61, %v21352_v52  ;;  %v21355_v29 = vpop.f32.mrb[202].mxu1  ;;  %v23444_v6 = vpop.f32.mrb[122].mxu0  ;;  %v13497_v58 = vrot.slane %v29911_v19, 1  ;;  %v13795_v3 = vrot.slane %v29911_v19, 2 }
 0xa58   : > { %v21356_v43 = vpop.f32.mrb[203].mxu1  ;;  %v13365_v49 = vpop.f32.mrb[123].mxu0 }
 0xa59   : > { %v21357_v28 = vadd.f32 %v21356_v43, %v21355_v29  ;;  %v13363_v25 = vadd.f32 %v21354_v42, %v13362_v44  ;;  %v25944_v42 = vld [vmem:[%s31262_s1 + $0x4e8] sm:$0xff]  }
 0xa5b   : > { %v13366_v18 = vadd.f32 %v21357_v28, %v13365_v49 }
 0xa5c   : > { %v13470_v10 = vld [vmem:[#allocation4] sm:$0xfe] }
 0xa5d   : > { %v29915_v11 = vpack.c.bf16 %v13366_v18, %v13363_v25  ;;  %v21358_v22 = vpop.f32.mrb[204].mxu1  ;;  %v13496_v7 = vrot.slane %v13470_v10, 1  ;;  %v23447_v30 = vpop.f32.mrb[124].mxu0  ;;  %v25945_v25 = vld [vmem:[%s31262_s1 + $0x4f0] sm:$0xff]  }
 0xa5e   : > { %v21359_v36 = vpop.f32.mrb[205].mxu1  ;;  %v13378_v40 = vpop.f32.mrb[125].mxu0 }
 0xa5f   : > { %v21360_v45 = vadd.f32 %v21359_v36, %v21358_v22  ;;  %v21361_v33 = vpop.f32.mrb[206].mxu1  ;;  %v13498_v4 = vsel %vm1715_vm1, %v13496_v7, %v13497_v58  ;;  %v23448_v17 = vpop.f32.mrb[126].mxu0  ;;  %v13499_v37 = vrot.slane %v29915_v11, 1  ;;  %v13797_v53 = vrot.slane %v29915_v11, 2 }
 0xa60   : > { %v21362_v15 = vpop.f32.mrb[207].mxu1  ;;  %23473 = vmatprep.mubr.bf16.mxu1 %v13498_v4  ;;  %v13381_v12 = vpop.f32.mrb[127].mxu0 }
 0xa61   : > { %v13371_v9 = vadd.f32 %v23443_v26, %v21360_v45  ;;  %v21363_v39 = vadd.f32 %v21362_v15, %v21361_v33  ;;  %v13500_v2 = vsel %vm1715_vm1, %v13497_v58, %v13499_v37  ;;  %v29931_v35 = vsel %vm2315_vm2, %v13795_v3, %v13797_v53 }
 0xa62   : > { %23474 = vmatmul.mubr.bf16.vlgmr.msra.gmra.mrb[232].mxu1 %v13500_v2 }
 0xa63   : > { %v13374_v51 = vadd.f32 %v23444_v6, %v21363_v39  ;;  %23486 = vmatpush3.bf16.msra.mxu1 %v29906_v14 }
 0xa64   : > { %23487 = vmatprep.subr.bf16.mxu1 %v25940_v54 }
 0xa65   : > { %v29937_v47 = vpack.c.bf16 %v13374_v51, %v13371_v9  ;;  %v21364_v55 = vpop.f32.mrb[208].mxu1  ;;  %v29939_v63 = vpop.f32.mrb[128].mxu0 }
 0xa66   : > { %v21365_v60 = vpop.f32.mrb[209].mxu1  ;;  %v13394_v41 = vpop.f32.mrb[129].mxu0 }
 0xa67   : > { %13438 = vst [vmem:[#allocation4 + $0x18] sm:$0xff] %v29937_v47  ;;  %v21366_v57 = vadd.f32 %v21365_v60, %v21364_v55  ;;  %v21367_v23 = vpop.f32.mrb[210].mxu1  ;;  %v13501_v13 = vrot.slane %v29937_v47, 1  ;;  %v29943_v56 = vpop.f32.mrb[130].mxu0  ;;  %23488 = vmatpush3.bf16.msra.mxu1 %v25940_v54 }
 0xa68   : > { %v21368_v14 = vpop.f32.mrb[211].mxu1  ;;  %v13397_v21 = vpop.f32.mrb[131].mxu0  ;;  %23489 = vmatprep.subr.bf16.mxu1 %v25941_v46 }
 0xa69   : > { %v21369_v50 = vadd.f32 %v21368_v14, %v21367_v23  ;;  %v13379_v27 = vadd.f32 %v21366_v57, %v13378_v40  ;;  %v13502_v1 = vsel %vm1715_vm1, %v13499_v37, %v13501_v13  ;;  %v25946_v40 = vld [vmem:[%s31262_s1 + $0x4f8] sm:$0xff]   ;;  %v25947_v37 = vld [vmem:[%s31262_s1 + $0x540] sm:$0xff]  }
 0xa6a   : > { %23477 = vmatprep.mubr.bf16.mxu1 %v13502_v1 }
 0xa6b   : > { %v13382_v59 = vadd.f32 %v21369_v50, %v13381_v12  ;;  %23490 = vmatpush3.bf16.msra.mxu1 %v25941_v46 }
 0xa6c   : > { %23491 = vmatprep.subr.bf16.mxu1 %v25942_v24 }
 0xa6d   : > { %v29952_v38 = vpack.c.bf16 %v13382_v59, %v13379_v27  ;;  %v21370_v62 = vpop.f32.mrb[212].mxu1  ;;  %v29954_v5 = vpop.f32.mrb[132].mxu0  ;;  %v25948_v59 = vld [vmem:[%s31262_s1 + $0x548] sm:$0xff]  }
 0xa6e   : > { %v21371_v8 = vpop.f32.mrb[213].mxu1  ;;  %v13410_v31 = vpop.f32.mrb[133].mxu0 }
 0xa6f   : > { %v21372_v20 = vadd.f32 %v21371_v8, %v21370_v62  ;;  %v21373_v52 = vpop.f32.mrb[214].mxu1  ;;  %v29957_v26 = vrot.slane %v29952_v38, 1  ;;  %23492 = vmatpush3.bf16.msra.mxu1 %v25942_v24  ;;  %v29959_v61 = vpop.f32.mrb[134].mxu0  ;;  %v13773_v62 = vld [vmem:[#allocation4] sm:$0xfc]  ;;  %v25951_v8 = vld [vmem:[%s31262_s1 + $0x560] sm:$0xff]  }
 0xa70   : > { %v21374_v44 = vpop.f32.mrb[215].mxu1  ;;  %23493 = vmatprep.subr.bf16.mxu1 %v25943_v0  ;;  %v13413_v29 = vpop.f32.mrb[135].mxu0 }
 0xa71   : > { %v13387_v6 = vadd.f32 %v23447_v30, %v21372_v20  ;;  %v21375_v43 = vadd.f32 %v21374_v44, %v21373_v52  ;;  %v13504_v49 = vsel %vm1715_vm1, %v13501_v13, %v29957_v26  ;;  %v25952_v20 = vld [vmem:[%s31262_s1 + $0x568] sm:$0xff]   ;;  %v25953_v44 = vld [vmem:[%s31262_s1 + $0x570] sm:$0xff]  }
 0xa72   : > { %23478 = vmatmul.mubr.bf16.gmra.mrb[236].mxu1 %v13504_v49  ;;  %v25957_v49 = vld [vmem:[%s31262_s1 + $0x590] sm:$0xff]  }
 0xa73   : > { %v13390_v28 = vadd.f32 %v23448_v17, %v21375_v43  ;;  %23494 = vmatpush3.bf16.msra.mxu1 %v25943_v0  ;;  %v25949_v0 = vld [vmem:[%s31262_s1 + $0x550] sm:$0xff]  }
 0xa74   : > { %23495 = vmatprep.subr.bf16.mxu1 %v25944_v42 }
 0xa75   : > { %v29969_v18 = vpack.c.bf16 %v13390_v28, %v13387_v6  ;;  %v21376_v10 = vpop.f32.mrb[216].mxu1 }
 0xa76   : > { %v21377_v22 = vpop.f32.mrb[217].mxu1 }
 0xa77   : > { %v21378_v7 = vadd.f32 %v21377_v22, %v21376_v10  ;;  %v21379_v58 = vpop.f32.mrb[218].mxu1  ;;  %v29972_v30 = vrot.slane %v29969_v18, 1  ;;  %23496 = vmatpush3.bf16.msra.mxu1 %v25944_v42  ;;  %v25954_v42 = vld [vmem:[%s31262_s1 + $0x578] sm:$0xff]  }
 0xa78   : > { %v21380_v36 = vpop.f32.mrb[219].mxu1  ;;  %23497 = vmatprep.subr.bf16.mxu1 %v25945_v25 }
 0xa79   : > { %v13395_v45 = vadd.f32 %v21378_v7, %v13394_v41  ;;  %v21381_v33 = vadd.f32 %v21380_v36, %v21379_v58  ;;  %v29980_v4 = vsel %vm1715_vm1, %v29957_v26, %v29972_v30  ;;  %v25958_v36 = vld [vmem:[%s31262_s1 + $0x598] sm:$0xff]  }
 0xa7a   : > { %23481 = vmatprep.mubr.bf16.mxu1 %v29980_v4 }
 0xa7b   : > { %v13398_v17 = vadd.f32 %v21381_v33, %v13397_v21  ;;  %23498 = vmatpush3.bf16.msra.mxu1 %v25945_v25  ;;  %v30043_v25 = vrot.slane %v29952_v38, 2 }
 0xa7c   : > { %23499 = vmatprep.subr.bf16.mxu1 %v25946_v40 }
 0xa7d   : > { %v29986_v15 = vpack.c.bf16 %v13398_v17, %v13395_v45  ;;  %v21382_v12 = vpop.f32.mrb[220].mxu1 }
 0xa7e   : > { %v21383_v54 = vpop.f32.mrb[221].mxu1 }
 0xa7f   : > { %13441 = vst [vmem:[#allocation4 + $0x30] sm:$0xff] %v29986_v15  ;;  %v21384_v9 = vadd.f32 %v21383_v54, %v21382_v12  ;;  %v21385_v39 = vpop.f32.mrb[222].mxu1  ;;  %23500 = vmatpush3.bf16.msra.mxu1 %v25946_v40  ;;  %v25959_v12 = vld [vmem:[%s31262_s1 + $0x5a0] sm:$0xff]  }
 0xa80   : > { %v21386_v2 = vpop.f32.mrb[223].mxu1  ;;  %23513 = vmatprep.subr.bf16.mxu1 %v25947_v37 }
 0xa81   : > { %v13403_v51 = vadd.f32 %v29939_v63, %v21384_v9  ;;  %v21387_v46 = vadd.f32 %v21386_v2, %v21385_v39  ;;  %v13987_v9 = vrot.slane %v29915_v11, 4  ;;  %v25960_v39 = vld [vmem:[%s31262_s1 + $0x5a8] sm:$0xff]  }
 0xa83   : > { %v13406_v55 = vadd.f32 %v29943_v56, %v21387_v46  ;;  %v25961_v46 = vld [vmem:[%s31262_s1 + $0x5b0] sm:$0xff]  }
 0xa85   : > { %v29991_v60 = vpack.c.bf16 %v13406_v55, %v13403_v51  ;;  %v21388_v41 = vpop.f32.mrb[224].mxu1  ;;  %v25962_v55 = vld [vmem:[%s31262_s1 + $0x5b8] sm:$0xff]  }
 0xa86   : > { %v21389_v57 = vpop.f32.mrb[225].mxu1  ;;  %v13471_v23 = vld [vmem:[#allocation4 + $0x30] sm:$0x1] }
 0xa87   : > { %13442 = vst [vmem:[#allocation4 + $0x38] sm:$0xff] %v29991_v60  ;;  %v21390_v13 = vadd.f32 %v21389_v57, %v21388_v41  ;;  %v21391_v14 = vpop.f32.mrb[226].mxu1  ;;  %v13507_v21 = vrot.slane %v13471_v23, 1  ;;  %v13774_v17 = vld [vmem:[#allocation4 + $0x30] sm:$0x3]  ;;  %v13989_v57 = vrot.slane %v29937_v47, 4 }
 0xa88   : > { %v21392_v24 = vpop.f32.mrb[227].mxu1  ;;  %v13805_v54 = vrot.slane %v13774_v17, 2  ;;  %v25963_v41 = vld [vmem:[%s31262_s1 + $0x5c0] sm:$0xff]   ;;  %v13991_v23 = vrot.slane %v29952_v38, 4  ;;  %v14328_v17 = vld [vmem:[#allocation4 + $0x8] sm:$0xc0] }
 0xa89   : > { %v21393_v50 = vadd.f32 %v21392_v24, %v21391_v14  ;;  %v13411_v27 = vadd.f32 %v21390_v13, %v13410_v31  ;;  %v13508_v1 = vsel %vm1715_vm1, %v29972_v30, %v13507_v21  ;;  %v13794_v31 = vrot.slane %v13773_v62, 2  ;;  %v25964_v13 = vld [vmem:[%s31262_s1 + $0x5c8] sm:$0xff]   ;;  %v25965_v24 = vld [vmem:[%s31262_s1 + $0x5d0] sm:$0xff]   ;;  %v25967_v62 = vld [vmem:[%s31262_s1 + $0x5e0] sm:$0xff]  }
 0xa8a   : > { %23482 = vmatmul.mubr.bf16.gmra.mrb[240].mxu1 %v13508_v1  ;;  %v13990_v14 = vsel %vm13985_vm8, %v13987_v9, %v13989_v57  ;;  %v13992_v21 = vsel %vm13985_vm8, %v13989_v57, %v13991_v23  ;;  %v25966_v1 = vld [vmem:[%s31262_s1 + $0x5d8] sm:$0xff]  }
 0xa8b   : > { %v13414_v63 = vadd.f32 %v21393_v50, %v13413_v29  ;;  %23501 = vmatprep.mubr.bf16.mxu1 %v29909_v34  ;;  %v25950_v34 = vld [vmem:[%s31262_s1 + $0x558] sm:$0xff]   ;;  %v13796_v52 = vsel %vm2315_vm2, %v13794_v31, %v13795_v3  ;;  %v13799_v3 = vrot.slane %v29937_v47, 2  ;;  %v25956_v29 = vld [vmem:[%s31262_s1 + $0x588] sm:$0xff]   ;;  %v13993_v50 = vrot.slane %v29969_v18, 4 }
 0xa8d   : > { %v29997_v56 = vpack.c.bf16 %v13414_v63, %v13411_v27  ;;  %v13800_v6 = vsel %vm2315_vm2, %v13797_v53, %v13799_v3  ;;  %v21394_v43 = vpop.f32.mrb[228].mxu1  ;;  %v13802_v40 = vsel %vm2315_vm2, %v13799_v3, %v30043_v25  ;;  %v13995_v27 = vrot.slane %v29986_v15, 4  ;;  %v25970_v3 = vld [vmem:[%s31262_s1 + $0x5f8] sm:$0xff]  }
 0xa8e   : > { %v21395_v28 = vpop.f32.mrb[229].mxu1  ;;  %v13994_v63 = vsel %vm13985_vm8, %v13991_v23, %v13993_v50 }
 0xa8f   : > { %v21396_v10 = vadd.f32 %v21395_v28, %v21394_v43  ;;  %v21397_v22 = vpop.f32.mrb[230].mxu1  ;;  %v14173_v43 = vrot.slane %v29952_v38, 5 }
 0xa90   : > { %v21398_v7 = vpop.f32.mrb[231].mxu1 }
 0xa91   : > { %v13419_v53 = vadd.f32 %v29954_v5, %v21396_v10  ;;  %v21399_v58 = vadd.f32 %v21398_v7, %v21397_v22  ;;  %v13954_v5 = vld [vmem:[#allocation4 + $0x8] sm:$0xf0]  ;;  %v25973_v22 = vld [vmem:[%s31262_s1 + $0x610] sm:$0xff]   ;;  %v14175_v7 = vrot.slane %v29969_v18, 5 }
 0xa92   : > { %23502 = vmatmul.mubr.bf16.vlgmr.msra.gmra.mrb[232].mxu1 %v29911_v19  ;;  %v25955_v19 = vld [vmem:[%s31262_s1 + $0x580] sm:$0xff]  }
 0xa93   : > { %23514 = vmatpush3.bf16.msra.mxu1 %v25947_v37  ;;  %23505 = vmatprep.mubr.bf16.mxu1 %v29915_v11  ;;  %v13422_v45 = vadd.f32 %v29959_v61, %v21399_v58  ;;  %v13986_v61 = vrot.slane %v13954_v5, 4  ;;  %v25974_v58 = vld [vmem:[%s31262_s1 + $0x618] sm:$0xff]   ;;  %v25975_v5 = vld [vmem:[%s31262_s1 + $0x620] sm:$0xff]  }
 0xa94   : > { %23515 = vmatprep.subr.bf16.mxu1 %v25948_v59 }
 0xa95   : > { %v13434_v37 = vpack.c.bf16 %v13422_v45, %v13419_v53  ;;  %v13988_v51 = vsel %vm13985_vm8, %v13986_v61, %v13987_v9  ;;  %v14177_v53 = vrot.slane %v29986_v15, 5  ;;  %v14147_v45 = vld [vmem:[#allocation4 + $0x38] sm:$0x1f] }
 0xa96   : > { %v25976_v61 = vld [vmem:[%s31262_s1 + $0x628] sm:$0xff]  }
 0xa97   : > { %23516 = vmatpush3.bf16.msra.mxu1 %v25948_v59  ;;  %13444 = vst [vmem:[#allocation4 + $0x48] sm:$0xff] %v13434_v37  ;;  %v13996_v59 = vsel %vm13985_vm8, %v13993_v50, %v13995_v27  ;;  %v14179_v37 = vrot.slane %v14147_v45, 5 }
 0xa98   : > { %23517 = vmatprep.subr.bf16.mxu1 %v25949_v0 }
 0xa99   : > { %v14180_v9 = vsel %vm14167_vm9, %v14177_v53, %v14179_v37 }
 0xa9a   : > { %23506 = vmatmul.mubr.bf16.gmra.mrb[236].mxu1 %v29937_v47 }
 0xa9b   : > { %23518 = vmatpush3.bf16.msra.mxu1 %v25949_v0  ;;  %23509 = vmatprep.mubr.bf16.mxu1 %v29952_v38  ;;  %v13960_v0 = vld [vmem:[#allocation4 + $0x38] sm:$0xf] }
 0xa9c   : > { %23519 = vmatprep.subr.bf16.mxu1 %v25950_v34 }
 0xa9f   : > { %23520 = vmatpush3.bf16.msra.mxu1 %v25950_v34  ;;  %v14146_v34 = vld [vmem:[#allocation4 + $0x8] sm:$0xe0] }
 0xaa0   : > { %23521 = vmatprep.subr.bf16.mxu1 %v25951_v8  ;;  %v14168_v31 = vrot.slane %v14146_v34, 5 }
 0xaa2   : > { %23510 = vmatmul.mubr.bf16.gmra.mrb[240].mxu1 %v29969_v18 }
 0xaa3   : > { %23522 = vmatpush3.bf16.msra.mxu1 %v25951_v8  ;;  %23529 = vmatprep.mubr.bf16.mxu1 %v13796_v52  ;;  %v13997_v8 = vrot.slane %v13960_v0, 4  ;;  %v25968_v52 = vld [vmem:[%s31262_s1 + $0x5e8] sm:$0xff]  }
 0xaa4   : > { %23523 = vmatprep.subr.bf16.mxu1 %v25952_v20  ;;  %v25984_v0 = vld [vmem:[%s31262_s1 + $0x668] sm:$0xff]  }
 0xaa7   : > { %23524 = vmatpush3.bf16.msra.mxu1 %v25952_v20  ;;  %v14169_v20 = vrot.slane %v29915_v11, 5 }
 0xaa8   : > { %23525 = vmatprep.subr.bf16.mxu1 %v25953_v44 }
 0xaab   : > { %23526 = vmatpush3.bf16.msra.mxu1 %v25953_v44  ;;  %v13998_v44 = vsel %vm13985_vm8, %v13995_v27, %v13997_v8  ;;  %v25986_v8 = vld [vmem:[%s31262_s1 + $0x678] sm:$0xff]  }
 0xaac   : > { %23527 = vmatprep.subr.bf16.mxu1 %v25954_v42 }
 0xaaf   : > { %23528 = vmatpush3.bf16.msra.mxu1 %v25954_v42  ;;  %v14170_v42 = vsel %vm14167_vm9, %v14168_v31, %v14169_v20  ;;  %v25987_v31 = vld [vmem:[%s31262_s1 + $0x680] sm:$0xff]  }
 0xab0   : > { %23541 = vmatprep.subr.bf16.mxu1 %v25955_v19 }
 0xab2   : > { %23530 = vmatmul.mubr.bf16.vlgmr.msra.gmra.mrb[232].mxu1 %v29931_v35  ;;  %v30046_v35 = vrot.slane %v29969_v18, 2 }
 0xab3   : > { %23533 = vmatprep.mubr.bf16.mxu1 %v13800_v6  ;;  %23542 = vmatpush3.bf16.msra.mxu1 %v25955_v19  ;;  %v25969_v19 = vld [vmem:[%s31262_s1 + $0x5f0] sm:$0xff]   ;;  %v14171_v6 = vrot.slane %v29937_v47, 5 }
 0xab4   : > { %23543 = vmatprep.subr.bf16.mxu1 %v25956_v29  ;;  %v30058_v33 = vsel %vm2315_vm2, %v30043_v25, %v30046_v35  ;;  %v13806_v2 = vsel %vm2315_vm2, %v30046_v35, %v13805_v54  ;;  %v14351_v54 = vrot.slane %v29915_v11, 6  ;;  %v25978_v11 = vld [vmem:[%s31262_s1 + $0x638] sm:$0xff]  }
 0xab5   : > { %v14172_v28 = vsel %vm14167_vm9, %v14169_v20, %v14171_v6  ;;  %v14174_v10 = vsel %vm14167_vm9, %v14171_v6, %v14173_v43  ;;  %v25989_v20 = vld [vmem:[%s31262_s1 + $0x690] sm:$0xff]   ;;  %v25995_v6 = vld [vmem:[%s31262_s1 + $0x6c0] sm:$0xff]  }
 0xab7   : > { %23544 = vmatpush3.bf16.msra.mxu1 %v25956_v29  ;;  %v25971_v29 = vld [vmem:[%s31262_s1 + $0x600] sm:$0xff]  }
 0xab8   : > { %23545 = vmatprep.subr.bf16.mxu1 %v25957_v49 }
 0xaba   : > { %23534 = vmatmul.mubr.bf16.gmra.mrb[236].mxu1 %v13802_v40  ;;  %v14178_v40 = vsel %vm14167_vm9, %v14175_v7, %v14177_v53  ;;  %v14680_v53 = vld [vmem:[#allocation4 + $0x48] sm:$0x1] }
 0xabb   : > { %23537 = vmatprep.mubr.bf16.mxu1 %v30058_v33  ;;  %23546 = vmatpush3.bf16.msra.mxu1 %v25957_v49  ;;  %v25972_v49 = vld [vmem:[%s31262_s1 + $0x608] sm:$0xff]  }
 0xabc   : > { %23547 = vmatprep.subr.bf16.mxu1 %v25958_v36 }
 0xabf   : > { %23548 = vmatpush3.bf16.msra.mxu1 %v25958_v36  ;;  %v14176_v36 = vsel %vm14167_vm9, %v14173_v43, %v14175_v7  ;;  %v25996_v43 = vld [vmem:[%s31262_s1 + $0x6c8] sm:$0xff]  }
 0xac0   : > { %23549 = vmatprep.subr.bf16.mxu1 %v25959_v12 }
 0xac2   : > { %23538 = vmatmul.mubr.bf16.gmra.mrb[240].mxu1 %v13806_v2  ;;  %v25977_v2 = vld [vmem:[%s31262_s1 + $0x630] sm:$0xff]  }
 0xac3   : > { %23550 = vmatpush3.bf16.msra.mxu1 %v25959_v12  ;;  %23557 = vmatprep.mubr.bf16.mxu1 %v13988_v51  ;;  %v14350_v12 = vrot.slane %v14328_v17, 6  ;;  %v25979_v51 = vld [vmem:[%s31262_s1 + $0x640] sm:$0xff]   ;;  %v26000_v17 = vld [vmem:[%s31262_s1 + $0x6e8] sm:$0xff]  }
 0xac4   : > { %23551 = vmatprep.subr.bf16.mxu1 %v25960_v39 }
 0xac7   : > { %23552 = vmatpush3.bf16.msra.mxu1 %v25960_v39  ;;  %v14352_v39 = vsel %vm14349_vm10, %v14350_v12, %v14351_v54  ;;  %v26001_v12 = vld [vmem:[%s31262_s1 + $0x6f0] sm:$0xff]  }
 0xac8   : > { %23553 = vmatprep.subr.bf16.mxu1 %v25961_v46 }
 0xacb   : > { %23554 = vmatpush3.bf16.msra.mxu1 %v25961_v46  ;;  %v14353_v46 = vrot.slane %v29937_v47, 6 }
 0xacc   : > { %23555 = vmatprep.subr.bf16.mxu1 %v25962_v55 }
 0xacd   : > { %v14354_v57 = vsel %vm14349_vm10, %v14351_v54, %v14353_v46  ;;  %v26002_v54 = vld [vmem:[%s31262_s1 + $0x6f8] sm:$0xff]  }
 0xacf   : > { %23556 = vmatpush3.bf16.msra.mxu1 %v25962_v55  ;;  %v14355_v55 = vrot.slane %v29952_v38, 6 }
 0xad0   : > { %23569 = vmatprep.subr.bf16.mxu1 %v25963_v41 }
 0xad1   : > { %v14356_v23 = vsel %vm14349_vm10, %v14353_v46, %v14355_v55 }
 0xad2   : > { %23558 = vmatmul.mubr.bf16.vlgmr.msra.gmra.mrb[232].mxu1 %v13990_v14  ;;  %v14357_v14 = vrot.slane %v29969_v18, 6 }
 0xad3   : > { %23561 = vmatprep.mubr.bf16.mxu1 %v13992_v21  ;;  %23570 = vmatpush3.bf16.msra.mxu1 %v25963_v41  ;;  %v25980_v41 = vld [vmem:[%s31262_s1 + $0x648] sm:$0xff]   ;;  %v14359_v21 = vrot.slane %v29986_v15, 6 }
 0xad4   : > { %23571 = vmatprep.subr.bf16.mxu1 %v25964_v13  ;;  %v14358_v50 = vsel %vm14349_vm10, %v14355_v55, %v14357_v14 }
 0xad5   : > { %v14360_v27 = vsel %vm14349_vm10, %v14357_v14, %v14359_v21 }
 0xad7   : > { %23572 = vmatpush3.bf16.msra.mxu1 %v25964_v13  ;;  %v25981_v13 = vld [vmem:[%s31262_s1 + $0x650] sm:$0xff]  }
 0xad8   : > { %23573 = vmatprep.subr.bf16.mxu1 %v25965_v24 }
 0xada   : > { %23562 = vmatmul.mubr.bf16.gmra.mrb[236].mxu1 %v13994_v63  ;;  %v25983_v63 = vld [vmem:[%s31262_s1 + $0x660] sm:$0xff]  }
 0xadb   : > { %23565 = vmatprep.mubr.bf16.mxu1 %v13996_v59  ;;  %23574 = vmatpush3.bf16.msra.mxu1 %v25965_v24  ;;  %v25982_v24 = vld [vmem:[%s31262_s1 + $0x658] sm:$0xff]  }
 0xadc   : > { %23575 = vmatprep.subr.bf16.mxu1 %v25966_v1 }
 0xadf   : > { %23576 = vmatpush3.bf16.msra.mxu1 %v25966_v1  ;;  %v14329_v1 = vld [vmem:[#allocation4 + $0x38] sm:$0x3f] }
 0xae0   : > { %23577 = vmatprep.subr.bf16.mxu1 %v25967_v62  ;;  %v14361_v59 = vrot.slane %v14329_v1, 6 }
 0xae2   : > { %23566 = vmatmul.mubr.bf16.gmra.mrb[240].mxu1 %v13998_v44  ;;  %v14362_v34 = vsel %vm14349_vm10, %v14359_v21, %v14361_v59 }
 0xae3   : > { %23578 = vmatpush3.bf16.msra.mxu1 %v25967_v62  ;;  %23585 = vmatprep.mubr.bf16.mxu1 %v14170_v42  ;;  %v25985_v62 = vld [vmem:[%s31262_s1 + $0x670] sm:$0xff]   ;;  %v25992_v42 = vld [vmem:[%s31262_s1 + $0x6a8] sm:$0xff]  }
 0xae4   : > { %23579 = vmatprep.subr.bf16.mxu1 %v25968_v52 }
 0xae7   : > { %23580 = vmatpush3.bf16.msra.mxu1 %v25968_v52  ;;  %v25990_v52 = vld [vmem:[%s31262_s1 + $0x698] sm:$0xff]  }
 0xae8   : > { %23581 = vmatprep.subr.bf16.mxu1 %v25969_v19 }
 0xaeb   : > { %23582 = vmatpush3.bf16.msra.mxu1 %v25969_v19 }
 0xaec   : > { %23583 = vmatprep.subr.bf16.mxu1 %v25970_v3 }
 0xaef   : > { %23584 = vmatpush3.bf16.msra.mxu1 %v25970_v3  ;;  %v25993_v3 = vld [vmem:[%s31262_s1 + $0x6b0] sm:$0xff]  }
 0xaf0   : > { %23597 = vmatprep.subr.bf16.mxu1 %v25971_v29 }
 0xaf2   : > { %23586 = vmatmul.mubr.bf16.vlgmr.msra.gmra.mrb[232].mxu1 %v14172_v28  ;;  %v25997_v28 = vld [vmem:[%s31262_s1 + $0x6d0] sm:$0xff]  }
 0xaf3   : > { %23589 = vmatprep.mubr.bf16.mxu1 %v14174_v10  ;;  %23598 = vmatpush3.bf16.msra.mxu1 %v25971_v29  ;;  %v25994_v29 = vld [vmem:[%s31262_s1 + $0x6b8] sm:$0xff]   ;;  %v14712_v10 = vrot.slane %v29991_v60, 1 }
 0xaf4   : > { %23599 = vmatprep.subr.bf16.mxu1 %v25972_v49 }
 0xaf7   : > { %23600 = vmatpush3.bf16.msra.mxu1 %v25972_v49 }
 0xaf8   : > { %23601 = vmatprep.subr.bf16.mxu1 %v25973_v22 }
 0xafa   : > { %23590 = vmatmul.mubr.bf16.gmra.mrb[236].mxu1 %v14176_v36  ;;  %v25999_v36 = vld [vmem:[%s31262_s1 + $0x6e0] sm:$0xff]  }
 0xafb   : > { %23593 = vmatprep.mubr.bf16.mxu1 %v14178_v40  ;;  %23602 = vmatpush3.bf16.msra.mxu1 %v25973_v22  ;;  %v14714_v22 = vrot.slane %v29997_v56, 1  ;;  %v14716_v40 = vrot.slane %v14680_v53, 1 }
 0xafc   : > { %23603 = vmatprep.subr.bf16.mxu1 %v25974_v58 }
 0xaff   : > { %23604 = vmatpush3.bf16.msra.mxu1 %v25974_v58  ;;  %v14865_v58 = vld [vmem:[#allocation4 + $0x18] sm:$0xfc] }
 0xb00   : > { %23605 = vmatprep.subr.bf16.mxu1 %v25975_v5  ;;  %v14886_v45 = vrot.slane %v14865_v58, 2 }
 0xb02   : > { %23594 = vmatmul.mubr.bf16.gmra.mrb[240].mxu1 %v14180_v9  ;;  %v14888_v37 = vsel %vm2315_vm2, %v14886_v45, %v30043_v25  ;;  %v14893_v9 = vrot.slane %v29991_v60, 2 }
 0xb03   : > { %23606 = vmatpush3.bf16.msra.mxu1 %v25975_v5  ;;  %23613 = vmatprep.mubr.bf16.mxu1 %v14352_v39  ;;  %v14717_v5 = vsel %vm1715_vm1, %v14714_v22, %v14716_v40  ;;  %v14895_v39 = vrot.slane %v29997_v56, 2 }
 0xb04   : > { %23607 = vmatprep.subr.bf16.mxu1 %v25976_v61 }
 0xb07   : > { %23608 = vmatpush3.bf16.msra.mxu1 %v25976_v61  ;;  %v14891_v61 = vrot.slane %v29986_v15, 2 }
 0xb08   : > { %23609 = vmatprep.subr.bf16.mxu1 %v25977_v2 }
 0xb09   : > { %v14892_v25 = vsel %vm2315_vm2, %v30046_v35, %v14891_v61 }
 0xb0b   : > { %23610 = vmatpush3.bf16.msra.mxu1 %v25977_v2  ;;  %v14894_v2 = vsel %vm2315_vm2, %v14891_v61, %v14893_v9 }
 0xb0c   : > { %23611 = vmatprep.subr.bf16.mxu1 %v25978_v11 }
 0xb0f   : > { %23612 = vmatpush3.bf16.msra.mxu1 %v25978_v11  ;;  %v14896_v11 = vsel %vm2315_vm2, %v14893_v9, %v14895_v39 }
 0xb10   : > { %23625 = vmatprep.subr.bf16.mxu1 %v25979_v51 }
 0xb12   : > { %23614 = vmatmul.mubr.bf16.vlgmr.msra.gmra.mrb[232].mxu1 %v14354_v57 }
 0xb13   : > { %23617 = vmatprep.mubr.bf16.mxu1 %v14356_v23  ;;  %23626 = vmatpush3.bf16.msra.mxu1 %v25979_v51  ;;  %v14866_v51 = vld [vmem:[#allocation4 + $0x48] sm:$0x3] }
 0xb14   : > { %23627 = vmatprep.subr.bf16.mxu1 %v25980_v41 }
 0xb17   : > { %23628 = vmatpush3.bf16.msra.mxu1 %v25980_v41 }
 0xb18   : > { %23629 = vmatprep.subr.bf16.mxu1 %v25981_v13 }
 0xb1a   : > { %23618 = vmatmul.mubr.bf16.gmra.mrb[236].mxu1 %v14358_v50 }
 0xb1b   : > { %23621 = vmatprep.mubr.bf16.mxu1 %v14360_v27  ;;  %23630 = vmatpush3.bf16.msra.mxu1 %v25981_v13 }
 0xb1c   : > { %23631 = vmatprep.subr.bf16.mxu1 %v25982_v24 }
 0xb1f   : > { %23632 = vmatpush3.bf16.msra.mxu1 %v25982_v24 }
 0xb20   : > { %23633 = vmatprep.subr.bf16.mxu1 %v25983_v63 }
 0xb22   : > { %23622 = vmatmul.mubr.bf16.gmra.mrb[240].mxu1 %v14362_v34 }
 0xb23   : > { %23634 = vmatpush3.bf16.msra.mxu1 %v25983_v63  ;;  %23641 = vmatprep.mubr.bf16.mxu1 %v29937_v47  ;;  %v25988_v47 = vld [vmem:[%s31262_s1 + $0x688] sm:$0xff]  }
 0xb24   : > { %23635 = vmatprep.subr.bf16.mxu1 %v25984_v0 }
 0xb27   : > { %23636 = vmatpush3.bf16.msra.mxu1 %v25984_v0 }
 0xb28   : > { %23637 = vmatprep.subr.bf16.mxu1 %v25985_v62 }
 0xb2b   : > { %23638 = vmatpush3.bf16.msra.mxu1 %v25985_v62 }
 0xb2c   : > { %23639 = vmatprep.subr.bf16.mxu1 %v25986_v8 }
 0xb2f   : > { %23640 = vmatpush3.bf16.msra.mxu1 %v25986_v8 }
 0xb30   : > { %23653 = vmatprep.subr.bf16.mxu1 %v25987_v31 }
 0xb32   : > { %23642 = vmatmul.mubr.bf16.vlgmr.msra.gmra.mrb[232].mxu1 %v29952_v38  ;;  %v14674_v38 = vld [vmem:[#allocation4 + $0x18] sm:$0xfe] }
 0xb33   : > { %23645 = vmatprep.mubr.bf16.mxu1 %v29969_v18  ;;  %23654 = vmatpush3.bf16.msra.mxu1 %v25987_v31  ;;  %v25991_v18 = vld [vmem:[%s31262_s1 + $0x6a0] sm:$0xff]   ;;  %v14705_v44 = vrot.slane %v14674_v38, 1 }
 0xb34   : > { %23655 = vmatprep.subr.bf16.mxu1 %v25988_v47 }
 0xb35   : > { %v14707_v19 = vsel %vm1715_vm1, %v14705_v44, %v29957_v26  ;;  %v14710_v26 = vrot.slane %v29986_v15, 1 }
 0xb37   : > { %23656 = vmatpush3.bf16.msra.mxu1 %v25988_v47  ;;  %v14711_v49 = vsel %vm1715_vm1, %v29972_v30, %v14710_v26  ;;  %v14713_v7 = vsel %vm1715_vm1, %v14710_v26, %v14712_v10  ;;  %v14715_v30 = vsel %vm1715_vm1, %v14712_v10, %v14714_v22 }
 0xb38   : > { %23657 = vmatprep.subr.bf16.mxu1 %v25989_v20 }
 0xb3a   : > { %23646 = vmatmul.mubr.bf16.gmra.mrb[236].mxu1 %v29986_v15  ;;  %v14897_v15 = vrot.slane %v14866_v51, 2  ;;  %v26010_v51 = vld [vmem:[%s31262_s1 + $0x740] sm:$0xff]  }
 0xb3b   : > { %23649 = vmatprep.mubr.bf16.mxu1 %v29991_v60  ;;  %23658 = vmatpush3.bf16.msra.mxu1 %v25989_v20  ;;  %v19844_v60 = vld [vmem:[%s31263_s2 + $0x6] sm:$0x3] }
 0xb3c   : > { %23659 = vmatprep.subr.bf16.mxu1 %v25990_v52  ;;  %v14898_v46 = vsel %vm2315_vm2, %v14895_v39, %v14897_v15  ;;  %v15065_v35 = vrot.slane %v19844_v60, %v31362_v32  ;;  %v26011_v15 = vld [vmem:[%s31262_s1 + $0x748] sm:$0xff]  }
 0xb3f   : > { %23660 = vmatpush3.bf16.msra.mxu1 %v25990_v52 }
 0xb40   : > { %23661 = vmatprep.subr.bf16.mxu1 %v25991_v18 }
 0xb42   : > { %23650 = vmatmul.mubr.bf16.gmra.mrb[240].mxu1 %v29997_v56  ;;  %v15049_v56 = vrot.slane %v19844_v60, %v31361_v48  ;;  %v26012_v60 = vld [vmem:[%s31262_s1 + $0x750] sm:$0xff]  }
 0xb43   : > { %23662 = vmatpush3.bf16.msra.mxu1 %v25991_v18  ;;  %23669 = vmatprep.mubr.bf16.mxu1 %v14707_v19 }
 0xb44   : > { %23663 = vmatprep.subr.bf16.mxu1 %v25992_v42 }
 0xb47   : > { %23664 = vmatpush3.bf16.msra.mxu1 %v25992_v42 }
 0xb48   : > { %23665 = vmatprep.subr.bf16.mxu1 %v25993_v3 }
 0xb4b   : > { %23666 = vmatpush3.bf16.msra.mxu1 %v25993_v3 }
 0xb4c   : > { %23667 = vmatprep.subr.bf16.mxu1 %v25994_v29 }
 0xb4f   : > { %23668 = vmatpush3.bf16.msra.mxu1 %v25994_v29 }
 0xb50   : > { %23681 = vmatprep.subr.bf16.mxu1 %v25995_v6 }
 0xb52   : > { %23670 = vmatmul.mubr.bf16.vlgmr.msra.gmra.mrb[232].mxu1 %v29980_v4  ;;  %v25998_v4 = vld [vmem:[%s31262_s1 + $0x6d8] sm:$0xff]  }
 0xb53   : > { %23673 = vmatprep.mubr.bf16.mxu1 %v14711_v49  ;;  %23682 = vmatpush3.bf16.msra.mxu1 %v25995_v6 }
 0xb54   : > { %23683 = vmatprep.subr.bf16.mxu1 %v25996_v43 }
 0xb57   : > { %23684 = vmatpush3.bf16.msra.mxu1 %v25996_v43 }
 0xb58   : > { %23685 = vmatprep.subr.bf16.mxu1 %v25997_v28 }
 0xb5a   : > { %23674 = vmatmul.mubr.bf16.gmra.mrb[236].mxu1 %v14713_v7 }
 0xb5b   : > { %23677 = vmatprep.mubr.bf16.mxu1 %v14715_v30  ;;  %23686 = vmatpush3.bf16.msra.mxu1 %v25997_v28 }
 0xb5c   : > { %23687 = vmatprep.subr.bf16.mxu1 %v25998_v4 }
 0xb5f   : > { %23688 = vmatpush3.bf16.msra.mxu1 %v25998_v4 }
 0xb60   : > { %23689 = vmatprep.subr.bf16.mxu1 %v25999_v36 }
 0xb62   : > { %23678 = vmatmul.mubr.bf16.gmra.mrb[240].mxu1 %v14717_v5 }
 0xb63   : > { %23690 = vmatpush3.bf16.msra.mxu1 %v25999_v36  ;;  %23697 = vmatprep.mubr.bf16.mxu1 %v14888_v37 }
 0xb64   : > { %23691 = vmatprep.subr.bf16.mxu1 %v26000_v17 }
 0xb67   : > { %23692 = vmatpush3.bf16.msra.mxu1 %v26000_v17 }
 0xb68   : > { %23693 = vmatprep.subr.bf16.mxu1 %v26001_v12 }
 0xb6b   : > { %23694 = vmatpush3.bf16.msra.mxu1 %v26001_v12 }
 0xb6c   : > { %23695 = vmatprep.subr.bf16.mxu1 %v26002_v54 }
 0xb6f   : > { %23696 = vmatpush3.bf16.msra.mxu1 %v26002_v54 }
 0xb70   : > { %24073 = vmatprep.subr.bf16.mxu1 %v31367_v16 }
 0xb72   : > { %23698 = vmatmul.mubr.bf16.vlgmr.msra.gmra.mrb[232].mxu1 %v30058_v33 }
 0xb73   : > { %23701 = vmatprep.mubr.bf16.mxu1 %v14892_v25 }
 0xb7a   : > { %23702 = vmatmul.mubr.bf16.gmra.mrb[236].mxu1 %v14894_v2 }
 0xb7b   : > { %23705 = vmatprep.mubr.bf16.mxu1 %v14896_v11  ;;  %v26003_v11 = vld [vmem:[%s31267_s6] sm:$0xff]  }
 0xb82   : > { %23706 = vmatmul.mubr.bf16.gmra.mrb[240].mxu1 %v14898_v46  ;;  %v26004_v46 = vld [vmem:[%s31267_s6 + $0x8] sm:$0xff]  }
 0xb83   : > { %24083 = vmatprep.mubr.msk.bf16.mxu1 %vm26204_vm6, %v31367_v16 }
 0xc45   : > { %v23699_v33 = vpop.f32.mrb[232].mxu1 }
 0xc46   : > { %v15052_v55 = vmul.f32 %v23699_v33, %v15049_v56  ;;  %v14987_v41 = vpop.f32.mrb[233].mxu1  ;;  %v26007_v33 = vld [vmem:[%s31267_s6 + $0x20] sm:$0xff]  }
 0xc47   : > { %v15050_v57 = vmul.f32 %v15049_v56, %v14987_v41  ;;  %v23700_v23 = vpop.f32.mrb[234].mxu1  ;;  %v26009_v41 = vld [vmem:[%s31267_s6 + $0x30] sm:$0xff]  }
 0xc48   : > { %v15068_v13 = vadd.f32 %v15065_v35, %v15052_v55  ;;  %v15053_v14 = vmul.f32 %v23700_v23, %v15049_v56  ;;  %v14990_v21 = vpop.f32.mrb[235].mxu1  ;;  %v26008_v55 = vld [vmem:[%s31267_s6 + $0x28] sm:$0xff]   ;;  %v26014_v23 = vld [vmem:[%s31262_s1 + $0x760] sm:$0xff]  }
 0xc49   : > { %v15066_v24 = vadd.f32 %v15065_v35, %v15050_v57  ;;  %v15051_v50 = vmul.f32 %v15049_v56, %v14990_v21  ;;  %v26013_v57 = vld [vmem:[%s31262_s1 + $0x758] sm:$0xff]  }
 0xc4a   : > { %v15069_v27 = vadd.f32 %v15065_v35, %v15053_v14  ;;  %v15080_v63 = vmax.f32 %v15068_v13, 0.0  ;;  %v26015_v13 = vld [vmem:[%s31262_s1 + $0x768] sm:$0xff]   ;;  %v26016_v14 = vld [vmem:[%s31262_s1 + $0x770] sm:$0xff]   ;;  %v26017_v21 = vld [vmem:[%s31262_s1 + $0x778] sm:$0xff]  }
 0xc4b   : > { %v15067_v1 = vadd.f32 %v15065_v35, %v15051_v50  ;;  %v15078_v0 = vmax.f32 %v15066_v24, 0.0 }
 0xc4c   : > { %v15081_v59 = vmax.f32 %v15069_v27, 0.0 }
 0xc4d   : > { %v15079_v34 = vmax.f32 %v15067_v1, 0.0  ;;  %v23703_v62 = vpop.f32.mrb[236].mxu1 }
 0xc4e   : > { %v15091_v8 = vpack.c.bf16 %v15081_v59, %v15080_v63  ;;  %v15056_v31 = vmul.f32 %v23703_v62, %v15049_v56  ;;  %v15003_v47 = vpop.f32.mrb[237].mxu1 }
 0xc4f   : > { %v15090_v20 = vpack.c.bf16 %v15079_v34, %v15078_v0  ;;  %v15054_v52 = vmul.f32 %v15049_v56, %v15003_v47  ;;  %v23704_v38 = vpop.f32.mrb[238].mxu1 }
 0xc50   : > { %v15072_v18 = vadd.f32 %v15065_v35, %v15056_v31  ;;  %v15057_v44 = vmul.f32 %v23704_v38, %v15049_v56  ;;  %v15006_v42 = vpop.f32.mrb[239].mxu1 }
 0xc51   : > { %v15070_v19 = vadd.f32 %v15065_v35, %v15054_v52  ;;  %v15055_v3 = vmul.f32 %v15049_v56, %v15006_v42  ;;  %23710 = vmatpush3.bf16.msra.mxu0 %v15090_v20 }
 0xc52   : > { %v15073_v29 = vadd.f32 %v15065_v35, %v15057_v44  ;;  %23711 = vmatprep.subr.bf16.mxu0 %v31367_v16  ;;  %v15084_v26 = vmax.f32 %v15072_v18, 0.0 }
 0xc53   : > { %v15071_v6 = vadd.f32 %v15065_v35, %v15055_v3  ;;  %v15082_v49 = vmax.f32 %v15070_v19, 0.0  ;;  %v26018_v19 = vld [vmem:[%s31262_s1 + $0x700] sm:$0xff]  }
 0xc54   : > { %v15085_v43 = vmax.f32 %v15073_v29, 0.0 }
 0xc55   : > { %v15083_v28 = vmax.f32 %v15071_v6, 0.0  ;;  %v23707_v10 = vpop.f32.mrb[240].mxu1  ;;  %23712 = vmatpush3.bf16.msra.mxu0 %v15091_v8 }
 0xc56   : > { %v15093_v22 = vpack.c.bf16 %v15085_v43, %v15084_v26  ;;  %v15060_v4 = vmul.f32 %v23707_v10, %v15049_v56  ;;  %v15019_v7 = vpop.f32.mrb[241].mxu1  ;;  %23713 = vmatprep.subr.bf16.mxu0 %v31367_v16 }
 0xc57   : > { %v15092_v30 = vpack.c.bf16 %v15083_v28, %v15082_v49  ;;  %v15058_v53 = vmul.f32 %v15049_v56, %v15019_v7  ;;  %v23708_v58 = vpop.f32.mrb[242].mxu1 }
 0xc58   : > { %v15076_v36 = vadd.f32 %v15065_v35, %v15060_v4  ;;  %v15061_v40 = vmul.f32 %v23708_v58, %v15049_v56  ;;  %v15022_v45 = vpop.f32.mrb[243].mxu1 }
 0xc59   : > { %v15074_v17 = vadd.f32 %v15065_v35, %v15058_v53  ;;  %v15059_v5 = vmul.f32 %v15049_v56, %v15022_v45  ;;  %23714 = vmatpush3.bf16.msra.mxu0 %v15092_v30  ;;  %v26005_v56 = vld [vmem:[%s31267_s6 + $0x10] sm:$0xff]  }
 0xc5a   : > { %v15077_v37 = vadd.f32 %v15065_v35, %v15061_v40  ;;  %23715 = vmatprep.subr.bf16.mxu0 %v31367_v16  ;;  %v15088_v54 = vmax.f32 %v15076_v36, 0.0 }
 0xc5b   : > { %v15075_v12 = vadd.f32 %v15065_v35, %v15059_v5  ;;  %v15086_v25 = vmax.f32 %v15074_v17, 0.0  ;;  %v26006_v35 = vld [vmem:[%s31267_s6 + $0x18] sm:$0xff]  }
 0xc5c   : > { %v15089_v61 = vmax.f32 %v15077_v37, 0.0  ;;  %v26020_v37 = vld [vmem:[%s31262_s1 + $0x710] sm:$0xff]  }
 0xc5d   : > { %v15087_v9 = vmax.f32 %v15075_v12, 0.0  ;;  %23716 = vmatpush3.bf16.msra.mxu0 %v15093_v22  ;;  %v26019_v22 = vld [vmem:[%s31262_s1 + $0x708] sm:$0xff]  }
 0xc5e   : > { %v15095_v39 = vpack.c.bf16 %v15089_v61, %v15088_v54  ;;  %23717 = vmatprep.subr.bf16.mxu0 %v31367_v16 }
 0xc5f   : > { %v15094_v2 = vpack.c.bf16 %v15087_v9, %v15086_v25 }
 0xc61   : > { %23718 = vmatpush3.bf16.msra.mxu0 %v15094_v2 }
 0xc62   : > { %23719 = vmatprep.subr.bf16.mxu0 %v31367_v16 }
 0xc65   : > { %23720 = vmatpush3.bf16.msra.mxu0 %v15095_v39 }
 0xc66   : > { %23749 = vmatprep.subr.bf16.mxu0 %v31367_v16 }
 0xc68   : > { %23722 = vmatmul.mubr.msk.bf16.vlgmr.msra.gmra.mrb[136].mxu0 %vm15145_vm11, %v26003_v11 }
 0xc69   : > { %23725 = vmatprep.mubr.msk.bf16.mxu0 %vm26204_vm6, %v31367_v16  ;;  %23750 = vmatpush3.bf16.msra.mxu0 %v26010_v51 }
 0xc6a   : > { %23751 = vmatprep.subr.bf16.mxu0 %v31367_v16 }
 0xc6d   : > { %23752 = vmatpush3.bf16.msra.mxu0 %v26011_v15 }
 0xc6e   : > { %23753 = vmatprep.subr.bf16.mxu0 %v31367_v16 }
 0xc70   : > { %23726 = vmatmul.mubr.msk.bf16.gmra.mrb[140].mxu0 %vm15145_vm11, %v26004_v46 }
 0xc71   : > { %23729 = vmatprep.mubr.msk.bf16.mxu0 %vm26204_vm6, %v31367_v16  ;;  %23754 = vmatpush3.bf16.msra.mxu0 %v26012_v60 }
 0xc72   : > { %23755 = vmatprep.subr.bf16.mxu0 %v31367_v16 }
 0xc75   : > { %23756 = vmatpush3.bf16.msra.mxu0 %v26013_v57 }
 0xc76   : > { %23757 = vmatprep.subr.bf16.mxu0 %v31367_v16 }
 0xc78   : > { %23730 = vmatmul.mubr.msk.bf16.gmra.mrb[144].mxu0 %vm15145_vm11, %v26005_v56 }
 0xc79   : > { %23733 = vmatprep.mubr.msk.bf16.mxu0 %vm26204_vm6, %v31367_v16  ;;  %23758 = vmatpush3.bf16.msra.mxu0 %v26014_v23 }
 0xc7a   : > { %23759 = vmatprep.subr.bf16.mxu0 %v31367_v16 }
 0xc7d   : > { %23760 = vmatpush3.bf16.msra.mxu0 %v26015_v13 }
 0xc7e   : > { %23761 = vmatprep.subr.bf16.mxu0 %v31367_v16 }
 0xc80   : > { %23734 = vmatmul.mubr.msk.bf16.gmra.mrb[148].mxu0 %vm15145_vm11, %v26006_v35 }
 0xc81   : > { %23737 = vmatprep.mubr.msk.bf16.mxu0 %vm26204_vm6, %v31367_v16  ;;  %23762 = vmatpush3.bf16.msra.mxu0 %v26016_v14 }
 0xc82   : > { %23763 = vmatprep.subr.bf16.mxu0 %v31367_v16 }
 0xc85   : > { %23764 = vmatpush3.bf16.msra.mxu0 %v26017_v21 }
 0xc86   : > { %23785 = vmatprep.subr.bf16.mxu0 %v31367_v16 }
 0xc88   : > { %23738 = vmatmul.mubr.msk.bf16.gmra.mrb[152].mxu0 %vm15145_vm11, %v26007_v33  ;;  %v26021_v33 = vld [vmem:[%s31262_s1 + $0x718] sm:$0xff]  }
 0xc89   : > { %23741 = vmatprep.mubr.msk.bf16.mxu0 %vm26204_vm6, %v31367_v16 }
 0xc90   : > { %23742 = vmatmul.mubr.msk.bf16.gmra.mrb[156].mxu0 %vm15145_vm11, %v26008_v55 }
 0xc91   : > { %23745 = vmatprep.mubr.msk.bf16.mxu0 %vm26204_vm6, %v31367_v16 }
 0xc98   : > { %23746 = vmatmul.mubr.msk.bf16.gmra.mrb[160].mxu0 %vm15145_vm11, %v26009_v41 }
 0xc99   : > { %23765 = vmatprep.mubr.msk.bf16.mxu0 %vm26204_vm6, %v31367_v16 }
 0xd3b   : > { %v15201_v24 = vpop.f32.mrb[136].mxu0 }
 0xd3c   : > { %v23723_v50 = vpop.f32.mrb[137].mxu0 }
 0xd3d   : > { %v15204_v27 = vpop.f32.mrb[138].mxu0 }
 0xd3e   : > { %v30344_v1 = vpack.c.bf16 %v15204_v27, %v15201_v24  ;;  %v23724_v63 = vpop.f32.mrb[139].mxu0 }
 0xd40   : > { %15263 = vst [vmem:[#allocation5] sm:$0xff] %v30344_v1  ;;  %v15315_v59 = vshll.u32 %v30344_v1, 16  ;;  %v15313_v20 = vshrl.u32 %v30344_v1, 16 }
 0xd42   : > { %v15317_v47 = vrot.slane %v15315_v59, 1 }
 0xd43   : > { %v15209_v0 = vpop.f32.mrb[140].mxu0 }
 0xd44   : > { %v23727_v34 = vpop.f32.mrb[141].mxu0  ;;  %v15318_v18 = vor.u32 %v15317_v47, %v15313_v20 }
 0xd45   : > { %v15212_v62 = vpop.f32.mrb[142].mxu0 }
 0xd46   : > { %v30348_v8 = vpack.c.bf16 %v15212_v62, %v15209_v0  ;;  %v23728_v31 = vpop.f32.mrb[143].mxu0  ;;  %v26022_v0 = vld [vmem:[%s31262_s1 + $0x720] sm:$0xff]  }
 0xd48   : > { %15264 = vst [vmem:[#allocation5 + $0x8] sm:$0xff] %v30348_v8  ;;  %v15320_v52 = vshll.u32 %v30348_v8, 16  ;;  %v15324_v38 = vshrl.u32 %v30348_v8, 16  ;;  %v15628_v4 = vrot.slane %v30348_v8, 1  ;;  %v15796_v7 = vrot.slane %v30348_v8, 5 }
 0xd49   : > { %v16151_v45 = vrot.slane %v30348_v8, 6 }
 0xd4a   : > { %v15322_v44 = vrot.slane %v15320_v52, 1  ;;  %v15969_v42 = vrot.slane %v15324_v38, 5  ;;  %v15970_v3 = vrot.slane %v15320_v52, 6 }
 0xd4b   : > { %v15217_v29 = vpop.f32.mrb[144].mxu0 }
 0xd4c   : > { %v23731_v6 = vpop.f32.mrb[145].mxu0  ;;  %v15323_v26 = vsel %vm1373_vm0, %v15318_v18, %v15322_v44  ;;  %v30358_v43 = vor.u32 %v15970_v3, %v15969_v42  ;;  %v15326_v40 = vor.u32 %v15324_v38, %v15322_v44 }
 0xd4d   : > { %v15220_v49 = vpop.f32.mrb[146].mxu0  ;;  %23766 = vmatmul.mubr.bf16.vlgmr.msra.gmra.mrb[164].mxu0 %v15323_v26 }
 0xd4e   : > { %v30360_v28 = vpack.c.bf16 %v15220_v49, %v15217_v29  ;;  %v23732_v10 = vpop.f32.mrb[147].mxu0  ;;  %23769 = vmatprep.mubr.msk.bf16.mxu0 %vm26204_vm6, %v31367_v16  ;;  %23786 = vmatpush3.bf16.msra.mxu0 %v26018_v19 }
 0xd4f   : > { %23787 = vmatprep.subr.bf16.mxu0 %v31367_v16 }
 0xd50   : > { %v15328_v30 = vshll.u32 %v30360_v28, 16  ;;  %v15332_v53 = vshrl.u32 %v30360_v28, 16  ;;  %v15630_v58 = vrot.slane %v30360_v28, 1  ;;  %v15798_v36 = vrot.slane %v30360_v28, 5 }
 0xd51   : > { %v16153_v17 = vrot.slane %v30360_v28, 6  ;;  %v16327_v41 = vrot.slane %v30360_v28, 2  ;;  %v16701_v18 = vrot.slane %v30360_v28, 3 }
 0xd52   : > { %v15330_v5 = vrot.slane %v15328_v30, 1  ;;  %23788 = vmatpush3.bf16.msra.mxu0 %v26019_v22  ;;  %v30382_v12 = vsel %vm1715_vm1, %v15628_v4, %v15630_v58  ;;  %v30387_v54 = vsel %vm14167_vm9, %v15796_v7, %v15798_v36  ;;  %v15973_v61 = vrot.slane %v15332_v53, 5  ;;  %v26023_v22 = vld [vmem:[%s31262_s1 + $0x728] sm:$0xff]  }
 0xd53   : > { %v15225_v25 = vpop.f32.mrb[148].mxu0  ;;  %23789 = vmatprep.subr.bf16.mxu0 %v31367_v16  ;;  %v15974_v9 = vrot.slane %v15328_v30, 6  ;;  %v30393_v39 = vsel %vm14349_vm10, %v16151_v45, %v16153_v17  ;;  %v16502_v51 = vrot.slane %v15332_v53, 2  ;;  %v16505_v60 = vrot.slane %v15328_v30, 3 }
 0xd54   : > { %v23735_v2 = vpop.f32.mrb[149].mxu0  ;;  %v15331_v11 = vsel %vm1373_vm0, %v15326_v40, %v15330_v5  ;;  %v15334_v24 = vor.u32 %v15332_v53, %v15330_v5 }
 0xd55   : > { %v15228_v15 = vpop.f32.mrb[150].mxu0  ;;  %23770 = vmatmul.mubr.bf16.gmra.mrb[168].mxu0 %v15331_v11  ;;  %v15975_v46 = vor.u32 %v15974_v9, %v15973_v61  ;;  %v30409_v57 = vor.u32 %v16505_v60, %v16502_v51  ;;  %v26024_v11 = vld [vmem:[%s31262_s1 + $0x730] sm:$0xff]  }
 0xd56   : > { %v30396_v56 = vpack.c.bf16 %v15228_v15, %v15225_v25  ;;  %v23736_v35 = vpop.f32.mrb[151].mxu0  ;;  %23773 = vmatprep.mubr.msk.bf16.mxu0 %vm26204_vm6, %v31367_v16  ;;  %23790 = vmatpush3.bf16.msra.mxu0 %v26020_v37 }
 0xd57   : > { %23791 = vmatprep.subr.bf16.mxu0 %v31367_v16  ;;  %v30406_v55 = vsel %vm15960_vm12, %v30358_v43, %v15975_v46 }
 0xd58   : > { %v15336_v23 = vshll.u32 %v30396_v56, 16  ;;  %v15340_v13 = vshrl.u32 %v30396_v56, 16  ;;  %v15632_v14 = vrot.slane %v30396_v56, 1  ;;  %v15800_v21 = vrot.slane %v30396_v56, 5 }
 0xd59   : > { %v16155_v50 = vrot.slane %v30396_v56, 6  ;;  %v16329_v27 = vrot.slane %v30396_v56, 2  ;;  %v16703_v63 = vrot.slane %v30396_v56, 3 }
 0xd5a   : > { %v15338_v59 = vrot.slane %v15336_v23, 1  ;;  %23792 = vmatpush3.bf16.msra.mxu0 %v26021_v33  ;;  %v30422_v34 = vsel %vm1715_vm1, %v15630_v58, %v15632_v14  ;;  %v30425_v62 = vsel %vm14167_vm9, %v15798_v36, %v15800_v21  ;;  %v15977_v31 = vrot.slane %v15340_v13, 5 }
 0xd5b   : > { %v15233_v47 = vpop.f32.mrb[152].mxu0  ;;  %23793 = vmatprep.subr.bf16.mxu0 %v31367_v16  ;;  %v15978_v20 = vrot.slane %v15336_v23, 6  ;;  %v30429_v52 = vsel %vm14349_vm10, %v16153_v17, %v16155_v50  ;;  %v30434_v38 = vsel %vm2315_vm2, %v16327_v41, %v16329_v27  ;;  %v16511_v19 = vrot.slane %v15340_v13, 2 }
 0xd5c   : > { %v23739_v44 = vpop.f32.mrb[153].mxu0  ;;  %v15339_v42 = vsel %vm1373_vm0, %v15334_v24, %v15338_v59  ;;  %v16514_v3 = vrot.slane %v15336_v23, 3  ;;  %v30441_v26 = vsel %vm2915_vm4, %v16701_v18, %v16703_v63  ;;  %v15342_v53 = vor.u32 %v15340_v13, %v15338_v59 }
 0xd5d   : > { %v15236_v29 = vpop.f32.mrb[154].mxu0  ;;  %23774 = vmatmul.mubr.bf16.gmra.mrb[172].mxu0 %v15339_v42  ;;  %v15979_v6 = vor.u32 %v15978_v20, %v15977_v31 }
 0xd5e   : > { %v30443_v49 = vpack.c.bf16 %v15236_v29, %v15233_v47  ;;  %v23740_v10 = vpop.f32.mrb[155].mxu0  ;;  %23777 = vmatprep.mubr.msk.bf16.mxu0 %vm26204_vm6, %v31367_v16  ;;  %23794 = vmatpush3.bf16.msra.mxu0 %v26022_v0  ;;  %v16515_v30 = vor.u32 %v16514_v3, %v16511_v19 }
 0xd5f   : > { %23795 = vmatprep.subr.bf16.mxu0 %v31367_v16  ;;  %v30452_v58 = vsel %vm15960_vm12, %v15975_v46, %v15979_v6 }
 0xd60   : > { %v15344_v36 = vshll.u32 %v30443_v49, 16  ;;  %v15348_v40 = vshrl.u32 %v30443_v49, 16  ;;  %v15634_v17 = vrot.slane %v30443_v49, 1  ;;  %v15802_v5 = vrot.slane %v30443_v49, 5 }
 0xd61   : > { %v16157_v37 = vrot.slane %v30443_v49, 6  ;;  %v16331_v61 = vrot.slane %v30443_v49, 2  ;;  %v30462_v25 = vsel %vm2685_vm5, %v30409_v57, %v16515_v30  ;;  %v16705_v9 = vrot.slane %v30443_v49, 3 }
 0xd62   : > { %v15346_v2 = vrot.slane %v15344_v36, 1  ;;  %23796 = vmatpush3.bf16.msra.mxu0 %v26023_v22  ;;  %v30469_v51 = vsel %vm1715_vm1, %v15632_v14, %v15634_v17  ;;  %v30474_v15 = vsel %vm14167_vm9, %v15800_v21, %v15802_v5  ;;  %v15981_v46 = vrot.slane %v15348_v40, 5 }
 0xd63   : > { %v15241_v60 = vpop.f32.mrb[156].mxu0  ;;  %23797 = vmatprep.subr.bf16.mxu0 %v31367_v16  ;;  %v15982_v35 = vrot.slane %v15344_v36, 6  ;;  %v30480_v33 = vsel %vm14349_vm10, %v16155_v50, %v16157_v37  ;;  %v30483_v23 = vsel %vm2315_vm2, %v16329_v27, %v16331_v61  ;;  %v16520_v13 = vrot.slane %v15348_v40, 2  ;;  %v26025_v50 = vld [vmem:[%s31262_s1 + $0x738] sm:$0xff]  }
 0xd64   : > { %v23743_v14 = vpop.f32.mrb[157].mxu0  ;;  %v15347_v24 = vsel %vm1373_vm0, %v15342_v53, %v15346_v2  ;;  %v16523_v59 = vrot.slane %v15344_v36, 3  ;;  %v30487_v21 = vsel %vm2915_vm4, %v16703_v63, %v16705_v9 }
 0xd65   : > { %v15244_v0 = vpop.f32.mrb[158].mxu0  ;;  %23778 = vmatmul.mubr.bf16.gmra.mrb[176].mxu0 %v15347_v24  ;;  %v30489_v31 = vor.u32 %v15982_v35, %v15981_v46 }
 0xd66   : > { %v30491_v47 = vpack.c.bf16 %v15244_v0, %v15241_v60  ;;  %v23744_v20 = vpop.f32.mrb[159].mxu0  ;;  %23781 = vmatprep.mubr.msk.bf16.mxu0 %vm26204_vm6, %v31367_v16  ;;  %23798 = vmatpush3.bf16.msra.mxu0 %v26024_v11  ;;  %v16524_v27 = vor.u32 %v16523_v59, %v16520_v13  ;;  %v15350_v59 = vor.u32 %v15348_v40, %v15346_v2  ;;  %v26027_v40 = vld [vmem:[%s31262_s1 + $0x788] sm:$0xff]   ;;  %v26030_v2 = vld [vmem:[%s31262_s1 + $0x7a0] sm:$0xff]  }
 0xd67   : > { %23799 = vmatprep.subr.bf16.mxu0 %v31367_v16  ;;  %v30501_v63 = vsel %vm15960_vm12, %v15979_v6, %v30489_v31 }
 0xd68   : > { %15268 = vst [vmem:[#allocation5 + $0x28] sm:$0xff] %v30491_v47  ;;  %v16333_v44 = vrot.slane %v30491_v47, 2  ;;  %v30506_v42 = vsel %vm2685_vm5, %v16515_v30, %v16524_v27  ;;  %v16527_v19 = vshrl.u32 %v30491_v47, 16  ;;  %v16530_v3 = vshll.u32 %v30491_v47, 16 }
 0xd69   : > { %v16707_v29 = vrot.slane %v30491_v47, 3 }
 0xd6a   : > { %23800 = vmatpush3.bf16.msra.mxu0 %v26025_v50  ;;  %v30514_v10 = vsel %vm2315_vm2, %v16331_v61, %v16333_v44  ;;  %v16529_v6 = vrot.slane %v16527_v19, 2  ;;  %v16532_v22 = vrot.slane %v16530_v3, 3  ;;  %v26026_v50 = vld [vmem:[%s31262_s1 + $0x780] sm:$0xff]   ;;  %v26032_v19 = vld [vmem:[%s31262_s1 + $0x7b0] sm:$0xff]   ;;  %v26033_v3 = vld [vmem:[%s31262_s1 + $0x7b8] sm:$0xff]  }
 0xd6b   : > { %v15249_v53 = vpop.f32.mrb[160].mxu0  ;;  %23821 = vmatprep.subr.bf16.mxu0 %v31367_v16  ;;  %v30520_v30 = vsel %vm2915_vm4, %v16705_v9, %v16707_v29 }
 0xd6c   : > { %v23747_v36 = vpop.f32.mrb[161].mxu0  ;;  %v30522_v11 = vor.u32 %v16532_v22, %v16529_v6  ;;  %v15603_v6 = vld [vmem:[#allocation5] sm:$0xfe] }
 0xd6d   : > { %v15252_v46 = vpop.f32.mrb[162].mxu0  ;;  %v26034_v22 = vld [vmem:[%s31262_s1 + $0x7c0] sm:$0xff]   ;;  %v26035_v36 = vld [vmem:[%s31262_s1 + $0x7c8] sm:$0xff]  }
 0xd6e   : > { %v15262_v60 = vpack.c.bf16 %v15252_v46, %v15249_v53  ;;  %v23748_v35 = vpop.f32.mrb[163].mxu0  ;;  %v30526_v61 = vsel %vm2685_vm5, %v16524_v27, %v30522_v11  ;;  %v26031_v27 = vld [vmem:[%s31262_s1 + $0x7a8] sm:$0xff]   ;;  %v26036_v46 = vld [vmem:[%s31262_s1 + $0x7d0] sm:$0xff]  }
 0xd6f   : > { %v15294_v13 = vld [vmem:[#allocation5 + $0x28] sm:$0x1]  ;;  %v26040_v35 = vld [vmem:[%s31262_s1 + $0x7f0] sm:$0xff]  }
 0xd70   : > { %15269 = vst [vmem:[#allocation5 + $0x30] sm:$0xff] %v15262_v60  ;;  %v15352_v14 = vshll.u32 %v15294_v13, 16  ;;  %v15636_v24 = vrot.slane %v15294_v13, 1  ;;  %v26038_v60 = vld [vmem:[%s31262_s1 + $0x7e0] sm:$0xff]  }
 0xd71   : > { %v15774_v13 = vld [vmem:[#allocation5] sm:$0xe0] }
 0xd72   : > { %v15354_v0 = vrot.slane %v15352_v14, 1  ;;  %v30529_v20 = vsel %vm1715_vm1, %v15634_v17, %v15636_v24  ;;  %v26028_v17 = vld [vmem:[%s31262_s1 + $0x790] sm:$0xff]   ;;  %v26042_v14 = vld [vmem:[%s31262_s1 + $0x800] sm:$0xff]  }
 0xd74   : > { %v15355_v9 = vsel %vm1373_vm0, %v15350_v59, %v15354_v0  ;;  %v26043_v59 = vld [vmem:[%s31262_s1 + $0x808] sm:$0xff]   ;;  %v26044_v0 = vld [vmem:[%s31262_s1 + $0x810] sm:$0xff]  }
 0xd75   : > { %23782 = vmatmul.mubr.bf16.gmra.mrb[180].mxu0 %v15355_v9  ;;  %v26048_v9 = vld [vmem:[%s31262_s1 + $0x830] sm:$0xff]  }
 0xd76   : > { %23801 = vmatprep.mubr.msk.bf16.mxu0 %vm26204_vm6, %v31367_v16 }
 0xd7d   : > { %23802 = vmatmul.mubr.bf16.vlgmr.msra.gmra.mrb[164].mxu0 %v30344_v1  ;;  %v26029_v1 = vld [vmem:[%s31262_s1 + $0x798] sm:$0xff]  }
 0xd7e   : > { %23805 = vmatprep.mubr.msk.bf16.mxu0 %vm26204_vm6, %v31367_v16  ;;  %23822 = vmatpush3.bf16.msra.mxu0 %v26026_v50  ;;  %v26049_v50 = vld [vmem:[%s31262_s1 + $0x838] sm:$0xff]  }
 0xd7f   : > { %23823 = vmatprep.subr.bf16.mxu0 %v31367_v16 }
 0xd82   : > { %23824 = vmatpush3.bf16.msra.mxu0 %v26027_v40 }
 0xd83   : > { %23825 = vmatprep.subr.bf16.mxu0 %v31367_v16 }
 0xd85   : > { %23806 = vmatmul.mubr.bf16.gmra.mrb[168].mxu0 %v30348_v8  ;;  %v26061_v8 = vld [vmem:[%s31262_s1 + $0x898] sm:$0xff]  }
 0xd86   : > { %23809 = vmatprep.mubr.msk.bf16.mxu0 %vm26204_vm6, %v31367_v16  ;;  %23826 = vmatpush3.bf16.msra.mxu0 %v26028_v17  ;;  %v15962_v17 = vshrl.u32 %v15774_v13, 16 }
 0xd87   : > { %23827 = vmatprep.subr.bf16.mxu0 %v31367_v16 }
 0xd8a   : > { %23828 = vmatpush3.bf16.msra.mxu0 %v26029_v1  ;;  %v15965_v1 = vshll.u32 %v15774_v13, 16 }
 0xd8b   : > { %23829 = vmatprep.subr.bf16.mxu0 %v31367_v16 }
 0xd8d   : > { %23810 = vmatmul.mubr.bf16.gmra.mrb[172].mxu0 %v30360_v28 }
 0xd8e   : > { %23813 = vmatprep.mubr.msk.bf16.mxu0 %vm26204_vm6, %v31367_v16  ;;  %23830 = vmatpush3.bf16.msra.mxu0 %v26030_v2  ;;  %v15964_v2 = vrot.slane %v15962_v17, 5 }
 0xd8f   : > { %23831 = vmatprep.subr.bf16.mxu0 %v31367_v16 }
 0xd92   : > { %23832 = vmatpush3.bf16.msra.mxu0 %v26031_v27  ;;  %v15967_v27 = vrot.slane %v15965_v1, 6 }
 0xd93   : > { %23833 = vmatprep.subr.bf16.mxu0 %v31367_v16 }
 0xd95   : > { %23814 = vmatmul.mubr.bf16.gmra.mrb[176].mxu0 %v30396_v56  ;;  %v15627_v56 = vrot.slane %v15603_v6, 1 }
 0xd96   : > { %23817 = vmatprep.mubr.msk.bf16.mxu0 %vm26204_vm6, %v31367_v16  ;;  %23834 = vmatpush3.bf16.msra.mxu0 %v26032_v19  ;;  %v15968_v19 = vor.u32 %v15967_v27, %v15964_v2 }
 0xd97   : > { %23835 = vmatprep.subr.bf16.mxu0 %v31367_v16  ;;  %v15629_v53 = vsel %vm1715_vm1, %v15627_v56, %v15628_v4  ;;  %v26037_v4 = vld [vmem:[%s31262_s1 + $0x7d8] sm:$0xff]   ;;  %v26052_v56 = vld [vmem:[%s31262_s1 + $0x850] sm:$0xff]  }
 0xd98   : > { %v15972_v6 = vsel %vm15960_vm12, %v15968_v19, %v30358_v43  ;;  %v26053_v43 = vld [vmem:[%s31262_s1 + $0x858] sm:$0xff]  }
 0xd9a   : > { %23836 = vmatpush3.bf16.msra.mxu0 %v26033_v3  ;;  %v26050_v3 = vld [vmem:[%s31262_s1 + $0x840] sm:$0xff]  }
 0xd9b   : > { %23857 = vmatprep.subr.bf16.mxu0 %v31367_v16 }
 0xd9d   : > { %23818 = vmatmul.mubr.bf16.gmra.mrb[180].mxu0 %v30443_v49  ;;  %v26067_v49 = vld [vmem:[%s31262_s1 + $0x8c8] sm:$0xff]  }
 0xd9e   : > { %23837 = vmatprep.mubr.msk.bf16.mxu0 %vm26204_vm6, %v31367_v16 }
 0xda5   : > { %23838 = vmatmul.mubr.bf16.vlgmr.msra.gmra.mrb[164].mxu0 %v15629_v53  ;;  %v26055_v53 = vld [vmem:[%s31262_s1 + $0x868] sm:$0xff]  }
 0xda6   : > { %23841 = vmatprep.mubr.msk.bf16.mxu0 %vm26204_vm6, %v31367_v16  ;;  %23858 = vmatpush3.bf16.msra.mxu0 %v26034_v22  ;;  %v26054_v22 = vld [vmem:[%s31262_s1 + $0x860] sm:$0xff]  }
 0xda7   : > { %23859 = vmatprep.subr.bf16.mxu0 %v31367_v16 }
 0xdaa   : > { %23860 = vmatpush3.bf16.msra.mxu0 %v26035_v36 }
 0xdab   : > { %23861 = vmatprep.subr.bf16.mxu0 %v31367_v16 }
 0xdad   : > { %23842 = vmatmul.mubr.bf16.gmra.mrb[168].mxu0 %v30382_v12  ;;  %v26039_v12 = vld [vmem:[%s31262_s1 + $0x7e8] sm:$0xff]  }
 0xdae   : > { %23845 = vmatprep.mubr.msk.bf16.mxu0 %vm26204_vm6, %v31367_v16  ;;  %23862 = vmatpush3.bf16.msra.mxu0 %v26036_v46 }
 0xdaf   : > { %23863 = vmatprep.subr.bf16.mxu0 %v31367_v16 }
 0xdb2   : > { %23864 = vmatpush3.bf16.msra.mxu0 %v26037_v4  ;;  %v26056_v4 = vld [vmem:[%s31262_s1 + $0x870] sm:$0xff]  }
 0xdb3   : > { %23865 = vmatprep.subr.bf16.mxu0 %v31367_v16 }
 0xdb5   : > { %23846 = vmatmul.mubr.bf16.gmra.mrb[172].mxu0 %v30422_v34  ;;  %v26041_v34 = vld [vmem:[%s31262_s1 + $0x7f8] sm:$0xff]  }
 0xdb6   : > { %23849 = vmatprep.mubr.msk.bf16.mxu0 %vm26204_vm6, %v31367_v16  ;;  %23866 = vmatpush3.bf16.msra.mxu0 %v26038_v60 }
 0xdb7   : > { %23867 = vmatprep.subr.bf16.mxu0 %v31367_v16 }
 0xdba   : > { %23868 = vmatpush3.bf16.msra.mxu0 %v26039_v12  ;;  %v26057_v12 = vld [vmem:[%s31262_s1 + $0x878] sm:$0xff]  }
 0xdbb   : > { %23869 = vmatprep.subr.bf16.mxu0 %v31367_v16 }
 0xdbd   : > { %23850 = vmatmul.mubr.bf16.gmra.mrb[176].mxu0 %v30469_v51  ;;  %v15795_v51 = vrot.slane %v15774_v13, 5  ;;  %v16130_v13 = vld [vmem:[#allocation5] sm:$0xc0] }
 0xdbe   : > { %23853 = vmatprep.mubr.msk.bf16.mxu0 %vm26204_vm6, %v31367_v16  ;;  %23870 = vmatpush3.bf16.msra.mxu0 %v26040_v35 }
 0xdbf   : > { %23871 = vmatprep.subr.bf16.mxu0 %v31367_v16  ;;  %v15797_v24 = vsel %vm14167_vm9, %v15795_v51, %v15796_v7  ;;  %v26045_v7 = vld [vmem:[%s31262_s1 + $0x818] sm:$0xff]   ;;  %v26058_v51 = vld [vmem:[%s31262_s1 + $0x880] sm:$0xff]  }
 0xdc2   : > { %23872 = vmatpush3.bf16.msra.mxu0 %v26041_v34 }
 0xdc3   : > { %23893 = vmatprep.subr.bf16.mxu0 %v31367_v16 }
 0xdc5   : > { %23854 = vmatmul.mubr.bf16.gmra.mrb[180].mxu0 %v30529_v20  ;;  %v26046_v20 = vld [vmem:[%s31262_s1 + $0x820] sm:$0xff]  }
 0xdc6   : > { %23873 = vmatprep.mubr.msk.bf16.mxu0 %vm26204_vm6, %v31367_v16 }
 0xdcd   : > { %23874 = vmatmul.mubr.bf16.vlgmr.msra.gmra.mrb[164].mxu0 %v15797_v24  ;;  %v26060_v24 = vld [vmem:[%s31262_s1 + $0x890] sm:$0xff]  }
 0xdce   : > { %23877 = vmatprep.mubr.msk.bf16.mxu0 %vm26204_vm6, %v31367_v16  ;;  %23894 = vmatpush3.bf16.msra.mxu0 %v26042_v14 }
 0xdcf   : > { %23895 = vmatprep.subr.bf16.mxu0 %v31367_v16 }
 0xdd2   : > { %23896 = vmatpush3.bf16.msra.mxu0 %v26043_v59  ;;  %v26064_v59 = vld [vmem:[%s31262_s1 + $0x8b0] sm:$0xff]  }
 0xdd3   : > { %23897 = vmatprep.subr.bf16.mxu0 %v31367_v16 }
 0xdd5   : > { %23878 = vmatmul.mubr.bf16.gmra.mrb[168].mxu0 %v30387_v54  ;;  %v26047_v54 = vld [vmem:[%s31262_s1 + $0x828] sm:$0xff]  }
 0xdd6   : > { %23881 = vmatprep.mubr.msk.bf16.mxu0 %vm26204_vm6, %v31367_v16  ;;  %23898 = vmatpush3.bf16.msra.mxu0 %v26044_v0 }
 0xdd7   : > { %23899 = vmatprep.subr.bf16.mxu0 %v31367_v16 }
 0xdda   : > { %23900 = vmatpush3.bf16.msra.mxu0 %v26045_v7 }
 0xddb   : > { %23901 = vmatprep.subr.bf16.mxu0 %v31367_v16 }
 0xddd   : > { %23882 = vmatmul.mubr.bf16.gmra.mrb[172].mxu0 %v30425_v62  ;;  %v15775_v62 = vld [vmem:[#allocation5 + $0x28] sm:$0x1f] }
 0xdde   : > { %23885 = vmatprep.mubr.msk.bf16.mxu0 %vm26204_vm6, %v31367_v16  ;;  %23902 = vmatpush3.bf16.msra.mxu0 %v26046_v20  ;;  %v15804_v40 = vrot.slane %v15775_v62, 5  ;;  %v26070_v62 = vld [vmem:[%s31262_s1 + $0x8e0] sm:$0xff]  }
 0xddf   : > { %23903 = vmatprep.subr.bf16.mxu0 %v31367_v16 }
 0xde2   : > { %23904 = vmatpush3.bf16.msra.mxu0 %v26047_v54  ;;  %v26066_v54 = vld [vmem:[%s31262_s1 + $0x8c0] sm:$0xff]  }
 0xde3   : > { %23905 = vmatprep.subr.bf16.mxu0 %v31367_v16 }
 0xde5   : > { %23886 = vmatmul.mubr.bf16.gmra.mrb[176].mxu0 %v30474_v15  ;;  %v15805_v15 = vsel %vm14167_vm9, %v15802_v5, %v15804_v40  ;;  %v26051_v5 = vld [vmem:[%s31262_s1 + $0x848] sm:$0xff]   ;;  %v26073_v40 = vld [vmem:[%s31262_s1 + $0x8f8] sm:$0xff]  }
 0xde6   : > { %23889 = vmatprep.mubr.msk.bf16.mxu0 %vm26204_vm6, %v31367_v16  ;;  %23906 = vmatpush3.bf16.msra.mxu0 %v26048_v9 }
 0xde7   : > { %23907 = vmatprep.subr.bf16.mxu0 %v31367_v16 }
 0xdea   : > { %23908 = vmatpush3.bf16.msra.mxu0 %v26049_v50  ;;  %v26072_v50 = vld [vmem:[%s31262_s1 + $0x8f0] sm:$0xff]  }
 0xdeb   : > { %23929 = vmatprep.subr.bf16.mxu0 %v31367_v16 }
 0xded   : > { %23890 = vmatmul.mubr.bf16.gmra.mrb[180].mxu0 %v15805_v15 }
 0xdee   : > { %23909 = vmatprep.mubr.msk.bf16.mxu0 %vm26204_vm6, %v31367_v16 }
 0xdf5   : > { %23910 = vmatmul.mubr.bf16.vlgmr.msra.gmra.mrb[164].mxu0 %v15972_v6 }
 0xdf6   : > { %23913 = vmatprep.mubr.msk.bf16.mxu0 %vm26204_vm6, %v31367_v16  ;;  %23930 = vmatpush3.bf16.msra.mxu0 %v26050_v3  ;;  %v26074_v3 = vld [vmem:[%s31262_s1 + $0x900] sm:$0xff]  }
 0xdf7   : > { %23931 = vmatprep.subr.bf16.mxu0 %v31367_v16 }
 0xdfa   : > { %23932 = vmatpush3.bf16.msra.mxu0 %v26051_v5  ;;  %v26076_v5 = vld [vmem:[%s31262_s1 + $0x910] sm:$0xff]  }
 0xdfb   : > { %23933 = vmatprep.subr.bf16.mxu0 %v31367_v16 }
 0xdfd   : > { %23914 = vmatmul.mubr.bf16.gmra.mrb[168].mxu0 %v30406_v55  ;;  %v15942_v55 = vld [vmem:[#allocation5 + $0x28] sm:$0x3f] }
 0xdfe   : > { %23917 = vmatprep.mubr.msk.bf16.mxu0 %vm26204_vm6, %v31367_v16  ;;  %23934 = vmatpush3.bf16.msra.mxu0 %v26052_v56  ;;  %v15986_v36 = vshrl.u32 %v15942_v55, 16  ;;  %v15989_v46 = vshll.u32 %v15942_v55, 16  ;;  %v16159_v0 = vrot.slane %v15942_v55, 6  ;;  %v26078_v56 = vld [vmem:[%s31262_s1 + $0x920] sm:$0xff]  }
 0xdff   : > { %23935 = vmatprep.subr.bf16.mxu0 %v31367_v16 }
 0xe00   : > { %v15991_v60 = vrot.slane %v15989_v46, 6  ;;  %v16160_v7 = vsel %vm14349_vm10, %v16157_v37, %v16159_v0  ;;  %v26068_v37 = vld [vmem:[%s31262_s1 + $0x8d0] sm:$0xff]   ;;  %v26081_v46 = vld [vmem:[%s31262_s1 + $0x938] sm:$0xff]  }
 0xe02   : > { %23936 = vmatpush3.bf16.msra.mxu0 %v26053_v43  ;;  %v26079_v43 = vld [vmem:[%s31262_s1 + $0x928] sm:$0xff]  }
 0xe03   : > { %23937 = vmatprep.subr.bf16.mxu0 %v31367_v16 }
 0xe05   : > { %23918 = vmatmul.mubr.bf16.gmra.mrb[172].mxu0 %v30452_v58  ;;  %v15988_v58 = vrot.slane %v15986_v36, 5 }
 0xe06   : > { %23921 = vmatprep.mubr.msk.bf16.mxu0 %vm26204_vm6, %v31367_v16  ;;  %23938 = vmatpush3.bf16.msra.mxu0 %v26054_v22 }
 0xe07   : > { %23939 = vmatprep.subr.bf16.mxu0 %v31367_v16  ;;  %v15992_v35 = vor.u32 %v15991_v60, %v15988_v58  ;;  %v16680_v60 = vld [vmem:[#allocation5 + $0x8] sm:$0xf8] }
 0xe09   : > { %v15993_v34 = vsel %vm15960_vm12, %v30489_v31, %v15992_v35  ;;  %v26059_v31 = vld [vmem:[%s31262_s1 + $0x888] sm:$0xff]  }
 0xe0a   : > { %23940 = vmatpush3.bf16.msra.mxu0 %v26055_v53  ;;  %v26080_v53 = vld [vmem:[%s31262_s1 + $0x930] sm:$0xff]  }
 0xe0b   : > { %23941 = vmatprep.subr.bf16.mxu0 %v31367_v16 }
 0xe0d   : > { %23922 = vmatmul.mubr.bf16.gmra.mrb[176].mxu0 %v30501_v63  ;;  %v16150_v63 = vrot.slane %v16130_v13, 6 }
 0xe0e   : > { %23925 = vmatprep.mubr.msk.bf16.mxu0 %vm26204_vm6, %v31367_v16  ;;  %23942 = vmatpush3.bf16.msra.mxu0 %v26056_v4 }
 0xe0f   : > { %23943 = vmatprep.subr.bf16.mxu0 %v31367_v16  ;;  %v16152_v14 = vsel %vm14349_vm10, %v16150_v63, %v16151_v45  ;;  %v26062_v45 = vld [vmem:[%s31262_s1 + $0x8a0] sm:$0xff]  }
 0xe12   : > { %23944 = vmatpush3.bf16.msra.mxu0 %v26057_v12 }
 0xe13   : > { %23965 = vmatprep.subr.bf16.mxu0 %v31367_v16 }
 0xe15   : > { %23926 = vmatmul.mubr.bf16.gmra.mrb[180].mxu0 %v15993_v34 }
 0xe16   : > { %23945 = vmatprep.mubr.msk.bf16.mxu0 %vm26204_vm6, %v31367_v16 }
 0xe1d   : > { %23946 = vmatmul.mubr.bf16.vlgmr.msra.gmra.mrb[164].mxu0 %v16152_v14 }
 0xe1e   : > { %23949 = vmatprep.mubr.msk.bf16.mxu0 %vm26204_vm6, %v31367_v16  ;;  %23966 = vmatpush3.bf16.msra.mxu0 %v26058_v51 }
 0xe1f   : > { %23967 = vmatprep.subr.bf16.mxu0 %v31367_v16 }
 0xe22   : > { %23968 = vmatpush3.bf16.msra.mxu0 %v26059_v31 }
 0xe23   : > { %23969 = vmatprep.subr.bf16.mxu0 %v31367_v16 }
 0xe25   : > { %23950 = vmatmul.mubr.bf16.gmra.mrb[168].mxu0 %v30393_v39  ;;  %v26063_v39 = vld [vmem:[%s31262_s1 + $0x8a8] sm:$0xff]  }
 0xe26   : > { %23953 = vmatprep.mubr.msk.bf16.mxu0 %vm26204_vm6, %v31367_v16  ;;  %23970 = vmatpush3.bf16.msra.mxu0 %v26060_v24 }
 0xe27   : > { %23971 = vmatprep.subr.bf16.mxu0 %v31367_v16 }
 0xe2a   : > { %23972 = vmatpush3.bf16.msra.mxu0 %v26061_v8 }
 0xe2b   : > { %23973 = vmatprep.subr.bf16.mxu0 %v31367_v16 }
 0xe2d   : > { %23954 = vmatmul.mubr.bf16.gmra.mrb[172].mxu0 %v30429_v52  ;;  %v26065_v52 = vld [vmem:[%s31262_s1 + $0x8b8] sm:$0xff]  }
 0xe2e   : > { %23957 = vmatprep.mubr.msk.bf16.mxu0 %vm26204_vm6, %v31367_v16  ;;  %23974 = vmatpush3.bf16.msra.mxu0 %v26062_v45 }
 0xe2f   : > { %23975 = vmatprep.subr.bf16.mxu0 %v31367_v16 }
 0xe32   : > { %23976 = vmatpush3.bf16.msra.mxu0 %v26063_v39 }
 0xe33   : > { %23977 = vmatprep.subr.bf16.mxu0 %v31367_v16 }
 0xe35   : > { %23958 = vmatmul.mubr.bf16.gmra.mrb[176].mxu0 %v30480_v33  ;;  %v16297_v33 = vld [vmem:[#allocation5 + $0x8] sm:$0xfc] }
 0xe36   : > { %23961 = vmatprep.mubr.msk.bf16.mxu0 %vm26204_vm6, %v31367_v16  ;;  %23978 = vmatpush3.bf16.msra.mxu0 %v26064_v59  ;;  %v16326_v20 = vrot.slane %v16297_v33, 2  ;;  %v16492_v1 = vshrl.u32 %v16297_v33, 16  ;;  %v16495_v15 = vshll.u32 %v16297_v33, 16 }
 0xe37   : > { %23979 = vmatprep.subr.bf16.mxu0 %v31367_v16 }
 0xe38   : > { %v16328_v9 = vsel %vm2315_vm2, %v16326_v20, %v16327_v41  ;;  %v26069_v41 = vld [vmem:[%s31262_s1 + $0x8d8] sm:$0xff]   ;;  %v16494_v2 = vrot.slane %v16492_v1, 2  ;;  %v16497_v27 = vrot.slane %v16495_v15, 3 }
 0xe3a   : > { %23980 = vmatpush3.bf16.msra.mxu0 %v26065_v52  ;;  %v16498_v19 = vor.u32 %v16497_v27, %v16494_v2 }
 0xe3b   : > { %24001 = vmatprep.subr.bf16.mxu0 %v31367_v16 }
 0xe3c   : > { %v16507_v6 = vsel %vm2685_vm5, %v16498_v19, %v30409_v57  ;;  %v26077_v57 = vld [vmem:[%s31262_s1 + $0x918] sm:$0xff]  }
 0xe3d   : > { %23962 = vmatmul.mubr.bf16.gmra.mrb[180].mxu0 %v16160_v7 }
 0xe3e   : > { %23981 = vmatprep.mubr.msk.bf16.mxu0 %vm26204_vm6, %v31367_v16 }
 0xe45   : > { %23982 = vmatmul.mubr.bf16.vlgmr.msra.gmra.mrb[164].mxu0 %v16328_v9 }
 0xe46   : > { %23985 = vmatprep.mubr.msk.bf16.mxu0 %vm26204_vm6, %v31367_v16  ;;  %24002 = vmatpush3.bf16.msra.mxu0 %v26066_v54 }
 0xe47   : > { %24003 = vmatprep.subr.bf16.mxu0 %v31367_v16 }
 0xe4a   : > { %24004 = vmatpush3.bf16.msra.mxu0 %v26067_v49 }
 0xe4b   : > { %24005 = vmatprep.subr.bf16.mxu0 %v31367_v16 }
 0xe4d   : > { %23986 = vmatmul.mubr.bf16.gmra.mrb[168].mxu0 %v30434_v38  ;;  %v26071_v38 = vld [vmem:[%s31262_s1 + $0x8e8] sm:$0xff]  }
 0xe4e   : > { %23989 = vmatprep.mubr.msk.bf16.mxu0 %vm26204_vm6, %v31367_v16  ;;  %24006 = vmatpush3.bf16.msra.mxu0 %v26068_v37 }
 0xe4f   : > { %24007 = vmatprep.subr.bf16.mxu0 %v31367_v16 }
 0xe52   : > { %24008 = vmatpush3.bf16.msra.mxu0 %v26069_v41 }
 0xe53   : > { %24009 = vmatprep.subr.bf16.mxu0 %v31367_v16 }
 0xe55   : > { %23990 = vmatmul.mubr.bf16.gmra.mrb[172].mxu0 %v30483_v23  ;;  %v16302_v23 = vld [vmem:[#allocation5 + $0x30] sm:$0x3] }
 0xe56   : > { %23993 = vmatprep.mubr.msk.bf16.mxu0 %vm26204_vm6, %v31367_v16  ;;  %24010 = vmatpush3.bf16.msra.mxu0 %v26070_v62  ;;  %v16335_v17 = vrot.slane %v16302_v23, 2 }
 0xe57   : > { %24011 = vmatprep.subr.bf16.mxu0 %v31367_v16 }
 0xe5a   : > { %24012 = vmatpush3.bf16.msra.mxu0 %v26071_v38 }
 0xe5b   : > { %24013 = vmatprep.subr.bf16.mxu0 %v31367_v16 }
 0xe5d   : > { %23994 = vmatmul.mubr.bf16.gmra.mrb[176].mxu0 %v30514_v10  ;;  %v16336_v10 = vsel %vm2315_vm2, %v16333_v44, %v16335_v17  ;;  %v26075_v44 = vld [vmem:[%s31262_s1 + $0x908] sm:$0xff]  }
 0xe5e   : > { %23997 = vmatprep.mubr.msk.bf16.mxu0 %vm26204_vm6, %v31367_v16  ;;  %24014 = vmatpush3.bf16.msra.mxu0 %v26072_v50 }
 0xe5f   : > { %24015 = vmatprep.subr.bf16.mxu0 %v31367_v16 }
 0xe62   : > { %24016 = vmatpush3.bf16.msra.mxu0 %v26073_v40 }
 0xe63   : > { %24037 = vmatprep.subr.bf16.mxu0 %v31367_v16 }
 0xe65   : > { %23998 = vmatmul.mubr.bf16.gmra.mrb[180].mxu0 %v16336_v10 }
 0xe66   : > { %24017 = vmatprep.mubr.msk.bf16.mxu0 %vm26204_vm6, %v31367_v16 }
 0xe6d   : > { %24018 = vmatmul.mubr.bf16.vlgmr.msra.gmra.mrb[164].mxu0 %v16507_v6 }
 0xe6e   : > { %24021 = vmatprep.mubr.msk.bf16.mxu0 %vm26204_vm6, %v31367_v16  ;;  %24038 = vmatpush3.bf16.msra.mxu0 %v26074_v3 }
 0xe6f   : > { %24039 = vmatprep.subr.bf16.mxu0 %v31367_v16 }
 0xe72   : > { %24040 = vmatpush3.bf16.msra.mxu0 %v26075_v44 }
 0xe73   : > { %24041 = vmatprep.subr.bf16.mxu0 %v31367_v16 }
 0xe75   : > { %24022 = vmatmul.mubr.bf16.gmra.mrb[168].mxu0 %v30462_v25  ;;  %v16473_v25 = vld [vmem:[#allocation5 + $0x30] sm:$0x7] }
 0xe76   : > { %24025 = vmatprep.mubr.msk.bf16.mxu0 %vm26204_vm6, %v31367_v16  ;;  %24042 = vmatpush3.bf16.msra.mxu0 %v26076_v5  ;;  %v16536_v22 = vshrl.u32 %v16473_v25, 16  ;;  %v16539_v55 = vshll.u32 %v16473_v25, 16  ;;  %v16709_v28 = vrot.slane %v16473_v25, 3 }
 0xe77   : > { %24043 = vmatprep.subr.bf16.mxu0 %v31367_v16 }
 0xe78   : > { %v16541_v36 = vrot.slane %v16539_v55, 3 }
 0xe7a   : > { %24044 = vmatpush3.bf16.msra.mxu0 %v26077_v57 }
 0xe7b   : > { %24045 = vmatprep.subr.bf16.mxu0 %v31367_v16 }
 0xe7d   : > { %24026 = vmatmul.mubr.bf16.gmra.mrb[172].mxu0 %v30506_v42  ;;  %v16538_v42 = vrot.slane %v16536_v22, 2 }
 0xe7e   : > { %24029 = vmatprep.mubr.msk.bf16.mxu0 %vm26204_vm6, %v31367_v16  ;;  %24046 = vmatpush3.bf16.msra.mxu0 %v26078_v56 }
 0xe7f   : > { %24047 = vmatprep.subr.bf16.mxu0 %v31367_v16  ;;  %v16542_v4 = vor.u32 %v16541_v36, %v16538_v42 }
 0xe81   : > { %v16543_v58 = vsel %vm2685_vm5, %v30522_v11, %v16542_v4 }
 0xe82   : > { %24048 = vmatpush3.bf16.msra.mxu0 %v26079_v43 }
 0xe83   : > { %24049 = vmatprep.subr.bf16.mxu0 %v31367_v16 }
 0xe85   : > { %24030 = vmatmul.mubr.bf16.gmra.mrb[176].mxu0 %v30526_v61  ;;  %v16700_v61 = vrot.slane %v16680_v60, 3 }
 0xe86   : > { %24033 = vmatprep.mubr.msk.bf16.mxu0 %vm26204_vm6, %v31367_v16  ;;  %24050 = vmatpush3.bf16.msra.mxu0 %v26080_v53 }
 0xe87   : > { %24051 = vmatprep.subr.bf16.mxu0 %v31367_v16  ;;  %v16702_v12 = vsel %vm2915_vm4, %v16700_v61, %v16701_v18  ;;  %v16710_v18 = vsel %vm2915_vm4, %v16707_v29, %v16709_v28  ;;  %v26087_v61 = vld [vmem:[%s31262_s1 + $0x980] sm:$0xff]  }
 0xe88   : > { %v26082_v28 = vld [vmem:[%s31268_s7] sm:$0xff]  }
 0xe8a   : > { %24052 = vmatpush3.bf16.msra.mxu0 %v26081_v46 }
 0xe8d   : > { %24034 = vmatmul.mubr.bf16.gmra.mrb[180].mxu0 %v16543_v58 }
 0xe8e   : > { %24053 = vmatprep.mubr.msk.bf16.mxu0 %vm26204_vm6, %v31367_v16 }
 0xe95   : > { %24054 = vmatmul.mubr.bf16.vlgmr.msra.gmra.mrb[164].mxu0 %v16702_v12 }
 0xe96   : > { %24057 = vmatprep.mubr.msk.bf16.mxu0 %vm26204_vm6, %v31367_v16 }
 0xe9d   : > { %24058 = vmatmul.mubr.bf16.gmra.mrb[168].mxu0 %v30441_v26  ;;  %v20075_v26 = vld [vmem:[%s31263_s2 + $0x8] sm:$0x3] }
 0xe9e   : > { %24061 = vmatprep.mubr.msk.bf16.mxu0 %vm26204_vm6, %v31367_v16 }
 0xea5   : > { %24062 = vmatmul.mubr.bf16.gmra.mrb[172].mxu0 %v30487_v21  ;;  %v16850_v21 = vrot.slane %v20075_v26, %v31361_v48 }
 0xea6   : > { %24065 = vmatprep.mubr.msk.bf16.mxu0 %vm26204_vm6, %v31367_v16 }
 0xead   : > { %24066 = vmatmul.mubr.bf16.gmra.mrb[176].mxu0 %v30520_v30  ;;  %v16864_v30 = vrot.slane %v20075_v26, %v31362_v32  ;;  %v26089_v26 = vld [vmem:[%s31262_s1 + $0x990] sm:$0xff]  }
 0xeae   : > { %24069 = vmatprep.mubr.msk.bf16.mxu0 %vm26204_vm6, %v31367_v16 }
 0xeb5   : > { %24070 = vmatmul.mubr.bf16.gmra.mrb[180].mxu0 %v16710_v18  ;;  %v26088_v18 = vld [vmem:[%s31262_s1 + $0x988] sm:$0xff]  }
 0xeb6   : > { %24315 = vmatprep.mubr.msk.f32.mxu0 %vm26204_vm6, %v31367_v16 }
 0xf68   : > { %v16798_v11 = vpop.f32.mrb[164].mxu0 }
 0xf69   : > { %v16851_v35 = vmul.f32 %v16850_v21, %v16798_v11  ;;  %v24055_v34 = vpop.f32.mrb[165].mxu0  ;;  %v26085_v11 = vld [vmem:[%s31268_s7 + $0x18] sm:$0xff]  }
 0xf6a   : > { %v16801_v13 = vpop.f32.mrb[166].mxu0  ;;  %v26090_v34 = vld [vmem:[%s31262_s1 + $0x998] sm:$0xff]  }
 0xf6b   : > { %v16865_v63 = vadd.f32 %v16864_v30, %v16851_v35  ;;  %v16852_v47 = vmul.f32 %v16850_v21, %v16801_v13  ;;  %v24056_v51 = vpop.f32.mrb[167].mxu0  ;;  %v26086_v35 = vld [vmem:[%s31268_s7 + $0x20] sm:$0xff]  }
 0xf6c   : > { %v26091_v13 = vld [vmem:[%s31262_s1 + $0x9a0] sm:$0xff]  }
 0xf6d   : > { %v16866_v29 = vadd.f32 %v16864_v30, %v16852_v47  ;;  %v16875_v14 = vmax.f32 %v16865_v63, 0.0  ;;  %v26093_v63 = vld [vmem:[%s31262_s1 + $0x9b0] sm:$0xff]   ;;  %v26094_v47 = vld [vmem:[%s31262_s1 + $0x9b8] sm:$0xff]   ;;  %v26095_v51 = vld [vmem:[%s31262_s1 + $0x940] sm:$0xff]  }
 0xf6f   : > { %v16876_v31 = vmax.f32 %v16866_v29, 0.0 }
 0xf70   : > { %v16806_v24 = vpop.f32.mrb[168].mxu0 }
 0xf71   : > { %v16885_v8 = vpack.c.bf16 %v16876_v31, %v16875_v14  ;;  %v16853_v45 = vmul.f32 %v16850_v21, %v16806_v24  ;;  %v24059_v39 = vpop.f32.mrb[169].mxu0 }
 0xf72   : > { %v16809_v59 = vpop.f32.mrb[170].mxu0 }
 0xf73   : > { %v16867_v52 = vadd.f32 %v16864_v30, %v16853_v45  ;;  %v16854_v0 = vmul.f32 %v16850_v21, %v16809_v59  ;;  %v24060_v7 = vpop.f32.mrb[171].mxu0  ;;  %24074 = vmatpush3.bf16.msra.mxu1 %v16885_v8 }
 0xf74   : > { %24075 = vmatprep.subr.bf16.mxu1 %v31367_v16 }
 0xf75   : > { %v16868_v33 = vadd.f32 %v16864_v30, %v16854_v0  ;;  %v16877_v20 = vmax.f32 %v16867_v52, 0.0 }
 0xf77   : > { %v16878_v54 = vmax.f32 %v16868_v33, 0.0 }
 0xf78   : > { %v16814_v9 = vpop.f32.mrb[172].mxu0 }
 0xf79   : > { %v16886_v49 = vpack.c.bf16 %v16878_v54, %v16877_v20  ;;  %v16855_v37 = vmul.f32 %v16850_v21, %v16814_v9  ;;  %v24063_v41 = vpop.f32.mrb[173].mxu0 }
 0xf7a   : > { %v16817_v62 = vpop.f32.mrb[174].mxu0 }
 0xf7b   : > { %v16869_v38 = vadd.f32 %v16864_v30, %v16855_v37  ;;  %v16856_v50 = vmul.f32 %v16850_v21, %v16817_v62  ;;  %v24064_v23 = vpop.f32.mrb[175].mxu0  ;;  %24076 = vmatpush3.bf16.msra.mxu1 %v16886_v49 }
 0xf7c   : > { %24077 = vmatprep.subr.bf16.mxu1 %v31367_v16 }
 0xf7d   : > { %v16870_v40 = vadd.f32 %v16864_v30, %v16856_v50  ;;  %v16879_v17 = vmax.f32 %v16869_v38, 0.0 }
 0xf7f   : > { %v16880_v1 = vmax.f32 %v16870_v40, 0.0 }
 0xf80   : > { %v16822_v15 = vpop.f32.mrb[176].mxu0 }
 0xf81   : > { %v16887_v10 = vpack.c.bf16 %v16880_v1, %v16879_v17  ;;  %v16857_v2 = vmul.f32 %v16850_v21, %v16822_v15  ;;  %v24067_v27 = vpop.f32.mrb[177].mxu0 }
 0xf82   : > { %v16825_v19 = vpop.f32.mrb[178].mxu0 }
 0xf83   : > { %v16871_v3 = vadd.f32 %v16864_v30, %v16857_v2  ;;  %v16858_v6 = vmul.f32 %v16850_v21, %v16825_v19  ;;  %v24068_v44 = vpop.f32.mrb[179].mxu0  ;;  %24078 = vmatpush3.bf16.msra.mxu1 %v16887_v10  ;;  %v26096_v10 = vld [vmem:[%s31262_s1 + $0x948] sm:$0xff]  }
 0xf84   : > { %24079 = vmatprep.subr.bf16.mxu1 %v31367_v16 }
 0xf85   : > { %v16872_v5 = vadd.f32 %v16864_v30, %v16858_v6  ;;  %v16881_v57 = vmax.f32 %v16871_v3, 0.0  ;;  %v26097_v3 = vld [vmem:[%s31262_s1 + $0x950] sm:$0xff]  }
 0xf87   : > { %v16882_v56 = vmax.f32 %v16872_v5, 0.0 }
 0xf88   : > { %v16830_v25 = vpop.f32.mrb[180].mxu0 }
 0xf89   : > { %v16888_v43 = vpack.c.bf16 %v16882_v56, %v16881_v57  ;;  %v16859_v22 = vmul.f32 %v16850_v21, %v16830_v25  ;;  %v24071_v55 = vpop.f32.mrb[181].mxu0  ;;  %v26098_v57 = vld [vmem:[%s31262_s1 + $0x958] sm:$0xff]   ;;  %v26099_v56 = vld [vmem:[%s31262_s1 + $0x960] sm:$0xff]   ;;  %v26100_v25 = vld [vmem:[%s31262_s1 + $0x968] sm:$0xff]  }
 0xf8a   : > { %v16833_v53 = vpop.f32.mrb[182].mxu0 }
 0xf8b   : > { %v16873_v42 = vadd.f32 %v16864_v30, %v16859_v22  ;;  %v16860_v36 = vmul.f32 %v16850_v21, %v16833_v53  ;;  %v24072_v46 = vpop.f32.mrb[183].mxu0  ;;  %24080 = vmatpush3.bf16.msra.mxu1 %v16888_v43  ;;  %v26083_v21 = vld [vmem:[%s31268_s7 + $0x8] sm:$0xff]   ;;  %v26101_v43 = vld [vmem:[%s31262_s1 + $0x970] sm:$0xff]   ;;  %v26102_v22 = vld [vmem:[%s31262_s1 + $0x978] sm:$0xff]  }
 0xf8c   : > { %24081 = vmatprep.subr.bf16.mxu1 %v31367_v16  ;;  %v26103_v53 = vld [vmem:[%s31262_s1 + $0x9c0] sm:$0xff]   ;;  %v26104_v46 = vld [vmem:[%s31262_s1 + $0x9c8] sm:$0xff]  }
 0xf8d   : > { %v16874_v4 = vadd.f32 %v16864_v30, %v16860_v36  ;;  %v16883_v58 = vmax.f32 %v16873_v42, 0.0  ;;  %v26084_v30 = vld [vmem:[%s31268_s7 + $0x10] sm:$0xff]  }
 0xf8f   : > { %v16884_v60 = vmax.f32 %v16874_v4, 0.0 }
 0xf91   : > { %v16889_v12 = vpack.c.bf16 %v16884_v60, %v16883_v58  ;;  %v26105_v58 = vld [vmem:[%s31262_s1 + $0x9d0] sm:$0xff]   ;;  %v26106_v60 = vld [vmem:[%s31262_s1 + $0x9d8] sm:$0xff]  }
 0xf93   : > { %24082 = vmatpush3.bf16.msra.mxu1 %v16889_v12  ;;  %v26108_v12 = vld [vmem:[%s31262_s1 + $0x9e8] sm:$0xff]  }
 0xf94   : > { %24103 = vmatprep.subr.bf16.mxu1 %v26087_v61 }
 0xf96   : > { %24084 = vmatmul.mubr.msk.bf16.vlgmr.msra.gmra.mrb[244].mxu1 %vm16925_vm13, %v26082_v28  ;;  %v26109_v28 = vld [vmem:[%s31262_s1 + $0x9f0] sm:$0xff]  }
 0xf97   : > { %24087 = vmatprep.mubr.msk.bf16.mxu1 %vm26204_vm6, %v31367_v16  ;;  %24104 = vmatpush3.bf16.msra.mxu1 %v26087_v61  ;;  %v26107_v61 = vld [vmem:[%s31262_s1 + $0x9e0] sm:$0xff]  }
 0xf98   : > { %24105 = vmatprep.subr.bf16.mxu1 %v26088_v18 }
 0xf9b   : > { %24106 = vmatpush3.bf16.msra.mxu1 %v26088_v18  ;;  %v26110_v18 = vld [vmem:[%s31262_s1 + $0x9f8] sm:$0xff]  }
 0xf9c   : > { %24107 = vmatprep.subr.bf16.mxu1 %v26089_v26 }
 0xf9e   : > { %24088 = vmatmul.mubr.msk.bf16.gmra.mrb[248].mxu1 %vm16925_vm13, %v26083_v21  ;;  %v26111_v21 = vld [vmem:[%s31262_s1 + $0xa00] sm:$0xff]  }
 0xf9f   : > { %24091 = vmatprep.mubr.msk.bf16.mxu1 %vm26204_vm6, %v31367_v16  ;;  %24108 = vmatpush3.bf16.msra.mxu1 %v26089_v26 }
 0xfa0   : > { %24109 = vmatprep.subr.bf16.mxu1 %v26090_v34 }
 0xfa3   : > { %24110 = vmatpush3.bf16.msra.mxu1 %v26090_v34  ;;  %v26113_v34 = vld [vmem:[%s31262_s1 + $0xa10] sm:$0xff]  }
 0xfa4   : > { %24111 = vmatprep.subr.bf16.mxu1 %v26091_v13 }
 0xfa6   : > { %24092 = vmatmul.mubr.msk.bf16.gmra.mrb[252].mxu1 %vm16925_vm13, %v26084_v30 }
 0xfa7   : > { %24095 = vmatprep.mubr.msk.bf16.mxu1 %vm26204_vm6, %v31367_v16  ;;  %24112 = vmatpush3.bf16.msra.mxu1 %v26091_v13  ;;  %v26114_v13 = vld [vmem:[%s31262_s1 + $0xa18] sm:$0xff]  }
 0xfae   : > { %24096 = vmatmul.mubr.msk.bf16.gmra.mrb[0].mxu1 %vm16925_vm13, %v26085_v11  ;;  %v26112_v11 = vld [vmem:[%s31262_s1 + $0xa08] sm:$0xff]  }
 0xfaf   : > { %24099 = vmatprep.mubr.msk.bf16.mxu1 %vm26204_vm6, %v31367_v16  ;;  %v26092_v16 = vld [vmem:[%s31262_s1 + $0x9a8] sm:$0xff]  }
 0xfb0   : > { %24113 = vmatprep.subr.bf16.mxu1 %v26092_v16 }
 0xfb1   : > { %24114 = vmatpush3.bf16.msra.mxu1 %v26092_v16  ;;  %v26115_v16 = vld [vmem:[%s31262_s1 + $0xa20] sm:$0xff]  }
 0xfb2   : > { %24115 = vmatprep.subr.bf16.mxu1 %v26093_v63 }
 0xfb5   : > { %24116 = vmatpush3.bf16.msra.mxu1 %v26093_v63  ;;  %v26116_v63 = vld [vmem:[%s31262_s1 + $0xa28] sm:$0xff]  }
 0xfb6   : > { %24100 = vmatmul.mubr.msk.bf16.gmra.mrb[4].mxu1 %vm16925_vm13, %v26086_v35  ;;  %24117 = vmatprep.subr.bf16.mxu1 %v26094_v47 }
 0xfb9   : > { %24118 = vmatpush3.bf16.msra.mxu1 %v26094_v47  ;;  %v26117_v47 = vld [vmem:[%s31262_s1 + $0xa30] sm:$0xff]  }
 0xfba   : > { %24123 = vmatprep.subr.bf16.mxu1 %v26095_v51 }
0x1069   : > { %v16975_v29 = vpop.f32.mrb[244].mxu1 }
0x106a   : > { %v24085_v14 = vpop.f32.mrb[245].mxu1 }
0x106b   : > { %v16978_v31 = vpop.f32.mrb[246].mxu1  ;;  %v26119_v14 = vld [vmem:[%s31262_s1 + $0xa40] sm:$0xff]  }
0x106c   : > { %v17014_v24 = vpack.c.bf16 %v16978_v31, %v16975_v29  ;;  %v24086_v8 = vpop.f32.mrb[247].mxu1 }
0x106d   : > { %v26120_v8 = vld [vmem:[%s31262_s1 + $0xa48] sm:$0xff]  }
0x106e   : > { %17019 = vst [vmem:[#allocation6] sm:$0xff] %v17014_v24 }
0x1071   : > { %v16983_v45 = vpop.f32.mrb[248].mxu1 }
0x1072   : > { %v24089_v39 = vpop.f32.mrb[249].mxu1 }
0x1073   : > { %v16986_v59 = vpop.f32.mrb[250].mxu1  ;;  %v26121_v39 = vld [vmem:[%s31262_s1 + $0xa50] sm:$0xff]  }
0x1074   : > { %v30963_v52 = vpack.c.bf16 %v16986_v59, %v16983_v45  ;;  %v24090_v0 = vpop.f32.mrb[251].mxu1  ;;  %v26122_v59 = vld [vmem:[%s31262_s1 + $0xa58] sm:$0xff]  }
0x1075   : > { %v17045_v7 = vld [vmem:[#allocation6] sm:$0xfe]  ;;  %v26124_v0 = vld [vmem:[%s31262_s1 + $0xa68] sm:$0xff]  }
0x1076   : > { %17020 = vst [vmem:[#allocation6 + $0x8] sm:$0xff] %v30963_v52  ;;  %v17067_v33 = vrot.slane %v17045_v7, 1  ;;  %v17068_v20 = vrot.slane %v30963_v52, 1  ;;  %v17268_v55 = vld [vmem:[#allocation6] sm:$0xfc]  ;;  %v17290_v36 = vrot.slane %v30963_v52, 2 }
0x1077   : > { %v17289_v42 = vrot.slane %v17268_v55, 2  ;;  %v26125_v7 = vld [vmem:[%s31262_s1 + $0xa70] sm:$0xff]   ;;  %v26142_v55 = vld [vmem:[%s31262_s1 + $0xaf8] sm:$0xff]  }
0x1078   : > { %v17069_v54 = vsel %vm1715_vm1, %v17067_v33, %v17068_v20  ;;  %v26126_v33 = vld [vmem:[%s31262_s1 + $0xa78] sm:$0xff]  }
0x1079   : > { %v16991_v9 = vpop.f32.mrb[252].mxu1  ;;  %24119 = vmatprep.mubr.bf16.mxu1 %v17069_v54  ;;  %v17291_v4 = vsel %vm2315_vm2, %v17289_v42, %v17290_v36  ;;  %v26143_v42 = vld [vmem:[%s31262_s1 + $0xb00] sm:$0xff]  }
0x107a   : > { %v24093_v49 = vpop.f32.mrb[253].mxu1 }
0x107b   : > { %v16994_v37 = vpop.f32.mrb[254].mxu1 }
0x107c   : > { %v30968_v41 = vpack.c.bf16 %v16994_v37, %v16991_v9  ;;  %v24094_v62 = vpop.f32.mrb[255].mxu1  ;;  %v26127_v9 = vld [vmem:[%s31262_s1 + $0xa80] sm:$0xff]  }
0x107d   : > { %v17516_v29 = vld [vmem:[#allocation6 + $0x8] sm:$0xfe] }
0x107e   : > { %17021 = vst [vmem:[#allocation6 + $0x10] sm:$0xff] %v30968_v41  ;;  %v17539_v31 = vrot.slane %v17516_v29, 1  ;;  %v17647_v54 = vld [vmem:[#allocation6 + $0x8] sm:$0xfc]  ;;  %v17669_v62 = vrot.slane %v30968_v41, 2 }
0x107f   : > { %v17668_v37 = vrot.slane %v17647_v54, 2  ;;  %v26155_v29 = vld [vmem:[%s31262_s1 + $0xb60] sm:$0xff]  }
0x1080   : > { %v18207_v54 = vld [vmem:[%s31269_s8 + $0x20] sm:$0xff] }
0x1081   : > { %v16999_v38 = vpop.f32.mrb[0].mxu1 }
0x1082   : > { %v24097_v50 = vpop.f32.mrb[1].mxu1 }
0x1083   : > { %v17002_v23 = vpop.f32.mrb[2].mxu1 }
0x1084   : > { %v30971_v40 = vpack.c.bf16 %v17002_v23, %v16999_v38  ;;  %v24098_v17 = vpop.f32.mrb[3].mxu1  ;;  %v26128_v38 = vld [vmem:[%s31262_s1 + $0xa88] sm:$0xff]   ;;  %v17670_v23 = vsel %vm2315_vm2, %v17668_v37, %v17669_v62  ;;  %v18209_v37 = vld [vmem:[%s31269_s8 + $0x30] sm:$0xff] }
0x1085   : > { %v17046_v1 = vld [vmem:[#allocation6 + $0x10] sm:$0x1]  ;;  %v26129_v17 = vld [vmem:[%s31262_s1 + $0xa90] sm:$0xff]  }
0x1086   : > { %v17070_v15 = vrot.slane %v17046_v1, 1  ;;  %17022 = vst [vmem:[#allocation6 + $0x18] sm:$0xff] %v30971_v40  ;;  %v17269_v26 = vld [vmem:[#allocation6 + $0x10] sm:$0x3]  ;;  %v26205_v1 = vmov 0.0|0.0  }
0x1087   : > { %v17292_v30 = vrot.slane %v17269_v26, 2  ;;  %24318 = vmatprep.subr.bf16.mxu0 %v26205_v1  ;;  %v26150_v26 = vld [vmem:[%s31262_s1 + $0xb38] sm:$0xff]  }
0x1088   : > { %v17071_v2 = vsel %vm1715_vm1, %v17068_v20, %v17070_v15  ;;  %v26130_v15 = vld [vmem:[%s31262_s1 + $0xa98] sm:$0xff]  }
0x1089   : > { %24120 = vmatmul.mubr.bf16.vlgmr.msra.gmra.mrb[8].mxu1 %v17071_v2  ;;  %v17007_v27 = vpop.f32.mrb[4].mxu1  ;;  %v17293_v35 = vsel %vm2315_vm2, %v17290_v36, %v17292_v30  ;;  %v26132_v2 = vld [vmem:[%s31262_s1 + $0xaa8] sm:$0xff]  }
0x108a   : > { %24124 = vmatpush3.bf16.msra.mxu1 %v26095_v51  ;;  %24139 = vmatprep.mubr.bf16.mxu1 %v17014_v24  ;;  %v24101_v19 = vpop.f32.mrb[5].mxu1  ;;  %v26118_v51 = vld [vmem:[%s31262_s1 + $0xa38] sm:$0xff]   ;;  %v17540_v24 = vrot.slane %v30968_v41, 1  ;;  %v18026_v30 = vld [vmem:[#allocation6 + $0x10] sm:$0xfc] }
0x108b   : > { %24125 = vmatprep.subr.bf16.mxu1 %v26096_v10  ;;  %v17010_v6 = vpop.f32.mrb[6].mxu1  ;;  %v26134_v19 = vld [vmem:[%s31262_s1 + $0xab8] sm:$0xff]  }
0x108c   : > { %v17018_v44 = vpack.c.bf16 %v17010_v6, %v17007_v27  ;;  %v24102_v5 = vpop.f32.mrb[7].mxu1  ;;  %v17541_v45 = vsel %vm1715_vm1, %v17539_v31, %v17540_v24  ;;  %v26133_v27 = vld [vmem:[%s31262_s1 + $0xab0] sm:$0xff]   ;;  %v26135_v6 = vld [vmem:[%s31262_s1 + $0xac0] sm:$0xff]  }
0x108d   : > { %v17518_v20 = vld [vmem:[#allocation6 + $0x18] sm:$0x1]  ;;  %v26136_v5 = vld [vmem:[%s31262_s1 + $0xac8] sm:$0xff]  }
0x108e   : > { %24126 = vmatpush3.bf16.msra.mxu1 %v26096_v10  ;;  %17023 = vst [vmem:[#allocation6 + $0x20] sm:$0xff] %v17018_v44  ;;  %v17542_v49 = vrot.slane %v17518_v20, 1  ;;  %v26131_v10 = vld [vmem:[%s31262_s1 + $0xaa0] sm:$0xff]   ;;  %v26157_v31 = vld [vmem:[%s31262_s1 + $0xb70] sm:$0xff]  }
0x108f   : > { %24127 = vmatprep.subr.bf16.mxu1 %v26097_v3 }
0x1090   : > { %v17543_v50 = vsel %vm1715_vm1, %v17540_v24, %v17542_v49  ;;  %v26158_v24 = vld [vmem:[%s31262_s1 + $0xb78] sm:$0xff]  }
0x1092   : > { %24128 = vmatpush3.bf16.msra.mxu1 %v26097_v3  ;;  %v17648_v3 = vld [vmem:[#allocation6 + $0x18] sm:$0x3] }
0x1093   : > { %24129 = vmatprep.subr.bf16.mxu1 %v26098_v57  ;;  %v17671_v44 = vrot.slane %v17648_v3, 2 }
0x1096   : > { %24130 = vmatpush3.bf16.msra.mxu1 %v26098_v57  ;;  %v17672_v57 = vsel %vm2315_vm2, %v17669_v62, %v17671_v44  ;;  %v18210_v62 = vld [vmem:[%s31269_s8 + $0x38] sm:$0xff] }
0x1097   : > { %24131 = vmatprep.subr.bf16.mxu1 %v26099_v56  ;;  %v18218_v44 = vld [vmem:[%s31269_s8 + $0x78] sm:$0xff] }
0x109a   : > { %24132 = vmatpush3.bf16.msra.mxu1 %v26099_v56  ;;  %v26137_v56 = vld [vmem:[%s31262_s1 + $0xad0] sm:$0xff]  }
0x109b   : > { %24133 = vmatprep.subr.bf16.mxu1 %v26100_v25 }
0x109e   : > { %24134 = vmatpush3.bf16.msra.mxu1 %v26100_v25  ;;  %v26138_v25 = vld [vmem:[%s31262_s1 + $0xad8] sm:$0xff]  }
0x109f   : > { %24135 = vmatprep.subr.bf16.mxu1 %v26101_v43 }
0x10a2   : > { %24136 = vmatpush3.bf16.msra.mxu1 %v26101_v43  ;;  %v26139_v43 = vld [vmem:[%s31262_s1 + $0xae0] sm:$0xff]  }
0x10a3   : > { %24137 = vmatprep.subr.bf16.mxu1 %v26102_v22 }
0x10a6   : > { %24138 = vmatpush3.bf16.msra.mxu1 %v26102_v22  ;;  %v26141_v22 = vld [vmem:[%s31262_s1 + $0xaf0] sm:$0xff]  }
0x10a7   : > { %24143 = vmatprep.subr.bf16.mxu1 %v26103_v53 }
0x10a9   : > { %24140 = vmatmul.mubr.bf16.vlgmr.msra.gmra.mrb[8].mxu1 %v30963_v52 }
0x10aa   : > { %24144 = vmatpush3.bf16.msra.mxu1 %v26103_v53  ;;  %24159 = vmatprep.mubr.bf16.mxu1 %v17291_v4  ;;  %v17895_v53 = vld [vmem:[#allocation6 + $0x10] sm:$0xfe] }
0x10ab   : > { %24145 = vmatprep.subr.bf16.mxu1 %v26104_v46  ;;  %v17918_v36 = vrot.slane %v17895_v53, 1  ;;  %v26144_v4 = vld [vmem:[%s31262_s1 + $0xb08] sm:$0xff]  }
0x10ae   : > { %24146 = vmatpush3.bf16.msra.mxu1 %v26104_v46  ;;  %v17919_v46 = vrot.slane %v30971_v40, 1 }
0x10af   : > { %24147 = vmatprep.subr.bf16.mxu1 %v26105_v58 }
0x10b2   : > { %24148 = vmatpush3.bf16.msra.mxu1 %v26105_v58  ;;  %v17920_v58 = vsel %vm1715_vm1, %v17918_v36, %v17919_v46 }
0x10b3   : > { %24149 = vmatprep.subr.bf16.mxu1 %v26106_v60 }
0x10b6   : > { %24150 = vmatpush3.bf16.msra.mxu1 %v26106_v60  ;;  %v26145_v60 = vld [vmem:[%s31262_s1 + $0xb10] sm:$0xff]  }
0x10b7   : > { %24151 = vmatprep.subr.bf16.mxu1 %v26107_v61 }
0x10ba   : > { %24152 = vmatpush3.bf16.msra.mxu1 %v26107_v61  ;;  %v26146_v61 = vld [vmem:[%s31262_s1 + $0xb18] sm:$0xff]  }
0x10bb   : > { %24153 = vmatprep.subr.bf16.mxu1 %v26108_v12 }
0x10be   : > { %24154 = vmatpush3.bf16.msra.mxu1 %v26108_v12  ;;  %v26147_v12 = vld [vmem:[%s31262_s1 + $0xb20] sm:$0xff]  }
0x10bf   : > { %24155 = vmatprep.subr.bf16.mxu1 %v26109_v28 }
0x10c2   : > { %24156 = vmatpush3.bf16.msra.mxu1 %v26109_v28  ;;  %v26148_v28 = vld [vmem:[%s31262_s1 + $0xb28] sm:$0xff]  }
0x10c3   : > { %24157 = vmatprep.subr.bf16.mxu1 %v26110_v18 }
0x10c6   : > { %24158 = vmatpush3.bf16.msra.mxu1 %v26110_v18  ;;  %v26149_v18 = vld [vmem:[%s31262_s1 + $0xb30] sm:$0xff]  }
0x10c7   : > { %24163 = vmatprep.subr.bf16.mxu1 %v26111_v21 }
0x10c9   : > { %24160 = vmatmul.mubr.bf16.vlgmr.msra.gmra.mrb[8].mxu1 %v17293_v35 }
0x10ca   : > { %24164 = vmatpush3.bf16.msra.mxu1 %v26111_v21  ;;  %24179 = vmatprep.mubr.bf16.mxu1 %v30963_v52  ;;  %v26123_v52 = vld [vmem:[%s31262_s1 + $0xa60] sm:$0xff]   ;;  %v17897_v21 = vld [vmem:[#allocation6 + $0x20] sm:$0x1] }
0x10cb   : > { %24165 = vmatprep.subr.bf16.mxu1 %v26112_v11  ;;  %v17921_v35 = vrot.slane %v17897_v21, 1 }
0x10ce   : > { %24166 = vmatpush3.bf16.msra.mxu1 %v26112_v11  ;;  %v26151_v11 = vld [vmem:[%s31262_s1 + $0xb40] sm:$0xff]  }
0x10cf   : > { %24167 = vmatprep.subr.bf16.mxu1 %v26113_v34 }
0x10d2   : > { %24168 = vmatpush3.bf16.msra.mxu1 %v26113_v34  ;;  %v18047_v34 = vrot.slane %v18026_v30, 2 }
0x10d3   : > { %24169 = vmatprep.subr.bf16.mxu1 %v26114_v13 }
0x10d6   : > { %24170 = vmatpush3.bf16.msra.mxu1 %v26114_v13  ;;  %v18048_v13 = vrot.slane %v30971_v40, 2 }
0x10d7   : > { %24171 = vmatprep.subr.bf16.mxu1 %v26115_v16 }
0x10da   : > { %24172 = vmatpush3.bf16.msra.mxu1 %v26115_v16  ;;  %v26152_v16 = vld [vmem:[%s31262_s1 + $0xb48] sm:$0xff]  }
0x10db   : > { %24173 = vmatprep.subr.bf16.mxu1 %v26116_v63 }
0x10de   : > { %24174 = vmatpush3.bf16.msra.mxu1 %v26116_v63  ;;  %v17922_v63 = vsel %vm1715_vm1, %v17919_v46, %v17921_v35 }
0x10df   : > { %24175 = vmatprep.subr.bf16.mxu1 %v26117_v47 }
0x10e2   : > { %24176 = vmatpush3.bf16.msra.mxu1 %v26117_v47  ;;  %v18049_v47 = vsel %vm2315_vm2, %v18047_v34, %v18048_v13 }
0x10e3   : > { %24177 = vmatprep.subr.bf16.mxu1 %v26118_v51 }
0x10e6   : > { %24178 = vmatpush3.bf16.msra.mxu1 %v26118_v51  ;;  %v26153_v51 = vld [vmem:[%s31262_s1 + $0xb50] sm:$0xff]  }
0x10e7   : > { %24183 = vmatprep.subr.bf16.mxu1 %v26119_v14 }
0x10e9   : > { %24180 = vmatmul.mubr.bf16.vlgmr.msra.gmra.mrb[8].mxu1 %v30968_v41 }
0x10ea   : > { %24184 = vmatpush3.bf16.msra.mxu1 %v26119_v14  ;;  %24199 = vmatprep.mubr.bf16.mxu1 %v17541_v45  ;;  %v26156_v14 = vld [vmem:[%s31262_s1 + $0xb68] sm:$0xff]  }
0x10eb   : > { %24185 = vmatprep.subr.bf16.mxu1 %v26120_v8 }
0x10ee   : > { %24186 = vmatpush3.bf16.msra.mxu1 %v26120_v8  ;;  %v18027_v8 = vld [vmem:[#allocation6 + $0x20] sm:$0x3] }
0x10ef   : > { %24187 = vmatprep.subr.bf16.mxu1 %v26121_v39  ;;  %v18050_v45 = vrot.slane %v18027_v8, 2 }
0x10f2   : > { %24188 = vmatpush3.bf16.msra.mxu1 %v26121_v39  ;;  %v18051_v39 = vsel %vm2315_vm2, %v18048_v13, %v18050_v45 }
0x10f3   : > { %24189 = vmatprep.subr.bf16.mxu1 %v26122_v59 }
0x10f6   : > { %24190 = vmatpush3.bf16.msra.mxu1 %v26122_v59  ;;  %v18203_v59 = vld [vmem:[%s31269_s8] sm:$0xff] }
0x10f7   : > { %24191 = vmatprep.subr.bf16.mxu1 %v26123_v52 }
0x10fa   : > { %24192 = vmatpush3.bf16.msra.mxu1 %v26123_v52  ;;  %v18204_v52 = vld [vmem:[%s31269_s8 + $0x8] sm:$0xff] }
0x10fb   : > { %24193 = vmatprep.subr.bf16.mxu1 %v26124_v0 }
0x10fe   : > { %24194 = vmatpush3.bf16.msra.mxu1 %v26124_v0  ;;  %v24319_v0 = vpack.c.bf16 %v18204_v52, %v18203_v59 }
0x10ff   : > { %24195 = vmatprep.subr.bf16.mxu1 %v26125_v7 }
0x1100   : > { %24320 = vmatpush3.bf16.msra.mxu0 %v24319_v0  ;;  %v18219_v0 = vld [vmem:[%s31270_s9] sm:$0x1] }
0x1101   : > { %24321 = vmatprep.subr.bf16.mxu0 %v26205_v1 }
0x1102   : > { %24196 = vmatpush3.bf16.msra.mxu1 %v26125_v7  ;;  %v18205_v7 = vld [vmem:[%s31269_s8 + $0x10] sm:$0xff] }
0x1103   : > { %24197 = vmatprep.subr.bf16.mxu1 %v26126_v33 }
0x1106   : > { %24198 = vmatpush3.bf16.msra.mxu1 %v26126_v33  ;;  %v18206_v33 = vld [vmem:[%s31269_s8 + $0x18] sm:$0xff] }
0x1107   : > { %24203 = vmatprep.subr.bf16.mxu1 %v26127_v9  ;;  %v24322_v20 = vpack.c.bf16 %v18206_v33, %v18205_v7 }
0x1109   : > { %24200 = vmatmul.mubr.bf16.vlgmr.msra.gmra.mrb[8].mxu1 %v17543_v50  ;;  %24323 = vmatpush3.bf16.msra.mxu0 %v24322_v20  ;;  %v18211_v50 = vld [vmem:[%s31269_s8 + $0x40] sm:$0xff] }
0x110a   : > { %24204 = vmatpush3.bf16.msra.mxu1 %v26127_v9  ;;  %24219 = vmatprep.mubr.bf16.mxu1 %v17670_v23  ;;  %v18208_v9 = vld [vmem:[%s31269_s8 + $0x28] sm:$0xff] }
0x110b   : > { %24205 = vmatprep.subr.bf16.mxu1 %v26128_v38  ;;  %24324 = vmatprep.subr.bf16.mxu0 %v26205_v1  ;;  %v24325_v49 = vpack.c.bf16 %v18208_v9, %v18207_v54  ;;  %v18212_v23 = vld [vmem:[%s31269_s8 + $0x48] sm:$0xff] }
0x110d   : > { %24326 = vmatpush3.bf16.msra.mxu0 %v24325_v49 }
0x110e   : > { %24206 = vmatpush3.bf16.msra.mxu1 %v26128_v38  ;;  %24327 = vmatprep.subr.bf16.mxu0 %v26205_v1  ;;  %v24328_v38 = vpack.c.bf16 %v18210_v62, %v18209_v37 }
0x110f   : > { %24207 = vmatprep.subr.bf16.mxu1 %v26129_v17 }
0x1111   : > { %24329 = vmatpush3.bf16.msra.mxu0 %v24328_v38 }
0x1112   : > { %24208 = vmatpush3.bf16.msra.mxu1 %v26129_v17  ;;  %24330 = vmatprep.subr.bf16.mxu0 %v26205_v1  ;;  %v24331_v17 = vpack.c.bf16 %v18212_v23, %v18211_v50 }
0x1113   : > { %24209 = vmatprep.subr.bf16.mxu1 %v26130_v15 }
0x1115   : > { %24332 = vmatpush3.bf16.msra.mxu0 %v24331_v17 }
0x1116   : > { %24210 = vmatpush3.bf16.msra.mxu1 %v26130_v15  ;;  %v18213_v15 = vld [vmem:[%s31269_s8 + $0x50] sm:$0xff]  ;;  %24333 = vmatprep.subr.bf16.mxu0 %v26205_v1 }
0x1117   : > { %24211 = vmatprep.subr.bf16.mxu1 %v26131_v10 }
0x111a   : > { %24212 = vmatpush3.bf16.msra.mxu1 %v26131_v10  ;;  %v18214_v10 = vld [vmem:[%s31269_s8 + $0x58] sm:$0xff] }
0x111b   : > { %24213 = vmatprep.subr.bf16.mxu1 %v26132_v2 }
0x111e   : > { %24214 = vmatpush3.bf16.msra.mxu1 %v26132_v2  ;;  %v24334_v2 = vpack.c.bf16 %v18214_v10, %v18213_v15 }
0x111f   : > { %24215 = vmatprep.subr.bf16.mxu1 %v26133_v27 }
0x1120   : > { %24335 = vmatpush3.bf16.msra.mxu0 %v24334_v2 }
0x1121   : > { %24336 = vmatprep.subr.bf16.mxu0 %v26205_v1 }
0x1122   : > { %24216 = vmatpush3.bf16.msra.mxu1 %v26133_v27  ;;  %v18215_v27 = vld [vmem:[%s31269_s8 + $0x60] sm:$0xff] }
0x1123   : > { %24217 = vmatprep.subr.bf16.mxu1 %v26134_v19 }
0x1126   : > { %24218 = vmatpush3.bf16.msra.mxu1 %v26134_v19  ;;  %v18216_v19 = vld [vmem:[%s31269_s8 + $0x68] sm:$0xff] }
0x1127   : > { %24223 = vmatprep.subr.bf16.mxu1 %v26135_v6  ;;  %v24337_v3 = vpack.c.bf16 %v18216_v19, %v18215_v27 }
0x1129   : > { %24220 = vmatmul.mubr.bf16.vlgmr.msra.gmra.mrb[8].mxu1 %v17672_v57  ;;  %24338 = vmatpush3.bf16.msra.mxu0 %v24337_v3  ;;  %v20302_v57 = vld [vmem:[%s31263_s2 + $0xa] sm:$0x3] }
0x112a   : > { %24224 = vmatpush3.bf16.msra.mxu1 %v26135_v6  ;;  %24239 = vmatprep.mubr.bf16.mxu1 %v30968_v41  ;;  %v26140_v41 = vld [vmem:[%s31262_s1 + $0xae8] sm:$0xff]   ;;  %v18217_v6 = vld [vmem:[%s31269_s8 + $0x70] sm:$0xff] }
0x112b   : > { %24225 = vmatprep.subr.bf16.mxu1 %v26136_v5  ;;  %24339 = vmatprep.subr.bf16.mxu0 %v26205_v1 }
0x112e   : > { %24226 = vmatpush3.bf16.msra.mxu1 %v26136_v5  ;;  %v24340_v5 = vpack.c.bf16 %v18218_v44, %v18217_v6 }
0x112f   : > { %24227 = vmatprep.subr.bf16.mxu1 %v26137_v56 }
0x1130   : > { %24341 = vmatpush3.bf16.msra.mxu0 %v24340_v5 }
0x1132   : > { %24228 = vmatpush3.bf16.msra.mxu1 %v26137_v56  ;;  %v18158_v56 = vrot.slane %v20302_v57, %v31361_v48 }
0x1133   : > { %24229 = vmatprep.subr.bf16.mxu1 %v26138_v25 }
0x1136   : > { %24230 = vmatpush3.bf16.msra.mxu1 %v26138_v25  ;;  %v31368_v25 = vld [vmem:[#allocation8_spill] sm:$0xff] }
0x1137   : > { %24231 = vmatprep.subr.bf16.mxu1 %v26139_v43  ;;  %v18178_v53 = vadd.s32 16, %v31368_v25  ;;  %v18180_v1 = vand.u32 7, %v31368_v25 }
0x1139   : > { %vm18184_vm14 = vcmp.lt.s32.totalorder %v18180_v1, 4 }
0x113a   : > { %24232 = vmatpush3.bf16.msra.mxu1 %v26139_v43  ;;  %v18177_v43 = vadd.s32 8, %v31368_v25 }
0x113b   : > { %24233 = vmatprep.subr.bf16.mxu1 %v26140_v41 }
0x113e   : > { %24234 = vmatpush3.bf16.msra.mxu1 %v26140_v41 }
0x113f   : > { %24235 = vmatprep.subr.bf16.mxu1 %v26141_v22 }
0x1142   : > { %24236 = vmatpush3.bf16.msra.mxu1 %v26141_v22  ;;  %v18166_v22 = vrot.slane %v20302_v57, %v31362_v32 }
0x1143   : > { %24237 = vmatprep.subr.bf16.mxu1 %v26142_v55 }
0x1146   : > { %24238 = vmatpush3.bf16.msra.mxu1 %v26142_v55 }
0x1147   : > { %24243 = vmatprep.subr.bf16.mxu1 %v26143_v42 }
0x1149   : > { %24240 = vmatmul.mubr.bf16.vlgmr.msra.gmra.mrb[8].mxu1 %v30971_v40  ;;  %v26154_v40 = vld [vmem:[%s31262_s1 + $0xb58] sm:$0xff]  }
0x114a   : > { %24244 = vmatpush3.bf16.msra.mxu1 %v26143_v42  ;;  %24259 = vmatprep.mubr.bf16.mxu1 %v17920_v58  ;;  %v18179_v58 = vadd.s32 24, %v31368_v25 }
0x114b   : > { %24245 = vmatprep.subr.bf16.mxu1 %v26144_v4 }
0x114e   : > { %24246 = vmatpush3.bf16.msra.mxu1 %v26144_v4 }
0x114f   : > { %24247 = vmatprep.subr.bf16.mxu1 %v26145_v60 }
0x1152   : > { %24248 = vmatpush3.bf16.msra.mxu1 %v26145_v60 }
0x1153   : > { %24249 = vmatprep.subr.bf16.mxu1 %v26146_v61 }
0x1156   : > { %24250 = vmatpush3.bf16.msra.mxu1 %v26146_v61  ;;  %v18181_v61 = vand.u32 7, %v18177_v43 }
0x1157   : > { %24251 = vmatprep.subr.bf16.mxu1 %v26147_v12 }
0x1158   : > { %vm18185_vm15 = vcmp.lt.s32.totalorder %v18181_v61, 4 }
0x115a   : > { %24252 = vmatpush3.bf16.msra.mxu1 %v26147_v12 }
0x115b   : > { %24253 = vmatprep.subr.bf16.mxu1 %v26148_v28 }
0x115e   : > { %24254 = vmatpush3.bf16.msra.mxu1 %v26148_v28 }
0x115f   : > { %24255 = vmatprep.subr.bf16.mxu1 %v26149_v18 }
0x1162   : > { %24256 = vmatpush3.bf16.msra.mxu1 %v26149_v18 }
0x1163   : > { %24257 = vmatprep.subr.bf16.mxu1 %v26150_v26 }
0x1166   : > { %24258 = vmatpush3.bf16.msra.mxu1 %v26150_v26  ;;  %v18182_v26 = vand.u32 7, %v18178_v53 }
0x1167   : > { %24263 = vmatprep.subr.bf16.mxu1 %v26151_v11 }
0x1168   : > { %vm18186_vm0 = vcmp.lt.s32.totalorder %v18182_v26, 4 }
0x1169   : > { %24260 = vmatmul.mubr.bf16.vlgmr.msra.gmra.mrb[8].mxu1 %v17922_v63 }
0x116a   : > { %24264 = vmatpush3.bf16.msra.mxu1 %v26151_v11  ;;  %24279 = vmatprep.mubr.bf16.mxu1 %v18049_v47  ;;  %v18183_v11 = vand.u32 7, %v18179_v58 }
0x116b   : > { %24265 = vmatprep.subr.bf16.mxu1 %v26152_v16 }
0x116c   : > { %vm18187_vm1 = vcmp.lt.s32.totalorder %v18183_v11, 4 }
0x116e   : > { %24266 = vmatpush3.bf16.msra.mxu1 %v26152_v16 }
0x116f   : > { %24267 = vmatprep.subr.bf16.mxu1 %v26153_v51 }
0x1172   : > { %24268 = vmatpush3.bf16.msra.mxu1 %v26153_v51 }
0x1173   : > { %24269 = vmatprep.subr.bf16.mxu1 %v26154_v40 }
0x1176   : > { %24270 = vmatpush3.bf16.msra.mxu1 %v26154_v40 }
0x1177   : > { %24271 = vmatprep.subr.bf16.mxu1 %v26155_v29 }
0x117a   : > { %24272 = vmatpush3.bf16.msra.mxu1 %v26155_v29 }
0x117b   : > { %24273 = vmatprep.subr.bf16.mxu1 %v26156_v14 }
0x117e   : > { %24274 = vmatpush3.bf16.msra.mxu1 %v26156_v14 }
0x117f   : > { %24275 = vmatprep.subr.bf16.mxu1 %v26157_v31 }
0x1182   : > { %24276 = vmatpush3.bf16.msra.mxu1 %v26157_v31 }
0x1183   : > { %24277 = vmatprep.subr.bf16.mxu1 %v26158_v24 }
0x1186   : > { %24278 = vmatpush3.bf16.msra.mxu1 %v26158_v24 }
0x1189   : > { %24280 = vmatmul.mubr.bf16.vlgmr.msra.gmra.mrb[8].mxu1 %v18051_v39 }
0x125c   : > { %v24281_v41 = vpop.f32.mrb[8].mxu1 }
0x125d   : > { %v18161_v55 = vmul.f32 %v24281_v41, %v18158_v56  ;;  %v18136_v42 = vpop.f32.mrb[9].mxu1 }
0x125e   : > { %v18159_v36 = vmul.f32 %v18158_v56, %v18136_v42  ;;  %v24282_v46 = vpop.f32.mrb[10].mxu1 }
0x125f   : > { %v18162_v4 = vmul.f32 %v24282_v46, %v18158_v56  ;;  %v18139_v60 = vpop.f32.mrb[11].mxu1  ;;  %v18169_v12 = vadd.f32 %v18166_v22, %v18161_v55 }
0x1260   : > { %v18167_v28 = vadd.f32 %v18166_v22, %v18159_v36  ;;  %v18160_v18 = vmul.f32 %v18158_v56, %v18139_v60 }
0x1261   : > { %v18170_v30 = vadd.f32 %v18166_v22, %v18162_v4  ;;  %v18173_v35 = vmax.f32 %v18169_v12, 0.0 }
0x1262   : > { %v18171_v21 = vmax.f32 %v18167_v28, 0.0  ;;  %v18168_v32 = vadd.f32 %v18166_v22, %v18160_v18 }
0x1263   : > { %v18174_v16 = vmax.f32 %v18170_v30, 0.0  ;;  %v18190_v51 = vsel %vm18186_vm0, %v18173_v35, 0.0 }
0x1264   : > { %v18172_v34 = vmax.f32 %v18168_v32, 0.0  ;;  %v18188_v13 = vsel %vm18184_vm14, %v18171_v21, 0.0 }
0x1265   : > { %v18191_v29 = vsel %vm18187_vm1, %v18174_v16, 0.0 }
0x1266   : > { %v18189_v63 = vsel %vm18185_vm15, %v18172_v34, 0.0 }
0x1267   : > { %v18192_v47 = vadd.f32 %v18189_v63, %v18188_v13 }
0x1269   : > { %v18193_v40 = vadd.f32 %v18192_v47, %v18190_v51 }
0x126b   : > { %v18194_v14 = vadd.f32 %v18193_v40, %v18191_v29 }
0x126d   : > { %v18195_v31 = vrot.slane %v18194_v14, 4 }
0x126f   : > { %v18196_v24 = vadd.f32 %v18195_v31, %v18194_v14 }
0x1271   : > { %v18197_v8 = vrot.slane %v18196_v24, 2 }
0x1273   : > { %v18198_v45 = vadd.f32 %v18197_v8, %v18196_v24 }
0x1275   : > { %v18199_v39 = vrot.slane %v18198_v45, 1 }
0x1277   : > { %v18200_v59 = vadd.f32 %v18199_v39, %v18198_v45 }
0x1279   : > { %v18202_v52 = vmul.f32 0.0625, %v18200_v59 }
0x127b   : > { %24316 = vmatmul.mubr.f32.vlgmr.msra.gmra.mrb[184].mxu0 %v18202_v52 }
0x134e   : > { %v18286_v7 = vpop.f32.mrb[184].mxu0 }
0x134f   : > { %v18287_v33 = vadd.f32 %v18286_v7, %v18219_v0  ;;  %v24317_v20 = vpop.f32.mrb[185].mxu0 }
0x1351   : > { %v18293_v54 = vrot.slane %v18287_v33, %v31361_v48 }
0x1353   : > { %18294 = vst [vmem:[%s359_s19] sm:$0xff] %v18293_v54 }
0x1354 PF: > { %s20_s13 = sadd.s32 1, %s26200_s13  }
0x1355   : > { %p17_p5 = scmp.ge.s32.totalorder %s20_s13, 4  }
0x1357   :  { %19 = sbr.rel (!%p17_p5) target bundleno = 1 (0x1), region = 140 }

</bundles_post_ra>
